<compile_context>
chip_gen: v6e
topology: v6e:2x2x1
jax: 0.10.0
libtpu: 0.0.40
codegen_flags: <defaults>
</compile_context>

<pallas_src>
import functools

import jax
import jax.numpy as jnp
from jax.experimental import pallas as pl
from jax.experimental.pallas import tpu as pltpu


def _round_up(a, m):
    return (a + m - 1) // m * m


def _vmem_limit_bytes():
    """~3/4 of physical per-core VMEM, with a conservative fallback."""
    try:
        cap = pltpu.get_tpu_info().vmem_capacity_bytes
        return int(cap * 3 // 4)
    except Exception:  # pragma: no cover - query unavailable on this jax build
        return 48 * 1024 * 1024


# ---------------------------------------------------------------------------
# Fused Pallas kernel (one batch element per grid step)
# ---------------------------------------------------------------------------
def _dense_block_kernel(x_ref,
                        w1, b1, w2, b2, w3, b3, w4, b4, w5, b5,
                        o_ref,
                        s_ref,
                        *, H, W, Wp, Cx, G):
    """Fused DenseBlock forward for one batch element.

    x_ref : (1, H, W, Cx)          unpadded input block
    w*    : (3, Cin_k, 3*Cout_k)   kw-fused weights (compute dtype)
    b*    : (1, Cout_k)            f32 biases
    o_ref : (1, H, W, Cx)          output (conv5 * 0.2 + x)
    s_ref : (H+2, Wp, Cx+4G)       combined padded scratch:
                                   [0:Cx)=x, [Cx:Cx+G)=out1, ... out4
    """
    Ctot = Cx + 4 * G
    cdt = s_ref.dtype

    # --- zero only the 1-px border (+ right sublane-alignment pad cols) ----
    s_ref[0:1, :, :] = jnp.zeros((1, Wp, Ctot), cdt)
    s_ref[H + 1:H + 2, :, :] = jnp.zeros((1, Wp, Ctot), cdt)
    s_ref[:, 0:1, :] = jnp.zeros((H + 2, 1, Ctot), cdt)
    s_ref[:, W + 1:Wp, :] = jnp.zeros((H + 2, Wp - (W + 1), Ctot), cdt)

    # --- stage x into the combined scratch, channels [0, Cx) ---------------
    s_ref[1:1 + H, 1:1 + W, 0:Cx] = x_ref[0].astype(cdt)

    def lrelu(v):
        return jnp.where(v >= 0, v, 0.2 * v)

    def conv3x3(w_ref, b_ref, cin, cout):
        """3x3 SAME conv over scratch channels [0, cin) -> (H, W, cout) f32."""
        acc_wide = None
        for kh in range(3):
            band = s_ref[kh:kh + H, :, 0:cin]          # (H, Wp, cin)
            band2d = band.reshape(H * Wp, cin)         # free view: Wp % 8 == 0
            part = jnp.dot(band2d, w_ref[kh],
                           preferred_element_type=jnp.float32)  # (H*Wp, 3*cout)
            acc_wide = part if acc_wide is None else acc_wide + part
        acc_wide = acc_wide.reshape(H, Wp, 3 * cout)   # free view: Wp % 8 == 0
        acc = (acc_wide[:, 0:0 + W, 0 * cout:1 * cout]
               + acc_wide[:, 1:1 + W, 1 * cout:2 * cout]
               + acc_wide[:, 2:2 + W, 2 * cout:3 * cout])
        return acc + b_ref[...]                        # bias once, in f32

    # conv1..conv4: LeakyReLU result goes back into the combined scratch.
    for k, (w_ref, b_ref) in enumerate(((w1, b1), (w2, b2), (w3, b3), (w4, b4))):
        cin = Cx + k * G
        coff = Cx + k * G
        a = conv3x3(w_ref, b_ref, cin, G)
        s_ref[1:1 + H, 1:1 + W, coff:coff + G] = lrelu(a).astype(cdt)

    # conv5 over all Cx+4G channels, then residual in f32.
    a5 = conv3x3(w5, b5, Ctot, Cx)
    residual = x_ref[0].astype(jnp.float32)
    out = a5 * 0.2 + residual
    o_ref[...] = out.reshape(1, H, W, Cx).astype(o_ref.dtype)


# ---------------------------------------------------------------------------
# Wrapper
# ---------------------------------------------------------------------------
def dense_block_forward(params, x_nchw, compute_dtype=jnp.bfloat16):
    """Matches PyTorch DenseBlock.forward.  Input/output are NCHW."""
    x = jnp.transpose(x_nchw, (0, 2, 3, 1))                  # -> NHWC
    N, H, W, Cx = x.shape
    G = params[0][0].shape[-1]
    Ctot = Cx + 4 * G
    Wp = _round_up(W + 2, 8)                                 # sublane-aligned width

    in_specs = [pl.BlockSpec((1, H, W, Cx), lambda n: (n, 0, 0, 0))]
    args = [x]
    for w, b in params:
        cin, cout = w.shape[2], w.shape[3]
        # kw-fuse: (3,3,cin,cout) -> (3, cin, 3*cout), kw-major along last dim.
        wf = jnp.transpose(w, (0, 2, 1, 3)).reshape(3, cin, 3 * cout)
        wf = wf.astype(compute_dtype)
        in_specs.append(pl.BlockSpec((3, cin, 3 * cout), lambda n: (0, 0, 0)))
        in_specs.append(pl.BlockSpec((1, cout), lambda n: (0, 0)))
        args.append(wf)
        args.append(b.reshape(1, cout).astype(jnp.float32))

    kernel = functools.partial(_dense_block_kernel,
                               H=H, W=W, Wp=Wp, Cx=Cx, G=G)
    out = pl.pallas_call(
        kernel,
        out_shape=jax.ShapeDtypeStruct((N, H, W, Cx), x.dtype),
        grid_spec=pltpu.PrefetchScalarGridSpec(
            num_scalar_prefetch=0,
            grid=(N,),
            in_specs=in_specs,
            out_specs=pl.BlockSpec((1, H, W, Cx), lambda n: (n, 0, 0, 0)),
            scratch_shapes=[pltpu.VMEM((H + 2, Wp, Ctot), compute_dtype)],
        ),
        compiler_params=pltpu.CompilerParams(
            dimension_semantics=("parallel",),
            vmem_limit_bytes=_vmem_limit_bytes()),
    )(*args)
    return jnp.transpose(out, (0, 3, 1, 2))                  # -> NCHW


# ---------------------------------------------------------------------------
# Parameters
# ---------------------------------------------------------------------------
def init_dense_block_params(key, in_channels=64, growth_rate=32,
                            dtype=jnp.float32):
    """Deterministic synthetic params.  Weights stored as (3,3,Cin,Cout)."""
    cins = [
        in_channels,
        in_channels + growth_rate,
        in_channels + 2 * growth_rate,
        in_channels + 3 * growth_rate,
        in_channels + 4 * growth_rate,
    ]
    couts = [growth_rate] * 4 + [in_channels]
    params = []
    for cin, cout in zip(cins, couts):
        key, kw, kb = jax.random.split(key, 3)
        fan_in = cin * 9
        scale = (1.0 / fan_in) ** 0.5
        w = jax.random.uniform(kw, (3, 3, cin, cout), dtype,
                               minval=-scale, maxval=scale)
        b = jax.random.uniform(kb, (cout,), dtype, minval=-scale, maxval=scale)
        params.append((w, b))
    return params


# ---------------------------------------------------------------------------
# Reference (plain JAX) for a sanity check
# ---------------------------------------------------------------------------
def _ref_conv(x_nhwc, w, b):
    y = jax.lax.conv_general_dilated(
        x_nhwc, w, window_strides=(1, 1), padding="SAME",
        dimension_numbers=("NHWC", "HWIO", "NHWC"))
    return y + b


def _ref_forward(params, x_nchw):
    x = jnp.transpose(x_nchw, (0, 2, 3, 1))
    lrelu = lambda v: jnp.where(v >= 0, v, 0.2 * v)
    (w1, b1), (w2, b2), (w3, b3), (w4, b4), (w5, b5) = params
    o1 = lrelu(_ref_conv(x, w1, b1))
    o2 = lrelu(_ref_conv(jnp.concatenate([x, o1], -1), w2, b2))
    o3 = lrelu(_ref_conv(jnp.concatenate([x, o1, o2], -1), w3, b3))
    o4 = lrelu(_ref_conv(jnp.concatenate([x, o1, o2, o3], -1), w4, b4))
    o5 = _ref_conv(jnp.concatenate([x, o1, o2, o3, o4], -1), w5, b5)
    return jnp.transpose(o5 * 0.2 + x, (0, 3, 1, 2))


if __name__ == "__main__":
    # Small smoke-test shapes: DenseBlock(in_channels=8, growth_rate=4).
    # (Far below (8,128) tiling minimums — correctness only, not a perf proxy.)
    N, C, H, W = 2, 8, 16, 16
    growth = 4

    key = jax.random.PRNGKey(0)
    k_params, k_x = jax.random.split(key)
    params = init_dense_block_params(k_params, in_channels=C,
                                     growth_rate=growth)
    x = jax.random.normal(k_x, (N, C, H, W), jnp.float32)

    ref = jax.block_until_ready(_ref_forward(params, x))

    # f32 compute path: tight check against the reference.
    out_f32 = jax.block_until_ready(
        dense_block_forward(params, x, compute_dtype=jnp.float32))
    assert out_f32.shape == (N, C, H, W), out_f32.shape
    assert jnp.allclose(out_f32, ref, atol=1e-4, rtol=1e-4), (
        float(jnp.max(jnp.abs(out_f32 - ref))))

    # bf16 MXU-operand path (v6e/v7x fast path): looser tolerance.
    out_bf16 = jax.block_until_ready(
        dense_block_forward(params, x, compute_dtype=jnp.bfloat16))
    assert out_bf16.shape == (N, C, H, W), out_bf16.shape
    assert jnp.allclose(out_bf16, ref, atol=5e-2, rtol=5e-2), (
        float(jnp.max(jnp.abs(out_bf16 - ref))))

    print("KERNEL_OK")
</pallas_src>

<mosaic_0001>
module attributes {stable_mosaic.version = 11 : i64} {
  func.func @_dense_block_kernel(%arg0: i32, %arg1: memref<1x16x16x8xf32, #tpu.memory_space<vmem>>, %arg2: memref<3x8x12xf32, #tpu.memory_space<vmem>>, %arg3: memref<1x4xf32, #tpu.memory_space<vmem>>, %arg4: memref<3x12x12xf32, #tpu.memory_space<vmem>>, %arg5: memref<1x4xf32, #tpu.memory_space<vmem>>, %arg6: memref<3x16x12xf32, #tpu.memory_space<vmem>>, %arg7: memref<1x4xf32, #tpu.memory_space<vmem>>, %arg8: memref<3x20x12xf32, #tpu.memory_space<vmem>>, %arg9: memref<1x4xf32, #tpu.memory_space<vmem>>, %arg10: memref<3x24x24xf32, #tpu.memory_space<vmem>>, %arg11: memref<1x8xf32, #tpu.memory_space<vmem>>, %arg12: memref<1x16x16x8xf32, #tpu.memory_space<vmem>>, %arg13: memref<18x24x24xf32, #tpu.memory_space<vmem>>) attributes {dimension_semantics = [#tpu.dimension_semantics<parallel>], iteration_bounds = array<i64: 2>, scalar_prefetch = 0 : i64, scratch_operands = 1 : i64, tpu.core_type = #tpu.core_type<tc>, window_params = [{transform_indices = @transform_0, window_bounds = array<i64: 1, 16, 16, 8>}, {pipeline_mode = #tpu.pipeline_mode<synchronous>, transform_indices = @transform_1, window_bounds = array<i64: 3, 8, 12>}, {pipeline_mode = #tpu.pipeline_mode<synchronous>, transform_indices = @transform_2, window_bounds = array<i64: 1, 4>}, {pipeline_mode = #tpu.pipeline_mode<synchronous>, transform_indices = @transform_3, window_bounds = array<i64: 3, 12, 12>}, {pipeline_mode = #tpu.pipeline_mode<synchronous>, transform_indices = @transform_4, window_bounds = array<i64: 1, 4>}, {pipeline_mode = #tpu.pipeline_mode<synchronous>, transform_indices = @transform_5, window_bounds = array<i64: 3, 16, 12>}, {pipeline_mode = #tpu.pipeline_mode<synchronous>, transform_indices = @transform_6, window_bounds = array<i64: 1, 4>}, {pipeline_mode = #tpu.pipeline_mode<synchronous>, transform_indices = @transform_7, window_bounds = array<i64: 3, 20, 12>}, {pipeline_mode = #tpu.pipeline_mode<synchronous>, transform_indices = @transform_8, window_bounds = array<i64: 1, 4>}, {pipeline_mode = #tpu.pipeline_mode<synchronous>, transform_indices = @transform_9, window_bounds = array<i64: 3, 24, 24>}, {pipeline_mode = #tpu.pipeline_mode<synchronous>, transform_indices = @transform_10, window_bounds = array<i64: 1, 8>}, {transform_indices = @transform_11, window_bounds = array<i64: 1, 16, 16, 8>}]} {
    %cst = arith.constant 0.000000e+00 : f32
    %0 = vector.broadcast %cst : f32 to vector<1x24x24xf32>
    %c0 = arith.constant 0 : index
    %c0_0 = arith.constant 0 : index
    %c0_1 = arith.constant 0 : index
    %1 = vector.load %arg13[%c0, %c0_0, %c0_1] : memref<18x24x24xf32, #tpu.memory_space<vmem>>, vector<1x24x24xf32>
    tpu.vector_store %arg13[%c0, %c0_0, %c0_1], %0 {strides = array<i32>} : memref<18x24x24xf32, #tpu.memory_space<vmem>>, vector<1x24x24xf32>,
    %cst_2 = arith.constant 0.000000e+00 : f32
    %2 = vector.broadcast %cst_2 : f32 to vector<1x24x24xf32>
    %c17 = arith.constant 17 : index
    %c0_3 = arith.constant 0 : index
    %c0_4 = arith.constant 0 : index
    %3 = vector.load %arg13[%c17, %c0_3, %c0_4] : memref<18x24x24xf32, #tpu.memory_space<vmem>>, vector<1x24x24xf32>
    tpu.vector_store %arg13[%c17, %c0_3, %c0_4], %2 {strides = array<i32>} : memref<18x24x24xf32, #tpu.memory_space<vmem>>, vector<1x24x24xf32>,
    %cst_5 = arith.constant 0.000000e+00 : f32
    %4 = vector.broadcast %cst_5 : f32 to vector<18x1x24xf32>
    %c0_6 = arith.constant 0 : index
    %c0_7 = arith.constant 0 : index
    %c0_8 = arith.constant 0 : index
    %5 = vector.load %arg13[%c0_6, %c0_7, %c0_8] : memref<18x24x24xf32, #tpu.memory_space<vmem>>, vector<18x1x24xf32>
    tpu.vector_store %arg13[%c0_6, %c0_7, %c0_8], %4 {strides = array<i32>} : memref<18x24x24xf32, #tpu.memory_space<vmem>>, vector<18x1x24xf32>,
    %cst_9 = arith.constant 0.000000e+00 : f32
    %6 = vector.broadcast %cst_9 : f32 to vector<18x7x24xf32>
    %c0_10 = arith.constant 0 : index
    %c17_11 = arith.constant 17 : index
    %c0_12 = arith.constant 0 : index
    %7 = vector.load %arg13[%c0_10, %c17_11, %c0_12] : memref<18x24x24xf32, #tpu.memory_space<vmem>>, vector<18x7x24xf32>
    tpu.vector_store %arg13[%c0_10, %c17_11, %c0_12], %6 {strides = array<i32>} : memref<18x24x24xf32, #tpu.memory_space<vmem>>, vector<18x7x24xf32>,
    %c0_13 = arith.constant 0 : index
    %c0_14 = arith.constant 0 : index
    %c0_15 = arith.constant 0 : index
    %c0_16 = arith.constant 0 : index
    %8 = vector.load %arg1[%c0_13, %c0_14, %c0_15, %c0_16] : memref<1x16x16x8xf32, #tpu.memory_space<vmem>>, vector<1x16x16x8xf32>
    %9 = vector.shape_cast %8 : vector<1x16x16x8xf32> to vector<16x16x8xf32>
    %c1 = arith.constant 1 : index
    %c1_17 = arith.constant 1 : index
    %c0_18 = arith.constant 0 : index
    %10 = vector.load %arg13[%c1, %c1_17, %c0_18] : memref<18x24x24xf32, #tpu.memory_space<vmem>>, vector<16x16x8xf32>
    tpu.vector_store %arg13[%c1, %c1_17, %c0_18], %9 {strides = array<i32>} : memref<18x24x24xf32, #tpu.memory_space<vmem>>, vector<16x16x8xf32>,
    %c0_19 = arith.constant 0 : index
    %c0_20 = arith.constant 0 : index
    %c0_21 = arith.constant 0 : index
    %11 = vector.load %arg13[%c0_19, %c0_20, %c0_21] : memref<18x24x24xf32, #tpu.memory_space<vmem>>, vector<16x24x8xf32>
    %12 = vector.shape_cast %11 : vector<16x24x8xf32> to vector<384x8xf32>
    %c0_22 = arith.constant 0 : index
    %c0_23 = arith.constant 0 : index
    %c0_24 = arith.constant 0 : index
    %13 = vector.load %arg2[%c0_22, %c0_23, %c0_24] : memref<3x8x12xf32, #tpu.memory_space<vmem>>, vector<1x8x12xf32>
    %14 = vector.shape_cast %13 : vector<1x8x12xf32> to vector<8x12xf32>
    %cst_25 = arith.constant dense<0.000000e+00> : vector<384x12xf32>
    %15 = tpu.matmul %12, %14, %cst_25 {dimension_numbers = #tpu.dot_dimension_numbers<[1], [0], [0], [1], [0, 0, 1, 1], [], []>} : vector<384x8xf32>, vector<8x12xf32>, vector<384x12xf32> -> vector<384x12xf32>
    %c1_26 = arith.constant 1 : index
    %c0_27 = arith.constant 0 : index
    %c0_28 = arith.constant 0 : index
    %16 = vector.load %arg13[%c1_26, %c0_27, %c0_28] : memref<18x24x24xf32, #tpu.memory_space<vmem>>, vector<16x24x8xf32>
    %17 = vector.shape_cast %16 : vector<16x24x8xf32> to vector<384x8xf32>
    %c1_29 = arith.constant 1 : index
    %c0_30 = arith.constant 0 : index
    %c0_31 = arith.constant 0 : index
    %18 = vector.load %arg2[%c1_29, %c0_30, %c0_31] : memref<3x8x12xf32, #tpu.memory_space<vmem>>, vector<1x8x12xf32>
    %19 = vector.shape_cast %18 : vector<1x8x12xf32> to vector<8x12xf32>
    %cst_32 = arith.constant dense<0.000000e+00> : vector<384x12xf32>
    %20 = tpu.matmul %17, %19, %cst_32 {dimension_numbers = #tpu.dot_dimension_numbers<[1], [0], [0], [1], [0, 0, 1, 1], [], []>} : vector<384x8xf32>, vector<8x12xf32>, vector<384x12xf32> -> vector<384x12xf32>
    %21 = arith.addf %15, %20 : vector<384x12xf32>
    %c2 = arith.constant 2 : index
    %c0_33 = arith.constant 0 : index
    %c0_34 = arith.constant 0 : index
    %22 = vector.load %arg13[%c2, %c0_33, %c0_34] : memref<18x24x24xf32, #tpu.memory_space<vmem>>, vector<16x24x8xf32>
    %23 = vector.shape_cast %22 : vector<16x24x8xf32> to vector<384x8xf32>
    %c2_35 = arith.constant 2 : index
    %c0_36 = arith.constant 0 : index
    %c0_37 = arith.constant 0 : index
    %24 = vector.load %arg2[%c2_35, %c0_36, %c0_37] : memref<3x8x12xf32, #tpu.memory_space<vmem>>, vector<1x8x12xf32>
    %25 = vector.shape_cast %24 : vector<1x8x12xf32> to vector<8x12xf32>
    %cst_38 = arith.constant dense<0.000000e+00> : vector<384x12xf32>
    %26 = tpu.matmul %23, %25, %cst_38 {dimension_numbers = #tpu.dot_dimension_numbers<[1], [0], [0], [1], [0, 0, 1, 1], [], []>} : vector<384x8xf32>, vector<8x12xf32>, vector<384x12xf32> -> vector<384x12xf32>
    %27 = arith.addf %21, %26 : vector<384x12xf32>
    %28 = vector.shape_cast %27 : vector<384x12xf32> to vector<16x24x12xf32>
    %29 = vector.extract_strided_slice %28 {offsets = [0, 0, 0], sizes = [16, 16, 4], strides = [1, 1, 1]} : vector<16x24x12xf32> to vector<16x16x4xf32>
    %30 = vector.extract_strided_slice %28 {offsets = [0, 1, 4], sizes = [16, 16, 4], strides = [1, 1, 1]} : vector<16x24x12xf32> to vector<16x16x4xf32>
    %31 = arith.addf %29, %30 : vector<16x16x4xf32>
    %32 = vector.extract_strided_slice %28 {offsets = [0, 2, 8], sizes = [16, 16, 4], strides = [1, 1, 1]} : vector<16x24x12xf32> to vector<16x16x4xf32>
    %33 = arith.addf %31, %32 : vector<16x16x4xf32>
    %c0_39 = arith.constant 0 : index
    %c0_40 = arith.constant 0 : index
    %34 = vector.load %arg3[%c0_39, %c0_40] : memref<1x4xf32, #tpu.memory_space<vmem>>, vector<1x4xf32>
    %35 = vector.shape_cast %34 : vector<1x4xf32> to vector<1x1x4xf32>
    %36 = vector.broadcast %35 : vector<1x1x4xf32> to vector<16x16x4xf32>
    %37 = arith.addf %33, %36 : vector<16x16x4xf32>
    %cst_41 = arith.constant 0.000000e+00 : f32
    %38 = vector.broadcast %cst_41 : f32 to vector<16x16x4xf32>
    %39 = arith.cmpf oge, %37, %38 : vector<16x16x4xf32>
    %cst_42 = arith.constant 2.000000e-01 : f32
    %40 = vector.broadcast %cst_42 : f32 to vector<16x16x4xf32>
    %41 = arith.mulf %40, %37 : vector<16x16x4xf32>
    %42 = arith.select %39, %37, %41 : vector<16x16x4xi1>, vector<16x16x4xf32>
    %c1_43 = arith.constant 1 : index
    %c1_44 = arith.constant 1 : index
    %c8 = arith.constant 8 : index
    %43 = vector.load %arg13[%c1_43, %c1_44, %c8] : memref<18x24x24xf32, #tpu.memory_space<vmem>>, vector<16x16x4xf32>
    tpu.vector_store %arg13[%c1_43, %c1_44, %c8], %42 {strides = array<i32>} : memref<18x24x24xf32, #tpu.memory_space<vmem>>, vector<16x16x4xf32>,
    %c0_45 = arith.constant 0 : index
    %c0_46 = arith.constant 0 : index
    %c0_47 = arith.constant 0 : index
    %44 = vector.load %arg13[%c0_45, %c0_46, %c0_47] : memref<18x24x24xf32, #tpu.memory_space<vmem>>, vector<16x24x12xf32>
    %45 = vector.shape_cast %44 : vector<16x24x12xf32> to vector<384x12xf32>
    %c0_48 = arith.constant 0 : index
    %c0_49 = arith.constant 0 : index
    %c0_50 = arith.constant 0 : index
    %46 = vector.load %arg4[%c0_48, %c0_49, %c0_50] : memref<3x12x12xf32, #tpu.memory_space<vmem>>, vector<1x12x12xf32>
    %47 = vector.shape_cast %46 : vector<1x12x12xf32> to vector<12x12xf32>
    %cst_51 = arith.constant dense<0.000000e+00> : vector<384x12xf32>
    %48 = tpu.matmul %45, %47, %cst_51 {dimension_numbers = #tpu.dot_dimension_numbers<[1], [0], [0], [1], [0, 0, 1, 1], [], []>} : vector<384x12xf32>, vector<12x12xf32>, vector<384x12xf32> -> vector<384x12xf32>
    %c1_52 = arith.constant 1 : index
    %c0_53 = arith.constant 0 : index
    %c0_54 = arith.constant 0 : index
    %49 = vector.load %arg13[%c1_52, %c0_53, %c0_54] : memref<18x24x24xf32, #tpu.memory_space<vmem>>, vector<16x24x12xf32>
    %50 = vector.shape_cast %49 : vector<16x24x12xf32> to vector<384x12xf32>
    %c1_55 = arith.constant 1 : index
    %c0_56 = arith.constant 0 : index
    %c0_57 = arith.constant 0 : index
    %51 = vector.load %arg4[%c1_55, %c0_56, %c0_57] : memref<3x12x12xf32, #tpu.memory_space<vmem>>, vector<1x12x12xf32>
    %52 = vector.shape_cast %51 : vector<1x12x12xf32> to vector<12x12xf32>
    %cst_58 = arith.constant dense<0.000000e+00> : vector<384x12xf32>
    %53 = tpu.matmul %50, %52, %cst_58 {dimension_numbers = #tpu.dot_dimension_numbers<[1], [0], [0], [1], [0, 0, 1, 1], [], []>} : vector<384x12xf32>, vector<12x12xf32>, vector<384x12xf32> -> vector<384x12xf32>
    %54 = arith.addf %48, %53 : vector<384x12xf32>
    %c2_59 = arith.constant 2 : index
    %c0_60 = arith.constant 0 : index
    %c0_61 = arith.constant 0 : index
    %55 = vector.load %arg13[%c2_59, %c0_60, %c0_61] : memref<18x24x24xf32, #tpu.memory_space<vmem>>, vector<16x24x12xf32>
    %56 = vector.shape_cast %55 : vector<16x24x12xf32> to vector<384x12xf32>
    %c2_62 = arith.constant 2 : index
    %c0_63 = arith.constant 0 : index
    %c0_64 = arith.constant 0 : index
    %57 = vector.load %arg4[%c2_62, %c0_63, %c0_64] : memref<3x12x12xf32, #tpu.memory_space<vmem>>, vector<1x12x12xf32>
    %58 = vector.shape_cast %57 : vector<1x12x12xf32> to vector<12x12xf32>
    %cst_65 = arith.constant dense<0.000000e+00> : vector<384x12xf32>
    %59 = tpu.matmul %56, %58, %cst_65 {dimension_numbers = #tpu.dot_dimension_numbers<[1], [0], [0], [1], [0, 0, 1, 1], [], []>} : vector<384x12xf32>, vector<12x12xf32>, vector<384x12xf32> -> vector<384x12xf32>
    %60 = arith.addf %54, %59 : vector<384x12xf32>
    %61 = vector.shape_cast %60 : vector<384x12xf32> to vector<16x24x12xf32>
    %62 = vector.extract_strided_slice %61 {offsets = [0, 0, 0], sizes = [16, 16, 4], strides = [1, 1, 1]} : vector<16x24x12xf32> to vector<16x16x4xf32>
    %63 = vector.extract_strided_slice %61 {offsets = [0, 1, 4], sizes = [16, 16, 4], strides = [1, 1, 1]} : vector<16x24x12xf32> to vector<16x16x4xf32>
    %64 = arith.addf %62, %63 : vector<16x16x4xf32>
    %65 = vector.extract_strided_slice %61 {offsets = [0, 2, 8], sizes = [16, 16, 4], strides = [1, 1, 1]} : vector<16x24x12xf32> to vector<16x16x4xf32>
    %66 = arith.addf %64, %65 : vector<16x16x4xf32>
    %c0_66 = arith.constant 0 : index
    %c0_67 = arith.constant 0 : index
    %67 = vector.load %arg5[%c0_66, %c0_67] : memref<1x4xf32, #tpu.memory_space<vmem>>, vector<1x4xf32>
    %68 = vector.shape_cast %67 : vector<1x4xf32> to vector<1x1x4xf32>
    %69 = vector.broadcast %68 : vector<1x1x4xf32> to vector<16x16x4xf32>
    %70 = arith.addf %66, %69 : vector<16x16x4xf32>
    %cst_68 = arith.constant 0.000000e+00 : f32
    %71 = vector.broadcast %cst_68 : f32 to vector<16x16x4xf32>
    %72 = arith.cmpf oge, %70, %71 : vector<16x16x4xf32>
    %cst_69 = arith.constant 2.000000e-01 : f32
    %73 = vector.broadcast %cst_69 : f32 to vector<16x16x4xf32>
    %74 = arith.mulf %73, %70 : vector<16x16x4xf32>
    %75 = arith.select %72, %70, %74 : vector<16x16x4xi1>, vector<16x16x4xf32>
    %c1_70 = arith.constant 1 : index
    %c1_71 = arith.constant 1 : index
    %c12 = arith.constant 12 : index
    %76 = vector.load %arg13[%c1_70, %c1_71, %c12] : memref<18x24x24xf32, #tpu.memory_space<vmem>>, vector<16x16x4xf32>
    tpu.vector_store %arg13[%c1_70, %c1_71, %c12], %75 {strides = array<i32>} : memref<18x24x24xf32, #tpu.memory_space<vmem>>, vector<16x16x4xf32>,
    %c0_72 = arith.constant 0 : index
    %c0_73 = arith.constant 0 : index
    %c0_74 = arith.constant 0 : index
    %77 = vector.load %arg13[%c0_72, %c0_73, %c0_74] : memref<18x24x24xf32, #tpu.memory_space<vmem>>, vector<16x24x16xf32>
    %78 = vector.shape_cast %77 : vector<16x24x16xf32> to vector<384x16xf32>
    %c0_75 = arith.constant 0 : index
    %c0_76 = arith.constant 0 : index
    %c0_77 = arith.constant 0 : index
    %79 = vector.load %arg6[%c0_75, %c0_76, %c0_77] : memref<3x16x12xf32, #tpu.memory_space<vmem>>, vector<1x16x12xf32>
    %80 = vector.shape_cast %79 : vector<1x16x12xf32> to vector<16x12xf32>
    %cst_78 = arith.constant dense<0.000000e+00> : vector<384x12xf32>
    %81 = tpu.matmul %78, %80, %cst_78 {dimension_numbers = #tpu.dot_dimension_numbers<[1], [0], [0], [1], [0, 0, 1, 1], [], []>} : vector<384x16xf32>, vector<16x12xf32>, vector<384x12xf32> -> vector<384x12xf32>
    %c1_79 = arith.constant 1 : index
    %c0_80 = arith.constant 0 : index
    %c0_81 = arith.constant 0 : index
    %82 = vector.load %arg13[%c1_79, %c0_80, %c0_81] : memref<18x24x24xf32, #tpu.memory_space<vmem>>, vector<16x24x16xf32>
    %83 = vector.shape_cast %82 : vector<16x24x16xf32> to vector<384x16xf32>
    %c1_82 = arith.constant 1 : index
    %c0_83 = arith.constant 0 : index
    %c0_84 = arith.constant 0 : index
    %84 = vector.load %arg6[%c1_82, %c0_83, %c0_84] : memref<3x16x12xf32, #tpu.memory_space<vmem>>, vector<1x16x12xf32>
    %85 = vector.shape_cast %84 : vector<1x16x12xf32> to vector<16x12xf32>
    %cst_85 = arith.constant dense<0.000000e+00> : vector<384x12xf32>
    %86 = tpu.matmul %83, %85, %cst_85 {dimension_numbers = #tpu.dot_dimension_numbers<[1], [0], [0], [1], [0, 0, 1, 1], [], []>} : vector<384x16xf32>, vector<16x12xf32>, vector<384x12xf32> -> vector<384x12xf32>
    %87 = arith.addf %81, %86 : vector<384x12xf32>
    %c2_86 = arith.constant 2 : index
    %c0_87 = arith.constant 0 : index
    %c0_88 = arith.constant 0 : index
    %88 = vector.load %arg13[%c2_86, %c0_87, %c0_88] : memref<18x24x24xf32, #tpu.memory_space<vmem>>, vector<16x24x16xf32>
    %89 = vector.shape_cast %88 : vector<16x24x16xf32> to vector<384x16xf32>
    %c2_89 = arith.constant 2 : index
    %c0_90 = arith.constant 0 : index
    %c0_91 = arith.constant 0 : index
    %90 = vector.load %arg6[%c2_89, %c0_90, %c0_91] : memref<3x16x12xf32, #tpu.memory_space<vmem>>, vector<1x16x12xf32>
    %91 = vector.shape_cast %90 : vector<1x16x12xf32> to vector<16x12xf32>
    %cst_92 = arith.constant dense<0.000000e+00> : vector<384x12xf32>
    %92 = tpu.matmul %89, %91, %cst_92 {dimension_numbers = #tpu.dot_dimension_numbers<[1], [0], [0], [1], [0, 0, 1, 1], [], []>} : vector<384x16xf32>, vector<16x12xf32>, vector<384x12xf32> -> vector<384x12xf32>
    %93 = arith.addf %87, %92 : vector<384x12xf32>
    %94 = vector.shape_cast %93 : vector<384x12xf32> to vector<16x24x12xf32>
    %95 = vector.extract_strided_slice %94 {offsets = [0, 0, 0], sizes = [16, 16, 4], strides = [1, 1, 1]} : vector<16x24x12xf32> to vector<16x16x4xf32>
    %96 = vector.extract_strided_slice %94 {offsets = [0, 1, 4], sizes = [16, 16, 4], strides = [1, 1, 1]} : vector<16x24x12xf32> to vector<16x16x4xf32>
    %97 = arith.addf %95, %96 : vector<16x16x4xf32>
    %98 = vector.extract_strided_slice %94 {offsets = [0, 2, 8], sizes = [16, 16, 4], strides = [1, 1, 1]} : vector<16x24x12xf32> to vector<16x16x4xf32>
    %99 = arith.addf %97, %98 : vector<16x16x4xf32>
    %c0_93 = arith.constant 0 : index
    %c0_94 = arith.constant 0 : index
    %100 = vector.load %arg7[%c0_93, %c0_94] : memref<1x4xf32, #tpu.memory_space<vmem>>, vector<1x4xf32>
    %101 = vector.shape_cast %100 : vector<1x4xf32> to vector<1x1x4xf32>
    %102 = vector.broadcast %101 : vector<1x1x4xf32> to vector<16x16x4xf32>
    %103 = arith.addf %99, %102 : vector<16x16x4xf32>
    %cst_95 = arith.constant 0.000000e+00 : f32
    %104 = vector.broadcast %cst_95 : f32 to vector<16x16x4xf32>
    %105 = arith.cmpf oge, %103, %104 : vector<16x16x4xf32>
    %cst_96 = arith.constant 2.000000e-01 : f32
    %106 = vector.broadcast %cst_96 : f32 to vector<16x16x4xf32>
    %107 = arith.mulf %106, %103 : vector<16x16x4xf32>
    %108 = arith.select %105, %103, %107 : vector<16x16x4xi1>, vector<16x16x4xf32>
    %c1_97 = arith.constant 1 : index
    %c1_98 = arith.constant 1 : index
    %c16 = arith.constant 16 : index
    %109 = vector.load %arg13[%c1_97, %c1_98, %c16] : memref<18x24x24xf32, #tpu.memory_space<vmem>>, vector<16x16x4xf32>
    tpu.vector_store %arg13[%c1_97, %c1_98, %c16], %108 {strides = array<i32>} : memref<18x24x24xf32, #tpu.memory_space<vmem>>, vector<16x16x4xf32>,
    %c0_99 = arith.constant 0 : index
    %c0_100 = arith.constant 0 : index
    %c0_101 = arith.constant 0 : index
    %110 = vector.load %arg13[%c0_99, %c0_100, %c0_101] : memref<18x24x24xf32, #tpu.memory_space<vmem>>, vector<16x24x20xf32>
    %111 = vector.shape_cast %110 : vector<16x24x20xf32> to vector<384x20xf32>
    %c0_102 = arith.constant 0 : index
    %c0_103 = arith.constant 0 : index
    %c0_104 = arith.constant 0 : index
    %112 = vector.load %arg8[%c0_102, %c0_103, %c0_104] : memref<3x20x12xf32, #tpu.memory_space<vmem>>, vector<1x20x12xf32>
    %113 = vector.shape_cast %112 : vector<1x20x12xf32> to vector<20x12xf32>
    %cst_105 = arith.constant dense<0.000000e+00> : vector<384x12xf32>
    %114 = tpu.matmul %111, %113, %cst_105 {dimension_numbers = #tpu.dot_dimension_numbers<[1], [0], [0], [1], [0, 0, 1, 1], [], []>} : vector<384x20xf32>, vector<20x12xf32>, vector<384x12xf32> -> vector<384x12xf32>
    %c1_106 = arith.constant 1 : index
    %c0_107 = arith.constant 0 : index
    %c0_108 = arith.constant 0 : index
    %115 = vector.load %arg13[%c1_106, %c0_107, %c0_108] : memref<18x24x24xf32, #tpu.memory_space<vmem>>, vector<16x24x20xf32>
    %116 = vector.shape_cast %115 : vector<16x24x20xf32> to vector<384x20xf32>
    %c1_109 = arith.constant 1 : index
    %c0_110 = arith.constant 0 : index
    %c0_111 = arith.constant 0 : index
    %117 = vector.load %arg8[%c1_109, %c0_110, %c0_111] : memref<3x20x12xf32, #tpu.memory_space<vmem>>, vector<1x20x12xf32>
    %118 = vector.shape_cast %117 : vector<1x20x12xf32> to vector<20x12xf32>
    %cst_112 = arith.constant dense<0.000000e+00> : vector<384x12xf32>
    %119 = tpu.matmul %116, %118, %cst_112 {dimension_numbers = #tpu.dot_dimension_numbers<[1], [0], [0], [1], [0, 0, 1, 1], [], []>} : vector<384x20xf32>, vector<20x12xf32>, vector<384x12xf32> -> vector<384x12xf32>
    %120 = arith.addf %114, %119 : vector<384x12xf32>
    %c2_113 = arith.constant 2 : index
    %c0_114 = arith.constant 0 : index
    %c0_115 = arith.constant 0 : index
    %121 = vector.load %arg13[%c2_113, %c0_114, %c0_115] : memref<18x24x24xf32, #tpu.memory_space<vmem>>, vector<16x24x20xf32>
    %122 = vector.shape_cast %121 : vector<16x24x20xf32> to vector<384x20xf32>
    %c2_116 = arith.constant 2 : index
    %c0_117 = arith.constant 0 : index
    %c0_118 = arith.constant 0 : index
    %123 = vector.load %arg8[%c2_116, %c0_117, %c0_118] : memref<3x20x12xf32, #tpu.memory_space<vmem>>, vector<1x20x12xf32>
    %124 = vector.shape_cast %123 : vector<1x20x12xf32> to vector<20x12xf32>
    %cst_119 = arith.constant dense<0.000000e+00> : vector<384x12xf32>
    %125 = tpu.matmul %122, %124, %cst_119 {dimension_numbers = #tpu.dot_dimension_numbers<[1], [0], [0], [1], [0, 0, 1, 1], [], []>} : vector<384x20xf32>, vector<20x12xf32>, vector<384x12xf32> -> vector<384x12xf32>
    %126 = arith.addf %120, %125 : vector<384x12xf32>
    %127 = vector.shape_cast %126 : vector<384x12xf32> to vector<16x24x12xf32>
    %128 = vector.extract_strided_slice %127 {offsets = [0, 0, 0], sizes = [16, 16, 4], strides = [1, 1, 1]} : vector<16x24x12xf32> to vector<16x16x4xf32>
    %129 = vector.extract_strided_slice %127 {offsets = [0, 1, 4], sizes = [16, 16, 4], strides = [1, 1, 1]} : vector<16x24x12xf32> to vector<16x16x4xf32>
    %130 = arith.addf %128, %129 : vector<16x16x4xf32>
    %131 = vector.extract_strided_slice %127 {offsets = [0, 2, 8], sizes = [16, 16, 4], strides = [1, 1, 1]} : vector<16x24x12xf32> to vector<16x16x4xf32>
    %132 = arith.addf %130, %131 : vector<16x16x4xf32>
    %c0_120 = arith.constant 0 : index
    %c0_121 = arith.constant 0 : index
    %133 = vector.load %arg9[%c0_120, %c0_121] : memref<1x4xf32, #tpu.memory_space<vmem>>, vector<1x4xf32>
    %134 = vector.shape_cast %133 : vector<1x4xf32> to vector<1x1x4xf32>
    %135 = vector.broadcast %134 : vector<1x1x4xf32> to vector<16x16x4xf32>
    %136 = arith.addf %132, %135 : vector<16x16x4xf32>
    %cst_122 = arith.constant 0.000000e+00 : f32
    %137 = vector.broadcast %cst_122 : f32 to vector<16x16x4xf32>
    %138 = arith.cmpf oge, %136, %137 : vector<16x16x4xf32>
    %cst_123 = arith.constant 2.000000e-01 : f32
    %139 = vector.broadcast %cst_123 : f32 to vector<16x16x4xf32>
    %140 = arith.mulf %139, %136 : vector<16x16x4xf32>
    %141 = arith.select %138, %136, %140 : vector<16x16x4xi1>, vector<16x16x4xf32>
    %c1_124 = arith.constant 1 : index
    %c1_125 = arith.constant 1 : index
    %c20 = arith.constant 20 : index
    %142 = vector.load %arg13[%c1_124, %c1_125, %c20] : memref<18x24x24xf32, #tpu.memory_space<vmem>>, vector<16x16x4xf32>
    tpu.vector_store %arg13[%c1_124, %c1_125, %c20], %141 {strides = array<i32>} : memref<18x24x24xf32, #tpu.memory_space<vmem>>, vector<16x16x4xf32>,
    %c0_126 = arith.constant 0 : index
    %c0_127 = arith.constant 0 : index
    %c0_128 = arith.constant 0 : index
    %143 = vector.load %arg13[%c0_126, %c0_127, %c0_128] : memref<18x24x24xf32, #tpu.memory_space<vmem>>, vector<16x24x24xf32>
    %144 = vector.shape_cast %143 : vector<16x24x24xf32> to vector<384x24xf32>
    %c0_129 = arith.constant 0 : index
    %c0_130 = arith.constant 0 : index
    %c0_131 = arith.constant 0 : index
    %145 = vector.load %arg10[%c0_129, %c0_130, %c0_131] : memref<3x24x24xf32, #tpu.memory_space<vmem>>, vector<1x24x24xf32>
    %146 = vector.shape_cast %145 : vector<1x24x24xf32> to vector<24x24xf32>
    %cst_132 = arith.constant dense<0.000000e+00> : vector<384x24xf32>
    %147 = tpu.matmul %144, %146, %cst_132 {dimension_numbers = #tpu.dot_dimension_numbers<[1], [0], [0], [1], [0, 0, 1, 1], [], []>} : vector<384x24xf32>, vector<24x24xf32>, vector<384x24xf32> -> vector<384x24xf32>
    %c1_133 = arith.constant 1 : index
    %c0_134 = arith.constant 0 : index
    %c0_135 = arith.constant 0 : index
    %148 = vector.load %arg13[%c1_133, %c0_134, %c0_135] : memref<18x24x24xf32, #tpu.memory_space<vmem>>, vector<16x24x24xf32>
    %149 = vector.shape_cast %148 : vector<16x24x24xf32> to vector<384x24xf32>
    %c1_136 = arith.constant 1 : index
    %c0_137 = arith.constant 0 : index
    %c0_138 = arith.constant 0 : index
    %150 = vector.load %arg10[%c1_136, %c0_137, %c0_138] : memref<3x24x24xf32, #tpu.memory_space<vmem>>, vector<1x24x24xf32>
    %151 = vector.shape_cast %150 : vector<1x24x24xf32> to vector<24x24xf32>
    %cst_139 = arith.constant dense<0.000000e+00> : vector<384x24xf32>
    %152 = tpu.matmul %149, %151, %cst_139 {dimension_numbers = #tpu.dot_dimension_numbers<[1], [0], [0], [1], [0, 0, 1, 1], [], []>} : vector<384x24xf32>, vector<24x24xf32>, vector<384x24xf32> -> vector<384x24xf32>
    %153 = arith.addf %147, %152 : vector<384x24xf32>
    %c2_140 = arith.constant 2 : index
    %c0_141 = arith.constant 0 : index
    %c0_142 = arith.constant 0 : index
    %154 = vector.load %arg13[%c2_140, %c0_141, %c0_142] : memref<18x24x24xf32, #tpu.memory_space<vmem>>, vector<16x24x24xf32>
    %155 = vector.shape_cast %154 : vector<16x24x24xf32> to vector<384x24xf32>
    %c2_143 = arith.constant 2 : index
    %c0_144 = arith.constant 0 : index
    %c0_145 = arith.constant 0 : index
    %156 = vector.load %arg10[%c2_143, %c0_144, %c0_145] : memref<3x24x24xf32, #tpu.memory_space<vmem>>, vector<1x24x24xf32>
    %157 = vector.shape_cast %156 : vector<1x24x24xf32> to vector<24x24xf32>
    %cst_146 = arith.constant dense<0.000000e+00> : vector<384x24xf32>
    %158 = tpu.matmul %155, %157, %cst_146 {dimension_numbers = #tpu.dot_dimension_numbers<[1], [0], [0], [1], [0, 0, 1, 1], [], []>} : vector<384x24xf32>, vector<24x24xf32>, vector<384x24xf32> -> vector<384x24xf32>
    %159 = arith.addf %153, %158 : vector<384x24xf32>
    %160 = vector.shape_cast %159 : vector<384x24xf32> to vector<16x24x24xf32>
    %161 = vector.extract_strided_slice %160 {offsets = [0, 0, 0], sizes = [16, 16, 8], strides = [1, 1, 1]} : vector<16x24x24xf32> to vector<16x16x8xf32>
    %162 = vector.extract_strided_slice %160 {offsets = [0, 1, 8], sizes = [16, 16, 8], strides = [1, 1, 1]} : vector<16x24x24xf32> to vector<16x16x8xf32>
    %163 = arith.addf %161, %162 : vector<16x16x8xf32>
    %164 = vector.extract_strided_slice %160 {offsets = [0, 2, 16], sizes = [16, 16, 8], strides = [1, 1, 1]} : vector<16x24x24xf32> to vector<16x16x8xf32>
    %165 = arith.addf %163, %164 : vector<16x16x8xf32>
    %c0_147 = arith.constant 0 : index
    %c0_148 = arith.constant 0 : index
    %166 = vector.load %arg11[%c0_147, %c0_148] : memref<1x8xf32, #tpu.memory_space<vmem>>, vector<1x8xf32>
    %167 = vector.shape_cast %166 : vector<1x8xf32> to vector<1x1x8xf32>
    %168 = vector.broadcast %167 : vector<1x1x8xf32> to vector<16x16x8xf32>
    %169 = arith.addf %165, %168 : vector<16x16x8xf32>
    %c0_149 = arith.constant 0 : index
    %c0_150 = arith.constant 0 : index
    %c0_151 = arith.constant 0 : index
    %c0_152 = arith.constant 0 : index
    %170 = vector.load %arg1[%c0_149, %c0_150, %c0_151, %c0_152] : memref<1x16x16x8xf32, #tpu.memory_space<vmem>>, vector<1x16x16x8xf32>
    %171 = vector.shape_cast %170 : vector<1x16x16x8xf32> to vector<16x16x8xf32>
    %cst_153 = arith.constant 2.000000e-01 : f32
    %172 = vector.broadcast %cst_153 : f32 to vector<16x16x8xf32>
    %173 = arith.mulf %169, %172 : vector<16x16x8xf32>
    %174 = arith.addf %173, %171 : vector<16x16x8xf32>
    %175 = vector.shape_cast %174 : vector<16x16x8xf32> to vector<1x16x16x8xf32>
    %c0_154 = arith.constant 0 : index
    %c0_155 = arith.constant 0 : index
    %c0_156 = arith.constant 0 : index
    %c0_157 = arith.constant 0 : index
    %176 = vector.load %arg12[%c0_154, %c0_155, %c0_156, %c0_157] : memref<1x16x16x8xf32, #tpu.memory_space<vmem>>, vector<1x16x16x8xf32>
    tpu.vector_store %arg12[%c0_154, %c0_155, %c0_156, %c0_157], %175 {strides = array<i32>} : memref<1x16x16x8xf32, #tpu.memory_space<vmem>>, vector<1x16x16x8xf32>,
    return
  }
  func.func @transform_0(%arg0: i32) -> (i32, i32, i32, i32) {
    %c0_i32 = arith.constant 0 : i32
    %c0_i32_0 = arith.constant 0 : i32
    %c0_i32_1 = arith.constant 0 : i32
    %c0_i32_2 = arith.constant 0 : i32
    return %arg0, %c0_i32, %c0_i32_0, %c0_i32_1 : i32, i32, i32, i32
  }
  func.func @transform_1(%arg0: i32) -> (i32, i32, i32) {
    %c0_i32 = arith.constant 0 : i32
    %c0_i32_0 = arith.constant 0 : i32
    %c0_i32_1 = arith.constant 0 : i32
    %c0_i32_2 = arith.constant 0 : i32
    return %c0_i32, %c0_i32_0, %c0_i32_1 : i32, i32, i32
  }
  func.func @transform_2(%arg0: i32) -> (i32, i32) {
    %c0_i32 = arith.constant 0 : i32
    %c0_i32_0 = arith.constant 0 : i32
    %c0_i32_1 = arith.constant 0 : i32
    return %c0_i32, %c0_i32_0 : i32, i32
  }
  func.func @transform_3(%arg0: i32) -> (i32, i32, i32) {
    %c0_i32 = arith.constant 0 : i32
    %c0_i32_0 = arith.constant 0 : i32
    %c0_i32_1 = arith.constant 0 : i32
    %c0_i32_2 = arith.constant 0 : i32
    return %c0_i32, %c0_i32_0, %c0_i32_1 : i32, i32, i32
  }
  func.func @transform_4(%arg0: i32) -> (i32, i32) {
    %c0_i32 = arith.constant 0 : i32
    %c0_i32_0 = arith.constant 0 : i32
    %c0_i32_1 = arith.constant 0 : i32
    return %c0_i32, %c0_i32_0 : i32, i32
  }
  func.func @transform_5(%arg0: i32) -> (i32, i32, i32) {
    %c0_i32 = arith.constant 0 : i32
    %c0_i32_0 = arith.constant 0 : i32
    %c0_i32_1 = arith.constant 0 : i32
    %c0_i32_2 = arith.constant 0 : i32
    return %c0_i32, %c0_i32_0, %c0_i32_1 : i32, i32, i32
  }
  func.func @transform_6(%arg0: i32) -> (i32, i32) {
    %c0_i32 = arith.constant 0 : i32
    %c0_i32_0 = arith.constant 0 : i32
    %c0_i32_1 = arith.constant 0 : i32
    return %c0_i32, %c0_i32_0 : i32, i32
  }
  func.func @transform_7(%arg0: i32) -> (i32, i32, i32) {
    %c0_i32 = arith.constant 0 : i32
    %c0_i32_0 = arith.constant 0 : i32
    %c0_i32_1 = arith.constant 0 : i32
    %c0_i32_2 = arith.constant 0 : i32
    return %c0_i32, %c0_i32_0, %c0_i32_1 : i32, i32, i32
  }
  func.func @transform_8(%arg0: i32) -> (i32, i32) {
    %c0_i32 = arith.constant 0 : i32
    %c0_i32_0 = arith.constant 0 : i32
    %c0_i32_1 = arith.constant 0 : i32
    return %c0_i32, %c0_i32_0 : i32, i32
  }
  func.func @transform_9(%arg0: i32) -> (i32, i32, i32) {
    %c0_i32 = arith.constant 0 : i32
    %c0_i32_0 = arith.constant 0 : i32
    %c0_i32_1 = arith.constant 0 : i32
    %c0_i32_2 = arith.constant 0 : i32
    return %c0_i32, %c0_i32_0, %c0_i32_1 : i32, i32, i32
  }
  func.func @transform_10(%arg0: i32) -> (i32, i32) {
    %c0_i32 = arith.constant 0 : i32
    %c0_i32_0 = arith.constant 0 : i32
    %c0_i32_1 = arith.constant 0 : i32
    return %c0_i32, %c0_i32_0 : i32, i32
  }
  func.func @transform_11(%arg0: i32) -> (i32, i32, i32, i32) {
    %c0_i32 = arith.constant 0 : i32
    %c0_i32_0 = arith.constant 0 : i32
    %c0_i32_1 = arith.constant 0 : i32
    %c0_i32_2 = arith.constant 0 : i32
    return %arg0, %c0_i32, %c0_i32_0, %c0_i32_1 : i32, i32, i32, i32
  }
}

</mosaic_0001>

<bundles_post_ra>
// kernel: tpu_custom_call.1
= control target key start
LH: loop header
LB: loop body
LE: loop exit
PB: predicated region body
PF: predicated region fallthrough
CT: control target
= control target key end

     0   :  { %s14747_s17 = smov 0   ;;  %s20081_s0 = inlined_call_operand.vmem [shape: f32[2,16,16,8], index: 0, kind: input, shape index: {}]   ;;  %s20082_s1 = inlined_call_operand.vmem [shape: f32[3,8,12], index: 1, kind: input, shape index: {}]   ;;  %s20083_s2 = inlined_call_operand.vmem [shape: f32[1,4], index: 2, kind: input, shape index: {}]   ;;  %s20084_s3 = inlined_call_operand.vmem [shape: f32[3,12,12], index: 3, kind: input, shape index: {}]   ;;  %s20085_s4 = inlined_call_operand.vmem [shape: f32[1,4], index: 4, kind: input, shape index: {}]   ;;  %s20086_s5 = inlined_call_operand.vmem [shape: f32[3,16,12], index: 5, kind: input, shape index: {}]   ;;  %s20087_s6 = inlined_call_operand.vmem [shape: f32[1,4], index: 6, kind: input, shape index: {}]   ;;  %s20088_s7 = inlined_call_operand.vmem [shape: f32[3,20,12], index: 7, kind: input, shape index: {}]   ;;  %s20089_s8 = inlined_call_operand.vmem [shape: f32[1,4], index: 8, kind: input, shape index: {}]   ;;  %s20090_s9 = inlined_call_operand.vmem [shape: f32[3,24,24], index: 9, kind: input, shape index: {}]   ;;  %s20091_s10 = inlined_call_operand.vmem [shape: f32[1,8], index: 10, kind: input, shape index: {}]   ;;  %s20092_s11 = inlined_call_operand.vmem [shape: f32[2,16,16,8], index: 11, kind: output, shape index: {}]  }
   0x1 LB: > { %s11988_s18 = sadd.s32 4294967295, %s14677_s17   ;;  %p11992_p0 = scmp.ge.s32.totalorder %s14677_s17, 1  ;;  %s14677_s17 = sphi %s14747_s17, %s21_s17  }
   0x2   : > { %p337_p1 = scmp.lt.s32.totalorder %s14677_s17, 3 }
   0x4   : > { %p338_p2 = pnand %p11992_p0, %p337_p1 }
   0x6   : > { %341 = sbr.rel (%p338_p2) target bundleno = 2991 (0xbaf), region = 64 }
   0xb   : > { %v11997_v0 = vld [vmem:[%s20082_s1 + $0x8] sm:$0xff]  ;;  %p14760_p3 = scmp.lt.s32.totalorder %s11988_s18, 1  ;;  %vm395_vm0 = vcmask 188416   ;;  %v14767_v1 = vld [vmem:[%s20082_s1] sm:$0xff]  ;;  %v14679_v2 = vmov 0.0   ;;  %v14788_v3 = vld [vmem:[%s20082_s1 + $0x10] sm:$0xff] }
   0xc   : > { %14653 = vmatprep.subr.mxu1 %v11997_v0  ;;  %13507 = vmatprep.subr.mxu0 %v11997_v0  ;;  %397 = vst.msk [vmem:[#allocation2 + $0x18] sm:$0x1] %vm395_vm0, %v14679_v2  ;;  %398 = vst.msk [vmem:[#allocation2 + $0x30] sm:$0x1] %vm395_vm0, %v14679_v2  ;;  %vm414_vm1 = vcmask 194560   ;;  %vm387_vm2 = vcmask 195584  }
   0xd   : > { %399 = vst.msk [vmem:[#allocation2 + $0x48] sm:$0x1] %vm395_vm0, %v14679_v2  ;;  %400 = vst.msk [vmem:[#allocation2 + $0x60] sm:$0x1] %vm395_vm0, %v14679_v2  ;;  %14654 = vmatpush3.msra.mxu1 %v11997_v0  ;;  %13508 = vmatpush3.msra.mxu0 %v11997_v0  ;;  %s20230_s18 = smov (!%p14760_p3, %s11988_s18), 1  ;;  %vm466_vm3 = vcmask 64512  }
   0xe   : > { %401 = vst.msk [vmem:[#allocation2 + $0x78] sm:$0x1] %vm395_vm0, %v14679_v2  ;;  %402 = vst.msk [vmem:[#allocation2 + $0x90] sm:$0x1] %vm395_vm0, %v14679_v2  ;;  %13581 = vmatprep.subr.mxu1 %v14767_v1  ;;  %13655 = vmatprep.subr.mxu0 %v14788_v3  ;;  %s12752_s26 = sshll.u32 %s20230_s18, 8  ;;  %vm2301_vm4 = vcmask 1045504  }
   0xf   : > { %403 = vst.msk [vmem:[#allocation2 + $0xa8] sm:$0x1] %vm395_vm0, %v14679_v2  ;;  %404 = vst.msk [vmem:[#allocation2 + $0xc0] sm:$0x1] %vm395_vm0, %v14679_v2  ;;  %s14830_s29 = scalar_lea.vmem %s20081_s0, %s12752_s26  ;;  %vm2092_vm5 = vcmask 1046528   ;;  %s14680_s30 = smov 120  }
  0x10   : > { %405 = vst.msk [vmem:[#allocation2 + $0xd8] sm:$0x1] %vm395_vm0, %v14679_v2  ;;  %406 = vst.msk [vmem:[#allocation2 + $0xf0] sm:$0x1] %vm395_vm0, %v14679_v2  ;;  %v433_v4 = vld [vmem:[%s14830_s29] sm:$0xff]  ;;  %v434_v6 = vld [vmem:[%s14830_s29 + $0x8] sm:$0xff]  ;;  %s19916_s27 = scalar_lea.vmem %s20092_s11, %s12752_s26 }
  0x11   : > { %407 = vst.msk [vmem:[#allocation2 + $0x108] sm:$0x1] %vm395_vm0, %v14679_v2  ;;  %408 = vst.msk [vmem:[#allocation2 + $0x120] sm:$0x1] %vm395_vm0, %v14679_v2  ;;  %v449_v5 = vld [vmem:[%s14830_s29 + $0x80] sm:$0xff]  ;;  %v450_v7 = vld [vmem:[%s14830_s29 + $0x88] sm:$0xff] }
  0x12   : > { %409 = vst.msk [vmem:[#allocation2 + $0x138] sm:$0x1] %vm395_vm0, %v14679_v2  ;;  %410 = vst.msk [vmem:[#allocation2 + $0x150] sm:$0x1] %vm395_vm0, %v14679_v2  ;;  %v435_v8 = vld [vmem:[%s14830_s29 + $0x10] sm:$0xff]  ;;  %v436_v10 = vld [vmem:[%s14830_s29 + $0x18] sm:$0xff] }
  0x13   : > { %411 = vst.msk [vmem:[#allocation2 + $0x168] sm:$0x1] %vm395_vm0, %v14679_v2  ;;  %412 = vst.msk [vmem:[#allocation2 + $0x180] sm:$0x1] %vm395_vm0, %v14679_v2  ;;  %v451_v9 = vld [vmem:[%s14830_s29 + $0x90] sm:$0xff]  ;;  %v452_v11 = vld [vmem:[%s14830_s29 + $0x98] sm:$0xff] }
  0x14   : > { %416 = vst.msk [vmem:[#allocation2 + $0x29] sm:$0x7f] %vm414_vm1, %v14679_v2  ;;  %417 = vst.msk [vmem:[#allocation2 + $0x41] sm:$0x7f] %vm414_vm1, %v14679_v2  ;;  %v437_v12 = vld [vmem:[%s14830_s29 + $0x20] sm:$0xff]  ;;  %v438_v14 = vld [vmem:[%s14830_s29 + $0x28] sm:$0xff] }
  0x15   : > { %418 = vst.msk [vmem:[#allocation2 + $0x59] sm:$0x7f] %vm414_vm1, %v14679_v2  ;;  %419 = vst.msk [vmem:[#allocation2 + $0x71] sm:$0x7f] %vm414_vm1, %v14679_v2  ;;  %v453_v13 = vld [vmem:[%s14830_s29 + $0xa0] sm:$0xff]  ;;  %v454_v15 = vld [vmem:[%s14830_s29 + $0xa8] sm:$0xff] }
  0x16   : > { %420 = vst.msk [vmem:[#allocation2 + $0x89] sm:$0x7f] %vm414_vm1, %v14679_v2  ;;  %421 = vst.msk [vmem:[#allocation2 + $0xa1] sm:$0x7f] %vm414_vm1, %v14679_v2  ;;  %v439_v16 = vld [vmem:[%s14830_s29 + $0x30] sm:$0xff]  ;;  %v440_v18 = vld [vmem:[%s14830_s29 + $0x38] sm:$0xff] }
  0x17   : > { %422 = vst.msk [vmem:[#allocation2 + $0xb9] sm:$0x7f] %vm414_vm1, %v14679_v2  ;;  %423 = vst.msk [vmem:[#allocation2 + $0xd1] sm:$0x7f] %vm414_vm1, %v14679_v2  ;;  %v455_v17 = vld [vmem:[%s14830_s29 + $0xb0] sm:$0xff]  ;;  %v456_v19 = vld [vmem:[%s14830_s29 + $0xb8] sm:$0xff] }
  0x18   : > { %424 = vst.msk [vmem:[#allocation2 + $0xe9] sm:$0x7f] %vm414_vm1, %v14679_v2  ;;  %425 = vst.msk [vmem:[#allocation2 + $0x101] sm:$0x7f] %vm414_vm1, %v14679_v2  ;;  %v441_v20 = vld [vmem:[%s14830_s29 + $0x40] sm:$0xff]  ;;  %v442_v22 = vld [vmem:[%s14830_s29 + $0x48] sm:$0xff] }
  0x19   : > { %426 = vst.msk [vmem:[#allocation2 + $0x119] sm:$0x7f] %vm414_vm1, %v14679_v2  ;;  %427 = vst.msk [vmem:[#allocation2 + $0x131] sm:$0x7f] %vm414_vm1, %v14679_v2  ;;  %v457_v21 = vld [vmem:[%s14830_s29 + $0xc0] sm:$0xff]  ;;  %v458_v23 = vld [vmem:[%s14830_s29 + $0xc8] sm:$0xff] }
  0x1a   : > { %428 = vst.msk [vmem:[#allocation2 + $0x149] sm:$0x7f] %vm414_vm1, %v14679_v2  ;;  %429 = vst.msk [vmem:[#allocation2 + $0x161] sm:$0x7f] %vm414_vm1, %v14679_v2  ;;  %v443_v24 = vld [vmem:[%s14830_s29 + $0x50] sm:$0xff]  ;;  %v444_v26 = vld [vmem:[%s14830_s29 + $0x58] sm:$0xff] }
  0x1b   : > { %430 = vst.msk [vmem:[#allocation2 + $0x179] sm:$0x7f] %vm414_vm1, %v14679_v2  ;;  %431 = vst.msk [vmem:[#allocation2 + $0x191] sm:$0x7f] %vm414_vm1, %v14679_v2  ;;  %v459_v25 = vld [vmem:[%s14830_s29 + $0xd0] sm:$0xff]  ;;  %v460_v27 = vld [vmem:[%s14830_s29 + $0xd8] sm:$0xff] }
  0x1c   : > { %388 = vst.msk [vmem:[#allocation2] sm:$0xff] %vm387_vm2, %v14679_v2  ;;  %389 = vst.msk [vmem:[#allocation2 + $0x8] sm:$0xff] %vm387_vm2, %v14679_v2  ;;  %v445_v46 = vld [vmem:[%s14830_s29 + $0x60] sm:$0xff]  ;;  %v446_v48 = vld [vmem:[%s14830_s29 + $0x68] sm:$0xff]  ;;  %s14681_s12 = smov 124   ;;  %vm3052_vm6 = vcmask 1043456  }
  0x1d   : > { %390 = vst.msk [vmem:[#allocation2 + $0x10] sm:$0xff] %vm387_vm2, %v14679_v2  ;;  %392 = vst.msk [vmem:[#allocation2 + $0x198] sm:$0xff] %vm387_vm2, %v14679_v2  ;;  %v461_v47 = vld [vmem:[%s14830_s29 + $0xe0] sm:$0xff]  ;;  %v462_v49 = vld [vmem:[%s14830_s29 + $0xe8] sm:$0xff]  ;;  %vm2907_vm7 = vcmask 97280   ;;  %s14682_s25 = smov 8  }
  0x1e   : > { %393 = vst.msk [vmem:[#allocation2 + $0x1a0] sm:$0xff] %vm387_vm2, %v14679_v2  ;;  %394 = vst.msk [vmem:[#allocation2 + $0x1a8] sm:$0xff] %vm387_vm2, %v14679_v2  ;;  %v447_v50 = vld [vmem:[%s14830_s29 + $0x70] sm:$0xff]  ;;  %v448_v52 = vld [vmem:[%s14830_s29 + $0x78] sm:$0xff]  ;;  %s14683_s28 = smov 12   ;;  %s14684_s20 = smov 16  }
  0x1f   : > { %396 = vst.msk [vmem:[#allocation2] sm:$0x1] %vm395_vm0, %v14679_v2  ;;  %413 = vst.msk [vmem:[#allocation2 + $0x198] sm:$0x1] %vm395_vm0, %v14679_v2  ;;  %v463_v51 = vld [vmem:[%s14830_s29 + $0xf0] sm:$0xff]  ;;  %v464_v53 = vld [vmem:[%s14830_s29 + $0xf8] sm:$0xff] }
  0x20   : > { %415 = vst.msk [vmem:[#allocation2 + $0x11] sm:$0x7f] %vm414_vm1, %v14679_v2  ;;  %432 = vst.msk [vmem:[#allocation2 + $0x1a9] sm:$0x7f] %vm414_vm1, %v14679_v2  ;;  %s14685_s13 = smov 20   ;;  %s14686_s21 = smov 112  }
  0x21   : > { %467 = vst.msk [vmem:[#allocation2 + $0x19] sm:$0xff] %vm466_vm3, %v433_v4  ;;  %483 = vst.msk [vmem:[#allocation2 + $0xd9] sm:$0xff] %vm466_vm3, %v449_v5 }
  0x22   : > { %468 = vst.msk [vmem:[#allocation2 + $0x21] sm:$0xff] %vm466_vm3, %v434_v6  ;;  %484 = vst.msk [vmem:[#allocation2 + $0xe1] sm:$0xff] %vm466_vm3, %v450_v7 }
  0x23   : > { %469 = vst.msk [vmem:[#allocation2 + $0x31] sm:$0xff] %vm466_vm3, %v435_v8  ;;  %485 = vst.msk [vmem:[#allocation2 + $0xf1] sm:$0xff] %vm466_vm3, %v451_v9 }
  0x24   : > { %470 = vst.msk [vmem:[#allocation2 + $0x39] sm:$0xff] %vm466_vm3, %v436_v10  ;;  %486 = vst.msk [vmem:[#allocation2 + $0xf9] sm:$0xff] %vm466_vm3, %v452_v11 }
  0x25   : > { %471 = vst.msk [vmem:[#allocation2 + $0x49] sm:$0xff] %vm466_vm3, %v437_v12  ;;  %487 = vst.msk [vmem:[#allocation2 + $0x109] sm:$0xff] %vm466_vm3, %v453_v13 }
  0x26   : > { %472 = vst.msk [vmem:[#allocation2 + $0x51] sm:$0xff] %vm466_vm3, %v438_v14  ;;  %488 = vst.msk [vmem:[#allocation2 + $0x111] sm:$0xff] %vm466_vm3, %v454_v15 }
  0x27   : > { %473 = vst.msk [vmem:[#allocation2 + $0x61] sm:$0xff] %vm466_vm3, %v439_v16  ;;  %489 = vst.msk [vmem:[#allocation2 + $0x121] sm:$0xff] %vm466_vm3, %v455_v17 }
  0x28   : > { %474 = vst.msk [vmem:[#allocation2 + $0x69] sm:$0xff] %vm466_vm3, %v440_v18  ;;  %490 = vst.msk [vmem:[#allocation2 + $0x129] sm:$0xff] %vm466_vm3, %v456_v19  ;;  %v14877_v28 = vld [vmem:[#allocation2 + $0x18] sm:$0xff] }
  0x29   : > { %475 = vst.msk [vmem:[#allocation2 + $0x79] sm:$0xff] %vm466_vm3, %v441_v20  ;;  %491 = vst.msk [vmem:[#allocation2 + $0x139] sm:$0xff] %vm466_vm3, %v457_v21  ;;  %v14879_v29 = vld [vmem:[#allocation2 + $0xd8] sm:$0xff]  ;;  %v14881_v30 = vld [vmem:[#allocation2 + $0x20] sm:$0xff]  ;;  %13509 = vmatprep.mubr.msk.f32.mxu0 %vm466_vm3, %v14877_v28 }
  0x2a   : > { %476 = vst.msk [vmem:[#allocation2 + $0x81] sm:$0xff] %vm466_vm3, %v442_v22  ;;  %492 = vst.msk [vmem:[#allocation2 + $0x141] sm:$0xff] %vm466_vm3, %v458_v23  ;;  %13545 = vmatprep.mubr.msk.f32.mxu1 %vm466_vm3, %v14879_v29  ;;  %v14890_v31 = vld [vmem:[#allocation2 + $0xe0] sm:$0xff]  ;;  %v14892_v32 = vld [vmem:[#allocation2 + $0x28] sm:$0xff]  ;;  %13510 = vmatmul.mubr.msk.f32.vlgmr.msra.gmra.mxu0 %vm466_vm3, %v14881_v30 }
  0x2b   : > { %477 = vst.msk [vmem:[#allocation2 + $0x91] sm:$0xff] %vm466_vm3, %v443_v24  ;;  %493 = vst.msk [vmem:[#allocation2 + $0x151] sm:$0xff] %vm466_vm3, %v459_v25  ;;  %v14894_v33 = vld [vmem:[#allocation2 + $0xe8] sm:$0xff]  ;;  %13546 = vmatmul.mubr.msk.f32.vlgmr.msra.gmra.mxu1 %vm466_vm3, %v14890_v31  ;;  %13656 = vmatpush3.msra.mxu0 %v14788_v3  ;;  %v14902_v34 = vld [vmem:[#allocation2 + $0x30] sm:$0xff] }
  0x2c   : > { %478 = vst.msk [vmem:[#allocation2 + $0x99] sm:$0xff] %vm466_vm3, %v444_v26  ;;  %494 = vst.msk [vmem:[#allocation2 + $0x159] sm:$0xff] %vm466_vm3, %v460_v27  ;;  %13582 = vmatpush3.msra.mxu1 %v14767_v1  ;;  %v14904_v35 = vld [vmem:[#allocation2 + $0xf0] sm:$0xff]  ;;  %13512 = vmatprep.mubr.msk.f32.mxu0 %vm466_vm3, %v14892_v32  ;;  %v14910_v36 = vld [vmem:[#allocation2 + $0x38] sm:$0xff] }
  0x2d   : > { %13548 = vmatprep.mubr.msk.f32.mxu1 %vm466_vm3, %v14894_v33  ;;  %v14912_v37 = vld [vmem:[#allocation2 + $0xf8] sm:$0xff]  ;;  %v14922_v38 = vld [vmem:[#allocation2 + $0x40] sm:$0xff]  ;;  %v14926_v40 = vld [vmem:[#allocation2 + $0x48] sm:$0xff]  ;;  %479 = vst.msk [vmem:[#allocation2 + $0xa9] sm:$0xff] %vm466_vm3, %v445_v46 }
  0x2e   : > { %13513 = vmatmul.mubr.msk.f32.gmra.mxu0 %vm466_vm3, %v14902_v34  ;;  %v14924_v39 = vld [vmem:[#allocation2 + $0x100] sm:$0xff]  ;;  %v14928_v41 = vld [vmem:[#allocation2 + $0x108] sm:$0xff]  ;;  %v14934_v42 = vld [vmem:[#allocation2 + $0x50] sm:$0xff]  ;;  %495 = vst.msk [vmem:[#allocation2 + $0x169] sm:$0xff] %vm466_vm3, %v461_v47 }
  0x2f   : > { %13549 = vmatmul.mubr.msk.f32.gmra.mxu1 %vm466_vm3, %v14904_v35  ;;  %13515 = vmatprep.mubr.msk.f32.mxu0 %vm466_vm3, %v14910_v36  ;;  %v14940_v43 = vld [vmem:[#allocation2 + $0x110] sm:$0xff]  ;;  %v14942_v44 = vld [vmem:[#allocation2 + $0x58] sm:$0xff]  ;;  %480 = vst.msk [vmem:[#allocation2 + $0xb1] sm:$0xff] %vm466_vm3, %v446_v48  ;;  %496 = vst.msk [vmem:[#allocation2 + $0x171] sm:$0xff] %vm466_vm3, %v462_v49 }
  0x30   : > { %13551 = vmatprep.mubr.msk.f32.mxu1 %vm466_vm3, %v14912_v37  ;;  %v14944_v45 = vld [vmem:[#allocation2 + $0x118] sm:$0xff]  ;;  %481 = vst.msk [vmem:[#allocation2 + $0xc1] sm:$0xff] %vm466_vm3, %v447_v50  ;;  %497 = vst.msk [vmem:[#allocation2 + $0x181] sm:$0xff] %vm466_vm3, %v463_v51  ;;  %v14968_v54 = vld [vmem:[#allocation2 + $0x60] sm:$0xff] }
  0x31   : > { %v14970_v55 = vld [vmem:[#allocation2 + $0x120] sm:$0xff]  ;;  %482 = vst.msk [vmem:[#allocation2 + $0xc9] sm:$0xff] %vm466_vm3, %v448_v52  ;;  %498 = vst.msk [vmem:[#allocation2 + $0x189] sm:$0xff] %vm466_vm3, %v464_v53  ;;  %v14974_v56 = vld [vmem:[#allocation2 + $0x68] sm:$0xff] }
  0x32   : > { %13516 = vmatmul.mubr.msk.f32.gmra.mxu0 %vm466_vm3, %v14922_v38  ;;  %v14976_v57 = vld [vmem:[#allocation2 + $0x128] sm:$0xff]  ;;  %v14986_v58 = vld [vmem:[#allocation2 + $0x70] sm:$0xff]  ;;  %v14990_v60 = vld [vmem:[#allocation2 + $0x78] sm:$0xff] }
  0x33   : > { %13552 = vmatmul.mubr.msk.f32.gmra.mxu1 %vm466_vm3, %v14924_v39  ;;  %13518 = vmatprep.mubr.msk.f32.mxu0 %vm466_vm3, %v14926_v40  ;;  %v14988_v59 = vld [vmem:[#allocation2 + $0x130] sm:$0xff]  ;;  %v14992_v61 = vld [vmem:[#allocation2 + $0x138] sm:$0xff]  ;;  %v15002_v62 = vld [vmem:[#allocation2 + $0x80] sm:$0xff] }
  0x34   : > { %13554 = vmatprep.mubr.msk.f32.mxu1 %vm466_vm3, %v14928_v41  ;;  %v15004_v63 = vld [vmem:[#allocation2 + $0x140] sm:$0xff]  ;;  %v15006_v0 = vld [vmem:[#allocation2 + $0x88] sm:$0xff]  ;;  %v15018_v2 = vld [vmem:[#allocation2 + $0x90] sm:$0xff] }
  0x35   : > { %v15008_v1 = vld [vmem:[#allocation2 + $0x148] sm:$0xff]  ;;  %v15020_v3 = vld [vmem:[#allocation2 + $0x150] sm:$0xff]  ;;  %v15022_v4 = vld [vmem:[#allocation2 + $0x98] sm:$0xff] }
  0x36   : > { %13519 = vmatmul.mubr.msk.f32.gmra.mxu0 %vm466_vm3, %v14934_v42  ;;  %v15024_v5 = vld [vmem:[#allocation2 + $0x158] sm:$0xff]  ;;  %v15034_v6 = vld [vmem:[#allocation2 + $0xa0] sm:$0xff]  ;;  %v15038_v8 = vld [vmem:[#allocation2 + $0xa8] sm:$0xff] }
  0x37   : > { %13555 = vmatmul.mubr.msk.f32.gmra.mxu1 %vm466_vm3, %v14940_v43  ;;  %13521 = vmatprep.mubr.msk.f32.mxu0 %vm466_vm3, %v14942_v44  ;;  %v15036_v7 = vld [vmem:[#allocation2 + $0x160] sm:$0xff]  ;;  %v15040_v9 = vld [vmem:[#allocation2 + $0x168] sm:$0xff]  ;;  %v15050_v10 = vld [vmem:[#allocation2 + $0xb0] sm:$0xff] }
  0x38   : > { %13557 = vmatprep.mubr.msk.f32.mxu1 %vm466_vm3, %v14944_v45  ;;  %v15052_v11 = vld [vmem:[#allocation2 + $0x170] sm:$0xff]  ;;  %v15054_v12 = vld [vmem:[#allocation2 + $0xb8] sm:$0xff]  ;;  %v15066_v14 = vld [vmem:[#allocation2 + $0xc0] sm:$0xff] }
  0x39   : > { %v15056_v13 = vld [vmem:[#allocation2 + $0x178] sm:$0xff]  ;;  %v15068_v15 = vld [vmem:[#allocation2 + $0x180] sm:$0xff]  ;;  %v15070_v16 = vld [vmem:[#allocation2 + $0xc8] sm:$0xff] }
  0x3a   : > { %13522 = vmatmul.mubr.msk.f32.gmra.mxu0 %vm466_vm3, %v14968_v54  ;;  %v15072_v17 = vld [vmem:[#allocation2 + $0x188] sm:$0xff]  ;;  %v571_v18 = vld [vmem:[#allocation2 + $0xd0] sm:$0xff]  ;;  %v499_v20 = vld [vmem:[#allocation2] sm:$0xff] }
  0x3b   : > { %13558 = vmatmul.mubr.msk.f32.gmra.mxu1 %vm466_vm3, %v14970_v55  ;;  %13524 = vmatprep.mubr.msk.f32.mxu0 %vm466_vm3, %v14974_v56  ;;  %v15082_v19 = vld [vmem:[#allocation2 + $0x190] sm:$0xff]  ;;  %v500_v21 = vld [vmem:[#allocation2 + $0x8] sm:$0xff]  ;;  %v1542_v23 = vld [vmem:[#allocation2 + $0x198] sm:$0xff] }
  0x3c   : > { %13560 = vmatprep.mubr.msk.f32.mxu1 %vm466_vm3, %v14976_v57  ;;  %v501_v22 = vld [vmem:[#allocation2 + $0x10] sm:$0xff]  ;;  %v1543_v24 = vld [vmem:[#allocation2 + $0x1a0] sm:$0xff]  ;;  %v1544_v25 = vld [vmem:[#allocation2 + $0x1a8] sm:$0xff] }
  0x3e   : > { %13525 = vmatmul.mubr.msk.f32.gmra.mxu0 %vm466_vm3, %v14986_v58 }
  0x3f   : > { %13561 = vmatmul.mubr.msk.f32.gmra.mxu1 %vm466_vm3, %v14988_v59  ;;  %13527 = vmatprep.mubr.msk.f32.mxu0 %vm466_vm3, %v14990_v60 }
  0x40   : > { %13563 = vmatprep.mubr.msk.f32.mxu1 %vm466_vm3, %v14992_v61 }
  0x42   : > { %13528 = vmatmul.mubr.msk.f32.gmra.mxu0 %vm466_vm3, %v15002_v62 }
  0x43   : > { %13564 = vmatmul.mubr.msk.f32.gmra.mxu1 %vm466_vm3, %v15004_v63  ;;  %13530 = vmatprep.mubr.msk.f32.mxu0 %vm466_vm3, %v15006_v0 }
  0x44   : > { %13566 = vmatprep.mubr.msk.f32.mxu1 %vm466_vm3, %v15008_v1 }
  0x46   : > { %13531 = vmatmul.mubr.msk.f32.gmra.mxu0 %vm466_vm3, %v15018_v2 }
  0x47   : > { %13567 = vmatmul.mubr.msk.f32.gmra.mxu1 %vm466_vm3, %v15020_v3  ;;  %13533 = vmatprep.mubr.msk.f32.mxu0 %vm466_vm3, %v15022_v4 }
  0x48   : > { %13569 = vmatprep.mubr.msk.f32.mxu1 %vm466_vm3, %v15024_v5 }
  0x4a   : > { %13534 = vmatmul.mubr.msk.f32.gmra.mxu0 %vm466_vm3, %v15034_v6 }
  0x4b   : > { %13570 = vmatmul.mubr.msk.f32.gmra.mxu1 %vm466_vm3, %v15036_v7  ;;  %13536 = vmatprep.mubr.msk.f32.mxu0 %vm466_vm3, %v15038_v8 }
  0x4c   : > { %13572 = vmatprep.mubr.msk.f32.mxu1 %vm466_vm3, %v15040_v9 }
  0x4e   : > { %13537 = vmatmul.mubr.msk.f32.gmra.mxu0 %vm466_vm3, %v15050_v10 }
  0x4f   : > { %13573 = vmatmul.mubr.msk.f32.gmra.mxu1 %vm466_vm3, %v15052_v11  ;;  %13539 = vmatprep.mubr.msk.f32.mxu0 %vm466_vm3, %v15054_v12 }
  0x50   : > { %13575 = vmatprep.mubr.msk.f32.mxu1 %vm466_vm3, %v15056_v13 }
  0x52   : > { %13540 = vmatmul.mubr.msk.f32.gmra.mxu0 %vm466_vm3, %v15066_v14 }
  0x53   : > { %13576 = vmatmul.mubr.msk.f32.gmra.mxu1 %vm466_vm3, %v15068_v15  ;;  %13542 = vmatprep.mubr.msk.f32.mxu0 %vm466_vm3, %v15070_v16 }
  0x54   : > { %13578 = vmatprep.mubr.msk.f32.mxu1 %vm466_vm3, %v15072_v17 }
  0x56   : > { %13543 = vmatmul.mubr.msk.f32.gmra.mxu0 %vm466_vm3, %v571_v18 }
  0x57   : > { %13579 = vmatmul.mubr.msk.f32.gmra.mxu1 %vm466_vm3, %v15082_v19  ;;  %13657 = vmatprep.mubr.msk.f32.mxu0 %vm466_vm3, %v14902_v34 }
  0x58   : > { %13583 = vmatprep.mubr.msk.f32.mxu1 %vm466_vm3, %v499_v20 }
  0x5a   : > { %13658 = vmatmul.mubr.msk.f32.vlgmr.msra.gmra.mxu0 %vm466_vm3, %v14910_v36 }
  0x5b   : > { %13584 = vmatmul.mubr.msk.f32.vlgmr.msra.gmra.mxu1 %vm466_vm3, %v500_v21  ;;  %13660 = vmatprep.mubr.msk.f32.mxu0 %vm466_vm3, %v14922_v38 }
  0x5c   : > { %13586 = vmatprep.mubr.msk.f32.mxu1 %vm466_vm3, %v501_v22 }
  0x5e   : > { %13661 = vmatmul.mubr.msk.f32.gmra.mxu0 %vm466_vm3, %v14926_v40 }
  0x5f   : > { %13587 = vmatmul.mubr.msk.f32.gmra.mxu1 %vm466_vm3, %v14877_v28  ;;  %13663 = vmatprep.mubr.msk.f32.mxu0 %vm466_vm3, %v14934_v42 }
  0x60   : > { %13589 = vmatprep.mubr.msk.f32.mxu1 %vm466_vm3, %v14881_v30 }
  0x62   : > { %13664 = vmatmul.mubr.msk.f32.gmra.mxu0 %vm466_vm3, %v14942_v44 }
  0x63   : > { %13590 = vmatmul.mubr.msk.f32.gmra.mxu1 %vm466_vm3, %v14892_v32  ;;  %13666 = vmatprep.mubr.msk.f32.mxu0 %vm466_vm3, %v14968_v54 }
  0x64   : > { %13592 = vmatprep.mubr.msk.f32.mxu1 %vm466_vm3, %v14902_v34 }
  0x66   : > { %13667 = vmatmul.mubr.msk.f32.gmra.mxu0 %vm466_vm3, %v14974_v56 }
  0x67   : > { %13593 = vmatmul.mubr.msk.f32.gmra.mxu1 %vm466_vm3, %v14910_v36  ;;  %13669 = vmatprep.mubr.msk.f32.mxu0 %vm466_vm3, %v14986_v58 }
  0x68   : > { %13595 = vmatprep.mubr.msk.f32.mxu1 %vm466_vm3, %v14922_v38 }
  0x6a   : > { %13670 = vmatmul.mubr.msk.f32.gmra.mxu0 %vm466_vm3, %v14990_v60 }
  0x6b   : > { %13596 = vmatmul.mubr.msk.f32.gmra.mxu1 %vm466_vm3, %v14926_v40  ;;  %13672 = vmatprep.mubr.msk.f32.mxu0 %vm466_vm3, %v15002_v62 }
  0x6c   : > { %13598 = vmatprep.mubr.msk.f32.mxu1 %vm466_vm3, %v14934_v42 }
  0x6e   : > { %13673 = vmatmul.mubr.msk.f32.gmra.mxu0 %vm466_vm3, %v15006_v0 }
  0x6f   : > { %13599 = vmatmul.mubr.msk.f32.gmra.mxu1 %vm466_vm3, %v14942_v44  ;;  %13675 = vmatprep.mubr.msk.f32.mxu0 %vm466_vm3, %v15018_v2 }
  0x70   : > { %13601 = vmatprep.mubr.msk.f32.mxu1 %vm466_vm3, %v14968_v54 }
  0x72   : > { %13676 = vmatmul.mubr.msk.f32.gmra.mxu0 %vm466_vm3, %v15022_v4 }
  0x73   : > { %13602 = vmatmul.mubr.msk.f32.gmra.mxu1 %vm466_vm3, %v14974_v56  ;;  %13678 = vmatprep.mubr.msk.f32.mxu0 %vm466_vm3, %v15034_v6 }
  0x74   : > { %13604 = vmatprep.mubr.msk.f32.mxu1 %vm466_vm3, %v14986_v58 }
  0x76   : > { %13679 = vmatmul.mubr.msk.f32.gmra.mxu0 %vm466_vm3, %v15038_v8 }
  0x77   : > { %13605 = vmatmul.mubr.msk.f32.gmra.mxu1 %vm466_vm3, %v14990_v60  ;;  %13681 = vmatprep.mubr.msk.f32.mxu0 %vm466_vm3, %v15050_v10 }
  0x78   : > { %13607 = vmatprep.mubr.msk.f32.mxu1 %vm466_vm3, %v15002_v62 }
  0x7a   : > { %13682 = vmatmul.mubr.msk.f32.gmra.mxu0 %vm466_vm3, %v15054_v12 }
  0x7b   : > { %13608 = vmatmul.mubr.msk.f32.gmra.mxu1 %vm466_vm3, %v15006_v0  ;;  %13684 = vmatprep.mubr.msk.f32.mxu0 %vm466_vm3, %v15066_v14 }
  0x7c   : > { %13610 = vmatprep.mubr.msk.f32.mxu1 %vm466_vm3, %v15018_v2 }
  0x7e   : > { %13685 = vmatmul.mubr.msk.f32.gmra.mxu0 %vm466_vm3, %v15070_v16 }
  0x7f   : > { %13611 = vmatmul.mubr.msk.f32.gmra.mxu1 %vm466_vm3, %v15022_v4  ;;  %13687 = vmatprep.mubr.msk.f32.mxu0 %vm466_vm3, %v571_v18 }
  0x80   : > { %13613 = vmatprep.mubr.msk.f32.mxu1 %vm466_vm3, %v15034_v6 }
  0x82   : > { %13688 = vmatmul.mubr.msk.f32.gmra.mxu0 %vm466_vm3, %v14879_v29 }
  0x83   : > { %13614 = vmatmul.mubr.msk.f32.gmra.mxu1 %vm466_vm3, %v15038_v8  ;;  %13690 = vmatprep.mubr.msk.f32.mxu0 %vm466_vm3, %v14890_v31 }
  0x84   : > { %13616 = vmatprep.mubr.msk.f32.mxu1 %vm466_vm3, %v15050_v10 }
  0x86   : > { %13691 = vmatmul.mubr.msk.f32.gmra.mxu0 %vm466_vm3, %v14894_v33 }
  0x87   : > { %13617 = vmatmul.mubr.msk.f32.gmra.mxu1 %vm466_vm3, %v15054_v12  ;;  %13693 = vmatprep.mubr.msk.f32.mxu0 %vm466_vm3, %v14904_v35 }
  0x88   : > { %13619 = vmatprep.mubr.msk.f32.mxu1 %vm466_vm3, %v15066_v14 }
  0x8a   : > { %13694 = vmatmul.mubr.msk.f32.gmra.mxu0 %vm466_vm3, %v14912_v37 }
  0x8b   : > { %13620 = vmatmul.mubr.msk.f32.gmra.mxu1 %vm466_vm3, %v15070_v16  ;;  %13696 = vmatprep.mubr.msk.f32.mxu0 %vm466_vm3, %v14924_v39 }
  0x8c   : > { %13622 = vmatprep.mubr.msk.f32.mxu1 %vm466_vm3, %v571_v18 }
  0x8e   : > { %13697 = vmatmul.mubr.msk.f32.gmra.mxu0 %vm466_vm3, %v14928_v41 }
  0x8f   : > { %13623 = vmatmul.mubr.msk.f32.gmra.mxu1 %vm466_vm3, %v14879_v29  ;;  %13699 = vmatprep.mubr.msk.f32.mxu0 %vm466_vm3, %v14940_v43 }
  0x90   : > { %13625 = vmatprep.mubr.msk.f32.mxu1 %vm466_vm3, %v14890_v31 }
  0x92   : > { %13700 = vmatmul.mubr.msk.f32.gmra.mxu0 %vm466_vm3, %v14944_v45 }
  0x93   : > { %13626 = vmatmul.mubr.msk.f32.gmra.mxu1 %vm466_vm3, %v14894_v33  ;;  %13702 = vmatprep.mubr.msk.f32.mxu0 %vm466_vm3, %v14970_v55 }
  0x94   : > { %13628 = vmatprep.mubr.msk.f32.mxu1 %vm466_vm3, %v14904_v35 }
  0x96   : > { %13703 = vmatmul.mubr.msk.f32.gmra.mxu0 %vm466_vm3, %v14976_v57 }
  0x97   : > { %13629 = vmatmul.mubr.msk.f32.gmra.mxu1 %vm466_vm3, %v14912_v37  ;;  %13705 = vmatprep.mubr.msk.f32.mxu0 %vm466_vm3, %v14988_v59 }
  0x98   : > { %13631 = vmatprep.mubr.msk.f32.mxu1 %vm466_vm3, %v14924_v39 }
  0x9a   : > { %13706 = vmatmul.mubr.msk.f32.gmra.mxu0 %vm466_vm3, %v14992_v61 }
  0x9b   : > { %13632 = vmatmul.mubr.msk.f32.gmra.mxu1 %vm466_vm3, %v14928_v41  ;;  %13708 = vmatprep.mubr.msk.f32.mxu0 %vm466_vm3, %v15004_v63 }
  0x9c   : > { %13634 = vmatprep.mubr.msk.f32.mxu1 %vm466_vm3, %v14940_v43 }
  0x9e   : > { %13709 = vmatmul.mubr.msk.f32.gmra.mxu0 %vm466_vm3, %v15008_v1 }
  0x9f   : > { %13635 = vmatmul.mubr.msk.f32.gmra.mxu1 %vm466_vm3, %v14944_v45  ;;  %13711 = vmatprep.mubr.msk.f32.mxu0 %vm466_vm3, %v15020_v3 }
  0xa0   : > { %13637 = vmatprep.mubr.msk.f32.mxu1 %vm466_vm3, %v14970_v55 }
  0xa2   : > { %13712 = vmatmul.mubr.msk.f32.gmra.mxu0 %vm466_vm3, %v15024_v5 }
  0xa3   : > { %13638 = vmatmul.mubr.msk.f32.gmra.mxu1 %vm466_vm3, %v14976_v57  ;;  %13714 = vmatprep.mubr.msk.f32.mxu0 %vm466_vm3, %v15036_v7 }
  0xa4   : > { %13640 = vmatprep.mubr.msk.f32.mxu1 %vm466_vm3, %v14988_v59 }
  0xa6   : > { %13715 = vmatmul.mubr.msk.f32.gmra.mxu0 %vm466_vm3, %v15040_v9 }
  0xa7   : > { %13641 = vmatmul.mubr.msk.f32.gmra.mxu1 %vm466_vm3, %v14992_v61  ;;  %13717 = vmatprep.mubr.msk.f32.mxu0 %vm466_vm3, %v15052_v11 }
  0xa8   : > { %13643 = vmatprep.mubr.msk.f32.mxu1 %vm466_vm3, %v15004_v63 }
  0xaa   : > { %13718 = vmatmul.mubr.msk.f32.gmra.mxu0 %vm466_vm3, %v15056_v13 }
  0xab   : > { %13644 = vmatmul.mubr.msk.f32.gmra.mxu1 %vm466_vm3, %v15008_v1  ;;  %13720 = vmatprep.mubr.msk.f32.mxu0 %vm466_vm3, %v15068_v15 }
  0xac   : > { %13646 = vmatprep.mubr.msk.f32.mxu1 %vm466_vm3, %v15020_v3 }
  0xae   : > { %13721 = vmatmul.mubr.msk.f32.gmra.mxu0 %vm466_vm3, %v15072_v17 }
  0xaf   : > { %13647 = vmatmul.mubr.msk.f32.gmra.mxu1 %vm466_vm3, %v15024_v5  ;;  %13723 = vmatprep.mubr.msk.f32.mxu0 %vm466_vm3, %v15082_v19 }
  0xb0   : > { %13649 = vmatprep.mubr.msk.f32.mxu1 %vm466_vm3, %v15036_v7 }
  0xb2   : > { %13724 = vmatmul.mubr.msk.f32.gmra.mxu0 %vm466_vm3, %v1542_v23 }
  0xb3   : > { %13650 = vmatmul.mubr.msk.f32.gmra.mxu1 %vm466_vm3, %v15040_v9  ;;  %13726 = vmatprep.mubr.msk.f32.mxu0 %vm466_vm3, %v1543_v24 }
  0xb4   : > { %13652 = vmatprep.mubr.msk.f32.mxu1 %vm466_vm3, %v15052_v11 }
  0xb6   : > { %13727 = vmatmul.mubr.msk.f32.gmra.mxu0 %vm466_vm3, %v1544_v25 }
  0xb7   : > { %13653 = vmatmul.mubr.msk.f32.gmra.mxu1 %vm466_vm3, %v15056_v13 }
  0xea   : > { %v13511_v26 = vpop.f32.mrf.mxu0 }
  0xeb   : > { %v15271_v27 = vpop.f32.mrf.mxu1 }
  0xec   : > { %v808_v28 = vpop.f32.mrf.mxu0 }
  0xed   : > { %v15273_v29 = vpop.f32.mrf.mxu1 }
  0xee   : > { %v13514_v30 = vpop.f32.mrf.mxu0 }
  0xef   : > { %v15275_v31 = vpop.f32.mrf.mxu1 }
  0xf0   : > { %v818_v32 = vpop.f32.mrf.mxu0 }
  0xf1   : > { %v15277_v33 = vpop.f32.mrf.mxu1 }
  0xf2   : > { %v15279_v34 = vpop.f32.mrf.mxu0 }
  0xf3   : > { %v15281_v35 = vpop.f32.mrf.mxu1 }
  0xf4   : > { %v15283_v36 = vpop.f32.mrf.mxu0 }
  0xf5   : > { %v15285_v37 = vpop.f32.mrf.mxu1 }
  0xf6   : > { %v15287_v38 = vpop.f32.mrf.mxu0 }
  0xf7   : > { %v15289_v39 = vpop.f32.mrf.mxu1 }
  0xf8   : > { %v15291_v40 = vpop.f32.mrf.mxu0 }
  0xf9   : > { %v15293_v41 = vpop.f32.mrf.mxu1 }
  0xfa   : > { %v15295_v42 = vpop.f32.mrf.mxu0 }
  0xfb   : > { %v15297_v43 = vpop.f32.mrf.mxu1 }
  0xfc   : > { %v15299_v44 = vpop.f32.mrf.mxu0 }
  0xfd   : > { %v15301_v45 = vpop.f32.mrf.mxu1 }
  0xfe   : > { %v15303_v46 = vpop.f32.mrf.mxu0 }
  0xff   : > { %v15305_v47 = vpop.f32.mrf.mxu1 }
 0x100   : > { %v15307_v48 = vpop.f32.mrf.mxu0 }
 0x101   : > { %v15309_v49 = vpop.f32.mrf.mxu1 }
 0x102   : > { %v15311_v50 = vpop.f32.mrf.mxu0 }
 0x103   : > { %v15313_v51 = vpop.f32.mrf.mxu1 }
 0x104   : > { %v15315_v52 = vpop.f32.mrf.mxu0 }
 0x105   : > { %v15317_v53 = vpop.f32.mrf.mxu1 }
 0x106   : > { %v15319_v54 = vpop.f32.mrf.mxu0 }
 0x107   : > { %v15321_v55 = vpop.f32.mrf.mxu1 }
 0x108   : > { %v15323_v56 = vpop.f32.mrf.mxu0 }
 0x109   : > { %v15325_v57 = vpop.f32.mrf.mxu1 }
 0x10a   : > { %v15327_v58 = vpop.f32.mrf.mxu0 }
 0x10b   : > { %v15329_v59 = vpop.f32.mrf.mxu1 }
 0x10c   : > { %v15331_v60 = vpop.f32.mrf.mxu0 }
 0x10d   : > { %v15333_v61 = vpop.f32.mrf.mxu1 }
 0x10e   : > { %v15335_v62 = vpop.f32.mrf.mxu0 }
 0x10f   : > { %v15337_v63 = vpop.f32.mrf.mxu1 }
 0x110   : > { %v15339_v0 = vpop.f32.mrf.mxu0 }
 0x111   : > { %v15341_v1 = vpop.f32.mrf.mxu1 }
 0x112   : > { %v15343_v2 = vpop.f32.mrf.mxu0 }
 0x113   : > { %v15345_v3 = vpop.f32.mrf.mxu1 }
 0x114   : > { %20101 = vst [vmem:[#allocation3_spill] sm:$0xff] %v15345_v3  ;;  %v15347_v4 = vpop.f32.mrf.mxu0 }
 0x115   : > { %v15349_v5 = vpop.f32.mrf.mxu1 }
 0x116   : > { %v15351_v6 = vpop.f32.mrf.mxu0 }
 0x117   : > { %v15353_v7 = vpop.f32.mrf.mxu1 }
 0x118   : > { %20102 = vst [vmem:[#allocation4_spill] sm:$0xff] %v15353_v7  ;;  %v15355_v8 = vpop.f32.mrf.mxu0 }
 0x119   : > { %v15357_v9 = vpop.f32.mrf.mxu1 }
 0x11a   : > { %20103 = vst [vmem:[#allocation5_spill] sm:$0xff] %v15357_v9  ;;  %v13659_v11 = vpop.f32.mrf.mxu0 }
 0x11b   : > { %v13585_v10 = vpop.f32.mrf.mxu1 }
 0x11c   : > { %v1263_v12 = vadd.f32 %v13585_v10, %v13511_v26  ;;  %v1757_v14 = vpop.f32.mrf.mxu0 }
 0x11d   : > { %v1257_v13 = vpop.f32.mrf.mxu1 }
 0x11e   : > { %v1258_v15 = vadd.f32 %v1257_v13, %v808_v28  ;;  %v15359_v16 = vadd.f32 %v13659_v11, %v1263_v12  ;;  %v13662_v18 = vpop.f32.mrf.mxu0 }
 0x11f   : > { %v13588_v17 = vpop.f32.mrf.mxu1 }
 0x120   : > { %20104 = vst [vmem:[#allocation6_spill] sm:$0xff] %v15359_v16  ;;  %v15361_v19 = vadd.f32 %v1757_v14, %v1258_v15  ;;  %v1767_v21 = vpop.f32.mrf.mxu0  ;;  %v1273_v25 = vadd.f32 %v13588_v17, %v13514_v30  ;;  %v2303_v28 = vrot.slane %v15359_v16, 2  ;;  %v2094_v11 = vrot.slane %v15359_v16, 1 }
 0x121   : > { %v1267_v20 = vpop.f32.mrf.mxu1 }
 0x122   : > { %v1268_v22 = vadd.f32 %v1267_v20, %v818_v32  ;;  %v2302_v23 = vrot.slane %v15361_v19, 2  ;;  %v2093_v24 = vrot.slane %v15361_v19, 1  ;;  %v13665_v10 = vpop.f32.mrf.mxu0  ;;  %v15372_v17 = vadd.f32 %v13662_v18, %v1273_v25 }
 0x123   : > { %v13591_v26 = vpop.f32.mrf.mxu1 }
 0x124   : > { %v1998_v12 = vadd.f32 %v1767_v21, %v1268_v22  ;;  %v2304_v13 = vsel %vm2301_vm4, %v2302_v23, %v2303_v28  ;;  %v2095_v14 = vsel %vm2092_vm5, %v2093_v24, %v2094_v11  ;;  %v1777_v7 = vpop.f32.mrf.mxu0  ;;  %v1283_v21 = vadd.f32 %v13591_v26, %v15279_v34 }
 0x125   : > { %v1277_v15 = vpop.f32.mrf.mxu1  ;;  %2382 = vrot.lane.b32.xlu1 %v2304_v13, %s14680_s30  ;;  %2173 = vrot.lane.b32.xlu0 %v2095_v14, %s14681_s12  ;;  %v2098_v18 = vrot.slane %v15372_v17, 1 }
 0x126   : > { %v2096_v32 = vrot.slane %v1998_v12, 1  ;;  %v2305_v20 = vrot.slane %v1998_v12, 2  ;;  %v1278_v30 = vadd.f32 %v1277_v15, %v15283_v36  ;;  %v13668_v23 = vpop.f32.mrf.mxu0  ;;  %v2001_v25 = vadd.f32 %v13665_v10, %v1283_v21 }
 0x127   : > { %v13594_v22 = vpop.f32.mrf.mxu1 }
 0x128   : > { %v15375_v3 = vadd.f32 %v1777_v7, %v1278_v30  ;;  %v2306_v9 = vsel %vm2301_vm4, %v2303_v28, %v2305_v20  ;;  %v2097_v12 = vsel %vm2092_vm5, %v2094_v11, %v2096_v32  ;;  %v1787_v16 = vpop.f32.mrf.mxu0  ;;  %v2307_v7 = vrot.slane %v15372_v17, 2 }
 0x129   : > { %v1287_v24 = vpop.f32.mrf.mxu1  ;;  %2384 = vrot.lane.b32.xlu1 %v2306_v9, %s14680_s30  ;;  %2175 = vrot.lane.b32.xlu0 %v2097_v12, %s14681_s12  ;;  %v1293_v26 = vadd.f32 %v13594_v22, %v15287_v38  ;;  %v2101_v30 = vrot.slane %v2001_v25, 1  ;;  %v2310_v10 = vrot.slane %v2001_v25, 2 }
 0x12a   : > { %v1288_v13 = vadd.f32 %v1287_v24, %v15291_v40  ;;  %v2308_v36 = vrot.slane %v15375_v3, 2  ;;  %v2099_v34 = vrot.slane %v15375_v3, 1  ;;  %v13671_v11 = vpop.f32.mrf.mxu0 }
 0x12b   : > { %v13597_v28 = vpop.f32.mrf.mxu1  ;;  %v15394_v21 = vadd.f32 %v13668_v23, %v1293_v26 }
 0x12c   : > { %v15387_v14 = vadd.f32 %v1787_v16, %v1288_v13  ;;  %v2309_v9 = vsel %vm2301_vm4, %v2307_v7, %v2308_v36  ;;  %v2100_v15 = vsel %vm2092_vm5, %v2098_v18, %v2099_v34  ;;  %v1797_v32 = vpop.f32.mrf.mxu0  ;;  %v2311_v12 = vsel %vm2301_vm4, %v2308_v36, %v2310_v10 }
 0x12d   : > { %v1297_v40 = vpop.f32.mrf.mxu1  ;;  %2386 = vrot.lane.b32.xlu1 %v2309_v9, %s14680_s30  ;;  %2177 = vrot.lane.b32.xlu0 %v2100_v15, %s14681_s12  ;;  %v2102_v13 = vsel %vm2092_vm5, %v2099_v34, %v2101_v30  ;;  %v2104_v23 = vrot.slane %v15394_v21, 1  ;;  %v1303_v25 = vadd.f32 %v13597_v28, %v15295_v42  ;;  %v2313_v10 = vrot.slane %v15394_v21, 2 }
 0x12e   : > { %v1298_v20 = vadd.f32 %v1297_v40, %v15299_v44  ;;  %v13674_v22 = vpop.f32.mrf.mxu0  ;;  %v2103_v7 = vrot.slane %v15387_v14, 1  ;;  %v2312_v36 = vrot.slane %v15387_v14, 2 }
 0x12f   : > { %v13600_v38 = vpop.f32.mrf.mxu1  ;;  %v15413_v42 = vadd.f32 %v13671_v11, %v1303_v25 }
 0x130   : > { %v2004_v16 = vadd.f32 %v1797_v32, %v1298_v20  ;;  %v1807_v18 = vpop.f32.mrf.mxu0 }
 0x131   : > { %v1307_v24 = vpop.f32.mrf.mxu1  ;;  %2388 = vrot.lane.b32.xlu1 %v2311_v12, %s14680_s30  ;;  %2179 = vrot.lane.b32.xlu0 %v2102_v13, %s14681_s12  ;;  %v2314_v12 = vsel %vm2301_vm4, %v2312_v36, %v2313_v10  ;;  %v2108_v11 = vrot.slane %v15413_v42, 1  ;;  %v2317_v25 = vrot.slane %v15413_v42, 2 }
 0x132   : > { %v2106_v44 = vrot.slane %v2004_v16, 1  ;;  %v1308_v40 = vadd.f32 %v1307_v24, %v15307_v48  ;;  %v13677_v9 = vpop.f32.mrf.mxu0  ;;  %v2315_v15 = vrot.slane %v2004_v16, 2  ;;  %v2105_v48 = vsel %vm2092_vm5, %v2103_v7, %v2104_v23 }
 0x133   : > { %v13603_v26 = vpop.f32.mrf.mxu1  ;;  %v1313_v24 = vadd.f32 %v13600_v38, %v15303_v46 }
 0x134   : > { %v15405_v34 = vadd.f32 %v1807_v18, %v1308_v40  ;;  %v2107_v20 = vsel %vm2092_vm5, %v2104_v23, %v2106_v44  ;;  %v1817_v30 = vpop.f32.mrf.mxu0  ;;  %v2316_v7 = vsel %vm2301_vm4, %v2313_v10, %v2315_v15 }
 0x135   : > { %v1317_v32 = vpop.f32.mrf.mxu1  ;;  %2183 = vrot.lane.b32.xlu1 %v2107_v20, %s14681_s12  ;;  %2181 = vrot.lane.b32.xlu0 %v2105_v48, %s14681_s12  ;;  %v2007_v38 = vadd.f32 %v13674_v22, %v1313_v24 }
 0x136   : > { %v13680_v16 = vpop.f32.mrf.mxu0  ;;  %v1318_v13 = vadd.f32 %v1317_v32, %v15315_v52  ;;  %v2318_v40 = vrot.slane %v15405_v34, 2  ;;  %v2109_v46 = vrot.slane %v15405_v34, 1  ;;  %v1323_v52 = vadd.f32 %v13603_v26, %v15311_v50 }
 0x137   : > { %v13606_v28 = vpop.f32.mrf.mxu1  ;;  %v2320_v24 = vrot.slane %v2007_v38, 2 }
 0x138   : > { %v1827_v44 = vpop.f32.mrf.mxu0  ;;  %v15426_v32 = vadd.f32 %v1817_v30, %v1318_v13  ;;  %v2319_v22 = vsel %vm2301_vm4, %v2317_v25, %v2318_v40 }
 0x139   : > { %v1327_v18 = vpop.f32.mrf.mxu1  ;;  %2392 = vrot.lane.b32.xlu1 %v2316_v7, %s14680_s30  ;;  %2390 = vrot.lane.b32.xlu0 %v2314_v12, %s14680_s30  ;;  %v2111_v12 = vrot.slane %v2007_v38, 1  ;;  %v2321_v30 = vsel %vm2301_vm4, %v2318_v40, %v2320_v24  ;;  %v1333_v38 = vadd.f32 %v13606_v28, %v15319_v54 }
 0x13a   : > { %v1328_v23 = vadd.f32 %v1327_v18, %v15323_v56  ;;  %v13683_v15 = vpop.f32.mrf.mxu0  ;;  %20105 = vst [vmem:[#allocation7_spill] sm:$0xff] %v15426_v32  ;;  %v2110_v56 = vsel %vm2092_vm5, %v2108_v11, %v2109_v46  ;;  %v15432_v18 = vadd.f32 %v13677_v9, %v1323_v52  ;;  %v2113_v25 = vrot.slane %v15426_v32, 1 }
 0x13b   : > { %v13609_v36 = vpop.f32.mrf.mxu1  ;;  %v15453_v54 = vadd.f32 %v13680_v16, %v1333_v38 }
 0x13c   : > { %v2010_v20 = vadd.f32 %v1827_v44, %v1328_v23  ;;  %v1837_v10 = vpop.f32.mrf.mxu0  ;;  %v2112_v23 = vsel %vm2092_vm5, %v2109_v46, %v2111_v12  ;;  %v2114_v9 = vrot.slane %v15432_v18, 1 }
 0x13d   : > { %v1337_v48 = vpop.f32.mrf.mxu1  ;;  %2394 = vrot.lane.b32.xlu1 %v2319_v22, %s14680_s30  ;;  %2185 = vrot.lane.b32.xlu0 %v2110_v56, %s14681_s12  ;;  %v2118_v16 = vrot.slane %v15453_v54, 1  ;;  %v2327_v38 = vrot.slane %v15453_v54, 2 }
 0x13e   : > { %v13686_v26 = vpop.f32.mrf.mxu0  ;;  %v2116_v13 = vrot.slane %v2010_v20, 1  ;;  %v1338_v7 = vadd.f32 %v1337_v48, %v15331_v60  ;;  %v2325_v40 = vrot.slane %v2010_v20, 2  ;;  %v2322_v60 = vrot.slane %v15426_v32, 2 }
 0x13f   : > { %v13612_v50 = vpop.f32.mrf.mxu1  ;;  %v2115_v24 = vsel %vm2092_vm5, %v2113_v25, %v2114_v9 }
 0x140   : > { %v1847_v11 = vpop.f32.mrf.mxu0  ;;  %v15445_v48 = vadd.f32 %v1837_v10, %v1338_v7  ;;  %v2117_v56 = vsel %vm2092_vm5, %v2114_v9, %v2116_v13 }
 0x141   : > { %v1347_v44 = vpop.f32.mrf.mxu1  ;;  %2396 = vrot.lane.b32.xlu1 %v2321_v30, %s14680_s30  ;;  %2187 = vrot.lane.b32.xlu0 %v2112_v23, %s14681_s12  ;;  %v2323_v30 = vrot.slane %v15432_v18, 2  ;;  %v1343_v23 = vadd.f32 %v13609_v36, %v15327_v58 }
 0x142   : > { %v15442_v22 = vpop.f32.mrf.mxu0  ;;  %20106 = vst [vmem:[#allocation8_spill] sm:$0xff] %v15445_v48  ;;  %v1348_v7 = vadd.f32 %v1347_v44, %v15339_v0  ;;  %v2328_v58 = vrot.slane %v15445_v48, 2  ;;  %v2119_v36 = vrot.slane %v15445_v48, 1 }
 0x143   : > { %v13615_v52 = vpop.f32.mrf.mxu1  ;;  %v2326_v10 = vsel %vm2301_vm4, %v2323_v30, %v2325_v40  ;;  %v2324_v13 = vsel %vm2301_vm4, %v2322_v60, %v2323_v30  ;;  %v1353_v40 = vadd.f32 %v13612_v50, %v15335_v62 }
 0x144   : > { %v1857_v12 = vpop.f32.mrf.mxu0 }
 0x145   : > { %v1357_v46 = vpop.f32.mrf.mxu1  ;;  %2191 = vrot.lane.b32.xlu1 %v2117_v56, %s14681_s12  ;;  %2189 = vrot.lane.b32.xlu0 %v2115_v24, %s14681_s12  ;;  %v2013_v56 = vadd.f32 %v13683_v15, %v1343_v23  ;;  %v2329_v24 = vsel %vm2301_vm4, %v2327_v38, %v2328_v58  ;;  %v2120_v15 = vsel %vm2092_vm5, %v2118_v16, %v2119_v36 }
 0x146   : > { %v15455_v20 = vpop.f32.mrf.mxu0  ;;  %v1358_v25 = vadd.f32 %v1357_v46, %v15347_v4  ;;  %v15470_v4 = vadd.f32 %v1847_v11, %v1348_v7 }
 0x147   : > { %v13618_v28 = vpop.f32.mrf.mxu1  ;;  %v2330_v23 = vrot.slane %v2013_v56, 2 }
 0x148   : > { %v1867_v32 = vpop.f32.mrf.mxu0  ;;  %v2016_v60 = vadd.f32 %v1857_v12, %v1358_v25  ;;  %v1373_v48 = vadd.f32 %v13618_v28, %v15351_v6 }
 0x149   : > { %v1367_v9 = vpop.f32.mrf.mxu1  ;;  %2400 = vrot.lane.b32.xlu1 %v2326_v10, %s14680_s30  ;;  %2398 = vrot.lane.b32.xlu0 %v2324_v13, %s14680_s30  ;;  %v2121_v10 = vrot.slane %v2013_v56, 1  ;;  %v15476_v13 = vadd.f32 %v13686_v26, %v1353_v40  ;;  %v2331_v11 = vsel %vm2301_vm4, %v2328_v58, %v2330_v23  ;;  %v1363_v56 = vadd.f32 %v13615_v52, %v15343_v2 }
 0x14a   : > { %v15468_v44 = vpop.f32.mrf.mxu0  ;;  %v2126_v12 = vrot.slane %v2016_v60, 1  ;;  %v1368_v7 = vadd.f32 %v1367_v9, %v15355_v8  ;;  %v2332_v8 = vrot.slane %v15470_v4, 2 }
 0x14b   : > { %v13621_v0 = vpop.f32.mrf.mxu1  ;;  %v2122_v16 = vsel %vm2092_vm5, %v2119_v36, %v2121_v10  ;;  %v2124_v26 = vrot.slane %v15476_v13, 1  ;;  %v15504_v2 = vadd.f32 %v15442_v22, %v1363_v56  ;;  %v2019_v22 = vadd.f32 %v15455_v20, %v1373_v48 }
 0x14c   : > { %v1877_v30 = vpop.f32.mrf.mxu0  ;;  %v15495_v9 = vadd.f32 %v1867_v32, %v1368_v7 }
 0x14d   : > { %v1377_v46 = vpop.f32.mrf.mxu1  ;;  %2402 = vrot.lane.b32.xlu1 %v2329_v24, %s14680_s30  ;;  %2193 = vrot.lane.b32.xlu0 %v2120_v15, %s14681_s12  ;;  %v2123_v24 = vrot.slane %v15470_v4, 1  ;;  %v2335_v15 = vrot.slane %v2016_v60, 2  ;;  %v2127_v23 = vsel %vm2092_vm5, %v2124_v26, %v2126_v12  ;;  %v2128_v56 = vrot.slane %v15504_v2, 1 }
 0x14e   : > { %v15480_v50 = vpop.f32.mrf.mxu0  ;;  %20107 = vst [vmem:[#allocation9_spill] sm:$0xff] %v15495_v9  ;;  %v1378_v7 = vadd.f32 %v1377_v46, %v15273_v29  ;;  %v1383_v29 = vadd.f32 %v13621_v0, %v15271_v27 }
 0x14f   : > { %v15478_v62 = vpop.f32.mrf.mxu1  ;;  %v2125_v10 = vsel %vm2092_vm5, %v2123_v24, %v2124_v26  ;;  %v2338_v26 = vrot.slane %v15495_v9, 2 }
 0x150   : > { %v1887_v38 = vpop.f32.mrf.mxu0  ;;  %v15533_v27 = vadd.f32 %v15468_v44, %v1383_v29  ;;  %v1393_v29 = vadd.f32 %v15478_v62, %v15275_v31 }
 0x151   : > { %v1387_v25 = vpop.f32.mrf.mxu1  ;;  %2404 = vrot.lane.b32.xlu1 %v2331_v11, %s14680_s30  ;;  %2195 = vrot.lane.b32.xlu0 %v2122_v16, %s14681_s12  ;;  %v2333_v16 = vrot.slane %v15476_v13, 2 }
 0x152   : > { %v15492_v58 = vpop.f32.mrf.mxu0  ;;  %v1388_v24 = vadd.f32 %v1387_v25, %v15277_v33  ;;  %v15526_v25 = vadd.f32 %v1877_v30, %v1378_v7  ;;  %v15561_v31 = vadd.f32 %v15480_v50, %v1393_v29 }
 0x153   : > { %v15490_v40 = vpop.f32.mrf.mxu1  ;;  %v2336_v60 = vsel %vm2301_vm4, %v2333_v16, %v2335_v15  ;;  %v2334_v12 = vsel %vm2301_vm4, %v2332_v8, %v2333_v16  ;;  %v2337_v15 = vrot.slane %v15504_v2, 2 }
 0x154   : > { %v1897_v11 = vpop.f32.mrf.mxu0  ;;  %v2022_v8 = vadd.f32 %v1887_v38, %v1388_v24  ;;  %v2138_v50 = vrot.slane %v15561_v31, 1  ;;  %v2347_v29 = vrot.slane %v15561_v31, 2 }
 0x155   : > { %v1397_v36 = vpop.f32.mrf.mxu1  ;;  %2199 = vrot.lane.b32.xlu1 %v2127_v23, %s14681_s12  ;;  %2197 = vrot.lane.b32.xlu0 %v2125_v10, %s14681_s12  ;;  %v2129_v23 = vrot.slane %v15495_v9, 1  ;;  %v2339_v48 = vsel %vm2301_vm4, %v2337_v15, %v2338_v26 }
 0x156   : > { %v15508_v32 = vpop.f32.mrf.mxu0  ;;  %v2136_v7 = vrot.slane %v2022_v8, 1  ;;  %v1398_v24 = vadd.f32 %v1397_v36, %v15285_v37 }
 0x157   : > { %v15506_v52 = vpop.f32.mrf.mxu1  ;;  %v2130_v20 = vsel %vm2092_vm5, %v2128_v56, %v2129_v23 }
 0x158   : > { %v1907_v28 = vpop.f32.mrf.mxu0  ;;  %v15549_v37 = vadd.f32 %v1897_v11, %v1398_v24 }
 0x159   : > { %v1407_v6 = vpop.f32.mrf.mxu1  ;;  %2408 = vrot.lane.b32.xlu1 %v2336_v60, %s14680_s30  ;;  %2406 = vrot.lane.b32.xlu0 %v2334_v12, %s14680_s30  ;;  %v2340_v60 = vrot.slane %v2019_v22, 2  ;;  %v2131_v12 = vrot.slane %v2019_v22, 1  ;;  %v2134_v22 = vrot.slane %v15533_v27, 1 }
 0x15a   : > { %v15524_v33 = vpop.f32.mrf.mxu0 }
 0x15b   : > { %v15522_v46 = vpop.f32.mrf.mxu1  ;;  %v2341_v38 = vsel %vm2301_vm4, %v2338_v26, %v2340_v60  ;;  %v2132_v15 = vsel %vm2092_vm5, %v2129_v23, %v2131_v12  ;;  %v2345_v26 = vrot.slane %v2022_v8, 2  ;;  %v2342_v60 = vrot.slane %v15526_v25, 2 }
 0x15c   : > { %v1917_v16 = vpop.f32.mrf.mxu0  ;;  %v2137_v36 = vsel %vm2092_vm5, %v2134_v22, %v2136_v7  ;;  %v2343_v12 = vrot.slane %v15533_v27, 2  ;;  %v1408_v8 = vadd.f32 %v1407_v6, %v15293_v41  ;;  %v1413_v41 = vadd.f32 %v15506_v52, %v15289_v39 }
 0x15d   : > { %v1417_v10 = vpop.f32.mrf.mxu1  ;;  %2410 = vrot.lane.b32.xlu1 %v2339_v48, %s14680_s30  ;;  %2201 = vrot.lane.b32.xlu0 %v2130_v20, %s14681_s12  ;;  %v2133_v48 = vrot.slane %v15526_v25, 1 }
 0x15e   : > { %v15537_v30 = vpop.f32.mrf.mxu0  ;;  %v2346_v62 = vsel %vm2301_vm4, %v2343_v12, %v2345_v26  ;;  %v2344_v11 = vsel %vm2301_vm4, %v2342_v60, %v2343_v12  ;;  %v1418_v7 = vadd.f32 %v1417_v10, %v15301_v45  ;;  %v15578_v45 = vadd.f32 %v1907_v28, %v1408_v8 }
 0x15f   : > { %v15535_v0 = vpop.f32.mrf.mxu1  ;;  %v2135_v23 = vsel %vm2092_vm5, %v2133_v48, %v2134_v22  ;;  %v15587_v12 = vadd.f32 %v15508_v32, %v1413_v41  ;;  %v1423_v32 = vadd.f32 %v15522_v46, %v15297_v43 }
 0x160   : > { %v1927_v44 = vpop.f32.mrf.mxu0  ;;  %v2028_v6 = vadd.f32 %v1917_v16, %v1418_v7  ;;  %v1433_v46 = vadd.f32 %v15535_v0, %v15305_v47 }
 0x161   : > { %v1427_v56 = vpop.f32.mrf.mxu1  ;;  %2412 = vrot.lane.b32.xlu1 %v2341_v38, %s14680_s30  ;;  %2203 = vrot.lane.b32.xlu0 %v2132_v15, %s14681_s12  ;;  %v1403_v38 = vadd.f32 %v15490_v40, %v15281_v35  ;;  %v2348_v35 = vrot.slane %v15549_v37, 2  ;;  %v2139_v40 = vrot.slane %v15549_v37, 1  ;;  %v2144_v8 = vrot.slane %v15587_v12, 1 }
 0x162   : > { %v15556_v9 = vpop.f32.mrf.mxu0  ;;  %v2146_v52 = vrot.slane %v2028_v6, 1  ;;  %v1428_v28 = vadd.f32 %v1427_v56, %v15309_v49  ;;  %v2355_v7 = vrot.slane %v2028_v6, 2  ;;  %v15612_v43 = vadd.f32 %v15524_v33, %v1423_v32 }
 0x163   : > { %v13639_v20 = vpop.f32.mrf.mxu1  ;;  %v2025_v24 = vadd.f32 %v15492_v58, %v1403_v38  ;;  %v2349_v10 = vsel %vm2301_vm4, %v2347_v29, %v2348_v35  ;;  %v2140_v58 = vsel %vm2092_vm5, %v2138_v50, %v2139_v40  ;;  %v2143_v38 = vrot.slane %v15578_v45, 1 }
 0x164   : > { %v1937_v22 = vpop.f32.mrf.mxu0  ;;  %v15601_v49 = vadd.f32 %v1927_v44, %v1428_v28  ;;  %v2353_v50 = vrot.slane %v15587_v12, 2  ;;  %v2148_v47 = vrot.slane %v15612_v43, 1  ;;  %v2031_v0 = vadd.f32 %v15537_v30, %v1433_v46 }
 0x165   : > { %v1437_v15 = vpop.f32.mrf.mxu1  ;;  %2207 = vrot.lane.b32.xlu1 %v2137_v36, %s14681_s12  ;;  %2205 = vrot.lane.b32.xlu0 %v2135_v23, %s14681_s12  ;;  %v2350_v26 = vrot.slane %v2025_v24, 2  ;;  %v2141_v23 = vrot.slane %v2025_v24, 1  ;;  %v2145_v24 = vsel %vm2092_vm5, %v2143_v38, %v2144_v8 }
 0x166   : > { %v15582_v36 = vpop.f32.mrf.mxu0  ;;  %v1438_v56 = vadd.f32 %v1437_v15, %v15317_v53  ;;  %v1443_v53 = vadd.f32 %v13639_v20, %v15313_v51  ;;  %v2356_v44 = vsel %vm2301_vm4, %v2353_v50, %v2355_v7  ;;  %v2357_v51 = vrot.slane %v15612_v43, 2 }
 0x167   : > { %v15570_v48 = vpop.f32.mrf.mxu1  ;;  %v2351_v39 = vsel %vm2301_vm4, %v2348_v35, %v2350_v26  ;;  %v2142_v16 = vsel %vm2092_vm5, %v2139_v40, %v2141_v23  ;;  %v2352_v35 = vrot.slane %v15578_v45, 2  ;;  %v2147_v40 = vsel %vm2092_vm5, %v2144_v8, %v2146_v52 }
 0x168   : > { %v15619_v6 = vadd.f32 %v1937_v22, %v1438_v56  ;;  %v2149_v26 = vrot.slane %v15601_v49, 1  ;;  %v15630_v20 = vadd.f32 %v15556_v9, %v1443_v53  ;;  %v12145_v9 = vld [vmem:[%s20084_s3 + $0x18] sm:$0xf]  ;;  %v2360_v56 = vrot.slane %v2031_v0, 2 }
 0x169   : > { %2416 = vrot.lane.b32.xlu1 %v2346_v62, %s14680_s30  ;;  %2414 = vrot.lane.b32.xlu0 %v2344_v11, %s14680_s30  ;;  %v1447_v60 = vpop.f32.mrf.mxu1  ;;  %v1947_v11 = vpop.f32.mrf.mxu0  ;;  %v2354_v15 = vsel %vm2301_vm4, %v2352_v35, %v2353_v50 }
 0x16a   : > { %v2154_v38 = vrot.slane %v15630_v20, 1  ;;  %13729 = vmatprep.subr.msk.mxu1 %vm3052_vm6, %v12145_v9 }
 0x16b   : > { %v15593_v62 = vpop.f32.mrf.mxu1  ;;  %v15607_v41 = vpop.f32.mrf.mxu0  ;;  %13730 = vmatpush3.msk.msra.mxu1 %vm3052_vm6, %v12145_v9 }
 0x16d   : > { %2418 = vrot.lane.b32.xlu1 %v2349_v10, %s14680_s30  ;;  %2209 = vrot.lane.b32.xlu0 %v2140_v58, %s14681_s12  ;;  %v1457_v29 = vpop.f32.mrf.mxu1  ;;  %v1448_v10 = vadd.f32 %v1447_v60, %v15325_v57  ;;  %v2358_v58 = vrot.slane %v15601_v49, 2  ;;  %v1957_v33 = vpop.f32.mrf.mxu0  ;;  %v2150_v60 = vsel %vm2092_vm5, %v2148_v47, %v2149_v26 }
 0x16f   : > { %v13648_v23 = vpop.f32.mrf.mxu1  ;;  %v2034_v57 = vadd.f32 %v1947_v11, %v1448_v10  ;;  %v2359_v22 = vsel %vm2301_vm4, %v2357_v51, %v2358_v58  ;;  %v13722_v28 = vpop.f32.mrf.mxu0  ;;  %v1458_v11 = vadd.f32 %v1457_v29, %v15333_v61  ;;  %v2362_v61 = vrot.slane %v15619_v6, 2 }
 0x170   : > { %v2361_v46 = vsel %vm2301_vm4, %v2358_v58, %v2360_v56 }
 0x171   : > { %2420 = vrot.lane.b32.xlu1 %v2351_v39, %s14680_s30  ;;  %2211 = vrot.lane.b32.xlu0 %v2142_v16, %s14681_s12  ;;  %v2153_v39 = vrot.slane %v15619_v6, 1  ;;  %v1467_v52 = vpop.f32.mrf.mxu1  ;;  %v2151_v16 = vrot.slane %v2031_v0, 1  ;;  %v2156_v30 = vrot.slane %v2034_v57, 1  ;;  %v1967_v35 = vpop.f32.mrf.mxu0  ;;  %v15653_v50 = vadd.f32 %v1957_v33, %v1458_v11 }
 0x172   : > { %v1468_v29 = vadd.f32 %v1467_v52, %v15341_v1  ;;  %v1473_v1 = vadd.f32 %v13648_v23, %v15337_v63 }
 0x173   : > { %v2152_v8 = vsel %vm2092_vm5, %v2149_v26, %v2151_v16  ;;  %v2155_v32 = vsel %vm2092_vm5, %v2153_v39, %v2154_v38  ;;  %v15646_v7 = vpop.f32.mrf.mxu1  ;;  %v2157_v53 = vsel %vm2092_vm5, %v2154_v38, %v2156_v30  ;;  %v15659_v10 = vpop.f32.mrf.mxu0  ;;  %v2368_v51 = vrot.slane %v15653_v50, 2 }
 0x174   : > { %v15671_v33 = vadd.f32 %v1967_v35, %v1468_v29  ;;  %v2159_v0 = vrot.slane %v15653_v50, 1  ;;  %v2854_v35 = vld [vmem:[%s20084_s3] sm:$0xff] }
 0x175   : > { %2215 = vrot.lane.b32.xlu1 %v2147_v40, %s14681_s12  ;;  %2213 = vrot.lane.b32.xlu0 %v2145_v24, %s14681_s12  ;;  %v1453_v40 = vadd.f32 %v15570_v48, %v15321_v55  ;;  %v2365_v24 = vrot.slane %v2034_v57, 2  ;;  %v1463_v48 = vadd.f32 %v15593_v62, %v15329_v59  ;;  %v1977_v57 = vpop.f32.mrf.mxu0  ;;  %v15681_v62 = vadd.f32 %v13722_v28, %v1473_v1 }
 0x176   : > { %v2372_v11 = vrot.slane %v15671_v33, 2 }
 0x177   : > { %v15664_v55 = vadd.f32 %v15582_v36, %v1453_v40  ;;  %v2037_v36 = vadd.f32 %v15607_v41, %v1463_v48  ;;  %v2164_v52 = vrot.slane %v15681_v62, 1  ;;  %v2373_v56 = vrot.slane %v15681_v62, 2 }
 0x179   : > { %2424 = vrot.lane.b32.xlu1 %v2356_v44, %s14680_s30  ;;  %2422 = vrot.lane.b32.xlu0 %v2354_v15, %s14680_s30  ;;  %v2363_v44 = vrot.slane %v15630_v20, 2  ;;  %v1477_v15 = vpop.f32.mrf.mxu1  ;;  %v2158_v59 = vrot.slane %v15664_v55, 1  ;;  %v2367_v63 = vrot.slane %v15664_v55, 2  ;;  %v2161_v39 = vrot.slane %v2037_v36, 1 }
 0x17a   : > { %v1478_v47 = vadd.f32 %v1477_v15, %v15349_v5  ;;  %v2370_v38 = vrot.slane %v2037_v36, 2  ;;  %v2374_v29 = vsel %vm2301_vm4, %v2372_v11, %v2373_v56 }
 0x17b   : > { %v2364_v58 = vsel %vm2301_vm4, %v2362_v61, %v2363_v44  ;;  %v2366_v26 = vsel %vm2301_vm4, %v2363_v44, %v2365_v24  ;;  %v2369_v5 = vsel %vm2301_vm4, %v2367_v63, %v2368_v51  ;;  %v2162_v41 = vsel %vm2092_vm5, %v2159_v0, %v2161_v39  ;;  %v15716_v44 = vld [vmem:[%s20083_s2] ss:$0 sm:$0xff]  ;;  %v15730_v39 = vpop.f32.mrf.mxu0 }
 0x17c   : > { %v15683_v23 = vadd.f32 %v1977_v57, %v1478_v47  ;;  %v2371_v9 = vsel %vm2301_vm4, %v2368_v51, %v2370_v38  ;;  %v15723_v47 = vpop.f32.mrf.mxu1  ;;  %v12144_v57 = vld [vmem:[%s20084_s3 + $0x10] sm:$0xff] }
 0x17d   : > { %2426 = vrot.lane.b32.xlu1 %v2359_v22, %s14680_s30  ;;  %2217 = vrot.lane.b32.xlu0 %v2150_v60, %s14681_s12  ;;  %v2160_v22 = vsel %vm2092_vm5, %v2158_v59, %v2159_v0  ;;  %v2163_v60 = vrot.slane %v15671_v33, 1 }
 0x17e   : > { %v2166_v16 = vrot.slane %v15683_v23, 1  ;;  %13731 = vmatprep.subr.mxu1 %v12144_v57 }
 0x17f   : > { %v2165_v28 = vsel %vm2092_vm5, %v2163_v60, %v2164_v52  ;;  %13732 = vmatpush3.msra.mxu1 %v12144_v57  ;;  %v1487_v60 = vpop.f32.mrf.mxu1 }
 0x180   : > { %v2167_v30 = vsel %vm2092_vm5, %v2164_v52, %v2166_v16 }
 0x181   : > { %2219 = vrot.lane.b32.xlu1 %v2152_v8, %s14681_s12  ;;  %2221 = vrot.lane.b32.xlu0 %v2155_v32, %s14681_s12  ;;  %v2855_v8 = vld [vmem:[%s20084_s3 + $0x8] sm:$0xf]  ;;  %v2806_v32 = vld [vmem:[#allocation2] sm:$0xff] }
 0x182   : > { %13805 = vmatprep.subr.msk.mxu0 %vm3052_vm6, %v2855_v8  ;;  %13809 = vmatprep.mubr.msk.f32.mxu0 %vm2907_vm7, %v2806_v32  ;;  %v20110_v32 = vld [vmem:[#allocation3_spill] sm:$0xff] }
 0x183   : > { %13806 = vmatpush3.msk.msra.mxu0 %vm3052_vm6, %v2855_v8 }
 0x184   : > { %13807 = vmatprep.subr.mxu0 %v2854_v35 }
 0x185   : > { %2428 = vrot.lane.b32.xlu1 %v2361_v46, %s14680_s30  ;;  %2223 = vrot.lane.b32.xlu0 %v2157_v53, %s14681_s12  ;;  %v2807_v46 = vld [vmem:[#allocation2 + $0x8] sm:$0xff]  ;;  %v2808_v53 = vld [vmem:[#allocation2 + $0x10] sm:$0xff] }
 0x186   : > { %13808 = vmatpush3.msra.mxu0 %v2854_v35  ;;  %v1483_v35 = vadd.f32 %v15646_v7, %v20110_v32 }
 0x187   : > { %13810 = vmatmul.mubr.msk.f32.vlgmr.msra.gmra.mxu0 %vm2907_vm7, %v2807_v46 }
 0x188   : > { %13812 = vmatprep.mubr.msk.f32.mxu0 %vm2907_vm7, %v2808_v53 }
 0x189   : > { %2430 = vrot.lane.b32.xlu1 %v2364_v58, %s14680_s30  ;;  %2432 = vrot.lane.b32.xlu0 %v2366_v26, %s14680_s30  ;;  %v20108_v58 = vld [vmem:[#allocation6_spill] sm:$0xff] }
 0x18d   : > { %2434 = vrot.lane.b32.xlu1 %v2369_v5, %s14680_s30  ;;  %2225 = vrot.lane.b32.xlu0 %v2160_v22, %s14681_s12 }
 0x191   : > { %2227 = vrot.lane.b32.xlu1 %v2162_v41, %s14681_s12  ;;  %2229 = vrot.lane.b32.xlu0 %v2165_v28, %s14681_s12  ;;  %v2375_v41 = vrot.slane %v15683_v23, 2 }
 0x195   : > { %2436 = vrot.lane.b32.xlu1 %v2371_v9, %s14680_s30  ;;  %2231 = vrot.lane.b32.xlu0 %v2167_v30, %s14681_s12  ;;  %v20109_v9 = vld [vmem:[#allocation5_spill] sm:$0xff] }
 0x196   : > { %v1488_v30 = vadd.f32 %v1487_v60, %v20109_v9  ;;  %v20111_v9 = vld [vmem:[#allocation4_spill] sm:$0xff] }
 0x197   : > { %v2383_v40 = vpop.permute.xlu1 %2382  ;;  %v2174_v24 = vpop.permute.xlu0 %2173 }
 0x198   : > { %v2269_v61 = vadd.f32 %v2174_v24, %v15361_v19 }
 0x199   : > { %2438 = vrot.lane.b32.xlu1 %v2374_v29, %s14680_s30 }
 0x19a   : > { %v2478_v15 = vadd.f32 %v2383_v40, %v2269_v61  ;;  %v1987_v40 = vpop.f32.mrf.mxu0 }
 0x19b   : > { %v2385_v48 = vpop.permute.xlu1 %2384  ;;  %v2176_v1 = vpop.permute.xlu0 %2175  ;;  %v15740_v46 = vadd.f32 %v1987_v40, %v1488_v30  ;;  %v1493_v30 = vadd.f32 %v15723_v47, %v20111_v9 }
 0x19c   : > { %v2517_v19 = vadd.f32 %v15716_v44, %v2478_v15  ;;  %v2270_v26 = vadd.f32 %v2176_v1, %v20108_v58  ;;  %v2376_v15 = vsel %vm2301_vm4, %v2373_v56, %v2375_v41 }
 0x19d   : > { %v2378_v56 = vrot.slane %v15740_v46, 2 }
 0x19e   : > { %v2479_v51 = vadd.f32 %v2385_v48, %v2270_v26  ;;  %vm2549_vm8 = vcmp.ge.f32.partialorder %v2517_v19, 0.0  ;;  %v2581_v0 = vmul.f32 0.2, %v2517_v19 }
 0x19f   : > { %v2387_v59 = vpop.permute.xlu1 %2386  ;;  %v2178_v63 = vpop.permute.xlu0 %2177 }
 0x1a0   : > { %v2518_v36 = vadd.f32 %v15716_v44, %v2479_v51  ;;  %v2271_v5 = vadd.f32 %v2178_v63, %v15372_v17  ;;  %v2613_v22 = vsel %vm2549_vm8, %v2517_v19, %v2581_v0 }
 0x1a1   : > { %2677 = vrot.lane.b32.xlu0 %v2613_v22, %s14682_s25 }
 0x1a2   : > { %v2480_v52 = vadd.f32 %v2387_v59, %v2271_v5  ;;  %vm2550_vm9 = vcmp.ge.f32.partialorder %v2518_v36, 0.0  ;;  %v2582_v16 = vmul.f32 0.2, %v2518_v36 }
 0x1a3   : > { %v2389_v28 = vpop.permute.xlu1 %2388  ;;  %v2180_v38 = vpop.permute.xlu0 %2179 }
 0x1a4   : > { %v2519_v11 = vadd.f32 %v15716_v44, %v2480_v52  ;;  %v2272_v17 = vadd.f32 %v2180_v38, %v15375_v3  ;;  %v2614_v8 = vsel %vm2550_vm9, %v2518_v36, %v2582_v16  ;;  %v15745_v3 = vadd.f32 %v15659_v10, %v1483_v35 }
 0x1a5   : > { %2679 = vrot.lane.b32.xlu0 %v2614_v8, %s14682_s25 }
 0x1a6   : > { %v2481_v24 = vadd.f32 %v2389_v28, %v2272_v17  ;;  %vm2551_vm10 = vcmp.ge.f32.partialorder %v2519_v11, 0.0  ;;  %v2583_v61 = vmul.f32 0.2, %v2519_v11  ;;  %v2377_v10 = vrot.slane %v15745_v3, 2 }
 0x1a7   : > { %v2184_v29 = vpop.permute.xlu1 %2183  ;;  %v2182_v23 = vpop.permute.xlu0 %2181  ;;  %v2168_v35 = vrot.slane %v15745_v3, 1 }
 0x1a8   : > { %v2520_v53 = vadd.f32 %v15716_v44, %v2481_v24  ;;  %v2615_v48 = vsel %vm2551_vm10, %v2519_v11, %v2583_v61  ;;  %v2274_v7 = vadd.f32 %v2184_v29, %v15394_v21  ;;  %v2273_v1 = vadd.f32 %v2182_v23, %v15387_v14 }
 0x1a9   : > { %2440 = vrot.lane.b32.xlu0 %v2376_v15, %s14680_s30  ;;  %2681 = vrot.lane.b32.xlu1 %v2615_v48, %s14682_s25  ;;  %v2379_v5 = vsel %vm2301_vm4, %v2377_v10, %v2378_v56  ;;  %v2169_v11 = vrot.slane %v15740_v46, 1 }
 0x1aa   : > { %vm2552_vm11 = vcmp.ge.f32.partialorder %v2520_v53, 0.0  ;;  %v2584_v19 = vmul.f32 0.2, %v2520_v53 }
 0x1ab   : > { %v2393_v58 = vpop.permute.xlu1 %2392  ;;  %v2391_v26 = vpop.permute.xlu0 %2390  ;;  %v2170_v47 = vsel %vm2092_vm5, %v2168_v35, %v2169_v11 }
 0x1ac   : > { %v2483_v51 = vadd.f32 %v2393_v58, %v2274_v7  ;;  %v2482_v0 = vadd.f32 %v2391_v26, %v2273_v1  ;;  %v2616_v57 = vsel %vm2552_vm11, %v2520_v53, %v2584_v19  ;;  %v20112_v53 = vld [vmem:[#allocation7_spill] sm:$0xff] }
 0x1ad   : > { %2683 = vrot.lane.b32.xlu1 %v2616_v57, %s14682_s25 }
 0x1ae   : > { %v2522_v59 = vadd.f32 %v15716_v44, %v2483_v51  ;;  %v2521_v63 = vadd.f32 %v15716_v44, %v2482_v0 }
 0x1af   : > { %v2395_v21 = vpop.permute.xlu1 %2394  ;;  %v2186_v36 = vpop.permute.xlu0 %2185 }
 0x1b0   : > { %v2275_v14 = vadd.f32 %v2186_v36, %v15413_v42  ;;  %vm2553_vm12 = vcmp.ge.f32.partialorder %v2521_v63, 0.0  ;;  %v2585_v22 = vmul.f32 0.2, %v2521_v63  ;;  %v2586_v16 = vmul.f32 0.2, %v2522_v59 }
 0x1b1   : > { %2442 = vrot.lane.b32.xlu1 %v2379_v5, %s14680_s30  ;;  %vm2554_vm13 = vcmp.ge.f32.partialorder %v2522_v59, 0.0 }
 0x1b2   : > { %v2484_v60 = vadd.f32 %v2395_v21, %v2275_v14  ;;  %v2617_v52 = vsel %vm2553_vm12, %v2521_v63, %v2585_v22  ;;  %v2618_v8 = vsel %vm2554_vm13, %v2522_v59, %v2586_v16  ;;  %v20113_v16 = vld [vmem:[#allocation8_spill] sm:$0xff] }
 0x1b3   : > { %v2397_v41 = vpop.permute.xlu1 %2396  ;;  %2685 = vrot.lane.b32.xlu0 %v2617_v52, %s14682_s25  ;;  %v2188_v28 = vpop.permute.xlu0 %2187 }
 0x1b4   : > { %v2523_v38 = vadd.f32 %v15716_v44, %v2484_v60  ;;  %v2276_v42 = vadd.f32 %v2188_v28, %v15405_v34  ;;  %v2043_v34 = vadd.f32 %v15730_v39, %v1493_v30 }
 0x1b6   : > { %v2485_v17 = vadd.f32 %v2397_v41, %v2276_v42  ;;  %vm2555_vm14 = vcmp.ge.f32.partialorder %v2523_v38, 0.0  ;;  %v2587_v32 = vmul.f32 0.2, %v2523_v38  ;;  %v2171_v39 = vrot.slane %v2043_v34, 1 }
 0x1b7   : > { %v2192_v40 = vpop.permute.xlu1 %2191  ;;  %2687 = vrot.lane.b32.xlu0 %v2618_v8, %s14682_s25  ;;  %v2190_v24 = vpop.permute.xlu0 %2189  ;;  %v2380_v21 = vrot.slane %v2043_v34, 2 }
 0x1b8   : > { %v2524_v61 = vadd.f32 %v15716_v44, %v2485_v17  ;;  %v2619_v29 = vsel %vm2555_vm14, %v2523_v38, %v2587_v32  ;;  %v2278_v23 = vadd.f32 %v2192_v40, %v15432_v18  ;;  %v2277_v15 = vadd.f32 %v2190_v24, %v20112_v53 }
 0x1b9   : > { %2689 = vrot.lane.b32.xlu1 %v2619_v29, %s14682_s25  ;;  %v2172_v59 = vsel %vm2092_vm5, %v2169_v11, %v2171_v39  ;;  %v20114_v39 = vld [vmem:[#allocation9_spill] sm:$0xff] }
 0x1ba   : > { %vm2556_vm15 = vcmp.ge.f32.partialorder %v2524_v61, 0.0  ;;  %v2588_v48 = vmul.f32 0.2, %v2524_v61 }
 0x1bb   : > { %v2401_v7 = vpop.permute.xlu1 %2400  ;;  %2233 = vrot.lane.b32.xlu0 %v2170_v47, %s14681_s12  ;;  %v2399_v1 = vpop.permute.xlu0 %2398 }
 0x1bc   : > { %v2487_v19 = vadd.f32 %v2401_v7, %v2278_v23  ;;  %v2486_v58 = vadd.f32 %v2399_v1, %v2277_v15  ;;  %v2620_v26 = vsel %vm2556_vm15, %v2524_v61, %v2588_v48 }
 0x1bd   : > { %2691 = vrot.lane.b32.xlu1 %v2620_v26, %s14682_s25 }
 0x1be   : > { %v2526_v51 = vadd.f32 %v15716_v44, %v2487_v19  ;;  %v2525_v0 = vadd.f32 %v15716_v44, %v2486_v58 }
 0x1bf   : > { %v2403_v57 = vpop.permute.xlu1 %2402  ;;  %v2194_v18 = vpop.permute.xlu0 %2193 }
 0x1c0   : > { %v2279_v10 = vadd.f32 %v2194_v18, %v15453_v54  ;;  %vm2557_vm0 = vcmp.ge.f32.partialorder %v2525_v0, 0.0  ;;  %v2589_v63 = vmul.f32 0.2, %v2525_v0  ;;  %v2590_v5 = vmul.f32 0.2, %v2526_v51 }
 0x1c1   : > { %2235 = vrot.lane.b32.xlu1 %v2172_v59, %s14681_s12  ;;  %vm2558_vm1 = vcmp.ge.f32.partialorder %v2526_v51, 0.0  ;;  %v2381_v54 = vsel %vm2301_vm4, %v2378_v56, %v2380_v21 }
 0x1c2   : > { %v2488_v36 = vadd.f32 %v2403_v57, %v2279_v10  ;;  %v2621_v14 = vsel %vm2557_vm0, %v2525_v0, %v2589_v63  ;;  %v2622_v38 = vsel %vm2558_vm1, %v2526_v51, %v2590_v5 }
 0x1c3   : > { %v2405_v22 = vpop.permute.xlu1 %2404  ;;  %2693 = vrot.lane.b32.xlu0 %v2621_v14, %s14682_s25  ;;  %v2196_v60 = vpop.permute.xlu0 %2195 }
 0x1c4   : > { %v2527_v52 = vadd.f32 %v15716_v44, %v2488_v36  ;;  %v2280_v41 = vadd.f32 %v2196_v60, %v20113_v16 }
 0x1c5   : > { %2444 = vrot.lane.b32.xlu1 %v2381_v54, %s14680_s30 }
 0x1c6   : > { %v2489_v28 = vadd.f32 %v2405_v22, %v2280_v41  ;;  %v2591_v42 = vmul.f32 0.2, %v2527_v52  ;;  %vm2559_vm8 = vcmp.ge.f32.partialorder %v2527_v52, 0.0 }
 0x1c7   : > { %v2200_v9 = vpop.permute.xlu1 %2199  ;;  %2695 = vrot.lane.b32.xlu0 %v2622_v38, %s14682_s25  ;;  %v2198_v30 = vpop.permute.xlu0 %2197 }
 0x1c8   : > { %v2528_v11 = vadd.f32 %v15716_v44, %v2489_v28  ;;  %v2282_v17 = vadd.f32 %v2200_v9, %v15476_v13  ;;  %v2281_v8 = vadd.f32 %v2198_v30, %v15470_v4  ;;  %v2623_v32 = vsel %vm2559_vm8, %v2527_v52, %v2591_v42 }
 0x1ca   : > { %vm2560_vm9 = vcmp.ge.f32.partialorder %v2528_v11, 0.0  ;;  %v2592_v35 = vmul.f32 0.2, %v2528_v11 }
 0x1cb   : > { %v2409_v56 = vpop.permute.xlu1 %2408  ;;  %2697 = vrot.lane.b32.xlu0 %v2623_v32, %s14682_s25  ;;  %v2407_v40 = vpop.permute.xlu0 %2406 }
 0x1cc   : > { %v2491_v24 = vadd.f32 %v2409_v56, %v2282_v17  ;;  %v2490_v61 = vadd.f32 %v2407_v40, %v2281_v8  ;;  %v2624_v29 = vsel %vm2560_vm9, %v2528_v11, %v2592_v35 }
 0x1cd   : > { %2699 = vrot.lane.b32.xlu1 %v2624_v29, %s14682_s25 }
 0x1ce   : > { %v2530_v34 = vadd.f32 %v15716_v44, %v2491_v24  ;;  %v2529_v47 = vadd.f32 %v15716_v44, %v2490_v61 }
 0x1cf   : > { %v2411_v23 = vpop.permute.xlu1 %2410  ;;  %v2202_v13 = vpop.permute.xlu0 %2201 }
 0x1d0   : > { %v2283_v4 = vadd.f32 %v2202_v13, %v15504_v2  ;;  %vm2562_vm10 = vcmp.ge.f32.partialorder %v2530_v34, 0.0  ;;  %v2594_v53 = vmul.f32 0.2, %v2530_v34  ;;  %vm2561_vm11 = vcmp.ge.f32.partialorder %v2529_v47, 0.0 }
 0x1d1   : > { %v2593_v15 = vmul.f32 0.2, %v2529_v47 }
 0x1d2   : > { %v2492_v48 = vadd.f32 %v2411_v23, %v2283_v4  ;;  %v2626_v7 = vsel %vm2562_vm10, %v2530_v34, %v2594_v53 }
 0x1d3   : > { %v2413_v1 = vpop.permute.xlu1 %2412  ;;  %2703 = vrot.lane.b32.xlu1 %v2626_v7, %s14682_s25  ;;  %v2625_v19 = vsel %vm2561_vm11, %v2529_v47, %v2593_v15  ;;  %v2204_v58 = vpop.permute.xlu0 %2203 }
 0x1d4   : > { %v2531_v26 = vadd.f32 %v15716_v44, %v2492_v48  ;;  %2701 = vrot.lane.b32.xlu0 %v2625_v19, %s14682_s25  ;;  %v2284_v51 = vadd.f32 %v2204_v58, %v20114_v39 }
 0x1d6   : > { %v2493_v0 = vadd.f32 %v2413_v1, %v2284_v51  ;;  %vm2563_vm12 = vcmp.ge.f32.partialorder %v2531_v26, 0.0  ;;  %v2595_v2 = vmul.f32 0.2, %v2531_v26 }
 0x1d7   : > { %v2208_v57 = vpop.permute.xlu1 %2207  ;;  %v2206_v18 = vpop.permute.xlu0 %2205 }
 0x1d8   : > { %v2532_v10 = vadd.f32 %v15716_v44, %v2493_v0  ;;  %v2627_v59 = vsel %vm2563_vm12, %v2531_v26, %v2595_v2  ;;  %v2286_v63 = vadd.f32 %v2208_v57, %v15533_v27  ;;  %v2285_v21 = vadd.f32 %v2206_v18, %v15526_v25  ;;  %v15812_v27 = vld [vmem:[%s20084_s3 + $0x28] sm:$0xf] }
 0x1d9   : > { %2705 = vrot.lane.b32.xlu0 %v2627_v59, %s14682_s25  ;;  %13881 = vmatprep.subr.msk.mxu1 %vm3052_vm6, %v15812_v27 }
 0x1da   : > { %vm2564_vm13 = vcmp.ge.f32.partialorder %v2532_v10, 0.0  ;;  %v2596_v36 = vmul.f32 0.2, %v2532_v10 }
 0x1db   : > { %v2417_v14 = vpop.permute.xlu1 %2416  ;;  %v2415_v5 = vpop.permute.xlu0 %2414 }
 0x1dc   : > { %v2495_v22 = vadd.f32 %v2417_v14, %v2286_v63  ;;  %v2494_v60 = vadd.f32 %v2415_v5, %v2285_v21  ;;  %v2628_v52 = vsel %vm2564_vm13, %v2532_v10, %v2596_v36 }
 0x1dd   : > { %2707 = vrot.lane.b32.xlu1 %v2628_v52, %s14682_s25 }
 0x1de   : > { %v2534_v16 = vadd.f32 %v15716_v44, %v2495_v22  ;;  %v2533_v41 = vadd.f32 %v15716_v44, %v2494_v60 }
 0x1df   : > { %v2419_v54 = vpop.permute.xlu1 %2418  ;;  %v2210_v28 = vpop.permute.xlu0 %2209 }
 0x1e0   : > { %v2287_v25 = vadd.f32 %v2210_v28, %v15561_v31  ;;  %vm2566_vm14 = vcmp.ge.f32.partialorder %v2534_v16, 0.0  ;;  %v2598_v38 = vmul.f32 0.2, %v2534_v16  ;;  %vm2565_vm15 = vcmp.ge.f32.partialorder %v2533_v41, 0.0 }
 0x1e1   : > { %v2597_v42 = vmul.f32 0.2, %v2533_v41 }
 0x1e2   : > { %v2496_v9 = vadd.f32 %v2419_v54, %v2287_v25  ;;  %v2630_v30 = vsel %vm2566_vm14, %v2534_v16, %v2598_v38 }
 0x1e3   : > { %v2421_v11 = vpop.permute.xlu1 %2420  ;;  %2711 = vrot.lane.b32.xlu1 %v2630_v30, %s14682_s25  ;;  %v2629_v17 = vsel %vm2565_vm15, %v2533_v41, %v2597_v42  ;;  %v2212_v8 = vpop.permute.xlu0 %2211 }
 0x1e4   : > { %v2535_v32 = vadd.f32 %v15716_v44, %v2496_v9  ;;  %2709 = vrot.lane.b32.xlu0 %v2629_v17, %s14682_s25  ;;  %v2288_v31 = vadd.f32 %v2212_v8, %v15549_v37 }
 0x1e6   : > { %v2497_v35 = vadd.f32 %v2421_v11, %v2288_v31  ;;  %vm2567_vm0 = vcmp.ge.f32.partialorder %v2535_v32, 0.0  ;;  %v2599_v56 = vmul.f32 0.2, %v2535_v32 }
 0x1e7   : > { %v2216_v40 = vpop.permute.xlu1 %2215  ;;  %v2214_v24 = vpop.permute.xlu0 %2213 }
 0x1e8   : > { %v2536_v61 = vadd.f32 %v15716_v44, %v2497_v35  ;;  %v2631_v29 = vsel %vm2567_vm0, %v2535_v32, %v2599_v56  ;;  %v2290_v34 = vadd.f32 %v2216_v40, %v15587_v12  ;;  %v2289_v47 = vadd.f32 %v2214_v24, %v15578_v45 }
 0x1e9   : > { %2713 = vrot.lane.b32.xlu0 %v2631_v29, %s14682_s25 }
 0x1ea   : > { %vm2568_vm1 = vcmp.ge.f32.partialorder %v2536_v61, 0.0  ;;  %v2600_v23 = vmul.f32 0.2, %v2536_v61 }
 0x1eb   : > { %v2425_v13 = vpop.permute.xlu1 %2424  ;;  %v2423_v4 = vpop.permute.xlu0 %2422 }
 0x1ec   : > { %v2499_v53 = vadd.f32 %v2425_v13, %v2290_v34  ;;  %v2498_v37 = vadd.f32 %v2423_v4, %v2289_v47  ;;  %v2632_v15 = vsel %vm2568_vm1, %v2536_v61, %v2600_v23  ;;  %vm2773_vm1 = vcmask 97344  }
 0x1ed   : > { %2715 = vrot.lane.b32.xlu1 %v2632_v15, %s14682_s25 }
 0x1ee   : > { %v2538_v48 = vadd.f32 %v15716_v44, %v2499_v53  ;;  %v2537_v7 = vadd.f32 %v15716_v44, %v2498_v37 }
 0x1ef   : > { %v2427_v1 = vpop.permute.xlu1 %2426  ;;  %v2218_v19 = vpop.permute.xlu0 %2217 }
 0x1f0   : > { %v2291_v58 = vadd.f32 %v2218_v19, %v15612_v43  ;;  %vm2570_vm8 = vcmp.ge.f32.partialorder %v2538_v48, 0.0  ;;  %v2602_v12 = vmul.f32 0.2, %v2538_v48  ;;  %vm2569_vm9 = vcmp.ge.f32.partialorder %v2537_v7, 0.0 }
 0x1f1   : > { %v2601_v45 = vmul.f32 0.2, %v2537_v7 }
 0x1f2   : > { %v2500_v26 = vadd.f32 %v2427_v1, %v2291_v58  ;;  %v2634_v39 = vsel %vm2570_vm8, %v2538_v48, %v2602_v12 }
 0x1f3   : > { %v2220_v51 = vpop.permute.xlu1 %2219  ;;  %2719 = vrot.lane.b32.xlu1 %v2634_v39, %s14682_s25  ;;  %v2633_v0 = vsel %vm2569_vm9, %v2537_v7, %v2601_v45  ;;  %v2222_v2 = vpop.permute.xlu0 %2221  ;;  %v12244_v39 = vld [vmem:[%s20084_s3 + $0x20] sm:$0xff] }
 0x1f4   : > { %v2539_v57 = vadd.f32 %v15716_v44, %v2500_v26  ;;  %2717 = vrot.lane.b32.xlu0 %v2633_v0, %s14682_s25  ;;  %v2292_v18 = vadd.f32 %v2220_v51, %v15601_v49  ;;  %v2293_v36 = vadd.f32 %v2222_v2, %v15619_v6 }
 0x1f6   : > { %vm2571_vm10 = vcmp.ge.f32.partialorder %v2539_v57, 0.0  ;;  %v2603_v10 = vmul.f32 0.2, %v2539_v57 }
 0x1f7   : > { %v2429_v43 = vpop.permute.xlu1 %2428  ;;  %v2224_v59 = vpop.permute.xlu0 %2223 }
 0x1f8   : > { %v2501_v63 = vadd.f32 %v2429_v43, %v2292_v18  ;;  %v2635_v21 = vsel %vm2571_vm10, %v2539_v57, %v2603_v10  ;;  %v2294_v5 = vadd.f32 %v2224_v59, %v15630_v20 }
 0x1f9   : > { %2721 = vrot.lane.b32.xlu0 %v2635_v21, %s14682_s25 }
 0x1fa   : > { %v2540_v14 = vadd.f32 %v15716_v44, %v2501_v63 }
 0x1fb   : > { %v2431_v22 = vpop.permute.xlu1 %2430  ;;  %v2433_v60 = vpop.permute.xlu0 %2432 }
 0x1fc   : > { %v2502_v52 = vadd.f32 %v2431_v22, %v2293_v36  ;;  %v2503_v16 = vadd.f32 %v2433_v60, %v2294_v5  ;;  %vm2572_vm11 = vcmp.ge.f32.partialorder %v2540_v14, 0.0  ;;  %v2604_v49 = vmul.f32 0.2, %v2540_v14 }
 0x1fe   : > { %v2541_v41 = vadd.f32 %v15716_v44, %v2502_v52  ;;  %v2542_v54 = vadd.f32 %v15716_v44, %v2503_v16  ;;  %v2636_v28 = vsel %vm2572_vm11, %v2540_v14, %v2604_v49 }
 0x1ff   : > { %v2435_v25 = vpop.permute.xlu1 %2434  ;;  %2723 = vrot.lane.b32.xlu1 %v2636_v28, %s14682_s25  ;;  %v2226_v38 = vpop.permute.xlu0 %2225 }
 0x200   : > { %v2295_v6 = vadd.f32 %v2226_v38, %v15664_v55  ;;  %vm2573_vm12 = vcmp.ge.f32.partialorder %v2541_v41, 0.0  ;;  %v2605_v42 = vmul.f32 0.2, %v2541_v41  ;;  %vm2574_vm13 = vcmp.ge.f32.partialorder %v2542_v54, 0.0 }
 0x201   : > { %v2606_v20 = vmul.f32 0.2, %v2542_v54 }
 0x202   : > { %v2504_v9 = vadd.f32 %v2435_v25, %v2295_v6  ;;  %v2637_v30 = vsel %vm2573_vm12, %v2541_v41, %v2605_v42 }
 0x203   : > { %v2228_v11 = vpop.permute.xlu1 %2227  ;;  %2725 = vrot.lane.b32.xlu0 %v2637_v30, %s14682_s25  ;;  %v2638_v17 = vsel %vm2574_vm13, %v2542_v54, %v2606_v20  ;;  %v2230_v35 = vpop.permute.xlu0 %2229 }
 0x204   : > { %v2543_v8 = vadd.f32 %v15716_v44, %v2504_v9  ;;  %2727 = vrot.lane.b32.xlu1 %v2638_v17, %s14682_s25  ;;  %v2296_v32 = vadd.f32 %v2228_v11, %v15653_v50  ;;  %v2297_v24 = vadd.f32 %v2230_v35, %v15671_v33 }
 0x206   : > { %vm2575_vm14 = vcmp.ge.f32.partialorder %v2543_v8, 0.0  ;;  %v2607_v31 = vmul.f32 0.2, %v2543_v8 }
 0x207   : > { %v2437_v55 = vpop.permute.xlu1 %2436  ;;  %v2232_v50 = vpop.permute.xlu0 %2231 }
 0x208   : > { %v2505_v56 = vadd.f32 %v2437_v55, %v2296_v32  ;;  %v2639_v40 = vsel %vm2575_vm14, %v2543_v8, %v2607_v31  ;;  %v2298_v15 = vadd.f32 %v2232_v50, %v15681_v62 }
 0x209   : > { %2729 = vrot.lane.b32.xlu0 %v2639_v40, %s14682_s25 }
 0x20a   : > { %v2544_v61 = vadd.f32 %v15716_v44, %v2505_v56 }
 0x20b   : > { %v2439_v29 = vpop.permute.xlu1 %2438 }
 0x20c   : > { %v2506_v34 = vadd.f32 %v2439_v29, %v2297_v24  ;;  %vm2576_vm15 = vcmp.ge.f32.partialorder %v2544_v61, 0.0  ;;  %v2608_v47 = vmul.f32 0.2, %v2544_v61 }
 0x20e   : > { %v2545_v23 = vadd.f32 %v15716_v44, %v2506_v34  ;;  %v2640_v13 = vsel %vm2576_vm15, %v2544_v61, %v2608_v47 }
 0x20f   : > { %2731 = vrot.lane.b32.xlu1 %v2640_v13, %s14682_s25 }
 0x210   : > { %vm2577_vm0 = vcmp.ge.f32.partialorder %v2545_v23, 0.0  ;;  %v2609_v4 = vmul.f32 0.2, %v2545_v23 }
 0x212   : > { %v2641_v53 = vsel %vm2577_vm0, %v2545_v23, %v2609_v4 }
 0x213   : > { %2733 = vrot.lane.b32.xlu0 %v2641_v53, %s14682_s25  ;;  %v2678_v37 = vpop.permute.xlu0 %2677 }
 0x214   : > { %2774 = vst.msk [vmem:[#allocation2 + $0x19] sm:$0xff] %vm2773_vm1, %v2678_v37 }
 0x217   : > { %v2680_v33 = vpop.permute.xlu0 %2679 }
 0x218   : > { %2775 = vst.msk [vmem:[#allocation2 + $0x21] sm:$0xff] %vm2773_vm1, %v2680_v33 }
 0x21b   : > { %v2682_v48 = vpop.permute.xlu1 %2681  ;;  %v2441_v7 = vpop.permute.xlu0 %2440  ;;  %v2856_v1 = vld [vmem:[#allocation2 + $0x18] sm:$0xff] }
 0x21c   : > { %2776 = vst.msk [vmem:[#allocation2 + $0x31] sm:$0xff] %vm2773_vm1, %v2682_v48  ;;  %v2507_v19 = vadd.f32 %v2441_v7, %v2298_v15  ;;  %13733 = vmatprep.mubr.msk.f32.mxu1 %vm2907_vm7, %v2856_v1  ;;  %13813 = vmatmul.mubr.msk.f32.gmra.mxu0 %vm2907_vm7, %v2856_v1 }
 0x21e   : > { %v2546_v58 = vadd.f32 %v15716_v44, %v2507_v19 }
 0x21f   : > { %v2684_v12 = vpop.permute.xlu1 %2683  ;;  %v2857_v45 = vld [vmem:[#allocation2 + $0x20] sm:$0xff]  ;;  %v2858_v26 = vld [vmem:[#allocation2 + $0x28] sm:$0xff] }
 0x220   : > { %2777 = vst.msk [vmem:[#allocation2 + $0x39] sm:$0xff] %vm2773_vm1, %v2684_v12  ;;  %13734 = vmatmul.mubr.msk.f32.vlgmr.msra.gmra.mxu1 %vm2907_vm7, %v2857_v45  ;;  %13815 = vmatprep.mubr.msk.f32.mxu0 %vm2907_vm7, %v2857_v45  ;;  %vm2578_vm8 = vcmp.ge.f32.partialorder %v2546_v58, 0.0  ;;  %v2610_v62 = vmul.f32 0.2, %v2546_v58 }
 0x221   : > { %13736 = vmatprep.mubr.msk.f32.mxu1 %vm2907_vm7, %v2858_v26  ;;  %13816 = vmatmul.mubr.msk.f32.gmra.mxu0 %vm2907_vm7, %v2858_v26 }
 0x222   : > { %v2642_v51 = vsel %vm2578_vm8, %v2546_v58, %v2610_v62  ;;  %13882 = vmatpush3.msk.msra.mxu1 %vm3052_vm6, %v15812_v27 }
 0x223   : > { %2735 = vrot.lane.b32.xlu1 %v2642_v51, %s14682_s25  ;;  %v15869_v0 = vld [vmem:[#allocation2 + $0x30] sm:$0xff]  ;;  %13883 = vmatprep.subr.mxu1 %v12244_v39  ;;  %v2443_v57 = vpop.permute.xlu1 %2442 }
 0x224   : > { %13737 = vmatmul.mubr.msk.f32.gmra.mxu1 %vm2907_vm7, %v15869_v0  ;;  %13818 = vmatprep.mubr.msk.f32.mxu0 %vm2907_vm7, %v15869_v0 }
 0x225   : > { %v2686_v2 = vpop.permute.xlu0 %2685  ;;  %13884 = vmatpush3.msra.mxu1 %v12244_v39 }
 0x226   : > { %2778 = vst.msk [vmem:[#allocation2 + $0x49] sm:$0xff] %vm2773_vm1, %v2686_v2 }
 0x227   : > { %v15876_v18 = vld [vmem:[#allocation2 + $0x38] sm:$0xff]  ;;  %v15878_v10 = vld [vmem:[#allocation2 + $0x40] sm:$0xff] }
 0x228   : > { %13739 = vmatprep.mubr.msk.f32.mxu1 %vm2907_vm7, %v15876_v18  ;;  %13819 = vmatmul.mubr.msk.f32.gmra.mxu0 %vm2907_vm7, %v15876_v18 }
 0x229   : > { %13740 = vmatmul.mubr.msk.f32.gmra.mxu1 %vm2907_vm7, %v15878_v10  ;;  %13821 = vmatprep.mubr.msk.f32.mxu0 %vm2907_vm7, %v15878_v10  ;;  %v2688_v27 = vpop.permute.xlu0 %2687 }
 0x22a   : > { %2779 = vst.msk [vmem:[#allocation2 + $0x51] sm:$0xff] %vm2773_vm1, %v2688_v27 }
 0x22b   : > { %v2690_v43 = vpop.permute.xlu1 %2689 }
 0x22c   : > { %2780 = vst.msk [vmem:[#allocation2 + $0x61] sm:$0xff] %vm2773_vm1, %v2690_v43 }
 0x22d   : > { %v2234_v59 = vpop.permute.xlu0 %2233  ;;  %v15890_v63 = vld [vmem:[#allocation2 + $0x48] sm:$0xff] }
 0x22e   : > { %v2299_v21 = vadd.f32 %v2234_v59, %v15745_v3  ;;  %13742 = vmatprep.mubr.msk.f32.mxu1 %vm2907_vm7, %v15890_v63  ;;  %13822 = vmatmul.mubr.msk.f32.gmra.mxu0 %vm2907_vm7, %v15890_v63 }
 0x22f   : > { %v2692_v36 = vpop.permute.xlu1 %2691 }
 0x230   : > { %v2508_v14 = vadd.f32 %v2443_v57, %v2299_v21  ;;  %2781 = vst.msk [vmem:[#allocation2 + $0x69] sm:$0xff] %vm2773_vm1, %v2692_v36 }
 0x231   : > { %v15898_v5 = vld [vmem:[#allocation2 + $0x50] sm:$0xff]  ;;  %v15900_v22 = vld [vmem:[#allocation2 + $0x58] sm:$0xff] }
 0x232   : > { %v2547_v60 = vadd.f32 %v15716_v44, %v2508_v14  ;;  %13743 = vmatmul.mubr.msk.f32.gmra.mxu1 %vm2907_vm7, %v15898_v5  ;;  %13824 = vmatprep.mubr.msk.f32.mxu0 %vm2907_vm7, %v15898_v5 }
 0x233   : > { %v2236_v3 = vpop.permute.xlu1 %2235  ;;  %13745 = vmatprep.mubr.msk.f32.mxu1 %vm2907_vm7, %v15900_v22  ;;  %13825 = vmatmul.mubr.msk.f32.gmra.mxu0 %vm2907_vm7, %v15900_v22  ;;  %v15911_v52 = vld [vmem:[#allocation2 + $0x60] sm:$0xff] }
 0x234   : > { %13827 = vmatprep.mubr.msk.f32.mxu0 %vm2907_vm7, %v15911_v52  ;;  %vm2579_vm9 = vcmp.ge.f32.partialorder %v2547_v60, 0.0  ;;  %v2611_v16 = vmul.f32 0.2, %v2547_v60  ;;  %v2300_v41 = vadd.f32 %v2236_v3, %v15740_v46 }
 0x235   : > { %v2694_v49 = vpop.permute.xlu0 %2693 }
 0x236   : > { %2782 = vst.msk [vmem:[#allocation2 + $0x79] sm:$0xff] %vm2773_vm1, %v2694_v49  ;;  %13746 = vmatmul.mubr.msk.f32.gmra.mxu1 %vm2907_vm7, %v15911_v52  ;;  %v2643_v54 = vsel %vm2579_vm9, %v2547_v60, %v2611_v16 }
 0x237   : > { %v2445_v28 = vpop.permute.xlu1 %2444  ;;  %2737 = vrot.lane.b32.xlu0 %v2643_v54, %s14682_s25  ;;  %v15920_v25 = vld [vmem:[#allocation2 + $0x68] sm:$0xff]  ;;  %v15922_v38 = vld [vmem:[#allocation2 + $0x70] sm:$0xff] }
 0x238   : > { %v2509_v6 = vadd.f32 %v2445_v28, %v2300_v41  ;;  %13748 = vmatprep.mubr.msk.f32.mxu1 %vm2907_vm7, %v15920_v25  ;;  %13828 = vmatmul.mubr.msk.f32.gmra.mxu0 %vm2907_vm7, %v15920_v25 }
 0x239   : > { %13830 = vmatprep.mubr.msk.f32.mxu0 %vm2907_vm7, %v15922_v38  ;;  %v2696_v46 = vpop.permute.xlu0 %2695 }
 0x23a   : > { %v2548_v42 = vadd.f32 %v15716_v44, %v2509_v6  ;;  %2783 = vst.msk [vmem:[#allocation2 + $0x81] sm:$0xff] %vm2773_vm1, %v2696_v46  ;;  %13749 = vmatmul.mubr.msk.f32.gmra.mxu1 %vm2907_vm7, %v15922_v38 }
 0x23c   : > { %vm2580_vm10 = vcmp.ge.f32.partialorder %v2548_v42, 0.0  ;;  %v2612_v20 = vmul.f32 0.2, %v2548_v42 }
 0x23d   : > { %v2698_v9 = vpop.permute.xlu0 %2697  ;;  %v15934_v30 = vld [vmem:[#allocation2 + $0x78] sm:$0xff] }
 0x23e   : > { %2784 = vst.msk [vmem:[#allocation2 + $0x91] sm:$0xff] %vm2773_vm1, %v2698_v9  ;;  %13751 = vmatprep.mubr.msk.f32.mxu1 %vm2907_vm7, %v15934_v30  ;;  %13831 = vmatmul.mubr.msk.f32.gmra.mxu0 %vm2907_vm7, %v15934_v30  ;;  %v2644_v11 = vsel %vm2580_vm10, %v2548_v42, %v2612_v20 }
 0x23f   : > { %v2700_v44 = vpop.permute.xlu1 %2699  ;;  %2739 = vrot.lane.b32.xlu1 %v2644_v11, %s14682_s25 }
 0x240   : > { %2785 = vst.msk [vmem:[#allocation2 + $0x99] sm:$0xff] %vm2773_vm1, %v2700_v44 }
 0x241   : > { %v15943_v17 = vld [vmem:[#allocation2 + $0x80] sm:$0xff]  ;;  %v15945_v8 = vld [vmem:[#allocation2 + $0x88] sm:$0xff] }
 0x242   : > { %13752 = vmatmul.mubr.msk.f32.gmra.mxu1 %vm2907_vm7, %v15943_v17  ;;  %13833 = vmatprep.mubr.msk.f32.mxu0 %vm2907_vm7, %v15943_v17 }
 0x243   : > { %13754 = vmatprep.mubr.msk.f32.mxu1 %vm2907_vm7, %v15945_v8  ;;  %13834 = vmatmul.mubr.msk.f32.gmra.mxu0 %vm2907_vm7, %v15945_v8 }
 0x245   : > { %v2704_v32 = vpop.permute.xlu1 %2703  ;;  %v15955_v31 = vld [vmem:[#allocation2 + $0x90] sm:$0xff] }
 0x246   : > { %2787 = vst.msk [vmem:[#allocation2 + $0xb1] sm:$0xff] %vm2773_vm1, %v2704_v32  ;;  %v2702_v35 = vpop.permute.xlu0 %2701  ;;  %13755 = vmatmul.mubr.msk.f32.gmra.mxu1 %vm2907_vm7, %v15955_v31  ;;  %13836 = vmatprep.mubr.msk.f32.mxu0 %vm2907_vm7, %v15955_v31 }
 0x247   : > { %2786 = vst.msk [vmem:[#allocation2 + $0xa9] sm:$0xff] %vm2773_vm1, %v2702_v35  ;;  %v15963_v55 = vld [vmem:[#allocation2 + $0x98] sm:$0xff]  ;;  %v15965_v56 = vld [vmem:[#allocation2 + $0xa0] sm:$0xff] }
 0x248   : > { %13757 = vmatprep.mubr.msk.f32.mxu1 %vm2907_vm7, %v15963_v55  ;;  %13837 = vmatmul.mubr.msk.f32.gmra.mxu0 %vm2907_vm7, %v15963_v55 }
 0x249   : > { %13839 = vmatprep.mubr.msk.f32.mxu0 %vm2907_vm7, %v15965_v56 }
 0x24a   : > { %13758 = vmatmul.mubr.msk.f32.gmra.mxu1 %vm2907_vm7, %v15965_v56 }
 0x24b   : > { %v2706_v40 = vpop.permute.xlu0 %2705 }
 0x24c   : > { %2788 = vst.msk [vmem:[#allocation2 + $0xc1] sm:$0xff] %vm2773_vm1, %v2706_v40 }
 0x24d   : > { %v15989_v34 = vld [vmem:[#allocation2 + $0xb8] sm:$0xff] }
 0x24e   : > { %v15976_v24 = vld [vmem:[#allocation2 + $0xa8] sm:$0xff]  ;;  %v15978_v61 = vld [vmem:[#allocation2 + $0xb0] sm:$0xff] }
 0x24f   : > { %13760 = vmatprep.mubr.msk.f32.mxu1 %vm2907_vm7, %v15976_v24  ;;  %13840 = vmatmul.mubr.msk.f32.gmra.mxu0 %vm2907_vm7, %v15976_v24  ;;  %v2708_v29 = vpop.permute.xlu1 %2707 }
 0x250   : > { %2789 = vst.msk [vmem:[#allocation2 + $0xc9] sm:$0xff] %vm2773_vm1, %v2708_v29  ;;  %13761 = vmatmul.mubr.msk.f32.gmra.mxu1 %vm2907_vm7, %v15978_v61  ;;  %13842 = vmatprep.mubr.msk.f32.mxu0 %vm2907_vm7, %v15978_v61  ;;  %v3859_v29 = vld [vmem:[#allocation2 + $0x1a0] sm:$0xff] }
 0x251   : > { %13763 = vmatprep.mubr.msk.f32.mxu1 %vm2907_vm7, %v15989_v34 }
 0x253   : > { %13843 = vmatmul.mubr.msk.f32.gmra.mxu0 %vm2907_vm7, %v15989_v34  ;;  %v15995_v47 = vld [vmem:[#allocation2 + $0xc0] sm:$0xff] }
 0x254   : > { %13764 = vmatmul.mubr.msk.f32.gmra.mxu1 %vm2907_vm7, %v15995_v47  ;;  %13845 = vmatprep.mubr.msk.f32.mxu0 %vm2907_vm7, %v15995_v47 }
 0x255   : > { %v2712_v23 = vpop.permute.xlu1 %2711 }
 0x256   : > { %2791 = vst.msk [vmem:[#allocation2 + $0xe1] sm:$0xff] %vm2773_vm1, %v2712_v23  ;;  %v2710_v13 = vpop.permute.xlu0 %2709 }
 0x257   : > { %2790 = vst.msk [vmem:[#allocation2 + $0xd9] sm:$0xff] %vm2773_vm1, %v2710_v13  ;;  %v16003_v50 = vld [vmem:[#allocation2 + $0xc8] sm:$0xff]  ;;  %v16005_v4 = vld [vmem:[#allocation2 + $0xd0] sm:$0xff] }
 0x258   : > { %13766 = vmatprep.mubr.msk.f32.mxu1 %vm2907_vm7, %v16003_v50  ;;  %13846 = vmatmul.mubr.msk.f32.gmra.mxu0 %vm2907_vm7, %v16003_v50 }
 0x259   : > { %13767 = vmatmul.mubr.msk.f32.gmra.mxu1 %vm2907_vm7, %v16005_v4  ;;  %13848 = vmatprep.mubr.msk.f32.mxu0 %vm2907_vm7, %v16005_v4 }
 0x25b   : > { %v2714_v53 = vpop.permute.xlu0 %2713 }
 0x25c   : > { %2792 = vst.msk [vmem:[#allocation2 + $0xf1] sm:$0xff] %vm2773_vm1, %v2714_v53 }
 0x25d   : > { %v16029_v48 = vld [vmem:[#allocation2 + $0xe8] sm:$0xff] }
 0x25e   : > { %v16016_v37 = vld [vmem:[#allocation2 + $0xd8] sm:$0xff]  ;;  %v16018_v33 = vld [vmem:[#allocation2 + $0xe0] sm:$0xff] }
 0x25f   : > { %13769 = vmatprep.mubr.msk.f32.mxu1 %vm2907_vm7, %v16016_v37  ;;  %13849 = vmatmul.mubr.msk.f32.gmra.mxu0 %vm2907_vm7, %v16016_v37  ;;  %v2716_v15 = vpop.permute.xlu1 %2715 }
 0x260   : > { %2793 = vst.msk [vmem:[#allocation2 + $0xf9] sm:$0xff] %vm2773_vm1, %v2716_v15  ;;  %13770 = vmatmul.mubr.msk.f32.gmra.mxu1 %vm2907_vm7, %v16018_v33  ;;  %13851 = vmatprep.mubr.msk.f32.mxu0 %vm2907_vm7, %v16018_v33 }
 0x261   : > { %13772 = vmatprep.mubr.msk.f32.mxu1 %vm2907_vm7, %v16029_v48 }
 0x263   : > { %13852 = vmatmul.mubr.msk.f32.gmra.mxu0 %vm2907_vm7, %v16029_v48  ;;  %v16035_v7 = vld [vmem:[#allocation2 + $0xf0] sm:$0xff] }
 0x264   : > { %13773 = vmatmul.mubr.msk.f32.gmra.mxu1 %vm2907_vm7, %v16035_v7  ;;  %13854 = vmatprep.mubr.msk.f32.mxu0 %vm2907_vm7, %v16035_v7 }
 0x265   : > { %v2720_v1 = vpop.permute.xlu1 %2719 }
 0x266   : > { %2795 = vst.msk [vmem:[#allocation2 + $0x111] sm:$0xff] %vm2773_vm1, %v2720_v1  ;;  %v2718_v19 = vpop.permute.xlu0 %2717 }
 0x267   : > { %2794 = vst.msk [vmem:[#allocation2 + $0x109] sm:$0xff] %vm2773_vm1, %v2718_v19  ;;  %v16043_v58 = vld [vmem:[#allocation2 + $0xf8] sm:$0xff]  ;;  %v16045_v12 = vld [vmem:[#allocation2 + $0x100] sm:$0xff] }
 0x268   : > { %13775 = vmatprep.mubr.msk.f32.mxu1 %vm2907_vm7, %v16043_v58  ;;  %13855 = vmatmul.mubr.msk.f32.gmra.mxu0 %vm2907_vm7, %v16043_v58 }
 0x269   : > { %13776 = vmatmul.mubr.msk.f32.gmra.mxu1 %vm2907_vm7, %v16045_v12  ;;  %13857 = vmatprep.mubr.msk.f32.mxu0 %vm2907_vm7, %v16045_v12 }
 0x26b   : > { %v2722_v45 = vpop.permute.xlu0 %2721 }
 0x26c   : > { %2796 = vst.msk [vmem:[#allocation2 + $0x121] sm:$0xff] %vm2773_vm1, %v2722_v45 }
 0x26d   : > { %v16068_v39 = vld [vmem:[#allocation2 + $0x118] sm:$0xff] }
 0x26e   : > { %v16056_v26 = vld [vmem:[#allocation2 + $0x108] sm:$0xff]  ;;  %v16058_v62 = vld [vmem:[#allocation2 + $0x110] sm:$0xff] }
 0x26f   : > { %13778 = vmatprep.mubr.msk.f32.mxu1 %vm2907_vm7, %v16056_v26  ;;  %13858 = vmatmul.mubr.msk.f32.gmra.mxu0 %vm2907_vm7, %v16056_v26 }
 0x270   : > { %13779 = vmatmul.mubr.msk.f32.gmra.mxu1 %vm2907_vm7, %v16058_v62  ;;  %13860 = vmatprep.mubr.msk.f32.mxu0 %vm2907_vm7, %v16058_v62 }
 0x271   : > { %13781 = vmatprep.mubr.msk.f32.mxu1 %vm2907_vm7, %v16068_v39  ;;  %v2724_v51 = vpop.permute.xlu1 %2723 }
 0x272   : > { %2797 = vst.msk [vmem:[#allocation2 + $0x129] sm:$0xff] %vm2773_vm1, %v2724_v51 }
 0x273   : > { %13861 = vmatmul.mubr.msk.f32.gmra.mxu0 %vm2907_vm7, %v16068_v39  ;;  %v16075_v2 = vld [vmem:[#allocation2 + $0x120] sm:$0xff] }
 0x274   : > { %13782 = vmatmul.mubr.msk.f32.gmra.mxu1 %vm2907_vm7, %v16075_v2  ;;  %13863 = vmatprep.mubr.msk.f32.mxu0 %vm2907_vm7, %v16075_v2 }
 0x275   : > { %v2726_v57 = vpop.permute.xlu0 %2725 }
 0x276   : > { %v2728_v27 = vpop.permute.xlu1 %2727  ;;  %2798 = vst.msk [vmem:[#allocation2 + $0x139] sm:$0xff] %vm2773_vm1, %v2726_v57 }
 0x277   : > { %2799 = vst.msk [vmem:[#allocation2 + $0x141] sm:$0xff] %vm2773_vm1, %v2728_v27 }
 0x279   : > { %v16083_v43 = vld [vmem:[#allocation2 + $0x128] sm:$0xff]  ;;  %v16085_v59 = vld [vmem:[#allocation2 + $0x130] sm:$0xff] }
 0x27a   : > { %13784 = vmatprep.mubr.msk.f32.mxu1 %vm2907_vm7, %v16083_v43  ;;  %13864 = vmatmul.mubr.msk.f32.gmra.mxu0 %vm2907_vm7, %v16083_v43 }
 0x27b   : > { %13785 = vmatmul.mubr.msk.f32.gmra.mxu1 %vm2907_vm7, %v16085_v59  ;;  %13866 = vmatprep.mubr.msk.f32.mxu0 %vm2907_vm7, %v16085_v59  ;;  %v2730_v21 = vpop.permute.xlu0 %2729 }
 0x27c   : > { %2800 = vst.msk [vmem:[#allocation2 + $0x151] sm:$0xff] %vm2773_vm1, %v2730_v21 }
 0x27d   : > { %v16096_v36 = vld [vmem:[#allocation2 + $0x138] sm:$0xff] }
 0x27e   : > { %13787 = vmatprep.mubr.msk.f32.mxu1 %vm2907_vm7, %v16096_v36  ;;  %13867 = vmatmul.mubr.msk.f32.gmra.mxu0 %vm2907_vm7, %v16096_v36  ;;  %v16102_v14 = vld [vmem:[#allocation2 + $0x140] sm:$0xff]  ;;  %v16108_v60 = vld [vmem:[#allocation2 + $0x148] sm:$0xff] }
 0x27f   : > { %13788 = vmatmul.mubr.msk.f32.gmra.mxu1 %vm2907_vm7, %v16102_v14  ;;  %13869 = vmatprep.mubr.msk.f32.mxu0 %vm2907_vm7, %v16102_v14 }
 0x280   : > { %13790 = vmatprep.mubr.msk.f32.mxu1 %vm2907_vm7, %v16108_v60 }
 0x281   : > { %v2732_v3 = vpop.permute.xlu1 %2731 }
 0x282   : > { %2801 = vst.msk [vmem:[#allocation2 + $0x159] sm:$0xff] %vm2773_vm1, %v2732_v3  ;;  %13870 = vmatmul.mubr.msk.f32.gmra.mxu0 %vm2907_vm7, %v16108_v60 }
 0x283   : > { %v16115_v16 = vld [vmem:[#allocation2 + $0x150] sm:$0xff] }
 0x284   : > { %13791 = vmatmul.mubr.msk.f32.gmra.mxu1 %vm2907_vm7, %v16115_v16  ;;  %13872 = vmatprep.mubr.msk.f32.mxu0 %vm2907_vm7, %v16115_v16 }
 0x285   : > { %v2734_v49 = vpop.permute.xlu0 %2733 }
 0x286   : > { %2802 = vst.msk [vmem:[#allocation2 + $0x169] sm:$0xff] %vm2773_vm1, %v2734_v49 }
 0x289   : > { %v16122_v41 = vld [vmem:[#allocation2 + $0x158] sm:$0xff]  ;;  %v16124_v54 = vld [vmem:[#allocation2 + $0x160] sm:$0xff] }
 0x28a   : > { %13793 = vmatprep.mubr.msk.f32.mxu1 %vm2907_vm7, %v16122_v41  ;;  %13873 = vmatmul.mubr.msk.f32.gmra.mxu0 %vm2907_vm7, %v16122_v41 }
 0x28b   : > { %13794 = vmatmul.mubr.msk.f32.gmra.mxu1 %vm2907_vm7, %v16124_v54  ;;  %13875 = vmatprep.mubr.msk.f32.mxu0 %vm2907_vm7, %v16124_v54 }
 0x28d   : > { %v16134_v28 = vld [vmem:[#allocation2 + $0x168] sm:$0xff] }
 0x28e   : > { %13796 = vmatprep.mubr.msk.f32.mxu1 %vm2907_vm7, %v16134_v28  ;;  %13876 = vmatmul.mubr.msk.f32.gmra.mxu0 %vm2907_vm7, %v16134_v28 }
 0x295   : > { %v2736_v6 = vpop.permute.xlu1 %2735 }
 0x296   : > { %2803 = vst.msk [vmem:[#allocation2 + $0x171] sm:$0xff] %vm2773_vm1, %v2736_v6 }
 0x29d   : > { %v16141_v46 = vld [vmem:[#allocation2 + $0x170] sm:$0xff]  ;;  %v16143_v42 = vld [vmem:[#allocation2 + $0x178] sm:$0xff] }
 0x29e   : > { %13797 = vmatmul.mubr.msk.f32.gmra.mxu1 %vm2907_vm7, %v16141_v46  ;;  %13878 = vmatprep.mubr.msk.f32.mxu0 %vm2907_vm7, %v16141_v46 }
 0x29f   : > { %13799 = vmatprep.mubr.msk.f32.mxu1 %vm2907_vm7, %v16143_v42  ;;  %13879 = vmatmul.mubr.msk.f32.gmra.mxu0 %vm2907_vm7, %v16143_v42 }
 0x2a9   : > { %v2738_v20 = vpop.permute.xlu0 %2737 }
 0x2aa   : > { %2804 = vst.msk [vmem:[#allocation2 + $0x181] sm:$0xff] %vm2773_vm1, %v2738_v20 }
 0x2b1   : > { %v2740_v9 = vpop.permute.xlu1 %2739  ;;  %v16154_v11 = vld [vmem:[#allocation2 + $0x180] sm:$0xff] }
 0x2b2   : > { %2805 = vst.msk [vmem:[#allocation2 + $0x189] sm:$0xff] %vm2773_vm1, %v2740_v9  ;;  %13800 = vmatmul.mubr.msk.f32.gmra.mxu1 %vm2907_vm7, %v16154_v11 }
 0x2b9   : > { %v16159_v44 = vld [vmem:[#allocation2 + $0x188] sm:$0xff]  ;;  %v16161_v32 = vld [vmem:[#allocation2 + $0x190] sm:$0xff] }
 0x2ba   : > { %13802 = vmatprep.mubr.msk.f32.mxu1 %vm2907_vm7, %v16159_v44 }
 0x2bb   : > { %13803 = vmatmul.mubr.msk.f32.gmra.mxu1 %vm2907_vm7, %v16161_v32 }
 0x2bc   : > { %13885 = vmatprep.mubr.msk.f32.mxu1 %vm2907_vm7, %v15869_v0 }
 0x2bf   : > { %13886 = vmatmul.mubr.msk.f32.vlgmr.msra.gmra.mxu1 %vm2907_vm7, %v15876_v18 }
 0x2c0   : > { %13888 = vmatprep.mubr.msk.f32.mxu1 %vm2907_vm7, %v15878_v10 }
 0x2c3   : > { %13889 = vmatmul.mubr.msk.f32.gmra.mxu1 %vm2907_vm7, %v15890_v63 }
 0x2c4   : > { %13891 = vmatprep.mubr.msk.f32.mxu1 %vm2907_vm7, %v15898_v5 }
 0x2c7   : > { %13892 = vmatmul.mubr.msk.f32.gmra.mxu1 %vm2907_vm7, %v15900_v22 }
 0x2c8   : > { %13894 = vmatprep.mubr.msk.f32.mxu1 %vm2907_vm7, %v15911_v52 }
 0x2cb   : > { %13895 = vmatmul.mubr.msk.f32.gmra.mxu1 %vm2907_vm7, %v15920_v25 }
 0x2cc   : > { %13897 = vmatprep.mubr.msk.f32.mxu1 %vm2907_vm7, %v15922_v38 }
 0x2cf   : > { %13898 = vmatmul.mubr.msk.f32.gmra.mxu1 %vm2907_vm7, %v15934_v30 }
 0x2d0   : > { %13900 = vmatprep.mubr.msk.f32.mxu1 %vm2907_vm7, %v15943_v17 }
 0x2d3   : > { %13901 = vmatmul.mubr.msk.f32.gmra.mxu1 %vm2907_vm7, %v15945_v8 }
 0x2d4   : > { %13903 = vmatprep.mubr.msk.f32.mxu1 %vm2907_vm7, %v15955_v31 }
 0x2d7   : > { %13904 = vmatmul.mubr.msk.f32.gmra.mxu1 %vm2907_vm7, %v15963_v55 }
 0x2d8   : > { %13906 = vmatprep.mubr.msk.f32.mxu1 %vm2907_vm7, %v15965_v56 }
 0x2db   : > { %13907 = vmatmul.mubr.msk.f32.gmra.mxu1 %vm2907_vm7, %v15976_v24  ;;  %v3858_v24 = vld [vmem:[#allocation2 + $0x198] sm:$0xff] }
 0x2dc   : > { %13909 = vmatprep.mubr.msk.f32.mxu1 %vm2907_vm7, %v15978_v61 }
 0x2df   : > { %13910 = vmatmul.mubr.msk.f32.gmra.mxu1 %vm2907_vm7, %v15989_v34  ;;  %v3860_v34 = vld [vmem:[#allocation2 + $0x1a8] sm:$0xff] }
 0x2e0   : > { %v16203_v0 = vpop.f32.mrf.mxu1  ;;  %13912 = vmatprep.mubr.msk.f32.mxu1 %vm2907_vm7, %v15995_v47 }
 0x2e2   : > { %v16207_v18 = vpop.f32.mrf.mxu1 }
 0x2e3   : > { %13913 = vmatmul.mubr.msk.f32.gmra.mxu1 %vm2907_vm7, %v16003_v50 }
 0x2e4   : > { %v16211_v10 = vpop.f32.mrf.mxu1  ;;  %13915 = vmatprep.mubr.msk.f32.mxu1 %vm2907_vm7, %v16005_v4 }
 0x2e6   : > { %v16217_v63 = vpop.f32.mrf.mxu1 }
 0x2e7   : > { %13916 = vmatmul.mubr.msk.f32.gmra.mxu1 %vm2907_vm7, %v16016_v37 }
 0x2e8   : > { %13918 = vmatprep.mubr.msk.f32.mxu1 %vm2907_vm7, %v16018_v33 }
 0x2e9   : > { %v16223_v5 = vpop.f32.mrf.mxu1 }
 0x2eb   : > { %13919 = vmatmul.mubr.msk.f32.gmra.mxu1 %vm2907_vm7, %v16029_v48  ;;  %v16229_v22 = vpop.f32.mrf.mxu1 }
 0x2ec   : > { %13921 = vmatprep.mubr.msk.f32.mxu1 %vm2907_vm7, %v16035_v7 }
 0x2ef   : > { %13922 = vmatmul.mubr.msk.f32.gmra.mxu1 %vm2907_vm7, %v16043_v58 }
 0x2f0   : > { %13924 = vmatprep.mubr.msk.f32.mxu1 %vm2907_vm7, %v16045_v12  ;;  %v13811_v12 = vpop.f32.mrf.mxu0 }
 0x2f2   : > { %v16233_v52 = vpop.f32.mrf.mxu1 }
 0x2f3   : > { %13925 = vmatmul.mubr.msk.f32.gmra.mxu1 %vm2907_vm7, %v16056_v26  ;;  %v3574_v26 = vpop.f32.mrf.mxu0 }
 0x2f4   : > { %v16237_v25 = vpop.f32.mrf.mxu1  ;;  %13927 = vmatprep.mubr.msk.f32.mxu1 %vm2907_vm7, %v16058_v62 }
 0x2f6   : > { %v16241_v38 = vpop.f32.mrf.mxu1 }
 0x2f7   : > { %13928 = vmatmul.mubr.msk.f32.gmra.mxu1 %vm2907_vm7, %v16068_v39  ;;  %v13814_v39 = vpop.f32.mrf.mxu0 }
 0x2f8   : > { %v16245_v30 = vpop.f32.mrf.mxu1  ;;  %13930 = vmatprep.mubr.msk.f32.mxu1 %vm2907_vm7, %v16075_v2 }
 0x2f9   : > { %v3584_v2 = vpop.f32.mrf.mxu0 }
 0x2fa   : > { %v16251_v17 = vpop.f32.mrf.mxu1 }
 0x2fb   : > { %13931 = vmatmul.mubr.msk.f32.gmra.mxu1 %vm2907_vm7, %v16083_v43  ;;  %v13817_v27 = vpop.f32.mrf.mxu0 }
 0x2fc   : > { %13933 = vmatprep.mubr.msk.f32.mxu1 %vm2907_vm7, %v16085_v59  ;;  %v16257_v8 = vpop.f32.mrf.mxu1 }
 0x2fd   : > { %v3594_v59 = vpop.f32.mrf.mxu0 }
 0x2ff   : > { %13934 = vmatmul.mubr.msk.f32.gmra.mxu1 %vm2907_vm7, %v16096_v36  ;;  %v13820_v36 = vpop.f32.mrf.mxu0 }
 0x300   : > { %13936 = vmatprep.mubr.msk.f32.mxu1 %vm2907_vm7, %v16102_v14 }
 0x302   : > { %v16261_v31 = vpop.f32.mrf.mxu1 }
 0x303   : > { %13937 = vmatmul.mubr.msk.f32.gmra.mxu1 %vm2907_vm7, %v16108_v60  ;;  %v3604_v60 = vpop.f32.mrf.mxu0 }
 0x304   : > { %13939 = vmatprep.mubr.msk.f32.mxu1 %vm2907_vm7, %v16115_v16  ;;  %v16267_v35 = vpop.f32.mrf.mxu1 }
 0x305   : > { %v16338_v3 = vpop.f32.mrf.mxu0 }
 0x306   : > { %v16273_v55 = vpop.f32.mrf.mxu1 }
 0x307   : > { %13940 = vmatmul.mubr.msk.f32.gmra.mxu1 %vm2907_vm7, %v16122_v41  ;;  %v3614_v41 = vpop.f32.mrf.mxu0 }
 0x308   : > { %13942 = vmatprep.mubr.msk.f32.mxu1 %vm2907_vm7, %v16124_v54  ;;  %v16279_v56 = vpop.f32.mrf.mxu1 }
 0x30a   : > { %v16285_v40 = vpop.f32.mrf.mxu1 }
 0x30b   : > { %13943 = vmatmul.mubr.msk.f32.gmra.mxu1 %vm2907_vm7, %v16134_v28  ;;  %v16346_v28 = vpop.f32.mrf.mxu0 }
 0x30c   : > { %13945 = vmatprep.mubr.msk.f32.mxu1 %vm2907_vm7, %v16141_v46  ;;  %v16291_v61 = vpop.f32.mrf.mxu1 }
 0x30d   : > { %v16350_v46 = vpop.f32.mrf.mxu0 }
 0x30f   : > { %13946 = vmatmul.mubr.msk.f32.gmra.mxu1 %vm2907_vm7, %v16143_v42  ;;  %v16356_v9 = vpop.f32.mrf.mxu0 }
 0x310   : > { %13948 = vmatprep.mubr.msk.f32.mxu1 %vm2907_vm7, %v16154_v11  ;;  %v16295_v47 = vpop.f32.mrf.mxu1 }
 0x312   : > { %v16298_v23 = vpop.f32.mrf.mxu1 }
 0x313   : > { %13949 = vmatmul.mubr.msk.f32.gmra.mxu1 %vm2907_vm7, %v16159_v44  ;;  %v16360_v44 = vpop.f32.mrf.mxu0 }
 0x314   : > { %13951 = vmatprep.mubr.msk.f32.mxu1 %vm2907_vm7, %v16161_v32  ;;  %v16300_v13 = vpop.f32.mrf.mxu1 }
 0x316   : > { %v16302_v50 = vpop.f32.mrf.mxu1 }
 0x317   : > { %13952 = vmatmul.mubr.msk.f32.gmra.mxu1 %vm2907_vm7, %v3858_v24  ;;  %v16364_v24 = vpop.f32.mrf.mxu0 }
 0x318   : > { %13954 = vmatprep.mubr.msk.f32.mxu1 %vm2907_vm7, %v3859_v29 }
 0x319   : > { %v16304_v4 = vpop.f32.mrf.mxu1 }
 0x31b   : > { %13955 = vmatmul.mubr.msk.f32.gmra.mxu1 %vm2907_vm7, %v3860_v34  ;;  %v16306_v53 = vpop.f32.mrf.mxu1  ;;  %v3580_v34 = vadd.f32 %v13811_v12, %v16203_v0  ;;  %v3590_v12 = vadd.f32 %v13814_v39, %v16211_v10  ;;  %vm5225_vm7 = vcmask 130048  }
 0x320   : > { %v16308_v37 = vpop.f32.mrf.mxu1 }
 0x322   : > { %v16310_v33 = vpop.f32.mrf.mxu1 }
 0x324   : > { %v16312_v15 = vpop.f32.mrf.mxu1 }
 0x326   : > { %v16314_v48 = vpop.f32.mrf.mxu1 }
 0x329   : > { %v16316_v7 = vpop.f32.mrf.mxu1 }
 0x32b   : > { %v16318_v1 = vpop.f32.mrf.mxu1 }
 0x330   : > { %v16320_v19 = vpop.f32.mrf.mxu1 }
 0x332   : > { %v16322_v58 = vpop.f32.mrf.mxu1 }
 0x334   : > { %v16324_v45 = vpop.f32.mrf.mxu1 }
 0x336   : > { %v16326_v62 = vpop.f32.mrf.mxu1 }
 0x33b   : > { %v16328_v51 = vpop.f32.mrf.mxu1 }
 0x33c   : > { %20115 = vst [vmem:[#allocation6_spill] sm:$0xff] %v16328_v51  ;;  %v3585_v51 = vadd.f32 %v3584_v2, %v16217_v63 }
 0x33d   : > { %v16330_v57 = vpop.f32.mrf.mxu1 }
 0x33f   : > { %v16332_v43 = vpop.f32.mrf.mxu1 }
 0x340   : > { %20116 = vst [vmem:[#allocation5_spill] sm:$0xff] %v16332_v43  ;;  %v3600_v43 = vadd.f32 %v13817_v27, %v16223_v5 }
 0x341   : > { %v16334_v21 = vpop.f32.mrf.mxu1 }
 0x342   : > { %20117 = vst [vmem:[#allocation3_spill] sm:$0xff] %v16334_v21 }
 0x344   : > { %v16336_v14 = vpop.f32.mrf.mxu1 }
 0x345   : > { %20118 = vst [vmem:[#allocation4_spill] sm:$0xff] %v16336_v14 }
 0x346   : > { %v16340_v16 = vpop.f32.mrf.mxu1 }
 0x347   : > { %20119 = vst [vmem:[#allocation7_spill] sm:$0xff] %v16340_v16 }
 0x34b   : > { %v16342_v49 = vpop.f32.mrf.mxu1 }
 0x34c   : > { %20120 = vst [vmem:[#allocation8_spill] sm:$0xff] %v16342_v49 }
 0x34d   : > { %v16344_v54 = vpop.f32.mrf.mxu1 }
 0x34e   : > { %20121 = vst [vmem:[#allocation9_spill] sm:$0xff] %v16344_v54 }
 0x35e   : > { %v16348_v6 = vpop.f32.mrf.mxu1 }
 0x35f   : > { %20122 = vst [vmem:[#allocation10_spill] sm:$0xff] %v16348_v6  ;;  %v3575_v6 = vadd.f32 %v3574_v26, %v16207_v18 }
 0x360   : > { %v16352_v42 = vpop.f32.mrf.mxu1 }
 0x361   : > { %20123 = vst [vmem:[#allocation11_spill] sm:$0xff] %v16352_v42 }
 0x372   : > { %v16354_v20 = vpop.f32.mrf.mxu1 }
 0x373   : > { %20124 = vst [vmem:[#allocation12_spill] sm:$0xff] %v16354_v20  ;;  %v16372_v20 = vpop.f32.mrf.mxu0 }
 0x374   : > { %v16358_v11 = vpop.f32.mrf.mxu1 }
 0x375   : > { %20125 = vst [vmem:[#allocation13_spill] sm:$0xff] %v16358_v11 }
 0x37b   : > { %v16362_v32 = vpop.f32.mrf.mxu1 }
 0x37c   : > { %20126 = vst [vmem:[#allocation14_spill] sm:$0xff] %v16362_v32 }
 0x37d   : > { %v16366_v29 = vpop.f32.mrf.mxu1 }
 0x37e   : > { %20127 = vst [vmem:[#allocation15_spill] sm:$0xff] %v16366_v29  ;;  %v16379_v29 = vpop.f32.mrf.mxu0 }
 0x37f   : > { %v13887_v49 = vpop.f32.mrf.mxu1 }
 0x380   : > { %v16370_v42 = vadd.f32 %v13887_v49, %v3580_v34  ;;  %v16390_v21 = vpop.f32.mrf.mxu0 }
 0x381   : > { %v4077_v14 = vpop.f32.mrf.mxu1 }
 0x382   : > { %v16374_v54 = vadd.f32 %v4077_v14, %v3575_v6  ;;  %v4413_v32 = vrot.slane %v16370_v42, 1  ;;  %v3595_v6 = vadd.f32 %v3594_v59, %v16229_v22  ;;  %v4621_v63 = vrot.slane %v16370_v42, 2 }
 0x383   : > { %v13890_v11 = vpop.f32.mrf.mxu1  ;;  %v3605_v59 = vadd.f32 %v3604_v60, %v16237_v25 }
 0x384   : > { %20128 = vst [vmem:[#allocation16_spill] sm:$0xff] %v16374_v54  ;;  %v4412_v16 = vrot.slane %v16374_v54, 1  ;;  %v4620_v18 = vrot.slane %v16374_v54, 2  ;;  %v16387_v2 = vadd.f32 %v13890_v11, %v3590_v12  ;;  %v16402_v12 = vpop.f32.mrf.mxu0 }
 0x385   : > { %v4087_v0 = vpop.f32.mrf.mxu1 }
 0x386   : > { %v4318_v26 = vadd.f32 %v4087_v0, %v3585_v51  ;;  %v4414_v49 = vsel %vm2092_vm5, %v4412_v16, %v4413_v32  ;;  %v4622_v51 = vsel %vm2301_vm4, %v4620_v18, %v4621_v63  ;;  %v4417_v11 = vrot.slane %v16387_v2, 1 }
 0x387   : > { %4492 = vrot.lane.b32.xlu0 %v4414_v49, %s14681_s12  ;;  %v13893_v14 = vpop.f32.mrf.mxu1  ;;  %v3610_v0 = vadd.f32 %v13820_v36, %v16233_v52  ;;  %v4625_v52 = vrot.slane %v16387_v2, 2 }
 0x388   : > { %v4415_v34 = vrot.slane %v4318_v26, 1  ;;  %v4623_v39 = vrot.slane %v4318_v26, 2  ;;  %v4321_v5 = vadd.f32 %v13893_v14, %v3600_v43  ;;  %v3615_v43 = vadd.f32 %v3614_v41, %v16245_v30  ;;  %v16415_v14 = vpop.f32.mrf.mxu0 }
 0x389   : > { %v4097_v10 = vpop.f32.mrf.mxu1  ;;  %v3625_v41 = vadd.f32 %v16350_v46, %v16257_v8 }
 0x38a   : > { %v16392_v54 = vadd.f32 %v4097_v10, %v3595_v6  ;;  %v4416_v16 = vsel %vm2092_vm5, %v4413_v32, %v4415_v34  ;;  %v4624_v49 = vsel %vm2301_vm4, %v4621_v63, %v4623_v39  ;;  %v4420_v36 = vrot.slane %v4321_v5, 1 }
 0x38b   : > { %4700 = vrot.lane.b32.xlu0 %v4622_v51, %s14680_s30  ;;  %4494 = vrot.lane.b32.xlu1 %v4416_v16, %s14681_s12  ;;  %v13896_v22 = vpop.f32.mrf.mxu1  ;;  %v16420_v16 = vpop.f32.mrf.mxu0 }
 0x38c   : > { %v4418_v27 = vrot.slane %v16392_v54, 1  ;;  %v4626_v18 = vrot.slane %v16392_v54, 2  ;;  %v16413_v60 = vadd.f32 %v13896_v22, %v3610_v0 }
 0x38d   : > { %v4107_v26 = vpop.f32.mrf.mxu1 }
 0x38e   : > { %v16405_v32 = vadd.f32 %v4107_v26, %v3605_v59  ;;  %v4419_v6 = vsel %vm2092_vm5, %v4417_v11, %v4418_v27  ;;  %v4627_v39 = vsel %vm2301_vm4, %v4625_v52, %v4626_v18  ;;  %v4421_v51 = vsel %vm2092_vm5, %v4418_v27, %v4420_v36 }
 0x38f   : > { %4702 = vrot.lane.b32.xlu1 %v4624_v49, %s14680_s30  ;;  %4496 = vrot.lane.b32.xlu0 %v4419_v6, %s14681_s12  ;;  %v13899_v25 = vpop.f32.mrf.mxu1  ;;  %v4628_v59 = vrot.slane %v4321_v5, 2  ;;  %v4423_v22 = vrot.slane %v16413_v60, 1  ;;  %v3620_v11 = vadd.f32 %v16338_v3, %v16241_v38  ;;  %v4631_v46 = vrot.slane %v16413_v60, 2 }
 0x390   : > { %v4422_v10 = vrot.slane %v16405_v32, 1  ;;  %v4630_v27 = vrot.slane %v16405_v32, 2  ;;  %v3630_v3 = vadd.f32 %v16346_v28, %v16251_v17 }
 0x391   : > { %v4117_v34 = vpop.f32.mrf.mxu1  ;;  %v4629_v26 = vsel %vm2301_vm4, %v4626_v18, %v4628_v59  ;;  %v16439_v38 = vadd.f32 %v13899_v25, %v3620_v11  ;;  %v3635_v25 = vadd.f32 %v16360_v44, %v16267_v35  ;;  %v3645_v44 = vadd.f32 %v16372_v20, %v16279_v56 }
 0x392   : > { %v4324_v63 = vadd.f32 %v4117_v34, %v3615_v43  ;;  %v4424_v6 = vsel %vm2092_vm5, %v4422_v10, %v4423_v22  ;;  %v16434_v43 = vpop.f32.mrf.mxu0  ;;  %v4632_v34 = vsel %vm2301_vm4, %v4630_v27, %v4631_v46  ;;  %v3655_v20 = vadd.f32 %v16390_v21, %v16291_v61 }
 0x393   : > { %4704 = vrot.lane.b32.xlu1 %v4627_v39, %s14680_s30  ;;  %4498 = vrot.lane.b32.xlu0 %v4421_v51, %s14681_s12  ;;  %v13902_v30 = vpop.f32.mrf.mxu1  ;;  %v4427_v17 = vrot.slane %v16439_v38, 1 }
 0x394   : > { %v4425_v49 = vrot.slane %v4324_v63, 1  ;;  %v4633_v52 = vrot.slane %v4324_v63, 2  ;;  %v16446_v39 = vpop.f32.mrf.mxu0  ;;  %v4327_v28 = vadd.f32 %v13902_v30, %v3630_v3  ;;  %v3640_v63 = vadd.f32 %v16356_v9, %v16261_v31 }
 0x395   : > { %v4127_v0 = vpop.f32.mrf.mxu1  ;;  %v4635_v31 = vrot.slane %v16439_v38, 2 }
 0x396   : > { %v16431_v5 = vadd.f32 %v4127_v0, %v3625_v41  ;;  %v4426_v10 = vsel %vm2092_vm5, %v4423_v22, %v4425_v49  ;;  %v4634_v11 = vsel %vm2301_vm4, %v4631_v46, %v4633_v52  ;;  %v4430_v9 = vrot.slane %v4327_v28, 1 }
 0x397   : > { %4706 = vrot.lane.b32.xlu1 %v4629_v26, %s14680_s30  ;;  %4500 = vrot.lane.b32.xlu0 %v4424_v6, %s14681_s12  ;;  %v13905_v8 = vpop.f32.mrf.mxu1  ;;  %v16460_v26 = vpop.f32.mrf.mxu0  ;;  %v4638_v52 = vrot.slane %v4327_v28, 2 }
 0x398   : > { %v4428_v36 = vrot.slane %v16431_v5, 1  ;;  %v4636_v41 = vrot.slane %v16431_v5, 2  ;;  %v16467_v30 = vadd.f32 %v13905_v8, %v3640_v63 }
 0x399   : > { %v4137_v18 = vpop.f32.mrf.mxu1  ;;  %v16469_v27 = vpop.f32.mrf.mxu0 }
 0x39a   : > { %v16456_v22 = vadd.f32 %v4137_v18, %v3635_v25  ;;  %v4429_v0 = vsel %vm2092_vm5, %v4427_v17, %v4428_v36  ;;  %v4637_v3 = vsel %vm2301_vm4, %v4635_v31, %v4636_v41  ;;  %v4431_v18 = vsel %vm2092_vm5, %v4428_v36, %v4430_v9 }
 0x39b   : > { %4708 = vrot.lane.b32.xlu0 %v4632_v34, %s14680_s30  ;;  %4502 = vrot.lane.b32.xlu1 %v4426_v10, %s14681_s12  ;;  %v13908_v51 = vpop.f32.mrf.mxu1  ;;  %v4433_v8 = vrot.slane %v16467_v30, 1  ;;  %v3650_v34 = vadd.f32 %v16364_v24, %v16273_v55  ;;  %v16481_v10 = vpop.f32.mrf.mxu0  ;;  %v4639_v17 = vsel %vm2301_vm4, %v4636_v41, %v4638_v52  ;;  %v4641_v55 = vrot.slane %v16467_v30, 2 }
 0x39c   : > { %v4432_v6 = vrot.slane %v16456_v22, 1  ;;  %v4640_v36 = vrot.slane %v16456_v22, 2  ;;  %v3660_v24 = vadd.f32 %v16379_v29, %v16285_v40 }
 0x39d   : > { %v4147_v59 = vpop.f32.mrf.mxu1  ;;  %v16493_v21 = vadd.f32 %v13908_v51, %v3650_v34  ;;  %v3665_v51 = vadd.f32 %v16415_v14, %v16298_v23  ;;  %v3675_v14 = vadd.f32 %v16434_v43, %v16302_v50  ;;  %v3685_v43 = vadd.f32 %v16460_v26, %v16306_v53 }
 0x39e   : > { %v4330_v46 = vadd.f32 %v4147_v59, %v3645_v44  ;;  %v4434_v59 = vsel %vm2092_vm5, %v4432_v6, %v4433_v8  ;;  %v4642_v31 = vsel %vm2301_vm4, %v4640_v36, %v4641_v55  ;;  %v3690_v26 = vadd.f32 %v16446_v39, %v16304_v4 }
 0x39f   : > { %4710 = vrot.lane.b32.xlu1 %v4634_v11, %s14680_s30  ;;  %4504 = vrot.lane.b32.xlu0 %v4429_v0, %s14681_s12  ;;  %v13911_v35 = vpop.f32.mrf.mxu1  ;;  %v16488_v11 = vpop.f32.mrf.mxu0  ;;  %v4437_v40 = vrot.slane %v16493_v21, 1  ;;  %v3695_v4 = vadd.f32 %v16481_v10, %v16310_v33 }
 0x3a0   : > { %v4435_v28 = vrot.slane %v4330_v46, 1  ;;  %v4643_v0 = vrot.slane %v4330_v46, 2  ;;  %v4333_v29 = vadd.f32 %v13911_v35, %v3660_v24  ;;  %v3670_v46 = vadd.f32 %v16402_v12, %v16295_v47 }
 0x3a1   : > { %v4157_v49 = vpop.f32.mrf.mxu1  ;;  %v4645_v47 = vrot.slane %v16493_v21, 2 }
 0x3a2   : > { %v16485_v63 = vadd.f32 %v4157_v49, %v3655_v20  ;;  %v4436_v9 = vsel %vm2092_vm5, %v4433_v8, %v4435_v28  ;;  %v16500_v49 = vpop.f32.mrf.mxu0  ;;  %v4644_v20 = vsel %vm2301_vm4, %v4641_v55, %v4643_v0  ;;  %v4440_v12 = vrot.slane %v4333_v29, 1 }
 0x3a3   : > { %4712 = vrot.lane.b32.xlu1 %v4637_v3, %s14680_s30  ;;  %4506 = vrot.lane.b32.xlu0 %v4431_v18, %s14681_s12  ;;  %v13914_v56 = vpop.f32.mrf.mxu1  ;;  %v4648_v24 = vrot.slane %v4333_v29, 2  ;;  %v3705_v10 = vadd.f32 %v16500_v49, %v16314_v48 }
 0x3a4   : > { %v4438_v44 = vrot.slane %v16485_v63, 1  ;;  %v4646_v18 = vrot.slane %v16485_v63, 2  ;;  %v16514_v34 = vpop.f32.mrf.mxu0  ;;  %v16521_v35 = vadd.f32 %v13914_v56, %v3670_v46 }
 0x3a5   : > { %v4167_v25 = vpop.f32.mrf.mxu1 }
 0x3a6   : > { %v16510_v52 = vadd.f32 %v4167_v25, %v3665_v51  ;;  %v4439_v8 = vsel %vm2092_vm5, %v4437_v40, %v4438_v44  ;;  %v4647_v28 = vsel %vm2301_vm4, %v4645_v47, %v4646_v18  ;;  %v3714_v55 = vpop.f32.mrf.mxu0  ;;  %v4443_v56 = vrot.slane %v16521_v35, 1 }
 0x3a7   : > { %4714 = vrot.lane.b32.xlu1 %v4639_v17, %s14680_s30  ;;  %4508 = vrot.lane.b32.xlu0 %v4434_v59, %s14681_s12  ;;  %v13917_v61 = vpop.f32.mrf.mxu1  ;;  %v4441_v59 = vsel %vm2092_vm5, %v4438_v44, %v4440_v12  ;;  %v4649_v44 = vsel %vm2301_vm4, %v4646_v18, %v4648_v24  ;;  %v3715_v49 = vadd.f32 %v3714_v55, %v16318_v1 }
 0x3a8   : > { %v4442_v17 = vrot.slane %v16510_v52, 1  ;;  %v16535_v0 = vpop.f32.mrf.mxu0 }
 0x3a9   : > { %v4177_v41 = vpop.f32.mrf.mxu1 }
 0x3aa   : > { %v4336_v36 = vadd.f32 %v4177_v41, %v3675_v14  ;;  %v3680_v41 = vadd.f32 %v16420_v16, %v16300_v13  ;;  %v4444_v29 = vsel %vm2092_vm5, %v4442_v17, %v4443_v56  ;;  %v4651_v13 = vrot.slane %v16521_v35, 2  ;;  %v3724_v46 = vpop.f32.mrf.mxu0 }
 0x3ab   : > { %4716 = vrot.lane.b32.xlu0 %v4642_v31, %s14680_s30  ;;  %4510 = vrot.lane.b32.xlu1 %v4436_v9, %s14681_s12  ;;  %v13920_v6 = vpop.f32.mrf.mxu1  ;;  %v4650_v9 = vrot.slane %v16510_v52, 2  ;;  %v3700_v17 = vadd.f32 %v16469_v27, %v16308_v37 }
 0x3ac   : > { %v4445_v51 = vrot.slane %v4336_v36, 1  ;;  %v16547_v16 = vadd.f32 %v13917_v61, %v3680_v41  ;;  %v16554_v47 = vpop.f32.mrf.mxu0  ;;  %v4339_v12 = vadd.f32 %v13920_v6, %v3690_v26 }
 0x3ad   : > { %v4187_v3 = vpop.f32.mrf.mxu1 }
 0x3ae   : > { %v16539_v40 = vadd.f32 %v4187_v3, %v3685_v43  ;;  %v4446_v14 = vsel %vm2092_vm5, %v4443_v56, %v4445_v51  ;;  %v4447_v39 = vrot.slane %v16547_v16, 1  ;;  %v3734_v56 = vpop.f32.mrf.mxu0  ;;  %v4655_v37 = vrot.slane %v16547_v16, 2 }
 0x3af   : > { %4718 = vrot.lane.b32.xlu1 %v4644_v20, %s14680_s30  ;;  %4512 = vrot.lane.b32.xlu0 %v4439_v8, %s14681_s12  ;;  %v13923_v23 = vpop.f32.mrf.mxu1  ;;  %v4653_v20 = vrot.slane %v4336_v36, 2  ;;  %v4652_v8 = vsel %vm2301_vm4, %v4650_v9, %v4651_v13  ;;  %v4450_v27 = vrot.slane %v4339_v12, 1 }
 0x3b0   : > { %v4448_v3 = vrot.slane %v16539_v40, 1  ;;  %v16577_v6 = vadd.f32 %v13923_v23, %v3700_v17 }
 0x3b1   : > { %v4197_v25 = vpop.f32.mrf.mxu1  ;;  %v4654_v24 = vsel %vm2301_vm4, %v4651_v13, %v4653_v20  ;;  %v4658_v13 = vrot.slane %v4339_v12, 2 }
 0x3b2   : > { %v4449_v43 = vsel %vm2092_vm5, %v4447_v39, %v4448_v3  ;;  %v4451_v51 = vsel %vm2092_vm5, %v4448_v3, %v4450_v27  ;;  %v4453_v23 = vrot.slane %v16577_v6, 1  ;;  %v4661_v55 = vrot.slane %v16577_v6, 2 }
 0x3b3   : > { %4720 = vrot.lane.b32.xlu1 %v4647_v28, %s14680_s30  ;;  %4514 = vrot.lane.b32.xlu0 %v4441_v59, %s14681_s12  ;;  %v16528_v50 = vpop.f32.mrf.mxu1  ;;  %v4656_v28 = vrot.slane %v16539_v40, 2  ;;  %v16566_v59 = vadd.f32 %v4197_v25, %v3695_v4 }
 0x3b5   : > { %v4207_v31 = vpop.f32.mrf.mxu1  ;;  %v4452_v41 = vrot.slane %v16566_v59, 1  ;;  %v4657_v9 = vsel %vm2301_vm4, %v4655_v37, %v4656_v28  ;;  %v4659_v20 = vsel %vm2301_vm4, %v4656_v28, %v4658_v13  ;;  %v4660_v3 = vrot.slane %v16566_v59, 2 }
 0x3b7   : > { %4722 = vrot.lane.b32.xlu1 %v4649_v44, %s14680_s30  ;;  %4516 = vrot.lane.b32.xlu0 %v4444_v29, %s14681_s12  ;;  %v16544_v53 = vpop.f32.mrf.mxu1  ;;  %v4342_v44 = vadd.f32 %v4207_v31, %v3705_v10  ;;  %v16582_v29 = vpop.f32.mrf.mxu0  ;;  %v3710_v31 = vadd.f32 %v16488_v11, %v16312_v15  ;;  %v4454_v4 = vsel %vm2092_vm5, %v4452_v41, %v4453_v23 }
 0x3b8   : > { %v3720_v11 = vadd.f32 %v16514_v34, %v16316_v7  ;;  %v4662_v28 = vsel %vm2301_vm4, %v4660_v3, %v4661_v55  ;;  %v3725_v10 = vadd.f32 %v3724_v46, %v16322_v58  ;;  %v3730_v7 = vadd.f32 %v16535_v0, %v16320_v19 }
 0x3b9   : > { %v4217_v18 = vpop.f32.mrf.mxu1  ;;  %v3744_v39 = vpop.f32.mrf.mxu0  ;;  %v16603_v15 = vadd.f32 %v16528_v50, %v3710_v31  ;;  %v3735_v58 = vadd.f32 %v3734_v56, %v16326_v62 }
 0x3ba   : > { %v4345_v37 = vadd.f32 %v16544_v53, %v3720_v11  ;;  %v3745_v62 = vadd.f32 %v3744_v39, %v16330_v57  ;;  %v20129_v57 = vld [vmem:[#allocation3_spill] sm:$0xff] }
 0x3bb   : > { %4724 = vrot.lane.b32.xlu0 %v4652_v8, %s14680_s30  ;;  %4518 = vrot.lane.b32.xlu1 %v4446_v14, %s14681_s12  ;;  %v16558_v61 = vpop.f32.mrf.mxu1  ;;  %v4455_v8 = vrot.slane %v4342_v44, 1  ;;  %v16594_v14 = vadd.f32 %v4217_v18, %v3715_v49  ;;  %v13865_v12 = vpop.f32.mrf.mxu0  ;;  %v4663_v18 = vrot.slane %v4342_v44, 2  ;;  %v4457_v50 = vrot.slane %v16603_v15, 1 }
 0x3bc   : > { %v4665_v53 = vrot.slane %v16603_v15, 2  ;;  %v4460_v19 = vrot.slane %v4345_v37, 1  ;;  %v16629_v0 = vadd.f32 %v16558_v61, %v3730_v7  ;;  %v4668_v31 = vrot.slane %v4345_v37, 2 }
 0x3bd   : > { %v4227_v36 = vpop.f32.mrf.mxu1  ;;  %v4458_v17 = vrot.slane %v16594_v14, 1  ;;  %v3754_v34 = vpop.f32.mrf.mxu0  ;;  %v4666_v27 = vrot.slane %v16594_v14, 2  ;;  %v4664_v44 = vsel %vm2301_vm4, %v4661_v55, %v4663_v18  ;;  %v3740_v61 = vadd.f32 %v16554_v47, %v16324_v45 }
 0x3be   : > { %v16618_v41 = vadd.f32 %v4227_v36, %v3725_v10  ;;  %v4463_v56 = vrot.slane %v16629_v0, 1  ;;  %v3755_v39 = vadd.f32 %v3754_v34, %v20129_v57  ;;  %v4671_v45 = vrot.slane %v16629_v0, 2  ;;  %v20134_v57 = vld [vmem:[#allocation4_spill] sm:$0xff] }
 0x3bf   : > { %4726 = vrot.lane.b32.xlu1 %v4654_v24, %s14680_s30  ;;  %4520 = vrot.lane.b32.xlu0 %v4449_v43, %s14681_s12  ;;  %v16572_v33 = vpop.f32.mrf.mxu1  ;;  %v4456_v24 = vsel %vm2092_vm5, %v4453_v23, %v4455_v8  ;;  %v13868_v46 = vpop.f32.mrf.mxu0  ;;  %v4667_v49 = vsel %vm2301_vm4, %v4665_v53, %v4666_v27  ;;  %v4461_v23 = vsel %vm2092_vm5, %v4458_v17, %v4460_v19 }
 0x3c0   : > { %v4462_v36 = vrot.slane %v16618_v41, 1  ;;  %v4670_v8 = vrot.slane %v16618_v41, 2  ;;  %v16652_v47 = vadd.f32 %v16572_v33, %v3740_v61  ;;  %v20131_v33 = vld [vmem:[#allocation7_spill] sm:$0xff] }
 0x3c1   : > { %v4237_v25 = vpop.f32.mrf.mxu1  ;;  %v3764_v3 = vpop.f32.mrf.mxu0 }
 0x3c2   : > { %v4348_v13 = vadd.f32 %v4237_v25, %v3735_v58  ;;  %v4669_v25 = vsel %vm2301_vm4, %v4666_v27, %v4668_v31  ;;  %v4464_v11 = vsel %vm2092_vm5, %v4462_v36, %v4463_v56  ;;  %v4672_v37 = vsel %vm2301_vm4, %v4670_v8, %v4671_v45  ;;  %v20133_v8 = vld [vmem:[#allocation9_spill] sm:$0xff] }
 0x3c3   : > { %4728 = vrot.lane.b32.xlu1 %v4657_v9, %s14680_s30  ;;  %4522 = vrot.lane.b32.xlu0 %v4451_v51, %s14681_s12  ;;  %v16586_v48 = vpop.f32.mrf.mxu1  ;;  %v4459_v9 = vsel %vm2092_vm5, %v4457_v50, %v4458_v17  ;;  %v20130_v17 = vld [vmem:[#allocation5_spill] sm:$0xff]  ;;  %v3765_v34 = vadd.f32 %v3764_v3, %v20131_v33  ;;  %v20135_v33 = vld [vmem:[#allocation11_spill] sm:$0xff] }
 0x3c5   : > { %v4247_v26 = vpop.f32.mrf.mxu1 }
 0x3c6   : > { %v16642_v55 = vadd.f32 %v4247_v26, %v3745_v62  ;;  %v4673_v26 = vrot.slane %v4348_v13, 2 }
 0x3c7   : > { %4730 = vrot.lane.b32.xlu1 %v4659_v20, %s14680_s30  ;;  %4524 = vrot.lane.b32.xlu0 %v4454_v4, %s14681_s12  ;;  %v16599_v1 = vpop.f32.mrf.mxu1  ;;  %v4465_v4 = vrot.slane %v4348_v13, 1 }
 0x3c8   : > { %v4468_v10 = vrot.slane %v16642_v55, 1  ;;  %v4674_v53 = vsel %vm2301_vm4, %v4671_v45, %v4673_v26  ;;  %v4676_v19 = vrot.slane %v16642_v55, 2 }
 0x3c9   : > { %v4257_v43 = vpop.f32.mrf.mxu1  ;;  %v4466_v7 = vsel %vm2092_vm5, %v4463_v56, %v4465_v4 }
 0x3ca   : > { %v16658_v50 = vadd.f32 %v4257_v43, %v3755_v39  ;;  %v3770_v39 = vadd.f32 %v13868_v46, %v20134_v57 }
 0x3cb   : > { %4732 = vrot.lane.b32.xlu0 %v4662_v28, %s14680_s30  ;;  %4526 = vrot.lane.b32.xlu1 %v4456_v24, %s14681_s12  ;;  %v16622_v51 = vpop.f32.mrf.mxu1  ;;  %v3760_v28 = vadd.f32 %v13865_v12, %v20130_v17  ;;  %v16655_v24 = vpop.f32.mrf.mxu0  ;;  %v4467_v12 = vrot.slane %v16652_v47, 1 }
 0x3cc   : > { %v4472_v36 = vrot.slane %v16658_v50, 1 }
 0x3cd   : > { %v4267_v20 = vpop.f32.mrf.mxu1  ;;  %v3774_v58 = vpop.f32.mrf.mxu0 }
 0x3ce   : > { %v4354_v13 = vadd.f32 %v4267_v20, %v3765_v34  ;;  %v3775_v4 = vadd.f32 %v3774_v58, %v20133_v8 }
 0x3cf   : > { %4734 = vrot.lane.b32.xlu1 %v4664_v44, %s14680_s30  ;;  %4528 = vrot.lane.b32.xlu0 %v4459_v9, %s14681_s12  ;;  %v16645_v18 = vpop.f32.mrf.mxu1  ;;  %v16667_v44 = vadd.f32 %v16599_v1, %v3760_v28  ;;  %v20132_v9 = vld [vmem:[#allocation6_spill] sm:$0xff]  ;;  %v4675_v1 = vrot.slane %v16652_v47, 2 }
 0x3d0   : > { %v3750_v43 = vadd.f32 %v16582_v29, %v20132_v9  ;;  %v4475_v56 = vrot.slane %v4354_v13, 1  ;;  %v4683_v45 = vrot.slane %v4354_v13, 2 }
 0x3d1   : > { %v4277_v27 = vpop.f32.mrf.mxu1  ;;  %v4473_v62 = vrot.slane %v16667_v44, 1  ;;  %v4677_v61 = vsel %vm2301_vm4, %v4675_v1, %v4676_v19 }
 0x3d2   : > { %v4351_v29 = vadd.f32 %v16586_v48, %v3750_v43  ;;  %v12297_v48 = vld [vmem:[%s20086_s5 + $0x18] sm:$0xff]  ;;  %v16689_v17 = vadd.f32 %v4277_v27, %v3775_v4  ;;  %v16702_v27 = vadd.f32 %v16622_v51, %v3770_v39  ;;  %v4680_v43 = vrot.slane %v16658_v50, 2  ;;  %v20137_v51 = vld [vmem:[#allocation13_spill] sm:$0xff] }
 0x3d3   : > { %4736 = vrot.lane.b32.xlu1 %v4667_v49, %s14680_s30  ;;  %4530 = vrot.lane.b32.xlu0 %v4461_v23, %s14681_s12  ;;  %v4469_v49 = vsel %vm2092_vm5, %v4467_v12, %v4468_v10  ;;  %v13874_v23 = vpop.f32.mrf.mxu0  ;;  %v13950_v31 = vpop.f32.mrf.mxu1  ;;  %v4474_v3 = vsel %vm2092_vm5, %v4472_v36, %v4473_v62  ;;  %v4476_v26 = vsel %vm2092_vm5, %v4473_v62, %v4475_v56  ;;  %v4681_v12 = vrot.slane %v16667_v44, 2  ;;  %v20138_v56 = vld [vmem:[#allocation8_spill] sm:$0xff] }
 0x3d4   : > { %13957 = vmatprep.subr.mxu0 %v12297_v48  ;;  %v4678_v46 = vrot.slane %v4351_v29, 2  ;;  %v4478_v58 = vrot.slane %v16689_v17, 1 }
 0x3d5   : > { %v3784_v20 = vpop.f32.mrf.mxu0  ;;  %13958 = vmatpush3.msra.mxu0 %v12297_v48  ;;  %v4684_v13 = vsel %vm2301_vm4, %v4681_v12, %v4683_v45 }
 0x3d6   : > { %v3785_v34 = vadd.f32 %v3784_v20, %v20135_v33  ;;  %v4679_v36 = vsel %vm2301_vm4, %v4676_v19, %v4678_v46  ;;  %v4686_v19 = vrot.slane %v16689_v17, 2  ;;  %v5124_v46 = vld [vmem:[#allocation2] sm:$0xff] }
 0x3d7   : > { %4738 = vrot.lane.b32.xlu1 %v4669_v25, %s14680_s30  ;;  %4532 = vrot.lane.b32.xlu0 %v4464_v11, %s14681_s12  ;;  %v4287_v25 = vpop.f32.mrf.mxu1  ;;  %v4470_v11 = vrot.slane %v4351_v29, 1 }
 0x3d8   : > { %14037 = vmatprep.mubr.msk.f32.mxu1 %vm5225_vm7, %v5124_v46 }
 0x3d9   : > { %v4471_v28 = vsel %vm2092_vm5, %v4468_v10, %v4470_v11  ;;  %v20136_v10 = vld [vmem:[#allocation10_spill] sm:$0xff] }
 0x3da   : > { %v3790_v9 = vadd.f32 %v13874_v23, %v20136_v10  ;;  %v4477_v23 = vrot.slane %v16702_v27, 1 }
 0x3db   : > { %4740 = vrot.lane.b32.xlu0 %v4672_v37, %s14680_s30  ;;  %4534 = vrot.lane.b32.xlu1 %v4466_v7, %s14681_s12  ;;  %v16693_v37 = vpop.f32.mrf.mxu0  ;;  %v16695_v7 = vpop.f32.mrf.mxu1 }
 0x3dc   : > { %v16715_v62 = vadd.f32 %v13950_v31, %v3790_v9  ;;  %v4479_v8 = vsel %vm2092_vm5, %v4477_v23, %v4478_v58  ;;  %v4685_v31 = vrot.slane %v16702_v27, 2 }
 0x3dd   : > { %v4297_v1 = vpop.f32.mrf.mxu1 }
 0x3de   : > { %v4687_v48 = vsel %vm2301_vm4, %v4685_v31, %v4686_v19  ;;  %v4691_v9 = vrot.slane %v16715_v62, 2  ;;  %v12296_v31 = vld [vmem:[%s20086_s5 + $0x10] sm:$0xff] }
 0x3df   : > { %4742 = vrot.lane.b32.xlu1 %v4674_v53, %s14680_s30  ;;  %4536 = vrot.lane.b32.xlu0 %v4469_v49, %s14681_s12  ;;  %v16707_v53 = vadd.f32 %v4287_v25, %v3785_v34  ;;  %v3794_v49 = vpop.f32.mrf.mxu0  ;;  %v5172_v34 = vld [vmem:[%s20086_s5] sm:$0xff] }
 0x3e0   : > { %v3795_v29 = vadd.f32 %v3794_v49, %v20137_v51  ;;  %v16754_v49 = vld [vmem:[%s20085_s4] ss:$0 sm:$0xff]  ;;  %13959 = vmatprep.subr.mxu0 %v12296_v31 }
 0x3e1   : > { %v4482_v20 = vrot.slane %v16707_v53, 1  ;;  %13960 = vmatpush3.msra.mxu0 %v12296_v31 }
 0x3e2   : > { %v16722_v25 = vadd.f32 %v4297_v1, %v3795_v29 }
 0x3e3   : > { %4744 = vrot.lane.b32.xlu1 %v4677_v61, %s14680_s30  ;;  %4540 = vrot.lane.b32.xlu0 %v4474_v3, %s14681_s12  ;;  %v3780_v61 = vadd.f32 %v16655_v24, %v20138_v56  ;;  %v4682_v3 = vsel %vm2301_vm4, %v4680_v43, %v4681_v12  ;;  %v4483_v24 = vrot.slane %v16715_v62, 1  ;;  %v4690_v12 = vrot.slane %v16707_v53, 2  ;;  %v20139_v43 = vld [vmem:[#allocation16_spill] sm:$0xff] }
 0x3e4   : > { %v4485_v11 = vrot.slane %v16722_v25, 1 }
 0x3e5   : > { %v4357_v4 = vadd.f32 %v16645_v18, %v3780_v61  ;;  %v4484_v57 = vsel %vm2092_vm5, %v4482_v20, %v4483_v24  ;;  %v4692_v23 = vsel %vm2301_vm4, %v4690_v12, %v4691_v9 }
 0x3e7   : > { %4538 = vrot.lane.b32.xlu1 %v4471_v28, %s14681_s12  ;;  %4542 = vrot.lane.b32.xlu0 %v4476_v26, %s14681_s12  ;;  %v4480_v39 = vrot.slane %v4357_v4, 1  ;;  %v4486_v28 = vsel %vm2092_vm5, %v4483_v24, %v4485_v11  ;;  %v4688_v18 = vrot.slane %v4357_v4, 2  ;;  %v5173_v26 = vld [vmem:[%s20086_s5 + $0x8] sm:$0xff]  ;;  %v16765_v4 = vpop.f32.mrf.mxu0  ;;  %v16767_v24 = vpop.f32.mrf.mxu1 }
 0x3e8   : > { %14033 = vmatprep.subr.mxu1 %v5173_v26 }
 0x3e9   : > { %v4481_v45 = vsel %vm2092_vm5, %v4478_v58, %v4480_v39  ;;  %v4689_v10 = vsel %vm2301_vm4, %v4686_v19, %v4688_v18  ;;  %14034 = vmatpush3.msra.mxu1 %v5173_v26  ;;  %v3804_v18 = vpop.f32.mrf.mxu0  ;;  %v4693_v26 = vrot.slane %v16722_v25, 2 }
 0x3ea   : > { %14035 = vmatprep.subr.mxu1 %v5172_v34 }
 0x3eb   : > { %4746 = vrot.lane.b32.xlu1 %v4679_v36, %s14680_s30  ;;  %4750 = vrot.lane.b32.xlu0 %v4684_v13, %s14680_s30  ;;  %v5125_v36 = vld [vmem:[#allocation2 + $0x8] sm:$0xff]  ;;  %v5126_v13 = vld [vmem:[#allocation2 + $0x10] sm:$0xff] }
 0x3ec   : > { %14036 = vmatpush3.msra.mxu1 %v5172_v34 }
 0x3ed   : > { %14038 = vmatmul.mubr.msk.f32.vlgmr.msra.gmra.mxu1 %vm5225_vm7, %v5125_v36 }
 0x3ee   : > { %14040 = vmatprep.mubr.msk.f32.mxu1 %vm5225_vm7, %v5126_v13 }
 0x3ef   : > { %4748 = vrot.lane.b32.xlu1 %v4682_v3, %s14680_s30  ;;  %4544 = vrot.lane.b32.xlu0 %v4479_v8, %s14681_s12 }
 0x3f3   : > { %4752 = vrot.lane.b32.xlu1 %v4687_v48, %s14680_s30  ;;  %4548 = vrot.lane.b32.xlu0 %v4484_v57, %s14681_s12 }
 0x3f7   : > { %4546 = vrot.lane.b32.xlu1 %v4481_v45, %s14681_s12  ;;  %4550 = vrot.lane.b32.xlu0 %v4486_v28, %s14681_s12 }
 0x3f9   : > { %v4493_v33 = vpop.permute.xlu0 %4492 }
 0x3fa   : > { %v4588_v58 = vadd.f32 %v4493_v33, %v20139_v43  ;;  %v4307_v33 = vpop.f32.mrf.mxu1 }
 0x3fb   : > { %4754 = vrot.lane.b32.xlu1 %v4689_v10, %s14680_s30 }
 0x3fd   : > { %v4701_v1 = vpop.permute.xlu0 %4700  ;;  %v4495_v51 = vpop.permute.xlu1 %4494 }
 0x3fe   : > { %v4796_v29 = vadd.f32 %v4701_v1, %v4588_v58  ;;  %v4589_v61 = vadd.f32 %v4495_v51, %v16370_v42  ;;  %v20141_v1 = vld [vmem:[#allocation12_spill] sm:$0xff] }
 0x3ff   : > { %4756 = vrot.lane.b32.xlu1 %v4692_v23, %s14680_s30  ;;  %v3800_v51 = vadd.f32 %v16693_v37, %v20141_v1  ;;  %v20142_v1 = vld [vmem:[#allocation14_spill] sm:$0xff] }
 0x400   : > { %v4835_v56 = vadd.f32 %v16754_v49, %v4796_v29 }
 0x401   : > { %v4703_v3 = vpop.permute.xlu1 %4702  ;;  %v4497_v19 = vpop.permute.xlu0 %4496 }
 0x402   : > { %v4797_v20 = vadd.f32 %v4703_v3, %v4589_v61  ;;  %vm4867_vm11 = vcmp.ge.f32.partialorder %v4835_v56, 0.0  ;;  %v4899_v8 = vmul.f32 0.2, %v4835_v56  ;;  %v4590_v48 = vadd.f32 %v4497_v19, %v16387_v2  ;;  %v20140_v2 = vld [vmem:[#allocation15_spill] sm:$0xff] }
 0x403   : > { %v3805_v10 = vadd.f32 %v3804_v18, %v20140_v2  ;;  %v16787_v19 = vadd.f32 %v16695_v7, %v3800_v51  ;;  %v3810_v51 = vadd.f32 %v16765_v4, %v20142_v1 }
 0x404   : > { %v4836_v11 = vadd.f32 %v16754_v49, %v4797_v20  ;;  %v4931_v57 = vsel %vm4867_vm11, %v4835_v56, %v4899_v8  ;;  %v4694_v56 = vsel %vm2301_vm4, %v4691_v9, %v4693_v26 }
 0x405   : > { %v4705_v42 = vpop.permute.xlu1 %4704  ;;  %v4499_v39 = vpop.permute.xlu0 %4498  ;;  %4995 = vrot.lane.b32.xlu0 %v4931_v57, %s14683_s28  ;;  %v16779_v29 = vadd.f32 %v4307_v33, %v3805_v10  ;;  %v4695_v57 = vrot.slane %v16787_v19, 2 }
 0x406   : > { %v4798_v45 = vadd.f32 %v4705_v42, %v4590_v48  ;;  %vm4868_vm12 = vcmp.ge.f32.partialorder %v4836_v11, 0.0  ;;  %v4900_v28 = vmul.f32 0.2, %v4836_v11  ;;  %v4591_v46 = vadd.f32 %v4499_v39, %v16392_v54 }
 0x407   : > { %v4696_v8 = vrot.slane %v16779_v29, 2 }
 0x408   : > { %v4837_v34 = vadd.f32 %v16754_v49, %v4798_v45  ;;  %v4932_v12 = vsel %vm4868_vm12, %v4836_v11, %v4900_v28 }
 0x409   : > { %v4707_v43 = vpop.permute.xlu1 %4706  ;;  %v4501_v58 = vpop.permute.xlu0 %4500  ;;  %4997 = vrot.lane.b32.xlu0 %v4932_v12, %s14683_s28  ;;  %v4697_v18 = vsel %vm2301_vm4, %v4695_v57, %v4696_v8 }
 0x40a   : > { %v4799_v36 = vadd.f32 %v4707_v43, %v4591_v46  ;;  %vm4869_vm13 = vcmp.ge.f32.partialorder %v4837_v34, 0.0  ;;  %v4901_v13 = vmul.f32 0.2, %v4837_v34  ;;  %v4592_v23 = vadd.f32 %v4501_v58, %v16405_v32 }
 0x40b   : > { %v4488_v46 = vrot.slane %v16779_v29, 1  ;;  %v4487_v58 = vrot.slane %v16787_v19, 1 }
 0x40c   : > { %v4838_v25 = vadd.f32 %v16754_v49, %v4799_v36  ;;  %v4933_v54 = vsel %vm4869_vm13, %v4837_v34, %v4901_v13 }
 0x40d   : > { %v4709_v61 = vpop.permute.xlu0 %4708  ;;  %v4503_v3 = vpop.permute.xlu1 %4502  ;;  %4999 = vrot.lane.b32.xlu1 %v4933_v54, %s14683_s28  ;;  %4758 = vrot.lane.b32.xlu0 %v4694_v56, %s14680_s30 }
 0x40e   : > { %v4800_v20 = vadd.f32 %v4709_v61, %v4592_v23  ;;  %vm4870_vm14 = vcmp.ge.f32.partialorder %v4838_v25, 0.0  ;;  %v4902_v37 = vmul.f32 0.2, %v4838_v25  ;;  %v4593_v32 = vadd.f32 %v4503_v3, %v16413_v60 }
 0x40f   : > { %v4363_v3 = vadd.f32 %v16767_v24, %v3810_v51 }
 0x410   : > { %v4839_v31 = vadd.f32 %v16754_v49, %v4800_v20  ;;  %v4934_v11 = vsel %vm4870_vm14, %v4838_v25, %v4902_v37 }
 0x411   : > { %v4711_v9 = vpop.permute.xlu1 %4710  ;;  %v4505_v48 = vpop.permute.xlu0 %4504  ;;  %5001 = vrot.lane.b32.xlu1 %v4934_v11, %s14683_s28 }
 0x412   : > { %v4801_v42 = vadd.f32 %v4711_v9, %v4593_v32  ;;  %vm4871_vm15 = vcmp.ge.f32.partialorder %v4839_v31, 0.0  ;;  %v4903_v7 = vmul.f32 0.2, %v4839_v31  ;;  %v4594_v45 = vadd.f32 %v4505_v48, %v16439_v38 }
 0x413   : > { %v4490_v9 = vrot.slane %v4363_v3, 1 }
 0x414   : > { %v4840_v39 = vadd.f32 %v16754_v49, %v4801_v42  ;;  %v4935_v28 = vsel %vm4871_vm15, %v4839_v31, %v4903_v7 }
 0x415   : > { %v4713_v60 = vpop.permute.xlu1 %4712  ;;  %v4507_v26 = vpop.permute.xlu0 %4506  ;;  %5003 = vrot.lane.b32.xlu0 %v4935_v28, %s14683_s28  ;;  %4760 = vrot.lane.b32.xlu1 %v4697_v18, %s14680_s30  ;;  %v4491_v7 = vsel %vm2092_vm5, %v4488_v46, %v4490_v9 }
 0x416   : > { %v4802_v33 = vadd.f32 %v4713_v60, %v4594_v45  ;;  %vm4872_vm0 = vcmp.ge.f32.partialorder %v4840_v39, 0.0  ;;  %v4904_v34 = vmul.f32 0.2, %v4840_v39  ;;  %v4595_v38 = vadd.f32 %v4507_v26, %v16431_v5 }
 0x417   : > { %v4489_v5 = vsel %vm2092_vm5, %v4487_v58, %v4488_v46 }
 0x418   : > { %v4841_v12 = vadd.f32 %v16754_v49, %v4802_v33  ;;  %v4936_v2 = vsel %vm4872_vm0, %v4840_v39, %v4904_v34 }
 0x419   : > { %v4715_v10 = vpop.permute.xlu1 %4714  ;;  %v4509_v43 = vpop.permute.xlu0 %4508  ;;  %5005 = vrot.lane.b32.xlu0 %v4936_v2, %s14683_s28 }
 0x41a   : > { %v4803_v36 = vadd.f32 %v4715_v10, %v4595_v38  ;;  %vm4873_vm1 = vcmp.ge.f32.partialorder %v4841_v12, 0.0  ;;  %v4905_v13 = vmul.f32 0.2, %v4841_v12  ;;  %v4596_v23 = vadd.f32 %v4509_v43, %v16456_v22 }
 0x41c   : > { %v4842_v25 = vadd.f32 %v16754_v49, %v4803_v36  ;;  %v4937_v54 = vsel %vm4873_vm1, %v4841_v12, %v4905_v13 }
 0x41d   : > { %v4717_v56 = vpop.permute.xlu0 %4716  ;;  %v4511_v61 = vpop.permute.xlu1 %4510  ;;  %5007 = vrot.lane.b32.xlu1 %v4937_v54, %s14683_s28  ;;  %4552 = vrot.lane.b32.xlu0 %v4489_v5, %s14681_s12 }
 0x41e   : > { %v4804_v20 = vadd.f32 %v4717_v56, %v4596_v23  ;;  %vm4874_vm8 = vcmp.ge.f32.partialorder %v4842_v25, 0.0  ;;  %v4906_v37 = vmul.f32 0.2, %v4842_v25  ;;  %v4597_v31 = vadd.f32 %v4511_v61, %v16467_v30 }
 0x41f   : > { %v4698_v30 = vrot.slane %v4363_v3, 2 }
 0x420   : > { %v4843_v4 = vadd.f32 %v16754_v49, %v4804_v20  ;;  %v4938_v32 = vsel %vm4874_vm8, %v4842_v25, %v4906_v37 }
 0x421   : > { %v4719_v22 = vpop.permute.xlu1 %4718  ;;  %v4513_v11 = vpop.permute.xlu0 %4512  ;;  %5009 = vrot.lane.b32.xlu1 %v4938_v32, %s14683_s28 }
 0x422   : > { %v4805_v48 = vadd.f32 %v4719_v22, %v4597_v31  ;;  %vm4875_vm9 = vcmp.ge.f32.partialorder %v4843_v4, 0.0  ;;  %v4907_v57 = vmul.f32 0.2, %v4843_v4  ;;  %v4598_v24 = vadd.f32 %v4513_v11, %v16493_v21 }
 0x423   : > { %v4699_v21 = vsel %vm2301_vm4, %v4696_v8, %v4698_v30 }
 0x424   : > { %v4844_v42 = vadd.f32 %v16754_v49, %v4805_v48  ;;  %v4939_v39 = vsel %vm4875_vm9, %v4843_v4, %v4907_v57 }
 0x425   : > { %v4721_v45 = vpop.permute.xlu1 %4720  ;;  %v4515_v28 = vpop.permute.xlu0 %4514  ;;  %4554 = vrot.lane.b32.xlu1 %v4491_v7, %s14681_s12  ;;  %5011 = vrot.lane.b32.xlu0 %v4939_v39, %s14683_s28 }
 0x426   : > { %v4806_v18 = vadd.f32 %v4721_v45, %v4598_v24  ;;  %vm4876_vm10 = vcmp.ge.f32.partialorder %v4844_v42, 0.0  ;;  %v4908_v60 = vmul.f32 0.2, %v4844_v42  ;;  %v4599_v33 = vadd.f32 %v4515_v28, %v16485_v63 }
 0x428   : > { %v4845_v26 = vadd.f32 %v16754_v49, %v4806_v18  ;;  %v4940_v34 = vsel %vm4876_vm10, %v4844_v42, %v4908_v60  ;;  %v16849_v60 = vld [vmem:[%s20086_s5 + $0x28] sm:$0xff] }
 0x429   : > { %v4723_v46 = vpop.permute.xlu1 %4722  ;;  %v4517_v12 = vpop.permute.xlu0 %4516  ;;  %4762 = vrot.lane.b32.xlu1 %v4699_v21, %s14680_s30  ;;  %5013 = vrot.lane.b32.xlu0 %v4940_v34, %s14683_s28 }
 0x42a   : > { %v4807_v38 = vadd.f32 %v4723_v46, %v4599_v33  ;;  %vm4877_vm11 = vcmp.ge.f32.partialorder %v4845_v26, 0.0  ;;  %v4909_v2 = vmul.f32 0.2, %v4845_v26  ;;  %v4600_v43 = vadd.f32 %v4517_v12, %v16510_v52  ;;  %14109 = vmatprep.subr.mxu0 %v16849_v60 }
 0x42c   : > { %v4846_v10 = vadd.f32 %v16754_v49, %v4807_v38  ;;  %v4941_v58 = vsel %vm4877_vm11, %v4845_v26, %v4909_v2 }
 0x42d   : > { %v4725_v63 = vpop.permute.xlu0 %4724  ;;  %v4519_v36 = vpop.permute.xlu1 %4518  ;;  %5015 = vrot.lane.b32.xlu0 %v4941_v58, %s14683_s28 }
 0x42e   : > { %v4808_v8 = vadd.f32 %v4725_v63, %v4600_v43  ;;  %vm4878_vm12 = vcmp.ge.f32.partialorder %v4846_v10, 0.0  ;;  %v4910_v13 = vmul.f32 0.2, %v4846_v10  ;;  %v4601_v51 = vadd.f32 %v4519_v36, %v16521_v35 }
 0x430   : > { %v4847_v1 = vadd.f32 %v16754_v49, %v4808_v8  ;;  %v4942_v25 = vsel %vm4878_vm12, %v4846_v10, %v4910_v13 }
 0x431   : > { %v4727_v23 = vpop.permute.xlu1 %4726  ;;  %v4521_v54 = vpop.permute.xlu0 %4520  ;;  %5017 = vrot.lane.b32.xlu1 %v4942_v25, %s14683_s28 }
 0x432   : > { %v4809_v5 = vadd.f32 %v4727_v23, %v4601_v51  ;;  %vm4879_vm13 = vcmp.ge.f32.partialorder %v4847_v1, 0.0  ;;  %v4911_v52 = vmul.f32 0.2, %v4847_v1  ;;  %v4602_v61 = vadd.f32 %v4521_v54, %v16547_v16 }
 0x434   : > { %v4848_v56 = vadd.f32 %v16754_v49, %v4809_v5  ;;  %v4943_v3 = vsel %vm4879_vm13, %v4847_v1, %v4911_v52 }
 0x435   : > { %v4729_v20 = vpop.permute.xlu1 %4728  ;;  %v4523_v37 = vpop.permute.xlu0 %4522  ;;  %5019 = vrot.lane.b32.xlu0 %v4943_v3, %s14683_s28 }
 0x436   : > { %v4810_v4 = vadd.f32 %v4729_v20, %v4602_v61  ;;  %vm4880_vm14 = vcmp.ge.f32.partialorder %v4848_v56, 0.0  ;;  %v4912_v35 = vmul.f32 0.2, %v4848_v56  ;;  %v4603_v32 = vadd.f32 %v4523_v37, %v16539_v40 }
 0x438   : > { %v4849_v31 = vadd.f32 %v16754_v49, %v4810_v4  ;;  %v4944_v22 = vsel %vm4880_vm14, %v4848_v56, %v4912_v35 }
 0x439   : > { %v4731_v11 = vpop.permute.xlu1 %4730  ;;  %v4525_v9 = vpop.permute.xlu0 %4524  ;;  %5021 = vrot.lane.b32.xlu1 %v4944_v22, %s14683_s28 }
 0x43a   : > { %v4811_v48 = vadd.f32 %v4731_v11, %v4603_v32  ;;  %vm4881_vm15 = vcmp.ge.f32.partialorder %v4849_v31, 0.0  ;;  %v4913_v16 = vmul.f32 0.2, %v4849_v31  ;;  %v4604_v42 = vadd.f32 %v4525_v9, %v16566_v59 }
 0x43c   : > { %v4850_v57 = vadd.f32 %v16754_v49, %v4811_v48  ;;  %v4945_v24 = vsel %vm4881_vm15, %v4849_v31, %v4913_v16 }
 0x43d   : > { %v4733_v7 = vpop.permute.xlu0 %4732  ;;  %v4527_v39 = vpop.permute.xlu1 %4526  ;;  %5023 = vrot.lane.b32.xlu0 %v4945_v24, %s14683_s28 }
 0x43e   : > { %v4812_v45 = vadd.f32 %v4733_v7, %v4604_v42  ;;  %vm4882_vm0 = vcmp.ge.f32.partialorder %v4850_v57, 0.0  ;;  %v4914_v40 = vmul.f32 0.2, %v4850_v57  ;;  %v4605_v30 = vadd.f32 %v4527_v39, %v16577_v6 }
 0x440   : > { %v4851_v28 = vadd.f32 %v16754_v49, %v4812_v45  ;;  %v4946_v18 = vsel %vm4882_vm0, %v4850_v57, %v4914_v40 }
 0x441   : > { %v4735_v26 = vpop.permute.xlu1 %4734  ;;  %v4529_v59 = vpop.permute.xlu0 %4528  ;;  %5025 = vrot.lane.b32.xlu1 %v4946_v18, %s14683_s28 }
 0x442   : > { %v4813_v33 = vadd.f32 %v4735_v26, %v4605_v30  ;;  %vm4883_vm1 = vcmp.ge.f32.partialorder %v4851_v28, 0.0  ;;  %v4915_v21 = vmul.f32 0.2, %v4851_v28  ;;  %v4606_v46 = vadd.f32 %v4529_v59, %v16603_v15 }
 0x444   : > { %v4852_v34 = vadd.f32 %v16754_v49, %v4813_v33  ;;  %v4947_v6 = vsel %vm4883_vm1, %v4851_v28, %v4915_v21 }
 0x445   : > { %v4737_v12 = vpop.permute.xlu1 %4736  ;;  %v4531_v38 = vpop.permute.xlu0 %4530  ;;  %5027 = vrot.lane.b32.xlu0 %v4947_v6, %s14683_s28 }
 0x446   : > { %v4814_v2 = vadd.f32 %v4737_v12, %v4606_v46  ;;  %vm4884_vm8 = vcmp.ge.f32.partialorder %v4852_v34, 0.0  ;;  %v4916_v10 = vmul.f32 0.2, %v4852_v34  ;;  %v4607_v58 = vadd.f32 %v4531_v38, %v16594_v14 }
 0x448   : > { %v4853_v43 = vadd.f32 %v16754_v49, %v4814_v2  ;;  %v4948_v63 = vsel %vm4884_vm8, %v4852_v34, %v4916_v10 }
 0x449   : > { %v4739_v36 = vpop.permute.xlu1 %4738  ;;  %v4533_v8 = vpop.permute.xlu0 %4532  ;;  %5029 = vrot.lane.b32.xlu1 %v4948_v63, %s14683_s28 }
 0x44a   : > { %v4815_v13 = vadd.f32 %v4739_v36, %v4607_v58  ;;  %vm4885_vm9 = vcmp.ge.f32.partialorder %v4853_v43, 0.0  ;;  %v4917_v15 = vmul.f32 0.2, %v4853_v43  ;;  %v4608_v51 = vadd.f32 %v4533_v8, %v16618_v41 }
 0x44c   : > { %v4854_v1 = vadd.f32 %v16754_v49, %v4815_v13  ;;  %v4949_v25 = vsel %vm4885_vm9, %v4853_v43, %v4917_v15  ;;  %vm5091_vm9 = vcmask 130144  }
 0x44d   : > { %v4741_v23 = vpop.permute.xlu0 %4740  ;;  %v4535_v54 = vpop.permute.xlu1 %4534  ;;  %5031 = vrot.lane.b32.xlu0 %v4949_v25, %s14683_s28 }
 0x44e   : > { %v4816_v5 = vadd.f32 %v4741_v23, %v4608_v51  ;;  %vm4886_vm10 = vcmp.ge.f32.partialorder %v4854_v1, 0.0  ;;  %v4918_v14 = vmul.f32 0.2, %v4854_v1  ;;  %v4609_v56 = vadd.f32 %v4535_v54, %v16629_v0 }
 0x450   : > { %v4855_v52 = vadd.f32 %v16754_v49, %v4816_v5  ;;  %v4950_v61 = vsel %vm4886_vm10, %v4854_v1, %v4918_v14 }
 0x451   : > { %v4743_v3 = vpop.permute.xlu1 %4742  ;;  %v4537_v20 = vpop.permute.xlu0 %4536  ;;  %5033 = vrot.lane.b32.xlu1 %v4950_v61, %s14683_s28 }
 0x452   : > { %v4817_v37 = vadd.f32 %v4743_v3, %v4609_v56  ;;  %vm4887_vm11 = vcmp.ge.f32.partialorder %v4855_v52, 0.0  ;;  %v4919_v41 = vmul.f32 0.2, %v4855_v52  ;;  %v4610_v35 = vadd.f32 %v4537_v20, %v16652_v47 }
 0x454   : > { %v4856_v4 = vadd.f32 %v16754_v49, %v4817_v37  ;;  %v4951_v31 = vsel %vm4887_vm11, %v4855_v52, %v4919_v41 }
 0x455   : > { %v4745_v32 = vpop.permute.xlu1 %4744  ;;  %v4541_v22 = vpop.permute.xlu0 %4540  ;;  %5035 = vrot.lane.b32.xlu0 %v4951_v31, %s14683_s28 }
 0x456   : > { %v4818_v11 = vadd.f32 %v4745_v32, %v4610_v35  ;;  %vm4888_vm12 = vcmp.ge.f32.partialorder %v4856_v4, 0.0  ;;  %v4920_v0 = vmul.f32 0.2, %v4856_v4  ;;  %v4612_v30 = vadd.f32 %v4541_v22, %v16658_v50 }
 0x458   : > { %v4857_v9 = vadd.f32 %v16754_v49, %v4818_v11  ;;  %v4952_v48 = vsel %vm4888_vm12, %v4856_v4, %v4920_v0  ;;  %v12394_v11 = vld [vmem:[%s20086_s5 + $0x20] sm:$0xff] }
 0x459   : > { %v4539_v16 = vpop.permute.xlu1 %4538  ;;  %v4543_v57 = vpop.permute.xlu0 %4542  ;;  %5037 = vrot.lane.b32.xlu1 %v4952_v48, %s14683_s28 }
 0x45a   : > { %vm4889_vm13 = vcmp.ge.f32.partialorder %v4857_v9, 0.0  ;;  %v4921_v42 = vmul.f32 0.2, %v4857_v9  ;;  %v4611_v24 = vadd.f32 %v4539_v16, %v16642_v55  ;;  %v4613_v47 = vadd.f32 %v4543_v57, %v16667_v44 }
 0x45c   : > { %v4953_v7 = vsel %vm4889_vm13, %v4857_v9, %v4921_v42 }
 0x45d   : > { %v4747_v39 = vpop.permute.xlu1 %4746  ;;  %v4751_v45 = vpop.permute.xlu0 %4750  ;;  %5039 = vrot.lane.b32.xlu0 %v4953_v7, %s14683_s28 }
 0x45e   : > { %v4819_v40 = vadd.f32 %v4747_v39, %v4611_v24  ;;  %v4821_v28 = vadd.f32 %v4751_v45, %v4613_v47 }
 0x460   : > { %v4858_v18 = vadd.f32 %v16754_v49, %v4819_v40  ;;  %v4860_v26 = vadd.f32 %v16754_v49, %v4821_v28 }
 0x461   : > { %v4749_v59 = vpop.permute.xlu1 %4748  ;;  %v4545_v33 = vpop.permute.xlu0 %4544 }
 0x462   : > { %v4820_v21 = vadd.f32 %v4749_v59, %v4612_v30  ;;  %vm4890_vm14 = vcmp.ge.f32.partialorder %v4858_v18, 0.0  ;;  %v4922_v55 = vmul.f32 0.2, %v4858_v18  ;;  %v4614_v34 = vadd.f32 %v4545_v33, %v16702_v27 }
 0x463   : > { %v4924_v6 = vmul.f32 0.2, %v4860_v26  ;;  %vm4892_vm15 = vcmp.ge.f32.partialorder %v4860_v26, 0.0 }
 0x464   : > { %v4859_v44 = vadd.f32 %v16754_v49, %v4820_v21  ;;  %v4954_v46 = vsel %vm4890_vm14, %v4858_v18, %v4922_v55 }
 0x465   : > { %v4753_v12 = vpop.permute.xlu1 %4752  ;;  %5041 = vrot.lane.b32.xlu1 %v4954_v46, %s14683_s28  ;;  %v4956_v10 = vsel %vm4892_vm15, %v4860_v26, %v4924_v6  ;;  %v4549_v8 = vpop.permute.xlu0 %4548 }
 0x466   : > { %v4822_v50 = vadd.f32 %v4753_v12, %v4614_v34  ;;  %vm4891_vm0 = vcmp.ge.f32.partialorder %v4859_v44, 0.0  ;;  %v4923_v38 = vmul.f32 0.2, %v4859_v44  ;;  %v4616_v1 = vadd.f32 %v4549_v8, %v16707_v53 }
 0x468   : > { %v4861_v2 = vadd.f32 %v16754_v49, %v4822_v50  ;;  %v4955_v43 = vsel %vm4891_vm0, %v4859_v44, %v4923_v38 }
 0x469   : > { %v4547_v58 = vpop.permute.xlu1 %4546  ;;  %5045 = vrot.lane.b32.xlu1 %v4956_v10, %s14683_s28  ;;  %5043 = vrot.lane.b32.xlu0 %v4955_v43, %s14683_s28  ;;  %v4551_v5 = vpop.permute.xlu0 %4550 }
 0x46a   : > { %vm4893_vm1 = vcmp.ge.f32.partialorder %v4861_v2, 0.0  ;;  %v4925_v27 = vmul.f32 0.2, %v4861_v2  ;;  %v4615_v63 = vadd.f32 %v4547_v58, %v16689_v17  ;;  %v4617_v3 = vadd.f32 %v4551_v5, %v16715_v62 }
 0x46c   : > { %v4957_v36 = vsel %vm4893_vm1, %v4861_v2, %v4925_v27 }
 0x46d   : > { %v4755_v13 = vpop.permute.xlu1 %4754  ;;  %5047 = vrot.lane.b32.xlu0 %v4957_v36, %s14683_s28 }
 0x46e   : > { %v4823_v15 = vadd.f32 %v4755_v13, %v4615_v63 }
 0x470   : > { %v4862_v51 = vadd.f32 %v16754_v49, %v4823_v15 }
 0x471   : > { %v4757_v25 = vpop.permute.xlu1 %4756 }
 0x472   : > { %v4824_v23 = vadd.f32 %v4757_v25, %v4616_v1  ;;  %vm4894_vm8 = vcmp.ge.f32.partialorder %v4862_v51, 0.0  ;;  %v4926_v54 = vmul.f32 0.2, %v4862_v51 }
 0x474   : > { %v4863_v14 = vadd.f32 %v16754_v49, %v4824_v23  ;;  %v4958_v52 = vsel %vm4894_vm8, %v4862_v51, %v4926_v54 }
 0x475   : > { %5049 = vrot.lane.b32.xlu1 %v4958_v52, %s14683_s28 }
 0x476   : > { %vm4895_vm10 = vcmp.ge.f32.partialorder %v4863_v14, 0.0  ;;  %v4927_v17 = vmul.f32 0.2, %v4863_v14 }
 0x477   : > { %v4996_v56 = vpop.permute.xlu0 %4995 }
 0x478   : > { %5092 = vst.msk [vmem:[#allocation2 + $0x19] sm:$0xff] %vm5091_vm9, %v4996_v56  ;;  %v4959_v61 = vsel %vm4895_vm10, %v4863_v14, %v4927_v17 }
 0x479   : > { %5051 = vrot.lane.b32.xlu0 %v4959_v61, %s14683_s28 }
 0x47b   : > { %v4998_v53 = vpop.permute.xlu0 %4997 }
 0x47c   : > { %5093 = vst.msk [vmem:[#allocation2 + $0x21] sm:$0xff] %vm5091_vm9, %v4998_v53 }
 0x47f   : > { %v5000_v20 = vpop.permute.xlu1 %4999  ;;  %v4759_v37 = vpop.permute.xlu0 %4758  ;;  %v5174_v41 = vld [vmem:[#allocation2 + $0x18] sm:$0xff] }
 0x480   : > { %5094 = vst.msk [vmem:[#allocation2 + $0x31] sm:$0xff] %vm5091_vm9, %v5000_v20  ;;  %v4825_v4 = vadd.f32 %v4759_v37, %v4617_v3  ;;  %13961 = vmatprep.mubr.msk.f32.mxu0 %vm5225_vm7, %v5174_v41  ;;  %14041 = vmatmul.mubr.msk.f32.gmra.mxu1 %vm5225_vm7, %v5174_v41 }
 0x482   : > { %v4864_v35 = vadd.f32 %v16754_v49, %v4825_v4 }
 0x483   : > { %v5002_v31 = vpop.permute.xlu1 %5001  ;;  %v5175_v32 = vld [vmem:[#allocation2 + $0x20] sm:$0xff]  ;;  %v5176_v22 = vld [vmem:[#allocation2 + $0x28] sm:$0xff] }
 0x484   : > { %5095 = vst.msk [vmem:[#allocation2 + $0x39] sm:$0xff] %vm5091_vm9, %v5002_v31  ;;  %13962 = vmatmul.mubr.msk.f32.vlgmr.msra.gmra.mxu0 %vm5225_vm7, %v5175_v32  ;;  %14043 = vmatprep.mubr.msk.f32.mxu1 %vm5225_vm7, %v5175_v32  ;;  %vm4896_vm11 = vcmp.ge.f32.partialorder %v4864_v35, 0.0  ;;  %v4928_v62 = vmul.f32 0.2, %v4864_v35 }
 0x485   : > { %13964 = vmatprep.mubr.msk.f32.mxu0 %vm5225_vm7, %v5176_v22  ;;  %14044 = vmatmul.mubr.msk.f32.gmra.mxu1 %vm5225_vm7, %v5176_v22 }
 0x486   : > { %v4960_v0 = vsel %vm4896_vm11, %v4864_v35, %v4928_v62  ;;  %14110 = vmatpush3.msra.mxu0 %v16849_v60 }
 0x487   : > { %v5004_v9 = vpop.permute.xlu0 %5003  ;;  %5053 = vrot.lane.b32.xlu1 %v4960_v0, %s14683_s28  ;;  %v16906_v48 = vld [vmem:[#allocation2 + $0x30] sm:$0xff]  ;;  %14111 = vmatprep.subr.mxu0 %v12394_v11  ;;  %v4761_v16 = vpop.permute.xlu1 %4760 }
 0x488   : > { %5096 = vst.msk [vmem:[#allocation2 + $0x49] sm:$0xff] %vm5091_vm9, %v5004_v9  ;;  %13965 = vmatmul.mubr.msk.f32.gmra.mxu0 %vm5225_vm7, %v16906_v48  ;;  %14046 = vmatprep.mubr.msk.f32.mxu1 %vm5225_vm7, %v16906_v48 }
 0x489   : > { %14112 = vmatpush3.msra.mxu0 %v12394_v11 }
 0x48b   : > { %v5006_v57 = vpop.permute.xlu0 %5005  ;;  %v16913_v42 = vld [vmem:[#allocation2 + $0x38] sm:$0xff]  ;;  %v16915_v60 = vld [vmem:[#allocation2 + $0x40] sm:$0xff] }
 0x48c   : > { %5097 = vst.msk [vmem:[#allocation2 + $0x51] sm:$0xff] %vm5091_vm9, %v5006_v57  ;;  %13967 = vmatprep.mubr.msk.f32.mxu0 %vm5225_vm7, %v16913_v42  ;;  %14047 = vmatmul.mubr.msk.f32.gmra.mxu1 %vm5225_vm7, %v16913_v42 }
 0x48d   : > { %13968 = vmatmul.mubr.msk.f32.gmra.mxu0 %vm5225_vm7, %v16915_v60  ;;  %14049 = vmatprep.mubr.msk.f32.mxu1 %vm5225_vm7, %v16915_v60 }
 0x48f   : > { %v5008_v24 = vpop.permute.xlu1 %5007  ;;  %v4553_v47 = vpop.permute.xlu0 %4552  ;;  %v16926_v7 = vld [vmem:[#allocation2 + $0x48] sm:$0xff] }
 0x490   : > { %5098 = vst.msk [vmem:[#allocation2 + $0x61] sm:$0xff] %vm5091_vm9, %v5008_v24  ;;  %v4618_v39 = vadd.f32 %v4553_v47, %v16787_v19  ;;  %13970 = vmatprep.mubr.msk.f32.mxu0 %vm5225_vm7, %v16926_v7  ;;  %14050 = vmatmul.mubr.msk.f32.gmra.mxu1 %vm5225_vm7, %v16926_v7 }
 0x492   : > { %v4826_v45 = vadd.f32 %v4761_v16, %v4618_v39 }
 0x493   : > { %v5010_v40 = vpop.permute.xlu1 %5009  ;;  %v16934_v28 = vld [vmem:[#allocation2 + $0x50] sm:$0xff]  ;;  %v16936_v30 = vld [vmem:[#allocation2 + $0x58] sm:$0xff] }
 0x494   : > { %v4865_v18 = vadd.f32 %v16754_v49, %v4826_v45  ;;  %5099 = vst.msk [vmem:[#allocation2 + $0x69] sm:$0xff] %vm5091_vm9, %v5010_v40  ;;  %13971 = vmatmul.mubr.msk.f32.gmra.mxu0 %vm5225_vm7, %v16934_v28  ;;  %14052 = vmatprep.mubr.msk.f32.mxu1 %vm5225_vm7, %v16934_v28 }
 0x495   : > { %13973 = vmatprep.mubr.msk.f32.mxu0 %vm5225_vm7, %v16936_v30  ;;  %14053 = vmatmul.mubr.msk.f32.gmra.mxu1 %vm5225_vm7, %v16936_v30 }
 0x496   : > { %vm4897_vm12 = vcmp.ge.f32.partialorder %v4865_v18, 0.0  ;;  %v4929_v19 = vmul.f32 0.2, %v4865_v18 }
 0x497   : > { %v4555_v26 = vpop.permute.xlu1 %4554  ;;  %v5012_v59 = vpop.permute.xlu0 %5011  ;;  %v16948_v33 = vld [vmem:[#allocation2 + $0x60] sm:$0xff] }
 0x498   : > { %5100 = vst.msk [vmem:[#allocation2 + $0x79] sm:$0xff] %vm5091_vm9, %v5012_v59  ;;  %13974 = vmatmul.mubr.msk.f32.gmra.mxu0 %vm5225_vm7, %v16948_v33  ;;  %14055 = vmatprep.mubr.msk.f32.mxu1 %vm5225_vm7, %v16948_v33  ;;  %v4961_v21 = vsel %vm4897_vm12, %v4865_v18, %v4929_v19  ;;  %v4619_v55 = vadd.f32 %v4555_v26, %v16779_v29 }
 0x499   : > { %5055 = vrot.lane.b32.xlu0 %v4961_v21, %s14683_s28 }
 0x49b   : > { %v4763_v44 = vpop.permute.xlu1 %4762  ;;  %v5014_v34 = vpop.permute.xlu0 %5013  ;;  %v16957_v46 = vld [vmem:[#allocation2 + $0x68] sm:$0xff]  ;;  %v16959_v6 = vld [vmem:[#allocation2 + $0x70] sm:$0xff] }
 0x49c   : > { %v4827_v12 = vadd.f32 %v4763_v44, %v4619_v55  ;;  %5101 = vst.msk [vmem:[#allocation2 + $0x81] sm:$0xff] %vm5091_vm9, %v5014_v34  ;;  %13976 = vmatprep.mubr.msk.f32.mxu0 %vm5225_vm7, %v16957_v46  ;;  %14056 = vmatmul.mubr.msk.f32.gmra.mxu1 %vm5225_vm7, %v16957_v46 }
 0x49d   : > { %13977 = vmatmul.mubr.msk.f32.gmra.mxu0 %vm5225_vm7, %v16959_v6  ;;  %14058 = vmatprep.mubr.msk.f32.mxu1 %vm5225_vm7, %v16959_v6 }
 0x49e   : > { %v4866_v29 = vadd.f32 %v16754_v49, %v4827_v12 }
 0x49f   : > { %v5016_v50 = vpop.permute.xlu0 %5015  ;;  %v16971_v38 = vld [vmem:[#allocation2 + $0x78] sm:$0xff] }
 0x4a0   : > { %5102 = vst.msk [vmem:[#allocation2 + $0x91] sm:$0xff] %vm5091_vm9, %v5016_v50  ;;  %13979 = vmatprep.mubr.msk.f32.mxu0 %vm5225_vm7, %v16971_v38  ;;  %14059 = vmatmul.mubr.msk.f32.gmra.mxu1 %vm5225_vm7, %v16971_v38  ;;  %vm4898_vm13 = vcmp.ge.f32.partialorder %v4866_v29, 0.0  ;;  %v4930_v2 = vmul.f32 0.2, %v4866_v29 }
 0x4a2   : > { %v4962_v10 = vsel %vm4898_vm13, %v4866_v29, %v4930_v2 }
 0x4a3   : > { %5057 = vrot.lane.b32.xlu1 %v4962_v10, %s14683_s28  ;;  %v5018_v43 = vpop.permute.xlu1 %5017  ;;  %v16979_v58 = vld [vmem:[#allocation2 + $0x80] sm:$0xff]  ;;  %v16981_v49 = vld [vmem:[#allocation2 + $0x88] sm:$0xff] }
 0x4a4   : > { %5103 = vst.msk [vmem:[#allocation2 + $0x99] sm:$0xff] %vm5091_vm9, %v5018_v43  ;;  %13980 = vmatmul.mubr.msk.f32.gmra.mxu0 %vm5225_vm7, %v16979_v58  ;;  %14061 = vmatprep.mubr.msk.f32.mxu1 %vm5225_vm7, %v16979_v58 }
 0x4a5   : > { %13982 = vmatprep.mubr.msk.f32.mxu0 %vm5225_vm7, %v16981_v49  ;;  %14062 = vmatmul.mubr.msk.f32.gmra.mxu1 %vm5225_vm7, %v16981_v49 }
 0x4a7   : > { %v5020_v27 = vpop.permute.xlu0 %5019  ;;  %v16992_v63 = vld [vmem:[#allocation2 + $0x90] sm:$0xff] }
 0x4a8   : > { %5104 = vst.msk [vmem:[#allocation2 + $0xa9] sm:$0xff] %vm5091_vm9, %v5020_v27  ;;  %13983 = vmatmul.mubr.msk.f32.gmra.mxu0 %vm5225_vm7, %v16992_v63  ;;  %14064 = vmatprep.mubr.msk.f32.mxu1 %vm5225_vm7, %v16992_v63 }
 0x4ab   : > { %v5022_v36 = vpop.permute.xlu1 %5021  ;;  %v16999_v8 = vld [vmem:[#allocation2 + $0x98] sm:$0xff]  ;;  %v17001_v13 = vld [vmem:[#allocation2 + $0xa0] sm:$0xff] }
 0x4ac   : > { %5105 = vst.msk [vmem:[#allocation2 + $0xb1] sm:$0xff] %vm5091_vm9, %v5022_v36  ;;  %13985 = vmatprep.mubr.msk.f32.mxu0 %vm5225_vm7, %v16999_v8  ;;  %14065 = vmatmul.mubr.msk.f32.gmra.mxu1 %vm5225_vm7, %v16999_v8 }
 0x4ad   : > { %13986 = vmatmul.mubr.msk.f32.gmra.mxu0 %vm5225_vm7, %v17001_v13  ;;  %14067 = vmatprep.mubr.msk.f32.mxu1 %vm5225_vm7, %v17001_v13 }
 0x4af   : > { %v5024_v15 = vpop.permute.xlu0 %5023  ;;  %v17012_v1 = vld [vmem:[#allocation2 + $0xa8] sm:$0xff] }
 0x4b0   : > { %5106 = vst.msk [vmem:[#allocation2 + $0xc1] sm:$0xff] %vm5091_vm9, %v5024_v15  ;;  %13988 = vmatprep.mubr.msk.f32.mxu0 %vm5225_vm7, %v17012_v1  ;;  %14068 = vmatmul.mubr.msk.f32.gmra.mxu1 %vm5225_vm7, %v17012_v1 }
 0x4b3   : > { %v5026_v51 = vpop.permute.xlu1 %5025  ;;  %v17019_v25 = vld [vmem:[#allocation2 + $0xb0] sm:$0xff]  ;;  %v17021_v23 = vld [vmem:[#allocation2 + $0xb8] sm:$0xff] }
 0x4b4   : > { %5107 = vst.msk [vmem:[#allocation2 + $0xc9] sm:$0xff] %vm5091_vm9, %v5026_v51  ;;  %13989 = vmatmul.mubr.msk.f32.gmra.mxu0 %vm5225_vm7, %v17019_v25  ;;  %14070 = vmatprep.mubr.msk.f32.mxu1 %vm5225_vm7, %v17019_v25  ;;  %v6170_v51 = vld [vmem:[#allocation2 + $0x1a0] sm:$0xff] }
 0x4b5   : > { %13991 = vmatprep.mubr.msk.f32.mxu0 %vm5225_vm7, %v17021_v23  ;;  %14071 = vmatmul.mubr.msk.f32.gmra.mxu1 %vm5225_vm7, %v17021_v23 }
 0x4b7   : > { %v5028_v54 = vpop.permute.xlu0 %5027  ;;  %v17032_v5 = vld [vmem:[#allocation2 + $0xc0] sm:$0xff] }
 0x4b8   : > { %5108 = vst.msk [vmem:[#allocation2 + $0xd9] sm:$0xff] %vm5091_vm9, %v5028_v54  ;;  %13992 = vmatmul.mubr.msk.f32.gmra.mxu0 %vm5225_vm7, %v17032_v5  ;;  %14073 = vmatprep.mubr.msk.f32.mxu1 %vm5225_vm7, %v17032_v5 }
 0x4bb   : > { %v5030_v14 = vpop.permute.xlu1 %5029  ;;  %v17039_v52 = vld [vmem:[#allocation2 + $0xc8] sm:$0xff]  ;;  %v17041_v17 = vld [vmem:[#allocation2 + $0xd0] sm:$0xff] }
 0x4bc   : > { %5109 = vst.msk [vmem:[#allocation2 + $0xe1] sm:$0xff] %vm5091_vm9, %v5030_v14  ;;  %13994 = vmatprep.mubr.msk.f32.mxu0 %vm5225_vm7, %v17039_v52  ;;  %14074 = vmatmul.mubr.msk.f32.gmra.mxu1 %vm5225_vm7, %v17039_v52 }
 0x4bd   : > { %13995 = vmatmul.mubr.msk.f32.gmra.mxu0 %vm5225_vm7, %v17041_v17  ;;  %14076 = vmatprep.mubr.msk.f32.mxu1 %vm5225_vm7, %v17041_v17 }
 0x4bf   : > { %v5032_v56 = vpop.permute.xlu0 %5031  ;;  %v17052_v61 = vld [vmem:[#allocation2 + $0xd8] sm:$0xff] }
 0x4c0   : > { %5110 = vst.msk [vmem:[#allocation2 + $0xf1] sm:$0xff] %vm5091_vm9, %v5032_v56  ;;  %13997 = vmatprep.mubr.msk.f32.mxu0 %vm5225_vm7, %v17052_v61  ;;  %14077 = vmatmul.mubr.msk.f32.gmra.mxu1 %vm5225_vm7, %v17052_v61 }
 0x4c3   : > { %v5034_v53 = vpop.permute.xlu1 %5033  ;;  %v17059_v3 = vld [vmem:[#allocation2 + $0xe0] sm:$0xff]  ;;  %v17061_v20 = vld [vmem:[#allocation2 + $0xe8] sm:$0xff] }
 0x4c4   : > { %5111 = vst.msk [vmem:[#allocation2 + $0xf9] sm:$0xff] %vm5091_vm9, %v5034_v53  ;;  %13998 = vmatmul.mubr.msk.f32.gmra.mxu0 %vm5225_vm7, %v17059_v3  ;;  %14079 = vmatprep.mubr.msk.f32.mxu1 %vm5225_vm7, %v17059_v3 }
 0x4c5   : > { %14000 = vmatprep.mubr.msk.f32.mxu0 %vm5225_vm7, %v17061_v20  ;;  %14080 = vmatmul.mubr.msk.f32.gmra.mxu1 %vm5225_vm7, %v17061_v20 }
 0x4c7   : > { %v5036_v37 = vpop.permute.xlu0 %5035  ;;  %v17072_v41 = vld [vmem:[#allocation2 + $0xf0] sm:$0xff] }
 0x4c8   : > { %5112 = vst.msk [vmem:[#allocation2 + $0x109] sm:$0xff] %vm5091_vm9, %v5036_v37  ;;  %14001 = vmatmul.mubr.msk.f32.gmra.mxu0 %vm5225_vm7, %v17072_v41  ;;  %14082 = vmatprep.mubr.msk.f32.mxu1 %vm5225_vm7, %v17072_v41 }
 0x4cb   : > { %v5038_v4 = vpop.permute.xlu1 %5037  ;;  %v17079_v35 = vld [vmem:[#allocation2 + $0xf8] sm:$0xff]  ;;  %v17081_v31 = vld [vmem:[#allocation2 + $0x100] sm:$0xff] }
 0x4cc   : > { %5113 = vst.msk [vmem:[#allocation2 + $0x111] sm:$0xff] %vm5091_vm9, %v5038_v4  ;;  %14003 = vmatprep.mubr.msk.f32.mxu0 %vm5225_vm7, %v17079_v35  ;;  %14083 = vmatmul.mubr.msk.f32.gmra.mxu1 %vm5225_vm7, %v17079_v35  ;;  %v14039_v4 = vpop.f32.mrf.mxu1 }
 0x4cd   : > { %14004 = vmatmul.mubr.msk.f32.gmra.mxu0 %vm5225_vm7, %v17081_v31  ;;  %14085 = vmatprep.mubr.msk.f32.mxu1 %vm5225_vm7, %v17081_v31 }
 0x4cf   : > { %v5040_v32 = vpop.permute.xlu0 %5039  ;;  %v17092_v22 = vld [vmem:[#allocation2 + $0x108] sm:$0xff] }
 0x4d0   : > { %5114 = vst.msk [vmem:[#allocation2 + $0x121] sm:$0xff] %vm5091_vm9, %v5040_v32  ;;  %14006 = vmatprep.mubr.msk.f32.mxu0 %vm5225_vm7, %v17092_v22  ;;  %14086 = vmatmul.mubr.msk.f32.gmra.mxu1 %vm5225_vm7, %v17092_v22 }
 0x4d3   : > { %v17099_v62 = vld [vmem:[#allocation2 + $0x110] sm:$0xff]  ;;  %v17101_v11 = vld [vmem:[#allocation2 + $0x118] sm:$0xff] }
 0x4d4   : > { %14007 = vmatmul.mubr.msk.f32.gmra.mxu0 %vm5225_vm7, %v17099_v62  ;;  %14088 = vmatprep.mubr.msk.f32.mxu1 %vm5225_vm7, %v17099_v62 }
 0x4d5   : > { %14009 = vmatprep.mubr.msk.f32.mxu0 %vm5225_vm7, %v17101_v11  ;;  %14089 = vmatmul.mubr.msk.f32.gmra.mxu1 %vm5225_vm7, %v17101_v11 }
 0x4d7   : > { %v5042_v0 = vpop.permute.xlu1 %5041  ;;  %v17111_v9 = vld [vmem:[#allocation2 + $0x120] sm:$0xff] }
 0x4d8   : > { %5115 = vst.msk [vmem:[#allocation2 + $0x129] sm:$0xff] %vm5091_vm9, %v5042_v0  ;;  %14010 = vmatmul.mubr.msk.f32.gmra.mxu0 %vm5225_vm7, %v17111_v9  ;;  %14091 = vmatprep.mubr.msk.f32.mxu1 %vm5225_vm7, %v17111_v9 }
 0x4db   : > { %v5046_v16 = vpop.permute.xlu1 %5045  ;;  %v5044_v57 = vpop.permute.xlu0 %5043 }
 0x4dc   : > { %5117 = vst.msk [vmem:[#allocation2 + $0x141] sm:$0xff] %vm5091_vm9, %v5046_v16  ;;  %5116 = vst.msk [vmem:[#allocation2 + $0x139] sm:$0xff] %vm5091_vm9, %v5044_v57 }
 0x4df   : > { %v5048_v24 = vpop.permute.xlu0 %5047  ;;  %v17120_v47 = vld [vmem:[#allocation2 + $0x128] sm:$0xff]  ;;  %v17122_v39 = vld [vmem:[#allocation2 + $0x130] sm:$0xff] }
 0x4e0   : > { %5118 = vst.msk [vmem:[#allocation2 + $0x151] sm:$0xff] %vm5091_vm9, %v5048_v24  ;;  %14012 = vmatprep.mubr.msk.f32.mxu0 %vm5225_vm7, %v17120_v47  ;;  %14092 = vmatmul.mubr.msk.f32.gmra.mxu1 %vm5225_vm7, %v17120_v47 }
 0x4e1   : > { %14013 = vmatmul.mubr.msk.f32.gmra.mxu0 %vm5225_vm7, %v17122_v39  ;;  %14094 = vmatprep.mubr.msk.f32.mxu1 %vm5225_vm7, %v17122_v39 }
 0x4e3   : > { %v17133_v45 = vld [vmem:[#allocation2 + $0x138] sm:$0xff]  ;;  %v17135_v40 = vld [vmem:[#allocation2 + $0x140] sm:$0xff]  ;;  %v17145_v18 = vld [vmem:[#allocation2 + $0x148] sm:$0xff] }
 0x4e4   : > { %14015 = vmatprep.mubr.msk.f32.mxu0 %vm5225_vm7, %v17133_v45  ;;  %14095 = vmatmul.mubr.msk.f32.gmra.mxu1 %vm5225_vm7, %v17133_v45 }
 0x4e5   : > { %14016 = vmatmul.mubr.msk.f32.gmra.mxu0 %vm5225_vm7, %v17135_v40  ;;  %14097 = vmatprep.mubr.msk.f32.mxu1 %vm5225_vm7, %v17135_v40 }
 0x4e6   : > { %14018 = vmatprep.mubr.msk.f32.mxu0 %vm5225_vm7, %v17145_v18 }
 0x4e7   : > { %v5050_v19 = vpop.permute.xlu1 %5049  ;;  %v17149_v26 = vld [vmem:[#allocation2 + $0x150] sm:$0xff] }
 0x4e8   : > { %5119 = vst.msk [vmem:[#allocation2 + $0x159] sm:$0xff] %vm5091_vm9, %v5050_v19  ;;  %14098 = vmatmul.mubr.msk.f32.gmra.mxu1 %vm5225_vm7, %v17145_v18 }
 0x4e9   : > { %14019 = vmatmul.mubr.msk.f32.gmra.mxu0 %vm5225_vm7, %v17149_v26  ;;  %14100 = vmatprep.mubr.msk.f32.mxu1 %vm5225_vm7, %v17149_v26 }
 0x4eb   : > { %v5052_v59 = vpop.permute.xlu0 %5051 }
 0x4ec   : > { %5120 = vst.msk [vmem:[#allocation2 + $0x169] sm:$0xff] %vm5091_vm9, %v5052_v59 }
 0x4ef   : > { %v17159_v21 = vld [vmem:[#allocation2 + $0x158] sm:$0xff]  ;;  %v17161_v55 = vld [vmem:[#allocation2 + $0x160] sm:$0xff] }
 0x4f0   : > { %14021 = vmatprep.mubr.msk.f32.mxu0 %vm5225_vm7, %v17159_v21  ;;  %14101 = vmatmul.mubr.msk.f32.gmra.mxu1 %vm5225_vm7, %v17159_v21 }
 0x4f1   : > { %14022 = vmatmul.mubr.msk.f32.gmra.mxu0 %vm5225_vm7, %v17161_v55  ;;  %14103 = vmatprep.mubr.msk.f32.mxu1 %vm5225_vm7, %v17161_v55 }
 0x4f3   : > { %v17171_v44 = vld [vmem:[#allocation2 + $0x168] sm:$0xff] }
 0x4f4   : > { %14024 = vmatprep.mubr.msk.f32.mxu0 %vm5225_vm7, %v17171_v44  ;;  %14104 = vmatmul.mubr.msk.f32.gmra.mxu1 %vm5225_vm7, %v17171_v44 }
 0x4f9   : > { %v5054_v34 = vpop.permute.xlu1 %5053 }
 0x4fa   : > { %5121 = vst.msk [vmem:[#allocation2 + $0x171] sm:$0xff] %vm5091_vm9, %v5054_v34 }
 0x501   : > { %v17178_v12 = vld [vmem:[#allocation2 + $0x170] sm:$0xff]  ;;  %v17180_v29 = vld [vmem:[#allocation2 + $0x178] sm:$0xff] }
 0x502   : > { %14025 = vmatmul.mubr.msk.f32.gmra.mxu0 %vm5225_vm7, %v17178_v12  ;;  %14106 = vmatprep.mubr.msk.f32.mxu1 %vm5225_vm7, %v17178_v12 }
 0x503   : > { %14027 = vmatprep.mubr.msk.f32.mxu0 %vm5225_vm7, %v17180_v29  ;;  %14107 = vmatmul.mubr.msk.f32.gmra.mxu1 %vm5225_vm7, %v17180_v29 }
 0x50b   : > { %v5056_v50 = vpop.permute.xlu0 %5055 }
 0x50c   : > { %5122 = vst.msk [vmem:[#allocation2 + $0x181] sm:$0xff] %vm5091_vm9, %v5056_v50 }
 0x513   : > { %v17191_v2 = vld [vmem:[#allocation2 + $0x180] sm:$0xff] }
 0x514   : > { %14028 = vmatmul.mubr.msk.f32.gmra.mxu0 %vm5225_vm7, %v17191_v2 }
 0x515   : > { %v5058_v10 = vpop.permute.xlu1 %5057 }
 0x516   : > { %5123 = vst.msk [vmem:[#allocation2 + $0x189] sm:$0xff] %vm5091_vm9, %v5058_v10 }
 0x51d   : > { %v17196_v43 = vld [vmem:[#allocation2 + $0x188] sm:$0xff]  ;;  %v17198_v27 = vld [vmem:[#allocation2 + $0x190] sm:$0xff] }
 0x51e   : > { %14030 = vmatprep.mubr.msk.f32.mxu0 %vm5225_vm7, %v17196_v43 }
 0x51f   : > { %14031 = vmatmul.mubr.msk.f32.gmra.mxu0 %vm5225_vm7, %v17198_v27 }
 0x520   : > { %14113 = vmatprep.mubr.msk.f32.mxu0 %vm5225_vm7, %v16906_v48 }
 0x523   : > { %14114 = vmatmul.mubr.msk.f32.vlgmr.msra.gmra.mxu0 %vm5225_vm7, %v16913_v42 }
 0x524   : > { %14116 = vmatprep.mubr.msk.f32.mxu0 %vm5225_vm7, %v16915_v60 }
 0x527   : > { %14117 = vmatmul.mubr.msk.f32.gmra.mxu0 %vm5225_vm7, %v16926_v7 }
 0x528   : > { %14119 = vmatprep.mubr.msk.f32.mxu0 %vm5225_vm7, %v16934_v28 }
 0x52b   : > { %14120 = vmatmul.mubr.msk.f32.gmra.mxu0 %vm5225_vm7, %v16936_v30 }
 0x52c   : > { %14122 = vmatprep.mubr.msk.f32.mxu0 %vm5225_vm7, %v16948_v33 }
 0x52f   : > { %14123 = vmatmul.mubr.msk.f32.gmra.mxu0 %vm5225_vm7, %v16957_v46 }
 0x530   : > { %14125 = vmatprep.mubr.msk.f32.mxu0 %vm5225_vm7, %v16959_v6 }
 0x533   : > { %14126 = vmatmul.mubr.msk.f32.gmra.mxu0 %vm5225_vm7, %v16971_v38 }
 0x534   : > { %14128 = vmatprep.mubr.msk.f32.mxu0 %vm5225_vm7, %v16979_v58 }
 0x537   : > { %14129 = vmatmul.mubr.msk.f32.gmra.mxu0 %vm5225_vm7, %v16981_v49 }
 0x538   : > { %14131 = vmatprep.mubr.msk.f32.mxu0 %vm5225_vm7, %v16992_v63 }
 0x53b   : > { %14132 = vmatmul.mubr.msk.f32.gmra.mxu0 %vm5225_vm7, %v16999_v8 }
 0x53c   : > { %14134 = vmatprep.mubr.msk.f32.mxu0 %vm5225_vm7, %v17001_v13 }
 0x53f   : > { %14135 = vmatmul.mubr.msk.f32.gmra.mxu0 %vm5225_vm7, %v17012_v1  ;;  %v6169_v1 = vld [vmem:[#allocation2 + $0x198] sm:$0xff] }
 0x540   : > { %14137 = vmatprep.mubr.msk.f32.mxu0 %vm5225_vm7, %v17019_v25 }
 0x543   : > { %14138 = vmatmul.mubr.msk.f32.gmra.mxu0 %vm5225_vm7, %v17021_v23  ;;  %v6171_v23 = vld [vmem:[#allocation2 + $0x1a8] sm:$0xff] }
 0x544   : > { %v17240_v48 = vpop.f32.mrf.mxu0  ;;  %14140 = vmatprep.mubr.msk.f32.mxu0 %vm5225_vm7, %v17032_v5 }
 0x546   : > { %v17244_v42 = vpop.f32.mrf.mxu0 }
 0x547   : > { %14141 = vmatmul.mubr.msk.f32.gmra.mxu0 %vm5225_vm7, %v17039_v52 }
 0x548   : > { %v17248_v60 = vpop.f32.mrf.mxu0  ;;  %14143 = vmatprep.mubr.msk.f32.mxu0 %vm5225_vm7, %v17041_v17 }
 0x54a   : > { %v17252_v7 = vpop.f32.mrf.mxu0 }
 0x54b   : > { %14144 = vmatmul.mubr.msk.f32.gmra.mxu0 %vm5225_vm7, %v17052_v61 }
 0x54c   : > { %14146 = vmatprep.mubr.msk.f32.mxu0 %vm5225_vm7, %v17059_v3 }
 0x54d   : > { %v17258_v28 = vpop.f32.mrf.mxu0 }
 0x54f   : > { %14147 = vmatmul.mubr.msk.f32.gmra.mxu0 %vm5225_vm7, %v17061_v20  ;;  %v17264_v30 = vpop.f32.mrf.mxu0 }
 0x550   : > { %14149 = vmatprep.mubr.msk.f32.mxu0 %vm5225_vm7, %v17072_v41 }
 0x553   : > { %14150 = vmatmul.mubr.msk.f32.gmra.mxu0 %vm5225_vm7, %v17079_v35 }
 0x554   : > { %v17268_v33 = vpop.f32.mrf.mxu0  ;;  %14152 = vmatprep.mubr.msk.f32.mxu0 %vm5225_vm7, %v17081_v31  ;;  %v5885_v31 = vpop.f32.mrf.mxu1 }
 0x556   : > { %v17272_v46 = vpop.f32.mrf.mxu0 }
 0x557   : > { %14153 = vmatmul.mubr.msk.f32.gmra.mxu0 %vm5225_vm7, %v17092_v22  ;;  %v14042_v22 = vpop.f32.mrf.mxu1 }
 0x558   : > { %14155 = vmatprep.mubr.msk.f32.mxu0 %vm5225_vm7, %v17099_v62  ;;  %v17278_v6 = vpop.f32.mrf.mxu0 }
 0x55a   : > { %v17284_v38 = vpop.f32.mrf.mxu0 }
 0x55b   : > { %14156 = vmatmul.mubr.msk.f32.gmra.mxu0 %vm5225_vm7, %v17101_v11  ;;  %v5895_v11 = vpop.f32.mrf.mxu1 }
 0x55c   : > { %14158 = vmatprep.mubr.msk.f32.mxu0 %vm5225_vm7, %v17111_v9 }
 0x55d   : > { %v17290_v58 = vpop.f32.mrf.mxu0  ;;  %v14045_v16 = vpop.f32.mrf.mxu1 }
 0x55f   : > { %14159 = vmatmul.mubr.msk.f32.gmra.mxu0 %vm5225_vm7, %v17120_v47  ;;  %v17296_v49 = vpop.f32.mrf.mxu0  ;;  %v5905_v24 = vpop.f32.mrf.mxu1 }
 0x560   : > { %14161 = vmatprep.mubr.msk.f32.mxu0 %vm5225_vm7, %v17122_v39 }
 0x561   : > { %v14048_v47 = vpop.f32.mrf.mxu1 }
 0x563   : > { %14162 = vmatmul.mubr.msk.f32.gmra.mxu0 %vm5225_vm7, %v17133_v45  ;;  %v5915_v45 = vpop.f32.mrf.mxu1 }
 0x564   : > { %14164 = vmatprep.mubr.msk.f32.mxu0 %vm5225_vm7, %v17135_v40  ;;  %v17298_v63 = vpop.f32.mrf.mxu0 }
 0x566   : > { %v17304_v36 = vpop.f32.mrf.mxu0 }
 0x567   : > { %14165 = vmatmul.mubr.msk.f32.gmra.mxu0 %vm5225_vm7, %v17145_v18  ;;  %v17373_v18 = vpop.f32.mrf.mxu1 }
 0x568   : > { %14167 = vmatprep.mubr.msk.f32.mxu0 %vm5225_vm7, %v17149_v26  ;;  %v17310_v8 = vpop.f32.mrf.mxu0 }
 0x569   : > { %v17377_v26 = vpop.f32.mrf.mxu1 }
 0x56a   : > { %v17316_v13 = vpop.f32.mrf.mxu0 }
 0x56b   : > { %14168 = vmatmul.mubr.msk.f32.gmra.mxu0 %vm5225_vm7, %v17159_v21 }
 0x56c   : > { %14170 = vmatprep.mubr.msk.f32.mxu0 %vm5225_vm7, %v17161_v55  ;;  %v17383_v55 = vpop.f32.mrf.mxu1 }
 0x56d   : > { %v17322_v15 = vpop.f32.mrf.mxu0 }
 0x56e   : > { %v17387_v34 = vpop.f32.mrf.mxu1 }
 0x56f   : > { %14171 = vmatmul.mubr.msk.f32.gmra.mxu0 %vm5225_vm7, %v17171_v44  ;;  %v17328_v25 = vpop.f32.mrf.mxu0 }
 0x570   : > { %14173 = vmatprep.mubr.msk.f32.mxu0 %vm5225_vm7, %v17178_v12 }
 0x573   : > { %14174 = vmatmul.mubr.msk.f32.gmra.mxu0 %vm5225_vm7, %v17180_v29  ;;  %v17391_v29 = vpop.f32.mrf.mxu1 }
 0x574   : > { %14176 = vmatprep.mubr.msk.f32.mxu0 %vm5225_vm7, %v17191_v2  ;;  %v17332_v54 = vpop.f32.mrf.mxu0 }
 0x575   : > { %v17395_v2 = vpop.f32.mrf.mxu1 }
 0x576   : > { %v17335_v5 = vpop.f32.mrf.mxu0 }
 0x577   : > { %14177 = vmatmul.mubr.msk.f32.gmra.mxu0 %vm5225_vm7, %v17196_v43  ;;  %v17399_v43 = vpop.f32.mrf.mxu1 }
 0x578   : > { %14179 = vmatprep.mubr.msk.f32.mxu0 %vm5225_vm7, %v17198_v27  ;;  %v17337_v14 = vpop.f32.mrf.mxu0 }
 0x57a   : > { %v17339_v52 = vpop.f32.mrf.mxu0 }
 0x57b   : > { %14180 = vmatmul.mubr.msk.f32.gmra.mxu0 %vm5225_vm7, %v6169_v1 }
 0x57c   : > { %14182 = vmatprep.mubr.msk.f32.mxu0 %vm5225_vm7, %v6170_v51  ;;  %v17405_v51 = vpop.f32.mrf.mxu1 }
 0x57d   : > { %v17341_v17 = vpop.f32.mrf.mxu0 }
 0x57f   : > { %14183 = vmatmul.mubr.msk.f32.gmra.mxu0 %vm5225_vm7, %v6171_v23  ;;  %v17343_v56 = vpop.f32.mrf.mxu0  ;;  %vm7535_vm7 = vcmask 162816  }
 0x584   : > { %v17345_v61 = vpop.f32.mrf.mxu0 }
 0x586   : > { %v17347_v53 = vpop.f32.mrf.mxu0 }
 0x588   : > { %v17349_v3 = vpop.f32.mrf.mxu0 }
 0x58a   : > { %v17351_v20 = vpop.f32.mrf.mxu0 }
 0x58d   : > { %v17353_v37 = vpop.f32.mrf.mxu0 }
 0x58f   : > { %v17355_v41 = vpop.f32.mrf.mxu0 }
 0x594   : > { %v17357_v35 = vpop.f32.mrf.mxu0 }
 0x596   : > { %v17359_v32 = vpop.f32.mrf.mxu0 }
 0x598   : > { %v17361_v62 = vpop.f32.mrf.mxu0 }
 0x599   : > { %20143 = vst [vmem:[#allocation3_spill] sm:$0xff] %v17361_v62  ;;  %v5911_v62 = vadd.f32 %v14045_v16, %v17258_v28 }
 0x59a   : > { %v17363_v0 = vpop.f32.mrf.mxu0 }
 0x5a1   : > { %v17365_v9 = vpop.f32.mrf.mxu0 }
 0x5a2   : > { %20144 = vst [vmem:[#allocation5_spill] sm:$0xff] %v17365_v9 }
 0x5a3   : > { %v17367_v57 = vpop.f32.mrf.mxu0 }
 0x5a5   : > { %v17369_v39 = vpop.f32.mrf.mxu0 }
 0x5a6   : > { %20145 = vst [vmem:[#allocation7_spill] sm:$0xff] %v17369_v39 }
 0x5a7   : > { %v17371_v40 = vpop.f32.mrf.mxu0 }
 0x5a8   : > { %20146 = vst [vmem:[#allocation6_spill] sm:$0xff] %v17371_v40 }
 0x5a9   : > { %v17375_v19 = vpop.f32.mrf.mxu0 }
 0x5aa   : > { %20147 = vst [vmem:[#allocation9_spill] sm:$0xff] %v17375_v19  ;;  %v5886_v19 = vadd.f32 %v5885_v31, %v17244_v42 }
 0x5ab   : > { %v17379_v59 = vpop.f32.mrf.mxu0 }
 0x5ac   : > { %20148 = vst [vmem:[#allocation4_spill] sm:$0xff] %v17379_v59 }
 0x5b1   : > { %v17381_v21 = vpop.f32.mrf.mxu0 }
 0x5b2   : > { %20149 = vst [vmem:[#allocation11_spill] sm:$0xff] %v17381_v21  ;;  %v5891_v21 = vadd.f32 %v14039_v4, %v17240_v48  ;;  %v5901_v4 = vadd.f32 %v14042_v22, %v17248_v60 }
 0x5b3   : > { %v17385_v44 = vpop.f32.mrf.mxu0 }
 0x5b4   : > { %20150 = vst [vmem:[#allocation10_spill] sm:$0xff] %v17385_v44  ;;  %v17413_v44 = vpop.f32.mrf.mxu1 }
 0x5c2   : > { %v17389_v12 = vpop.f32.mrf.mxu0 }
 0x5c3   : > { %20151 = vst [vmem:[#allocation13_spill] sm:$0xff] %v17389_v12 }
 0x5c4   : > { %v17393_v50 = vpop.f32.mrf.mxu0 }
 0x5c5   : > { %20152 = vst [vmem:[#allocation8_spill] sm:$0xff] %v17393_v50 }
 0x5d4   : > { %v17397_v10 = vpop.f32.mrf.mxu0 }
 0x5d5   : > { %20153 = vst [vmem:[#allocation16_spill] sm:$0xff] %v17397_v10 }
 0x5d6   : > { %v17401_v27 = vpop.f32.mrf.mxu0 }
 0x5d7   : > { %20154 = vst [vmem:[#allocation15_spill] sm:$0xff] %v17401_v27  ;;  %v5896_v27 = vadd.f32 %v5895_v11, %v17252_v7  ;;  %v5906_v7 = vadd.f32 %v5905_v24, %v17264_v30  ;;  %v5916_v24 = vadd.f32 %v5915_v45, %v17272_v46 }
 0x5df   : > { %v17403_v1 = vpop.f32.mrf.mxu0 }
 0x5e0   : > { %20155 = vst [vmem:[#allocation12_spill] sm:$0xff] %v17403_v1 }
 0x5e1   : > { %v17407_v23 = vpop.f32.mrf.mxu0 }
 0x5e2   : > { %20156 = vst [vmem:[#allocation14_spill] sm:$0xff] %v17407_v23  ;;  %v17420_v23 = vpop.f32.mrf.mxu1 }
 0x5e3   : > { %v14115_v12 = vpop.f32.mrf.mxu0 }
 0x5e4   : > { %v17411_v50 = vadd.f32 %v14115_v12, %v5891_v21  ;;  %v17425_v12 = vpop.f32.mrf.mxu1 }
 0x5e5   : > { %v6385_v10 = vpop.f32.mrf.mxu0 }
 0x5e6   : > { %v17415_v9 = vadd.f32 %v6385_v10, %v5886_v19  ;;  %v6721_v1 = vrot.slane %v17411_v50, 1  ;;  %v6929_v11 = vrot.slane %v17411_v50, 2 }
 0x5e7   : > { %v14118_v59 = vpop.f32.mrf.mxu0 }
 0x5e8   : > { %20157 = vst [vmem:[#allocation17_spill] sm:$0xff] %v17415_v9  ;;  %v6720_v39 = vrot.slane %v17415_v9, 1  ;;  %v6928_v42 = vrot.slane %v17415_v9, 2  ;;  %v17430_v10 = vadd.f32 %v14118_v59, %v5901_v4  ;;  %v5921_v4 = vadd.f32 %v14048_v47, %v17268_v33 }
 0x5e9   : > { %v6395_v48 = vpop.f32.mrf.mxu0 }
 0x5ea   : > { %v6626_v31 = vadd.f32 %v6395_v48, %v5896_v27  ;;  %v6722_v21 = vsel %vm2092_vm5, %v6720_v39, %v6721_v1  ;;  %v6930_v39 = vsel %vm2301_vm4, %v6928_v42, %v6929_v11  ;;  %v17437_v48 = vpop.f32.mrf.mxu1  ;;  %v6725_v59 = vrot.slane %v17430_v10, 1 }
 0x5eb   : > { %6800 = vrot.lane.b32.xlu0 %v6722_v21, %s14681_s12  ;;  %v14121_v19 = vpop.f32.mrf.mxu0  ;;  %v6933_v33 = vrot.slane %v17430_v10, 2 }
 0x5ec   : > { %v6723_v40 = vrot.slane %v6626_v31, 1  ;;  %v6931_v22 = vrot.slane %v6626_v31, 2  ;;  %v6629_v28 = vadd.f32 %v14121_v19, %v5911_v62  ;;  %v5926_v62 = vadd.f32 %v17377_v26, %v17284_v38 }
 0x5ed   : > { %v6405_v60 = vpop.f32.mrf.mxu0  ;;  %v5936_v26 = vadd.f32 %v17387_v34, %v17296_v49 }
 0x5ee   : > { %v17433_v9 = vadd.f32 %v6405_v60, %v5906_v7  ;;  %v6724_v27 = vsel %vm2092_vm5, %v6721_v1, %v6723_v40  ;;  %v6932_v1 = vsel %vm2301_vm4, %v6929_v11, %v6931_v22  ;;  %v17450_v7 = vpop.f32.mrf.mxu1  ;;  %v6728_v47 = vrot.slane %v6629_v28, 1 }
 0x5ef   : > { %7008 = vrot.lane.b32.xlu0 %v6930_v39, %s14680_s30  ;;  %6802 = vrot.lane.b32.xlu1 %v6724_v27, %s14681_s12  ;;  %v14124_v30 = vpop.f32.mrf.mxu0 }
 0x5f0   : > { %v6726_v16 = vrot.slane %v17433_v9, 1  ;;  %v6934_v42 = vrot.slane %v17433_v9, 2  ;;  %v17457_v45 = vadd.f32 %v14124_v30, %v5921_v4  ;;  %v17462_v27 = vpop.f32.mrf.mxu1 }
 0x5f1   : > { %v6415_v31 = vpop.f32.mrf.mxu0 }
 0x5f2   : > { %v17446_v40 = vadd.f32 %v6415_v31, %v5916_v24  ;;  %v6727_v21 = vsel %vm2092_vm5, %v6725_v59, %v6726_v16  ;;  %v6935_v22 = vsel %vm2301_vm4, %v6933_v33, %v6934_v42  ;;  %v6729_v39 = vsel %vm2092_vm5, %v6726_v16, %v6728_v47 }
 0x5f3   : > { %7010 = vrot.lane.b32.xlu1 %v6932_v1, %s14680_s30  ;;  %6804 = vrot.lane.b32.xlu0 %v6727_v21, %s14681_s12  ;;  %v14127_v46 = vpop.f32.mrf.mxu0  ;;  %v6936_v24 = vrot.slane %v6629_v28, 2  ;;  %v6731_v30 = vrot.slane %v17457_v45, 1  ;;  %v5931_v59 = vadd.f32 %v17373_v18, %v17278_v6  ;;  %v6939_v34 = vrot.slane %v17457_v45, 2 }
 0x5f4   : > { %v6730_v11 = vrot.slane %v17446_v40, 1  ;;  %v6938_v16 = vrot.slane %v17446_v40, 2  ;;  %v5941_v18 = vadd.f32 %v17383_v55, %v17290_v58 }
 0x5f5   : > { %v6425_v19 = vpop.f32.mrf.mxu0  ;;  %v6937_v31 = vsel %vm2301_vm4, %v6934_v42, %v6936_v24  ;;  %v17481_v6 = vadd.f32 %v14127_v46, %v5931_v59  ;;  %v5946_v46 = vadd.f32 %v17395_v2, %v17304_v36  ;;  %v5956_v2 = vadd.f32 %v17405_v51, %v17316_v13 }
 0x5f6   : > { %v6632_v60 = vadd.f32 %v6425_v19, %v5926_v62  ;;  %v6732_v21 = vsel %vm2092_vm5, %v6730_v11, %v6731_v30  ;;  %v17476_v62 = vpop.f32.mrf.mxu1  ;;  %v6940_v19 = vsel %vm2301_vm4, %v6938_v16, %v6939_v34  ;;  %v5966_v51 = vadd.f32 %v17420_v23, %v17328_v25 }
 0x5f7   : > { %7012 = vrot.lane.b32.xlu1 %v6935_v22, %s14680_s30  ;;  %6806 = vrot.lane.b32.xlu0 %v6729_v39, %s14681_s12  ;;  %v14130_v38 = vpop.f32.mrf.mxu0  ;;  %v6735_v58 = vrot.slane %v17481_v6, 1 }
 0x5f8   : > { %v6733_v1 = vrot.slane %v6632_v60, 1  ;;  %v6941_v33 = vrot.slane %v6632_v60, 2  ;;  %v17488_v22 = vpop.f32.mrf.mxu1  ;;  %v6635_v55 = vadd.f32 %v14130_v38, %v5941_v18  ;;  %v5951_v60 = vadd.f32 %v17391_v29, %v17298_v63 }
 0x5f9   : > { %v6435_v4 = vpop.f32.mrf.mxu0  ;;  %v6943_v63 = vrot.slane %v17481_v6, 2 }
 0x5fa   : > { %v17473_v28 = vadd.f32 %v6435_v4, %v5936_v26  ;;  %v6734_v11 = vsel %vm2092_vm5, %v6731_v30, %v6733_v1  ;;  %v17497_v24 = vpop.f32.mrf.mxu1  ;;  %v6942_v4 = vsel %vm2301_vm4, %v6939_v34, %v6941_v33  ;;  %v6738_v29 = vrot.slane %v6635_v55, 1 }
 0x5fb   : > { %7014 = vrot.lane.b32.xlu1 %v6937_v31, %s14680_s30  ;;  %6808 = vrot.lane.b32.xlu0 %v6732_v21, %s14681_s12  ;;  %v14133_v49 = vpop.f32.mrf.mxu0  ;;  %v6946_v33 = vrot.slane %v6635_v55, 2 }
 0x5fc   : > { %v6736_v47 = vrot.slane %v17473_v28, 1  ;;  %v6944_v30 = vrot.slane %v17473_v28, 2  ;;  %v17509_v38 = vadd.f32 %v14133_v49, %v5951_v60  ;;  %v17511_v16 = vpop.f32.mrf.mxu1 }
 0x5fd   : > { %v6445_v42 = vpop.f32.mrf.mxu0 }
 0x5fe   : > { %v17500_v59 = vadd.f32 %v6445_v42, %v5946_v46  ;;  %v6737_v31 = vsel %vm2092_vm5, %v6735_v58, %v6736_v47  ;;  %v6945_v18 = vsel %vm2301_vm4, %v6943_v63, %v6944_v30  ;;  %v6739_v42 = vsel %vm2092_vm5, %v6736_v47, %v6738_v29 }
 0x5ff   : > { %7016 = vrot.lane.b32.xlu0 %v6940_v19, %s14680_s30  ;;  %6810 = vrot.lane.b32.xlu1 %v6734_v11, %s14681_s12  ;;  %v14136_v39 = vpop.f32.mrf.mxu0  ;;  %v6741_v49 = vrot.slane %v17509_v38, 1  ;;  %v5961_v19 = vadd.f32 %v17399_v43, %v17310_v8  ;;  %v17523_v11 = vpop.f32.mrf.mxu1  ;;  %v6947_v58 = vsel %vm2301_vm4, %v6944_v30, %v6946_v33  ;;  %v6949_v23 = vrot.slane %v17509_v38, 2 }
 0x600   : > { %v6740_v21 = vrot.slane %v17500_v59, 1  ;;  %v6948_v47 = vrot.slane %v17500_v59, 2  ;;  %v5971_v43 = vadd.f32 %v17413_v44, %v17322_v15 }
 0x601   : > { %v6455_v26 = vpop.f32.mrf.mxu0  ;;  %v17533_v8 = vadd.f32 %v14136_v39, %v5961_v19  ;;  %v17537_v30 = vpop.f32.mrf.mxu1  ;;  %v5976_v39 = vadd.f32 %v17437_v48, %v17335_v5  ;;  %v5986_v48 = vadd.f32 %v17462_v27, %v17339_v52  ;;  %v5996_v27 = vadd.f32 %v17488_v22, %v17343_v56 }
 0x602   : > { %v6638_v34 = vadd.f32 %v6455_v26, %v5956_v2  ;;  %v6742_v26 = vsel %vm2092_vm5, %v6740_v21, %v6741_v49  ;;  %v6950_v63 = vsel %vm2301_vm4, %v6948_v47, %v6949_v23  ;;  %v5981_v21 = vadd.f32 %v17425_v12, %v17332_v54 }
 0x603   : > { %7018 = vrot.lane.b32.xlu1 %v6942_v4, %s14680_s30  ;;  %6812 = vrot.lane.b32.xlu0 %v6737_v31, %s14681_s12  ;;  %v14139_v36 = vpop.f32.mrf.mxu0  ;;  %v6745_v15 = vrot.slane %v17533_v8, 1  ;;  %v6953_v54 = vrot.slane %v17533_v8, 2  ;;  %v6001_v22 = vadd.f32 %v17476_v62, %v17341_v17 }
 0x604   : > { %v6743_v55 = vrot.slane %v6638_v34, 1  ;;  %v6951_v31 = vrot.slane %v6638_v34, 2  ;;  %v6641_v44 = vadd.f32 %v14139_v36, %v5971_v43  ;;  %v17549_v34 = vpop.f32.mrf.mxu1 }
 0x605   : > { %v6465_v1 = vpop.f32.mrf.mxu0 }
 0x606   : > { %v17527_v60 = vadd.f32 %v6465_v1, %v5966_v51  ;;  %v6744_v29 = vsel %vm2092_vm5, %v6741_v49, %v6743_v55  ;;  %v6952_v51 = vsel %vm2301_vm4, %v6949_v23, %v6951_v31  ;;  %v6748_v12 = vrot.slane %v6641_v44, 1  ;;  %v17563_v19 = vpop.f32.mrf.mxu1 }
 0x607   : > { %7020 = vrot.lane.b32.xlu1 %v6945_v18, %s14680_s30  ;;  %6814 = vrot.lane.b32.xlu0 %v6739_v42, %s14681_s12  ;;  %v14142_v13 = vpop.f32.mrf.mxu0  ;;  %v6956_v43 = vrot.slane %v6641_v44, 2 }
 0x608   : > { %v6746_v2 = vrot.slane %v17527_v60, 1  ;;  %v6954_v42 = vrot.slane %v17527_v60, 2  ;;  %v17561_v36 = vadd.f32 %v14142_v13, %v5981_v21  ;;  %v17568_v23 = vpop.f32.mrf.mxu1 }
 0x609   : > { %v6475_v46 = vpop.f32.mrf.mxu0 }
 0x60a   : > { %v17552_v33 = vadd.f32 %v6475_v46, %v5976_v39  ;;  %v6747_v49 = vsel %vm2092_vm5, %v6745_v15, %v6746_v2  ;;  %v6955_v55 = vsel %vm2301_vm4, %v6953_v54, %v6954_v42  ;;  %v6751_v13 = vrot.slane %v17561_v36, 1  ;;  %v17584_v44 = vpop.f32.mrf.mxu1 }
 0x60b   : > { %7022 = vrot.lane.b32.xlu1 %v6947_v58, %s14680_s30  ;;  %6816 = vrot.lane.b32.xlu0 %v6742_v26, %s14681_s12  ;;  %v14145_v25 = vpop.f32.mrf.mxu0  ;;  %v6749_v26 = vsel %vm2092_vm5, %v6746_v2, %v6748_v12  ;;  %v6957_v2 = vsel %vm2301_vm4, %v6954_v42, %v6956_v43  ;;  %v6011_v12 = vadd.f32 %v17497_v24, %v17345_v61 }
 0x60c   : > { %v6750_v58 = vrot.slane %v17552_v33, 1 }
 0x60d   : > { %v6485_v4 = vpop.f32.mrf.mxu0 }
 0x60e   : > { %v6644_v47 = vadd.f32 %v6485_v4, %v5986_v48  ;;  %v5991_v4 = vadd.f32 %v17450_v7, %v17337_v14  ;;  %v6752_v15 = vsel %vm2092_vm5, %v6750_v58, %v6751_v13  ;;  %v6959_v14 = vrot.slane %v17561_v36, 2  ;;  %v17598_v48 = vpop.f32.mrf.mxu1 }
 0x60f   : > { %7024 = vrot.lane.b32.xlu0 %v6950_v63, %s14680_s30  ;;  %6818 = vrot.lane.b32.xlu1 %v6744_v29, %s14681_s12  ;;  %v14148_v1 = vpop.f32.mrf.mxu0  ;;  %v6958_v63 = vrot.slane %v17552_v33, 2 }
 0x610   : > { %v6753_v29 = vrot.slane %v6644_v47, 1  ;;  %v17591_v7 = vadd.f32 %v14145_v25, %v5991_v4  ;;  %v6006_v25 = vadd.f32 %v17511_v16, %v17347_v53  ;;  %v6647_v62 = vadd.f32 %v14148_v1, %v6001_v22 }
 0x611   : > { %v6495_v18 = vpop.f32.mrf.mxu0  ;;  %v6016_v16 = vadd.f32 %v17537_v30, %v17351_v20  ;;  %v6026_v30 = vadd.f32 %v17563_v19, %v17355_v41 }
 0x612   : > { %v17581_v39 = vadd.f32 %v6495_v18, %v5996_v27  ;;  %v6961_v18 = vrot.slane %v6644_v47, 2  ;;  %v6755_v17 = vrot.slane %v17591_v7, 1  ;;  %v6045_v27 = vpop.f32.mrf.mxu1  ;;  %v6963_v61 = vrot.slane %v17591_v7, 2 }
 0x613   : > { %7026 = vrot.lane.b32.xlu1 %v6952_v51, %s14680_s30  ;;  %6820 = vrot.lane.b32.xlu0 %v6747_v49, %s14681_s12  ;;  %v14151_v5 = vpop.f32.mrf.mxu0  ;;  %v6960_v51 = vsel %vm2301_vm4, %v6958_v63, %v6959_v14  ;;  %v6754_v49 = vsel %vm2092_vm5, %v6751_v13, %v6753_v29  ;;  %v6758_v24 = vrot.slane %v6647_v62, 1 }
 0x614   : > { %v6756_v42 = vrot.slane %v17581_v39, 1  ;;  %v6964_v47 = vrot.slane %v17581_v39, 2  ;;  %v17621_v1 = vadd.f32 %v14151_v5, %v6011_v12  ;;  %v17626_v29 = vpop.f32.mrf.mxu1 }
 0x615   : > { %v6505_v46 = vpop.f32.mrf.mxu0 }
 0x616   : > { %v6757_v43 = vsel %vm2092_vm5, %v6755_v17, %v6756_v42  ;;  %v6759_v63 = vsel %vm2092_vm5, %v6756_v42, %v6758_v24  ;;  %v6761_v5 = vrot.slane %v17621_v1, 1  ;;  %v6969_v19 = vrot.slane %v17621_v1, 2 }
 0x617   : > { %7028 = vrot.lane.b32.xlu1 %v6955_v55, %s14680_s30  ;;  %6822 = vrot.lane.b32.xlu0 %v6749_v26, %s14681_s12  ;;  %v17572_v52 = vpop.f32.mrf.mxu0  ;;  %v17610_v55 = vadd.f32 %v6505_v46, %v6006_v25  ;;  %v6962_v26 = vsel %vm2301_vm4, %v6959_v14, %v6961_v18  ;;  %v6055_v25 = vpop.f32.mrf.mxu1 }
 0x619   : > { %v6515_v31 = vpop.f32.mrf.mxu0  ;;  %v6760_v13 = vrot.slane %v17610_v55, 1  ;;  %v6968_v18 = vrot.slane %v17610_v55, 2  ;;  %v14093_v17 = vpop.f32.mrf.mxu1 }
 0x61a   : > { %v6650_v4 = vadd.f32 %v6515_v31, %v6016_v16  ;;  %v6021_v31 = vadd.f32 %v17523_v11, %v17349_v3  ;;  %v6031_v11 = vadd.f32 %v17549_v34, %v17353_v37  ;;  %v6041_v34 = vadd.f32 %v17568_v23, %v17357_v35 }
 0x61b   : > { %7030 = vrot.lane.b32.xlu1 %v6957_v2, %s14680_s30  ;;  %6824 = vrot.lane.b32.xlu0 %v6752_v15, %s14681_s12  ;;  %v17588_v56 = vpop.f32.mrf.mxu0  ;;  %v6965_v2 = vsel %vm2301_vm4, %v6963_v61, %v6964_v47  ;;  %v6966_v15 = vrot.slane %v6647_v62, 2  ;;  %v6970_v12 = vsel %vm2301_vm4, %v6968_v18, %v6969_v19  ;;  %v6065_v16 = vpop.f32.mrf.mxu1 }
 0x61c   : > { %v6763_v42 = vrot.slane %v6650_v4, 1  ;;  %v17648_v3 = vadd.f32 %v17572_v52, %v6021_v31  ;;  %v6036_v52 = vadd.f32 %v17584_v44, %v17359_v32  ;;  %v6653_v37 = vadd.f32 %v17588_v56, %v6031_v11 }
 0x61d   : > { %v6525_v21 = vpop.f32.mrf.mxu0  ;;  %v6967_v22 = vsel %vm2301_vm4, %v6964_v47, %v6966_v15  ;;  %v6046_v32 = vadd.f32 %v6045_v27, %v17363_v0  ;;  %v14096_v56 = vpop.f32.mrf.mxu1  ;;  %v6056_v0 = vadd.f32 %v6055_v25, %v17367_v57  ;;  %v20159_v57 = vld [vmem:[#allocation6_spill] sm:$0xff] }
 0x61e   : > { %v6764_v47 = vsel %vm2092_vm5, %v6761_v5, %v6763_v42  ;;  %v6973_v44 = vrot.slane %v17648_v3, 2  ;;  %v6768_v35 = vrot.slane %v6653_v37, 1  ;;  %v6066_v25 = vadd.f32 %v6065_v16, %v20159_v57  ;;  %v20164_v57 = vld [vmem:[#allocation9_spill] sm:$0xff] }
 0x61f   : > { %7032 = vrot.lane.b32.xlu0 %v6960_v51, %s14680_s30  ;;  %6826 = vrot.lane.b32.xlu1 %v6754_v49, %s14681_s12  ;;  %v17602_v54 = vpop.f32.mrf.mxu0  ;;  %v17639_v51 = vadd.f32 %v6525_v21, %v6026_v30  ;;  %v6762_v49 = vsel %vm2092_vm5, %v6760_v13, %v6761_v5  ;;  %v6971_v21 = vrot.slane %v6650_v4, 2  ;;  %v6976_v5 = vrot.slane %v6653_v37, 2  ;;  %v6075_v18 = vpop.f32.mrf.mxu1 }
 0x620   : > { %v17675_v23 = vadd.f32 %v17602_v54, %v6041_v34  ;;  %v20158_v54 = vld [vmem:[#allocation3_spill] sm:$0xff] }
 0x621   : > { %v6535_v58 = vpop.f32.mrf.mxu0  ;;  %v6766_v62 = vrot.slane %v17639_v51, 1  ;;  %v6974_v61 = vrot.slane %v17639_v51, 2  ;;  %v6972_v13 = vsel %vm2301_vm4, %v6969_v19, %v6971_v21 }
 0x622   : > { %v17664_v24 = vadd.f32 %v6535_v58, %v6036_v52  ;;  %v6771_v27 = vrot.slane %v17675_v23, 1  ;;  %v17701_v52 = vpop.f32.mrf.mxu1 }
 0x623   : > { %7034 = vrot.lane.b32.xlu1 %v6962_v26, %s14680_s30  ;;  %6828 = vrot.lane.b32.xlu0 %v6757_v43, %s14681_s12  ;;  %v17616_v53 = vpop.f32.mrf.mxu0  ;;  %v6765_v43 = vrot.slane %v17648_v3, 1  ;;  %v6975_v15 = vsel %vm2301_vm4, %v6973_v44, %v6974_v61  ;;  %v6769_v30 = vsel %vm2092_vm5, %v6766_v62, %v6768_v35 }
 0x624   : > { %v6770_v58 = vrot.slane %v17664_v24, 1  ;;  %v6978_v42 = vrot.slane %v17664_v24, 2  ;;  %v6085_v44 = vpop.f32.mrf.mxu1 }
 0x625   : > { %v6545_v46 = vpop.f32.mrf.mxu0  ;;  %v6767_v4 = vsel %vm2092_vm5, %v6765_v43, %v6766_v62 }
 0x626   : > { %v6772_v11 = vsel %vm2092_vm5, %v6770_v58, %v6771_v27 }
 0x627   : > { %7036 = vrot.lane.b32.xlu1 %v6965_v2, %s14680_s30  ;;  %6830 = vrot.lane.b32.xlu0 %v6759_v63, %s14681_s12  ;;  %v17630_v20 = vpop.f32.mrf.mxu0  ;;  %v6656_v63 = vadd.f32 %v6545_v46, %v6046_v32  ;;  %v6977_v46 = vsel %vm2301_vm4, %v6974_v61, %v6976_v5  ;;  %v20162_v32 = vld [vmem:[#allocation5_spill] sm:$0xff]  ;;  %v14102_v5 = vpop.f32.mrf.mxu1 }
 0x629   : > { %v6555_v14 = vpop.f32.mrf.mxu0 }
 0x62a   : > { %v17688_v19 = vadd.f32 %v6555_v14, %v6056_v0  ;;  %v6981_v14 = vrot.slane %v6656_v63, 2 }
 0x62b   : > { %7038 = vrot.lane.b32.xlu1 %v6967_v22, %s14680_s30  ;;  %6832 = vrot.lane.b32.xlu0 %v6762_v49, %s14681_s12  ;;  %v17644_v41 = vpop.f32.mrf.mxu0  ;;  %v6051_v22 = vadd.f32 %v17598_v48, %v20158_v54  ;;  %v6773_v49 = vrot.slane %v6656_v63, 1  ;;  %v6979_v48 = vrot.slane %v17675_v23, 2 }
 0x62c   : > { %v6776_v43 = vrot.slane %v17688_v19, 1  ;;  %v6984_v58 = vrot.slane %v17688_v19, 2 }
 0x62d   : > { %v6565_v26 = vpop.f32.mrf.mxu0  ;;  %v17698_v62 = vadd.f32 %v17616_v53, %v6051_v22  ;;  %v6980_v34 = vsel %vm2301_vm4, %v6978_v42, %v6979_v48  ;;  %v6774_v61 = vsel %vm2092_vm5, %v6771_v27, %v6773_v49  ;;  %v20161_v53 = vld [vmem:[#allocation4_spill] sm:$0xff]  ;;  %v6982_v35 = vsel %vm2301_vm4, %v6979_v48, %v6981_v14  ;;  %v20163_v42 = vld [vmem:[#allocation10_spill] sm:$0xff] }
 0x62e   : > { %v17704_v37 = vadd.f32 %v6565_v26, %v6066_v25  ;;  %v6076_v16 = vadd.f32 %v6075_v18, %v20161_v53  ;;  %v6061_v26 = vadd.f32 %v17626_v29, %v20162_v32  ;;  %v6086_v49 = vadd.f32 %v6085_v44, %v20163_v42 }
 0x62f   : > { %7040 = vrot.lane.b32.xlu0 %v6970_v12, %s14680_s30  ;;  %6834 = vrot.lane.b32.xlu1 %v6764_v47, %s14681_s12  ;;  %v17668_v2 = vpop.f32.mrf.mxu0  ;;  %v20160_v12 = vld [vmem:[#allocation7_spill] sm:$0xff]  ;;  %v6081_v25 = vadd.f32 %v14096_v56, %v20164_v57  ;;  %v20165_v56 = vld [vmem:[#allocation8_spill] sm:$0xff] }
 0x630   : > { %v6071_v47 = vadd.f32 %v14093_v17, %v20160_v12  ;;  %v6775_v17 = vrot.slane %v17698_v62, 1  ;;  %v6780_v63 = vrot.slane %v17704_v37, 1  ;;  %v6659_v29 = vadd.f32 %v17630_v20, %v6061_v26  ;;  %v12447_v20 = vld [vmem:[%s20088_s7 + $0x28] sm:$0xf] }
 0x631   : > { %v6575_v31 = vpop.f32.mrf.mxu0  ;;  %14185 = vmatprep.subr.msk.mxu1 %vm3052_vm6, %v12447_v20  ;;  %v6988_v26 = vrot.slane %v17704_v37, 2 }
 0x632   : > { %14186 = vmatpush3.msk.msra.mxu1 %vm3052_vm6, %v12447_v20 }
 0x633   : > { %7042 = vrot.lane.b32.xlu1 %v6972_v13, %s14680_s30  ;;  %6836 = vrot.lane.b32.xlu0 %v6767_v4, %s14681_s12  ;;  %v17691_v21 = vpop.f32.mrf.mxu0  ;;  %v17713_v4 = vadd.f32 %v17644_v41, %v6071_v47  ;;  %v6983_v41 = vrot.slane %v17698_v62, 2 }
 0x635   : > { %v6585_v13 = vpop.f32.mrf.mxu0  ;;  %v6781_v27 = vrot.slane %v17713_v4, 1  ;;  %v6985_v22 = vsel %vm2301_vm4, %v6983_v41, %v6984_v58 }
 0x636   : > { %v17736_v12 = vadd.f32 %v6585_v13, %v6086_v49  ;;  %v6989_v13 = vrot.slane %v17713_v4, 2 }
 0x637   : > { %7044 = vrot.lane.b32.xlu1 %v6975_v15, %s14680_s30  ;;  %6838 = vrot.lane.b32.xlu0 %v6769_v30, %s14681_s12  ;;  %v6662_v15 = vadd.f32 %v6575_v31, %v6076_v16  ;;  %v6777_v30 = vsel %vm2092_vm5, %v6775_v17, %v6776_v43  ;;  %v14178_v0 = vpop.f32.mrf.mxu0  ;;  %v6782_v18 = vsel %vm2092_vm5, %v6780_v63, %v6781_v27  ;;  %v6095_v31 = vpop.f32.mrf.mxu1  ;;  %v6986_v16 = vrot.slane %v6659_v29, 2 }
 0x638   : > { %v6096_v53 = vadd.f32 %v6095_v31, %v20165_v56  ;;  %v17750_v17 = vadd.f32 %v17668_v2, %v6081_v25  ;;  %v6786_v44 = vrot.slane %v17736_v12, 1  ;;  %v20167_v2 = vld [vmem:[#allocation15_spill] sm:$0xff] }
 0x639   : > { %v6783_v54 = vrot.slane %v6662_v15, 1  ;;  %v6991_v48 = vrot.slane %v6662_v15, 2  ;;  %v6987_v63 = vsel %vm2301_vm4, %v6984_v58, %v6986_v16  ;;  %v6994_v58 = vrot.slane %v17736_v12, 2  ;;  %v7480_v16 = vld [vmem:[%s20088_s7] sm:$0xff] }
 0x63b   : > { %7046 = vrot.lane.b32.xlu1 %v6977_v46, %s14680_s30  ;;  %6840 = vrot.lane.b32.xlu0 %v6772_v11, %s14681_s12  ;;  %v6595_v46 = vpop.f32.mrf.mxu0  ;;  %v6778_v11 = vrot.slane %v6659_v29, 1  ;;  %v6784_v14 = vsel %vm2092_vm5, %v6781_v27, %v6783_v54  ;;  %v6992_v15 = vsel %vm2301_vm4, %v6989_v13, %v6991_v48  ;;  %v20168_v54 = vld [vmem:[#allocation11_spill] sm:$0xff] }
 0x63c   : > { %v7482_v48 = vld [vmem:[%s20088_s7 + $0x10] sm:$0xf] }
 0x63d   : > { %v6779_v47 = vsel %vm2092_vm5, %v6776_v43, %v6778_v11  ;;  %v20166_v43 = vld [vmem:[#allocation13_spill] sm:$0xff]  ;;  %14263 = vmatprep.subr.msk.mxu0 %vm3052_vm6, %v7482_v48 }
 0x63e   : > { %v6101_v32 = vadd.f32 %v14102_v5, %v20166_v43  ;;  %v6785_v5 = vrot.slane %v17750_v17, 1  ;;  %14264 = vmatpush3.msk.msra.mxu0 %vm3052_vm6, %v7482_v48 }
 0x63f   : > { %7048 = vrot.lane.b32.xlu0 %v6980_v34, %s14680_s30  ;;  %6842 = vrot.lane.b32.xlu1 %v6774_v61, %s14681_s12  ;;  %v17741_v34 = vpop.f32.mrf.mxu1  ;;  %v17743_v61 = vpop.f32.mrf.mxu0 }
 0x640   : > { %v17763_v27 = vadd.f32 %v14178_v0, %v6101_v32  ;;  %v6787_v42 = vsel %vm2092_vm5, %v6785_v5, %v6786_v44  ;;  %v6993_v0 = vrot.slane %v17750_v17, 2 }
 0x641   : > { %v6605_v41 = vpop.f32.mrf.mxu0 }
 0x642   : > { %v6995_v20 = vsel %vm2301_vm4, %v6993_v0, %v6994_v58 }
 0x643   : > { %7050 = vrot.lane.b32.xlu1 %v6982_v35, %s14680_s30  ;;  %6844 = vrot.lane.b32.xlu0 %v6777_v30, %s14681_s12  ;;  %v17755_v35 = vadd.f32 %v6595_v46, %v6096_v53  ;;  %v6105_v30 = vpop.f32.mrf.mxu1 }
 0x644   : > { %v6106_v29 = vadd.f32 %v6105_v30, %v20167_v2 }
 0x645   : > { %v6790_v31 = vrot.slane %v17755_v35, 1  ;;  %v6998_v43 = vrot.slane %v17755_v35, 2 }
 0x646   : > { %v17770_v46 = vadd.f32 %v6605_v41, %v6106_v29  ;;  %v17807_v41 = vld [vmem:[%s20087_s6] ss:$0 sm:$0xff] }
 0x647   : > { %7052 = vrot.lane.b32.xlu1 %v6985_v22, %s14680_s30  ;;  %6848 = vrot.lane.b32.xlu0 %v6782_v18, %s14681_s12  ;;  %v6091_v22 = vadd.f32 %v17701_v52, %v20168_v54  ;;  %v6990_v18 = vsel %vm2301_vm4, %v6988_v26, %v6989_v13  ;;  %v6791_v52 = vrot.slane %v17763_v27, 1  ;;  %v7432_v13 = vld [vmem:[#allocation2] sm:$0xff]  ;;  %v7433_v26 = vld [vmem:[#allocation2 + $0x8] sm:$0xff] }
 0x648   : > { %v6793_v11 = vrot.slane %v17770_v46, 1  ;;  %14269 = vmatprep.mubr.msk.f32.mxu0 %vm7535_vm7, %v7432_v13 }
 0x649   : > { %v6665_v49 = vadd.f32 %v17691_v21, %v6091_v22  ;;  %v6792_v57 = vsel %vm2092_vm5, %v6790_v31, %v6791_v52 }
 0x64a   : > { %v6794_v21 = vsel %vm2092_vm5, %v6791_v52, %v6793_v11  ;;  %v12445_v52 = vld [vmem:[%s20088_s7 + $0x18] sm:$0xff]  ;;  %v17821_v11 = vpop.f32.mrf.mxu1 }
 0x64b   : > { %6846 = vrot.lane.b32.xlu1 %v6779_v47, %s14681_s12  ;;  %6850 = vrot.lane.b32.xlu0 %v6784_v14, %s14681_s12  ;;  %v6788_v25 = vrot.slane %v6665_v49, 1  ;;  %v7481_v14 = vld [vmem:[%s20088_s7 + $0x8] sm:$0xff]  ;;  %v6996_v56 = vrot.slane %v6665_v49, 2 }
 0x64c   : > { %14265 = vmatprep.subr.mxu0 %v7481_v14 }
 0x64d   : > { %v6789_v47 = vsel %vm2092_vm5, %v6786_v44, %v6788_v25  ;;  %v6997_v32 = vsel %vm2301_vm4, %v6994_v58, %v6996_v56  ;;  %14266 = vmatpush3.msra.mxu0 %v7481_v14  ;;  %v7434_v44 = vld [vmem:[#allocation2 + $0x10] sm:$0xff]  ;;  %v12446_v58 = vld [vmem:[%s20088_s7 + $0x20] sm:$0xff]  ;;  %v6115_v56 = vpop.f32.mrf.mxu1 }
 0x64e   : > { %14267 = vmatprep.subr.mxu0 %v7480_v16  ;;  %14187 = vmatprep.subr.mxu1 %v12446_v58 }
 0x64f   : > { %7054 = vrot.lane.b32.xlu1 %v6987_v63, %s14680_s30  ;;  %7058 = vrot.lane.b32.xlu0 %v6992_v15, %s14680_s30  ;;  %v6999_v63 = vrot.slane %v17763_v27, 2  ;;  %v20169_v15 = vld [vmem:[#allocation17_spill] sm:$0xff] }
 0x650   : > { %14268 = vmatpush3.msra.mxu0 %v7480_v16  ;;  %14188 = vmatpush3.msra.mxu1 %v12446_v58 }
 0x651   : > { %14270 = vmatmul.mubr.msk.f32.vlgmr.msra.gmra.mxu0 %vm7535_vm7, %v7433_v26  ;;  %v7000_v54 = vsel %vm2301_vm4, %v6998_v43, %v6999_v63  ;;  %14189 = vmatprep.subr.mxu1 %v12445_v52 }
 0x652   : > { %14272 = vmatprep.mubr.msk.f32.mxu0 %vm7535_vm7, %v7434_v44  ;;  %14190 = vmatpush3.msra.mxu1 %v12445_v52 }
 0x653   : > { %7056 = vrot.lane.b32.xlu1 %v6990_v18, %s14680_s30  ;;  %6852 = vrot.lane.b32.xlu0 %v6787_v42, %s14681_s12 }
 0x657   : > { %7060 = vrot.lane.b32.xlu1 %v6995_v20, %s14680_s30  ;;  %6856 = vrot.lane.b32.xlu0 %v6792_v57, %s14681_s12  ;;  %v17823_v20 = vpop.f32.mrf.mxu0 }
 0x659   : > { %v6615_v16 = vpop.f32.mrf.mxu0 }
 0x65b   : > { %6854 = vrot.lane.b32.xlu1 %v6789_v47, %s14681_s12  ;;  %6858 = vrot.lane.b32.xlu0 %v6794_v21, %s14681_s12 }
 0x65d   : > { %v6801_v53 = vpop.permute.xlu0 %6800 }
 0x65e   : > { %v6896_v30 = vadd.f32 %v6801_v53, %v20169_v15  ;;  %v7001_v53 = vrot.slane %v17770_v46, 2 }
 0x65f   : > { %7062 = vrot.lane.b32.xlu1 %v6997_v32, %s14680_s30 }
 0x661   : > { %v7009_v2 = vpop.permute.xlu0 %7008  ;;  %v6803_v29 = vpop.permute.xlu1 %6802 }
 0x662   : > { %v7104_v5 = vadd.f32 %v7009_v2, %v6896_v30  ;;  %v6897_v18 = vadd.f32 %v6803_v29, %v17411_v50  ;;  %v20171_v29 = vld [vmem:[#allocation16_spill] sm:$0xff] }
 0x663   : > { %7064 = vrot.lane.b32.xlu1 %v7000_v54, %s14680_s30 }
 0x664   : > { %v7143_v22 = vadd.f32 %v17807_v41, %v7104_v5  ;;  %v6111_v5 = vadd.f32 %v17741_v34, %v20171_v29  ;;  %v20172_v29 = vld [vmem:[#allocation12_spill] sm:$0xff] }
 0x665   : > { %v7011_v31 = vpop.permute.xlu1 %7010  ;;  %v6805_v42 = vpop.permute.xlu0 %6804 }
 0x666   : > { %v7105_v0 = vadd.f32 %v7011_v31, %v6897_v18  ;;  %vm7175_vm14 = vcmp.ge.f32.partialorder %v7143_v22, 0.0  ;;  %v7207_v49 = vmul.f32 0.2, %v7143_v22  ;;  %v6898_v57 = vadd.f32 %v6805_v42, %v17430_v10  ;;  %v20170_v10 = vld [vmem:[#allocation14_spill] sm:$0xff] }
 0x667   : > { %v6116_v26 = vadd.f32 %v6115_v56, %v20170_v10  ;;  %v7002_v18 = vsel %vm2301_vm4, %v6999_v63, %v7001_v53  ;;  %v17843_v42 = vadd.f32 %v17743_v61, %v6111_v5  ;;  %v6121_v5 = vadd.f32 %v17821_v11, %v20172_v29 }
 0x668   : > { %v7144_v50 = vadd.f32 %v17807_v41, %v7105_v0  ;;  %v7239_v25 = vsel %vm7175_vm14, %v7143_v22, %v7207_v49 }
 0x669   : > { %v7013_v48 = vpop.permute.xlu1 %7012  ;;  %v6807_v47 = vpop.permute.xlu0 %6806  ;;  %7303 = vrot.lane.b32.xlu0 %v7239_v25, %s14684_s20  ;;  %v17835_v54 = vadd.f32 %v6615_v16, %v6116_v26  ;;  %v7003_v25 = vrot.slane %v17843_v42, 2 }
 0x66a   : > { %v7106_v21 = vadd.f32 %v7013_v48, %v6898_v57  ;;  %vm7176_vm15 = vcmp.ge.f32.partialorder %v7144_v50, 0.0  ;;  %v7208_v14 = vmul.f32 0.2, %v7144_v50  ;;  %v6899_v43 = vadd.f32 %v6807_v47, %v17433_v9 }
 0x66b   : > { %v7004_v49 = vrot.slane %v17835_v54, 2 }
 0x66c   : > { %v7145_v13 = vadd.f32 %v17807_v41, %v7106_v21  ;;  %v7240_v32 = vsel %vm7176_vm15, %v7144_v50, %v7208_v14 }
 0x66d   : > { %v7015_v44 = vpop.permute.xlu1 %7014  ;;  %v6809_v15 = vpop.permute.xlu0 %6808  ;;  %7305 = vrot.lane.b32.xlu0 %v7240_v32, %s14684_s20  ;;  %v7005_v56 = vsel %vm2301_vm4, %v7003_v25, %v7004_v49 }
 0x66e   : > { %v7107_v30 = vadd.f32 %v7015_v44, %v6899_v43  ;;  %vm7177_vm0 = vcmp.ge.f32.partialorder %v7145_v13, 0.0  ;;  %v7209_v2 = vmul.f32 0.2, %v7145_v13  ;;  %v6900_v22 = vadd.f32 %v6809_v15, %v17446_v40 }
 0x66f   : > { %v6796_v43 = vrot.slane %v17835_v54, 1  ;;  %v6795_v15 = vrot.slane %v17843_v42, 1 }
 0x670   : > { %v7146_v46 = vadd.f32 %v17807_v41, %v7107_v30  ;;  %v7241_v9 = vsel %vm7177_vm0, %v7145_v13, %v7209_v2 }
 0x671   : > { %v7017_v58 = vpop.permute.xlu0 %7016  ;;  %v6811_v31 = vpop.permute.xlu1 %6810  ;;  %7307 = vrot.lane.b32.xlu1 %v7241_v9, %s14684_s20  ;;  %7066 = vrot.lane.b32.xlu0 %v7002_v18, %s14680_s30 }
 0x672   : > { %v7108_v0 = vadd.f32 %v7017_v58, %v6900_v22  ;;  %vm7178_vm1 = vcmp.ge.f32.partialorder %v7146_v46, 0.0  ;;  %v7210_v34 = vmul.f32 0.2, %v7146_v46  ;;  %v6901_v40 = vadd.f32 %v6811_v31, %v17457_v45 }
 0x673   : > { %v6671_v31 = vadd.f32 %v17823_v20, %v6121_v5 }
 0x674   : > { %v7147_v52 = vadd.f32 %v17807_v41, %v7108_v0  ;;  %v7242_v50 = vsel %vm7178_vm1, %v7146_v46, %v7210_v34 }
 0x675   : > { %v7019_v63 = vpop.permute.xlu1 %7018  ;;  %v6813_v57 = vpop.permute.xlu0 %6812  ;;  %7309 = vrot.lane.b32.xlu1 %v7242_v50, %s14684_s20 }
 0x676   : > { %v7109_v48 = vadd.f32 %v7019_v63, %v6901_v40  ;;  %vm7179_vm8 = vcmp.ge.f32.partialorder %v7147_v52, 0.0  ;;  %v7211_v61 = vmul.f32 0.2, %v7147_v52  ;;  %v6902_v21 = vadd.f32 %v6813_v57, %v17481_v6 }
 0x677   : > { %v6798_v63 = vrot.slane %v6671_v31, 1 }
 0x678   : > { %v7148_v47 = vadd.f32 %v17807_v41, %v7109_v48  ;;  %v7243_v14 = vsel %vm7179_vm8, %v7147_v52, %v7211_v61 }
 0x679   : > { %v7021_v45 = vpop.permute.xlu1 %7020  ;;  %v6815_v53 = vpop.permute.xlu0 %6814  ;;  %7311 = vrot.lane.b32.xlu0 %v7243_v14, %s14684_s20  ;;  %7068 = vrot.lane.b32.xlu1 %v7005_v56, %s14680_s30  ;;  %v6799_v61 = vsel %vm2092_vm5, %v6796_v43, %v6798_v63 }
 0x67a   : > { %v7110_v16 = vadd.f32 %v7021_v45, %v6902_v21  ;;  %vm7180_vm9 = vcmp.ge.f32.partialorder %v7148_v47, 0.0  ;;  %v7212_v13 = vmul.f32 0.2, %v7148_v47  ;;  %v6903_v6 = vadd.f32 %v6815_v53, %v17473_v28 }
 0x67b   : > { %v6797_v28 = vsel %vm2092_vm5, %v6795_v15, %v6796_v43 }
 0x67c   : > { %v7149_v32 = vadd.f32 %v17807_v41, %v7110_v16  ;;  %v7244_v10 = vsel %vm7180_vm9, %v7148_v47, %v7212_v13 }
 0x67d   : > { %v7023_v26 = vpop.permute.xlu1 %7022  ;;  %v6817_v44 = vpop.permute.xlu0 %6816  ;;  %7313 = vrot.lane.b32.xlu0 %v7244_v10, %s14684_s20 }
 0x67e   : > { %v7111_v30 = vadd.f32 %v7023_v26, %v6903_v6  ;;  %vm7181_vm10 = vcmp.ge.f32.partialorder %v7149_v32, 0.0  ;;  %v7213_v2 = vmul.f32 0.2, %v7149_v32  ;;  %v6904_v22 = vadd.f32 %v6817_v44, %v17500_v59 }
 0x680   : > { %v7150_v46 = vadd.f32 %v17807_v41, %v7111_v30  ;;  %v7245_v9 = vsel %vm7181_vm10, %v7149_v32, %v7213_v2 }
 0x681   : > { %v7025_v18 = vpop.permute.xlu0 %7024  ;;  %v6819_v58 = vpop.permute.xlu1 %6818  ;;  %7315 = vrot.lane.b32.xlu1 %v7245_v9, %s14684_s20  ;;  %6860 = vrot.lane.b32.xlu0 %v6797_v28, %s14681_s12 }
 0x682   : > { %v7112_v0 = vadd.f32 %v7025_v18, %v6904_v22  ;;  %vm7182_vm11 = vcmp.ge.f32.partialorder %v7150_v46, 0.0  ;;  %v7214_v34 = vmul.f32 0.2, %v7150_v46  ;;  %v6905_v52 = vadd.f32 %v6819_v58, %v17509_v38 }
 0x683   : > { %v7006_v38 = vrot.slane %v6671_v31, 2 }
 0x684   : > { %v7151_v11 = vadd.f32 %v17807_v41, %v7112_v0  ;;  %v7246_v40 = vsel %vm7182_vm11, %v7150_v46, %v7214_v34 }
 0x685   : > { %v7027_v59 = vpop.permute.xlu1 %7026  ;;  %v6821_v50 = vpop.permute.xlu0 %6820  ;;  %7317 = vrot.lane.b32.xlu1 %v7246_v40, %s14684_s20 }
 0x686   : > { %v7113_v57 = vadd.f32 %v7027_v59, %v6905_v52  ;;  %vm7183_vm12 = vcmp.ge.f32.partialorder %v7151_v11, 0.0  ;;  %v7215_v25 = vmul.f32 0.2, %v7151_v11  ;;  %v6906_v20 = vadd.f32 %v6821_v50, %v17533_v8 }
 0x687   : > { %v7007_v8 = vsel %vm2301_vm4, %v7004_v49, %v7006_v38 }
 0x688   : > { %v7152_v48 = vadd.f32 %v17807_v41, %v7113_v57  ;;  %v7247_v47 = vsel %vm7183_vm12, %v7151_v11, %v7215_v25 }
 0x689   : > { %v7029_v21 = vpop.permute.xlu1 %7028  ;;  %v6823_v14 = vpop.permute.xlu0 %6822  ;;  %6862 = vrot.lane.b32.xlu1 %v6799_v61, %s14681_s12  ;;  %7319 = vrot.lane.b32.xlu0 %v7247_v47, %s14684_s20 }
 0x68a   : > { %v7114_v56 = vadd.f32 %v7029_v21, %v6906_v20  ;;  %vm7184_vm13 = vcmp.ge.f32.partialorder %v7152_v48, 0.0  ;;  %v7216_v45 = vmul.f32 0.2, %v7152_v48  ;;  %v6907_v16 = vadd.f32 %v6823_v14, %v17527_v60 }
 0x68c   : > { %v7153_v53 = vadd.f32 %v17807_v41, %v7114_v56  ;;  %v7248_v13 = vsel %vm7184_vm13, %v7152_v48, %v7216_v45  ;;  %v17905_v45 = vld [vmem:[%s20088_s7 + $0x40] sm:$0xf] }
 0x68d   : > { %v7031_v43 = vpop.permute.xlu1 %7030  ;;  %v6825_v32 = vpop.permute.xlu0 %6824  ;;  %7070 = vrot.lane.b32.xlu1 %v7007_v8, %s14680_s30  ;;  %7321 = vrot.lane.b32.xlu0 %v7248_v13, %s14684_s20 }
 0x68e   : > { %v7115_v6 = vadd.f32 %v7031_v43, %v6907_v16  ;;  %vm7185_vm14 = vcmp.ge.f32.partialorder %v7153_v53, 0.0  ;;  %v7217_v10 = vmul.f32 0.2, %v7153_v53  ;;  %v6908_v44 = vadd.f32 %v6825_v32, %v17552_v33  ;;  %14341 = vmatprep.subr.msk.mxu1 %vm3052_vm6, %v17905_v45 }
 0x690   : > { %v7154_v26 = vadd.f32 %v17807_v41, %v7115_v6  ;;  %v7249_v15 = vsel %vm7185_vm14, %v7153_v53, %v7217_v10 }
 0x691   : > { %v7033_v60 = vpop.permute.xlu0 %7032  ;;  %v6827_v30 = vpop.permute.xlu1 %6826  ;;  %7323 = vrot.lane.b32.xlu0 %v7249_v15, %s14684_s20 }
 0x692   : > { %v7116_v49 = vadd.f32 %v7033_v60, %v6908_v44  ;;  %vm7186_vm15 = vcmp.ge.f32.partialorder %v7154_v26, 0.0  ;;  %v7218_v2 = vmul.f32 0.2, %v7154_v26  ;;  %v6909_v5 = vadd.f32 %v6827_v30, %v17561_v36 }
 0x694   : > { %v7155_v29 = vadd.f32 %v17807_v41, %v7116_v49  ;;  %v7250_v46 = vsel %vm7186_vm15, %v7154_v26, %v7218_v2 }
 0x695   : > { %v7035_v22 = vpop.permute.xlu1 %7034  ;;  %v6829_v9 = vpop.permute.xlu0 %6828  ;;  %7325 = vrot.lane.b32.xlu1 %v7250_v46, %s14684_s20 }
 0x696   : > { %v7117_v28 = vadd.f32 %v7035_v22, %v6909_v5  ;;  %vm7187_vm0 = vcmp.ge.f32.partialorder %v7155_v29, 0.0  ;;  %v7219_v33 = vmul.f32 0.2, %v7155_v29  ;;  %v6910_v58 = vadd.f32 %v6829_v9, %v17591_v7 }
 0x698   : > { %v7156_v18 = vadd.f32 %v17807_v41, %v7117_v28  ;;  %v7251_v31 = vsel %vm7187_vm0, %v7155_v29, %v7219_v33 }
 0x699   : > { %v7037_v0 = vpop.permute.xlu1 %7036  ;;  %v6831_v34 = vpop.permute.xlu0 %6830  ;;  %7327 = vrot.lane.b32.xlu0 %v7251_v31, %s14684_s20 }
 0x69a   : > { %v7118_v11 = vadd.f32 %v7037_v0, %v6910_v58  ;;  %vm7188_vm1 = vcmp.ge.f32.partialorder %v7156_v18, 0.0  ;;  %v7220_v36 = vmul.f32 0.2, %v7156_v18  ;;  %v6911_v40 = vadd.f32 %v6831_v34, %v17581_v39 }
 0x69c   : > { %v7157_v52 = vadd.f32 %v17807_v41, %v7118_v11  ;;  %v7252_v59 = vsel %vm7188_vm1, %v7156_v18, %v7220_v36 }
 0x69d   : > { %v7039_v50 = vpop.permute.xlu1 %7038  ;;  %v6833_v63 = vpop.permute.xlu0 %6832  ;;  %7329 = vrot.lane.b32.xlu1 %v7252_v59, %s14684_s20 }
 0x69e   : > { %v7119_v57 = vadd.f32 %v7039_v50, %v6911_v40  ;;  %vm7189_vm8 = vcmp.ge.f32.partialorder %v7157_v52, 0.0  ;;  %v7221_v7 = vmul.f32 0.2, %v7157_v52  ;;  %v6912_v48 = vadd.f32 %v6833_v63, %v17610_v55 }
 0x6a0   : > { %v7158_v25 = vadd.f32 %v17807_v41, %v7119_v57  ;;  %v7253_v20 = vsel %vm7189_vm8, %v7157_v52, %v7221_v7 }
 0x6a1   : > { %v7041_v61 = vpop.permute.xlu0 %7040  ;;  %v6835_v47 = vpop.permute.xlu1 %6834  ;;  %7331 = vrot.lane.b32.xlu0 %v7253_v20, %s14684_s20 }
 0x6a2   : > { %v7120_v21 = vadd.f32 %v7041_v61, %v6912_v48  ;;  %vm7190_vm9 = vcmp.ge.f32.partialorder %v7158_v25, 0.0  ;;  %v7222_v39 = vmul.f32 0.2, %v7158_v25  ;;  %v6913_v38 = vadd.f32 %v6835_v47, %v17621_v1 }
 0x6a4   : > { %v7159_v14 = vadd.f32 %v17807_v41, %v7120_v21  ;;  %v7254_v56 = vsel %vm7190_vm9, %v7158_v25, %v7222_v39 }
 0x6a5   : > { %v7043_v53 = vpop.permute.xlu1 %7042  ;;  %v6837_v55 = vpop.permute.xlu0 %6836  ;;  %7333 = vrot.lane.b32.xlu1 %v7254_v56, %s14684_s20 }
 0x6a6   : > { %v7121_v16 = vadd.f32 %v7043_v53, %v6913_v38  ;;  %vm7191_vm10 = vcmp.ge.f32.partialorder %v7159_v14, 0.0  ;;  %v7223_v8 = vmul.f32 0.2, %v7159_v14  ;;  %v6914_v1 = vadd.f32 %v6837_v55, %v17648_v3 }
 0x6a8   : > { %v7160_v13 = vadd.f32 %v17807_v41, %v7121_v16  ;;  %v7255_v43 = vsel %vm7191_vm10, %v7159_v14, %v7223_v8 }
 0x6a9   : > { %v7045_v32 = vpop.permute.xlu1 %7044  ;;  %v6839_v6 = vpop.permute.xlu0 %6838  ;;  %7335 = vrot.lane.b32.xlu0 %v7255_v43, %s14684_s20 }
 0x6aa   : > { %v7122_v10 = vadd.f32 %v7045_v32, %v6914_v1  ;;  %vm7192_vm11 = vcmp.ge.f32.partialorder %v7160_v13, 0.0  ;;  %v7224_v26 = vmul.f32 0.2, %v7160_v13  ;;  %v6915_v15 = vadd.f32 %v6839_v6, %v17639_v51 }
 0x6ac   : > { %v7161_v44 = vadd.f32 %v17807_v41, %v7122_v10  ;;  %v7256_v60 = vsel %vm7192_vm11, %v7160_v13, %v7224_v26 }
 0x6ad   : > { %v7047_v30 = vpop.permute.xlu1 %7046  ;;  %v6841_v49 = vpop.permute.xlu0 %6840  ;;  %7337 = vrot.lane.b32.xlu1 %v7256_v60, %s14684_s20 }
 0x6ae   : > { %v7123_v2 = vadd.f32 %v7047_v30, %v6915_v15  ;;  %vm7193_vm12 = vcmp.ge.f32.partialorder %v7161_v44, 0.0  ;;  %v7225_v3 = vmul.f32 0.2, %v7161_v44  ;;  %v6916_v5 = vadd.f32 %v6841_v49, %v17664_v24 }
 0x6b0   : > { %v7162_v29 = vadd.f32 %v17807_v41, %v7123_v2  ;;  %v7257_v46 = vsel %vm7193_vm12, %v7161_v44, %v7225_v3  ;;  %vm7399_vm12 = vcmask 162944  }
 0x6b1   : > { %v7049_v22 = vpop.permute.xlu0 %7048  ;;  %v6843_v9 = vpop.permute.xlu1 %6842  ;;  %7339 = vrot.lane.b32.xlu0 %v7257_v46, %s14684_s20 }
 0x6b2   : > { %v7124_v28 = vadd.f32 %v7049_v22, %v6916_v5  ;;  %vm7194_vm13 = vcmp.ge.f32.partialorder %v7162_v29, 0.0  ;;  %v7226_v51 = vmul.f32 0.2, %v7162_v29  ;;  %v6917_v18 = vadd.f32 %v6843_v9, %v17675_v23 }
 0x6b4   : > { %v7163_v33 = vadd.f32 %v17807_v41, %v7124_v28  ;;  %v7258_v58 = vsel %vm7194_vm13, %v7162_v29, %v7226_v51 }
 0x6b5   : > { %v7051_v31 = vpop.permute.xlu1 %7050  ;;  %v6845_v0 = vpop.permute.xlu0 %6844  ;;  %7341 = vrot.lane.b32.xlu1 %v7258_v58, %s14684_s20 }
 0x6b6   : > { %v7125_v34 = vadd.f32 %v7051_v31, %v6917_v18  ;;  %vm7195_vm14 = vcmp.ge.f32.partialorder %v7163_v33, 0.0  ;;  %v7227_v24 = vmul.f32 0.2, %v7163_v33  ;;  %v6918_v36 = vadd.f32 %v6845_v0, %v17698_v62 }
 0x6b8   : > { %v7164_v11 = vadd.f32 %v17807_v41, %v7125_v34  ;;  %v7259_v52 = vsel %vm7195_vm14, %v7163_v33, %v7227_v24 }
 0x6b9   : > { %v7053_v40 = vpop.permute.xlu1 %7052  ;;  %v6849_v59 = vpop.permute.xlu0 %6848  ;;  %7343 = vrot.lane.b32.xlu0 %v7259_v52, %s14684_s20 }
 0x6ba   : > { %v7126_v50 = vadd.f32 %v7053_v40, %v6918_v36  ;;  %vm7196_vm15 = vcmp.ge.f32.partialorder %v7164_v11, 0.0  ;;  %v7228_v23 = vmul.f32 0.2, %v7164_v11  ;;  %v6920_v38 = vadd.f32 %v6849_v59, %v17704_v37 }
 0x6bc   : > { %v7165_v63 = vadd.f32 %v17807_v41, %v7126_v50  ;;  %v7260_v57 = vsel %vm7196_vm15, %v7164_v11, %v7228_v23  ;;  %v12547_v50 = vld [vmem:[%s20088_s7 + $0x38] sm:$0xff] }
 0x6bd   : > { %v6847_v7 = vpop.permute.xlu1 %6846  ;;  %v6851_v25 = vpop.permute.xlu0 %6850  ;;  %7345 = vrot.lane.b32.xlu1 %v7260_v57, %s14684_s20 }
 0x6be   : > { %vm7197_vm0 = vcmp.ge.f32.partialorder %v7165_v63, 0.0  ;;  %v7229_v48 = vmul.f32 0.2, %v7165_v63  ;;  %v6919_v20 = vadd.f32 %v6847_v7, %v17688_v19  ;;  %v6921_v62 = vadd.f32 %v6851_v25, %v17713_v4  ;;  %v12546_v7 = vld [vmem:[%s20088_s7 + $0x30] sm:$0xff] }
 0x6c0   : > { %v7261_v61 = vsel %vm7197_vm0, %v7165_v63, %v7229_v48 }
 0x6c1   : > { %v7055_v47 = vpop.permute.xlu1 %7054  ;;  %v7059_v21 = vpop.permute.xlu0 %7058  ;;  %7347 = vrot.lane.b32.xlu0 %v7261_v61, %s14684_s20 }
 0x6c2   : > { %v7127_v39 = vadd.f32 %v7055_v47, %v6919_v20  ;;  %v7129_v14 = vadd.f32 %v7059_v21, %v6921_v62 }
 0x6c4   : > { %v7166_v56 = vadd.f32 %v17807_v41, %v7127_v39  ;;  %v7168_v53 = vadd.f32 %v17807_v41, %v7129_v14 }
 0x6c5   : > { %v7057_v55 = vpop.permute.xlu1 %7056  ;;  %v6853_v16 = vpop.permute.xlu0 %6852 }
 0x6c6   : > { %v7128_v8 = vadd.f32 %v7057_v55, %v6920_v38  ;;  %vm7198_vm1 = vcmp.ge.f32.partialorder %v7166_v56, 0.0  ;;  %v7230_v19 = vmul.f32 0.2, %v7166_v56  ;;  %v6922_v13 = vadd.f32 %v6853_v16, %v17750_v17 }
 0x6c7   : > { %v7232_v43 = vmul.f32 0.2, %v7168_v53  ;;  %vm7200_vm8 = vcmp.ge.f32.partialorder %v7168_v53, 0.0 }
 0x6c8   : > { %v7167_v4 = vadd.f32 %v17807_v41, %v7128_v8  ;;  %v7262_v1 = vsel %vm7198_vm1, %v7166_v56, %v7230_v19 }
 0x6c9   : > { %v7061_v32 = vpop.permute.xlu1 %7060  ;;  %7349 = vrot.lane.b32.xlu1 %v7262_v1, %s14684_s20  ;;  %v7264_v26 = vsel %vm7200_vm8, %v7168_v53, %v7232_v43  ;;  %v6857_v49 = vpop.permute.xlu0 %6856 }
 0x6ca   : > { %v7130_v37 = vadd.f32 %v7061_v32, %v6922_v13  ;;  %vm7199_vm9 = vcmp.ge.f32.partialorder %v7167_v4, 0.0  ;;  %v7231_v6 = vmul.f32 0.2, %v7167_v4  ;;  %v6924_v29 = vadd.f32 %v6857_v49, %v17755_v35 }
 0x6cc   : > { %v7169_v10 = vadd.f32 %v17807_v41, %v7130_v37  ;;  %v7263_v44 = vsel %vm7199_vm9, %v7167_v4, %v7231_v6 }
 0x6cd   : > { %v6855_v15 = vpop.permute.xlu1 %6854  ;;  %7353 = vrot.lane.b32.xlu1 %v7264_v26, %s14684_s20  ;;  %7351 = vrot.lane.b32.xlu0 %v7263_v44, %s14684_s20  ;;  %v6859_v28 = vpop.permute.xlu0 %6858 }
 0x6ce   : > { %vm7201_vm10 = vcmp.ge.f32.partialorder %v7169_v10, 0.0  ;;  %v7233_v17 = vmul.f32 0.2, %v7169_v10  ;;  %v6923_v60 = vadd.f32 %v6855_v15, %v17736_v12  ;;  %v6925_v31 = vadd.f32 %v6859_v28, %v17763_v27 }
 0x6d0   : > { %v7265_v30 = vsel %vm7201_vm10, %v7169_v10, %v7233_v17 }
 0x6d1   : > { %v7063_v2 = vpop.permute.xlu1 %7062  ;;  %7355 = vrot.lane.b32.xlu0 %v7265_v30, %s14684_s20 }
 0x6d2   : > { %v7131_v3 = vadd.f32 %v7063_v2, %v6923_v60 }
 0x6d4   : > { %v7170_v5 = vadd.f32 %v17807_v41, %v7131_v3 }
 0x6d5   : > { %v7065_v46 = vpop.permute.xlu1 %7064 }
 0x6d6   : > { %v7132_v22 = vadd.f32 %v7065_v46, %v6924_v29  ;;  %vm7202_vm11 = vcmp.ge.f32.partialorder %v7170_v5, 0.0  ;;  %v7234_v9 = vmul.f32 0.2, %v7170_v5 }
 0x6d8   : > { %v7171_v51 = vadd.f32 %v17807_v41, %v7132_v22  ;;  %v7266_v33 = vsel %vm7202_vm11, %v7170_v5, %v7234_v9 }
 0x6d9   : > { %7357 = vrot.lane.b32.xlu1 %v7266_v33, %s14684_s20 }
 0x6da   : > { %vm7203_vm13 = vcmp.ge.f32.partialorder %v7171_v51, 0.0  ;;  %v7235_v12 = vmul.f32 0.2, %v7171_v51 }
 0x6db   : > { %v7304_v18 = vpop.permute.xlu0 %7303 }
 0x6dc   : > { %v7267_v58 = vsel %vm7203_vm13, %v7171_v51, %v7235_v12  ;;  %7400 = vst.msk [vmem:[#allocation2 + $0x19] sm:$0xff] %vm7399_vm12, %v7304_v18 }
 0x6dd   : > { %7359 = vrot.lane.b32.xlu0 %v7267_v58, %s14684_s20 }
 0x6df   : > { %v7306_v35 = vpop.permute.xlu0 %7305 }
 0x6e0   : > { %7401 = vst.msk [vmem:[#allocation2 + $0x21] sm:$0xff] %vm7399_vm12, %v7306_v35 }
 0x6e3   : > { %v7308_v0 = vpop.permute.xlu1 %7307  ;;  %v7067_v34 = vpop.permute.xlu0 %7066  ;;  %v7483_v24 = vld [vmem:[#allocation2 + $0x18] sm:$0xff] }
 0x6e4   : > { %v7133_v11 = vadd.f32 %v7067_v34, %v6925_v31  ;;  %14191 = vmatprep.mubr.msk.f32.mxu1 %vm7535_vm7, %v7483_v24  ;;  %7402 = vst.msk [vmem:[#allocation2 + $0x31] sm:$0xff] %vm7399_vm12, %v7308_v0  ;;  %14273 = vmatmul.mubr.msk.f32.gmra.mxu0 %vm7535_vm7, %v7483_v24 }
 0x6e6   : > { %v7172_v36 = vadd.f32 %v17807_v41, %v7133_v11 }
 0x6e7   : > { %v7310_v52 = vpop.permute.xlu1 %7309  ;;  %v7484_v40 = vld [vmem:[#allocation2 + $0x20] sm:$0xff]  ;;  %v7485_v59 = vld [vmem:[#allocation2 + $0x28] sm:$0xff] }
 0x6e8   : > { %7403 = vst.msk [vmem:[#allocation2 + $0x39] sm:$0xff] %vm7399_vm12, %v7310_v52  ;;  %14192 = vmatmul.mubr.msk.f32.vlgmr.msra.gmra.mxu1 %vm7535_vm7, %v7484_v40  ;;  %14275 = vmatprep.mubr.msk.f32.mxu0 %vm7535_vm7, %v7484_v40  ;;  %vm7204_vm14 = vcmp.ge.f32.partialorder %v7172_v36, 0.0  ;;  %v7236_v27 = vmul.f32 0.2, %v7172_v36 }
 0x6e9   : > { %14194 = vmatprep.mubr.msk.f32.mxu1 %vm7535_vm7, %v7485_v59  ;;  %14276 = vmatmul.mubr.msk.f32.gmra.mxu0 %vm7535_vm7, %v7485_v59 }
 0x6ea   : > { %v7268_v23 = vsel %vm7204_vm14, %v7172_v36, %v7236_v27  ;;  %14342 = vmatpush3.msk.msra.mxu1 %vm3052_vm6, %v17905_v45 }
 0x6eb   : > { %v7312_v63 = vpop.permute.xlu0 %7311  ;;  %7361 = vrot.lane.b32.xlu1 %v7268_v23, %s14684_s20  ;;  %v17964_v57 = vld [vmem:[#allocation2 + $0x30] sm:$0xff]  ;;  %14343 = vmatprep.subr.mxu1 %v12547_v50  ;;  %v7069_v45 = vpop.permute.xlu1 %7068 }
 0x6ec   : > { %7404 = vst.msk [vmem:[#allocation2 + $0x49] sm:$0xff] %vm7399_vm12, %v7312_v63  ;;  %14195 = vmatmul.mubr.msk.f32.gmra.mxu1 %vm7535_vm7, %v17964_v57  ;;  %14278 = vmatprep.mubr.msk.f32.mxu0 %vm7535_vm7, %v17964_v57 }
 0x6ed   : > { %14344 = vmatpush3.msra.mxu1 %v12547_v50 }
 0x6ee   : > { %14345 = vmatprep.subr.mxu1 %v12546_v7 }
 0x6ef   : > { %v7314_v25 = vpop.permute.xlu0 %7313  ;;  %v17974_v48 = vld [vmem:[#allocation2 + $0x38] sm:$0xff]  ;;  %v17976_v20 = vld [vmem:[#allocation2 + $0x40] sm:$0xff]  ;;  %14346 = vmatpush3.msra.mxu1 %v12546_v7 }
 0x6f0   : > { %7405 = vst.msk [vmem:[#allocation2 + $0x51] sm:$0xff] %vm7399_vm12, %v7314_v25  ;;  %14197 = vmatprep.mubr.msk.f32.mxu1 %vm7535_vm7, %v17974_v48  ;;  %14279 = vmatmul.mubr.msk.f32.gmra.mxu0 %vm7535_vm7, %v17974_v48 }
 0x6f1   : > { %14198 = vmatmul.mubr.msk.f32.gmra.mxu1 %vm7535_vm7, %v17976_v20  ;;  %14281 = vmatprep.mubr.msk.f32.mxu0 %vm7535_vm7, %v17976_v20 }
 0x6f3   : > { %v7316_v62 = vpop.permute.xlu1 %7315  ;;  %v6861_v61 = vpop.permute.xlu0 %6860  ;;  %v17987_v47 = vld [vmem:[#allocation2 + $0x48] sm:$0xff] }
 0x6f4   : > { %7406 = vst.msk [vmem:[#allocation2 + $0x61] sm:$0xff] %vm7399_vm12, %v7316_v62  ;;  %v6926_v21 = vadd.f32 %v6861_v61, %v17843_v42  ;;  %14200 = vmatprep.mubr.msk.f32.mxu1 %vm7535_vm7, %v17987_v47  ;;  %14282 = vmatmul.mubr.msk.f32.gmra.mxu0 %vm7535_vm7, %v17987_v47 }
 0x6f6   : > { %v7134_v39 = vadd.f32 %v7069_v45, %v6926_v21 }
 0x6f7   : > { %v7318_v14 = vpop.permute.xlu1 %7317  ;;  %v17995_v38 = vld [vmem:[#allocation2 + $0x50] sm:$0xff]  ;;  %v17997_v56 = vld [vmem:[#allocation2 + $0x58] sm:$0xff] }
 0x6f8   : > { %v7173_v53 = vadd.f32 %v17807_v41, %v7134_v39  ;;  %7407 = vst.msk [vmem:[#allocation2 + $0x69] sm:$0xff] %vm7399_vm12, %v7318_v14  ;;  %14201 = vmatmul.mubr.msk.f32.gmra.mxu1 %vm7535_vm7, %v17995_v38  ;;  %14284 = vmatprep.mubr.msk.f32.mxu0 %vm7535_vm7, %v17995_v38 }
 0x6f9   : > { %14203 = vmatprep.mubr.msk.f32.mxu1 %vm7535_vm7, %v17997_v56  ;;  %14285 = vmatmul.mubr.msk.f32.gmra.mxu0 %vm7535_vm7, %v17997_v56 }
 0x6fa   : > { %vm7205_vm6 = vcmp.ge.f32.partialorder %v7173_v53, 0.0  ;;  %v7237_v42 = vmul.f32 0.2, %v7173_v53 }
 0x6fb   : > { %v6863_v55 = vpop.permute.xlu1 %6862  ;;  %v7320_v16 = vpop.permute.xlu0 %7319  ;;  %v18009_v8 = vld [vmem:[#allocation2 + $0x60] sm:$0xff] }
 0x6fc   : > { %7408 = vst.msk [vmem:[#allocation2 + $0x79] sm:$0xff] %vm7399_vm12, %v7320_v16  ;;  %14204 = vmatmul.mubr.msk.f32.gmra.mxu1 %vm7535_vm7, %v18009_v8  ;;  %14287 = vmatprep.mubr.msk.f32.mxu0 %vm7535_vm7, %v18009_v8  ;;  %v7269_v19 = vsel %vm7205_vm6, %v7173_v53, %v7237_v42  ;;  %v6927_v4 = vadd.f32 %v6863_v55, %v17835_v54 }
 0x6fd   : > { %7363 = vrot.lane.b32.xlu0 %v7269_v19, %s14684_s20 }
 0x6ff   : > { %v7071_v13 = vpop.permute.xlu1 %7070  ;;  %v7322_v1 = vpop.permute.xlu0 %7321  ;;  %v18018_v43 = vld [vmem:[#allocation2 + $0x68] sm:$0xff]  ;;  %v18020_v32 = vld [vmem:[#allocation2 + $0x70] sm:$0xff] }
 0x700   : > { %v7135_v37 = vadd.f32 %v7071_v13, %v6927_v4  ;;  %7409 = vst.msk [vmem:[#allocation2 + $0x81] sm:$0xff] %vm7399_vm12, %v7322_v1  ;;  %14206 = vmatprep.mubr.msk.f32.mxu1 %vm7535_vm7, %v18018_v43  ;;  %14288 = vmatmul.mubr.msk.f32.gmra.mxu0 %vm7535_vm7, %v18018_v43 }
 0x701   : > { %14207 = vmatmul.mubr.msk.f32.gmra.mxu1 %vm7535_vm7, %v18020_v32  ;;  %14290 = vmatprep.mubr.msk.f32.mxu0 %vm7535_vm7, %v18020_v32 }
 0x702   : > { %v7174_v54 = vadd.f32 %v17807_v41, %v7135_v37 }
 0x703   : > { %v7324_v6 = vpop.permute.xlu0 %7323  ;;  %v18032_v10 = vld [vmem:[#allocation2 + $0x78] sm:$0xff] }
 0x704   : > { %7410 = vst.msk [vmem:[#allocation2 + $0x91] sm:$0xff] %vm7399_vm12, %v7324_v6  ;;  %14209 = vmatprep.mubr.msk.f32.mxu1 %vm7535_vm7, %v18032_v10  ;;  %14291 = vmatmul.mubr.msk.f32.gmra.mxu0 %vm7535_vm7, %v18032_v10  ;;  %vm7206_vm15 = vcmp.ge.f32.partialorder %v7174_v54, 0.0  ;;  %v7238_v26 = vmul.f32 0.2, %v7174_v54 }
 0x706   : > { %v7270_v44 = vsel %vm7206_vm15, %v7174_v54, %v7238_v26 }
 0x707   : > { %7365 = vrot.lane.b32.xlu1 %v7270_v44, %s14684_s20  ;;  %v7326_v15 = vpop.permute.xlu1 %7325  ;;  %v18040_v17 = vld [vmem:[#allocation2 + $0x80] sm:$0xff]  ;;  %v18042_v41 = vld [vmem:[#allocation2 + $0x88] sm:$0xff] }
 0x708   : > { %7411 = vst.msk [vmem:[#allocation2 + $0x99] sm:$0xff] %vm7399_vm12, %v7326_v15  ;;  %14210 = vmatmul.mubr.msk.f32.gmra.mxu1 %vm7535_vm7, %v18040_v17  ;;  %14293 = vmatprep.mubr.msk.f32.mxu0 %vm7535_vm7, %v18040_v17 }
 0x709   : > { %14212 = vmatprep.mubr.msk.f32.mxu1 %vm7535_vm7, %v18042_v41  ;;  %14294 = vmatmul.mubr.msk.f32.gmra.mxu0 %vm7535_vm7, %v18042_v41 }
 0x70b   : > { %v7328_v60 = vpop.permute.xlu0 %7327  ;;  %v18053_v30 = vld [vmem:[#allocation2 + $0x90] sm:$0xff] }
 0x70c   : > { %7412 = vst.msk [vmem:[#allocation2 + $0xa9] sm:$0xff] %vm7399_vm12, %v7328_v60  ;;  %14213 = vmatmul.mubr.msk.f32.gmra.mxu1 %vm7535_vm7, %v18053_v30  ;;  %14296 = vmatprep.mubr.msk.f32.mxu0 %vm7535_vm7, %v18053_v30 }
 0x70f   : > { %v7330_v49 = vpop.permute.xlu1 %7329  ;;  %v18060_v2 = vld [vmem:[#allocation2 + $0x98] sm:$0xff]  ;;  %v18062_v3 = vld [vmem:[#allocation2 + $0xa0] sm:$0xff] }
 0x710   : > { %7413 = vst.msk [vmem:[#allocation2 + $0xb1] sm:$0xff] %vm7399_vm12, %v7330_v49  ;;  %14215 = vmatprep.mubr.msk.f32.mxu1 %vm7535_vm7, %v18060_v2  ;;  %14297 = vmatmul.mubr.msk.f32.gmra.mxu0 %vm7535_vm7, %v18060_v2 }
 0x711   : > { %14216 = vmatmul.mubr.msk.f32.gmra.mxu1 %vm7535_vm7, %v18062_v3  ;;  %14299 = vmatprep.mubr.msk.f32.mxu0 %vm7535_vm7, %v18062_v3 }
 0x713   : > { %v7332_v29 = vpop.permute.xlu0 %7331  ;;  %v18073_v5 = vld [vmem:[#allocation2 + $0xa8] sm:$0xff] }
 0x714   : > { %7414 = vst.msk [vmem:[#allocation2 + $0xc1] sm:$0xff] %vm7399_vm12, %v7332_v29  ;;  %14218 = vmatprep.mubr.msk.f32.mxu1 %vm7535_vm7, %v18073_v5  ;;  %14300 = vmatmul.mubr.msk.f32.gmra.mxu0 %vm7535_vm7, %v18073_v5 }
 0x717   : > { %v7334_v46 = vpop.permute.xlu1 %7333  ;;  %v18080_v22 = vld [vmem:[#allocation2 + $0xb0] sm:$0xff]  ;;  %v18082_v9 = vld [vmem:[#allocation2 + $0xb8] sm:$0xff] }
 0x718   : > { %7415 = vst.msk [vmem:[#allocation2 + $0xc9] sm:$0xff] %vm7399_vm12, %v7334_v46  ;;  %14219 = vmatmul.mubr.msk.f32.gmra.mxu1 %vm7535_vm7, %v18080_v22  ;;  %14302 = vmatprep.mubr.msk.f32.mxu0 %vm7535_vm7, %v18080_v22  ;;  %v8486_v46 = vld [vmem:[#allocation2 + $0x1a0] sm:$0xff] }
 0x719   : > { %14221 = vmatprep.mubr.msk.f32.mxu1 %vm7535_vm7, %v18082_v9  ;;  %14303 = vmatmul.mubr.msk.f32.gmra.mxu0 %vm7535_vm7, %v18082_v9 }
 0x71b   : > { %v7336_v28 = vpop.permute.xlu0 %7335  ;;  %v18093_v51 = vld [vmem:[#allocation2 + $0xc0] sm:$0xff] }
 0x71c   : > { %7416 = vst.msk [vmem:[#allocation2 + $0xd9] sm:$0xff] %vm7399_vm12, %v7336_v28  ;;  %14222 = vmatmul.mubr.msk.f32.gmra.mxu1 %vm7535_vm7, %v18093_v51  ;;  %14305 = vmatprep.mubr.msk.f32.mxu0 %vm7535_vm7, %v18093_v51 }
 0x71f   : > { %v7338_v33 = vpop.permute.xlu1 %7337  ;;  %v18100_v12 = vld [vmem:[#allocation2 + $0xc8] sm:$0xff]  ;;  %v18102_v18 = vld [vmem:[#allocation2 + $0xd0] sm:$0xff] }
 0x720   : > { %7417 = vst.msk [vmem:[#allocation2 + $0xe1] sm:$0xff] %vm7399_vm12, %v7338_v33  ;;  %14224 = vmatprep.mubr.msk.f32.mxu1 %vm7535_vm7, %v18100_v12  ;;  %14306 = vmatmul.mubr.msk.f32.gmra.mxu0 %vm7535_vm7, %v18100_v12 }
 0x721   : > { %14225 = vmatmul.mubr.msk.f32.gmra.mxu1 %vm7535_vm7, %v18102_v18  ;;  %14308 = vmatprep.mubr.msk.f32.mxu0 %vm7535_vm7, %v18102_v18 }
 0x723   : > { %v7340_v58 = vpop.permute.xlu0 %7339  ;;  %v18113_v35 = vld [vmem:[#allocation2 + $0xd8] sm:$0xff] }
 0x724   : > { %7418 = vst.msk [vmem:[#allocation2 + $0xf1] sm:$0xff] %vm7399_vm12, %v7340_v58  ;;  %14227 = vmatprep.mubr.msk.f32.mxu1 %vm7535_vm7, %v18113_v35  ;;  %14309 = vmatmul.mubr.msk.f32.gmra.mxu0 %vm7535_vm7, %v18113_v35 }
 0x727   : > { %v7342_v31 = vpop.permute.xlu1 %7341  ;;  %v18120_v0 = vld [vmem:[#allocation2 + $0xe0] sm:$0xff]  ;;  %v18122_v34 = vld [vmem:[#allocation2 + $0xe8] sm:$0xff] }
 0x728   : > { %7419 = vst.msk [vmem:[#allocation2 + $0xf9] sm:$0xff] %vm7399_vm12, %v7342_v31  ;;  %14228 = vmatmul.mubr.msk.f32.gmra.mxu1 %vm7535_vm7, %v18120_v0  ;;  %14311 = vmatprep.mubr.msk.f32.mxu0 %vm7535_vm7, %v18120_v0 }
 0x729   : > { %14230 = vmatprep.mubr.msk.f32.mxu1 %vm7535_vm7, %v18122_v34  ;;  %14312 = vmatmul.mubr.msk.f32.gmra.mxu0 %vm7535_vm7, %v18122_v34 }
 0x72b   : > { %v7344_v24 = vpop.permute.xlu0 %7343  ;;  %v18133_v11 = vld [vmem:[#allocation2 + $0xf0] sm:$0xff] }
 0x72c   : > { %7420 = vst.msk [vmem:[#allocation2 + $0x109] sm:$0xff] %vm7399_vm12, %v7344_v24  ;;  %14231 = vmatmul.mubr.msk.f32.gmra.mxu1 %vm7535_vm7, %v18133_v11  ;;  %14314 = vmatprep.mubr.msk.f32.mxu0 %vm7535_vm7, %v18133_v11 }
 0x72f   : > { %v7346_v36 = vpop.permute.xlu1 %7345  ;;  %v18140_v52 = vld [vmem:[#allocation2 + $0xf8] sm:$0xff]  ;;  %v18142_v40 = vld [vmem:[#allocation2 + $0x100] sm:$0xff] }
 0x730   : > { %7421 = vst.msk [vmem:[#allocation2 + $0x111] sm:$0xff] %vm7399_vm12, %v7346_v36  ;;  %14233 = vmatprep.mubr.msk.f32.mxu1 %vm7535_vm7, %v18140_v52  ;;  %14315 = vmatmul.mubr.msk.f32.gmra.mxu0 %vm7535_vm7, %v18140_v52  ;;  %v14271_v36 = vpop.f32.mrf.mxu0 }
 0x731   : > { %14234 = vmatmul.mubr.msk.f32.gmra.mxu1 %vm7535_vm7, %v18142_v40  ;;  %14317 = vmatprep.mubr.msk.f32.mxu0 %vm7535_vm7, %v18142_v40 }
 0x733   : > { %v7348_v59 = vpop.permute.xlu0 %7347  ;;  %v18153_v27 = vld [vmem:[#allocation2 + $0x108] sm:$0xff] }
 0x734   : > { %7422 = vst.msk [vmem:[#allocation2 + $0x121] sm:$0xff] %vm7399_vm12, %v7348_v59  ;;  %14236 = vmatprep.mubr.msk.f32.mxu1 %vm7535_vm7, %v18153_v27  ;;  %14318 = vmatmul.mubr.msk.f32.gmra.mxu0 %vm7535_vm7, %v18153_v27 }
 0x737   : > { %v18160_v50 = vld [vmem:[#allocation2 + $0x110] sm:$0xff]  ;;  %v18162_v23 = vld [vmem:[#allocation2 + $0x118] sm:$0xff] }
 0x738   : > { %14237 = vmatmul.mubr.msk.f32.gmra.mxu1 %vm7535_vm7, %v18160_v50  ;;  %14320 = vmatprep.mubr.msk.f32.mxu0 %vm7535_vm7, %v18160_v50 }
 0x739   : > { %14239 = vmatprep.mubr.msk.f32.mxu1 %vm7535_vm7, %v18162_v23  ;;  %14321 = vmatmul.mubr.msk.f32.gmra.mxu0 %vm7535_vm7, %v18162_v23 }
 0x73b   : > { %v7350_v63 = vpop.permute.xlu1 %7349  ;;  %v18172_v7 = vld [vmem:[#allocation2 + $0x120] sm:$0xff] }
 0x73c   : > { %7423 = vst.msk [vmem:[#allocation2 + $0x129] sm:$0xff] %vm7399_vm12, %v7350_v63  ;;  %14240 = vmatmul.mubr.msk.f32.gmra.mxu1 %vm7535_vm7, %v18172_v7  ;;  %14323 = vmatprep.mubr.msk.f32.mxu0 %vm7535_vm7, %v18172_v7 }
 0x73f   : > { %v7354_v45 = vpop.permute.xlu1 %7353  ;;  %v7352_v25 = vpop.permute.xlu0 %7351 }
 0x740   : > { %7425 = vst.msk [vmem:[#allocation2 + $0x141] sm:$0xff] %vm7399_vm12, %v7354_v45  ;;  %7424 = vst.msk [vmem:[#allocation2 + $0x139] sm:$0xff] %vm7399_vm12, %v7352_v25 }
 0x743   : > { %v7356_v62 = vpop.permute.xlu0 %7355  ;;  %v18181_v61 = vld [vmem:[#allocation2 + $0x128] sm:$0xff]  ;;  %v18183_v21 = vld [vmem:[#allocation2 + $0x130] sm:$0xff] }
 0x744   : > { %7426 = vst.msk [vmem:[#allocation2 + $0x151] sm:$0xff] %vm7399_vm12, %v7356_v62  ;;  %14242 = vmatprep.mubr.msk.f32.mxu1 %vm7535_vm7, %v18181_v61  ;;  %14324 = vmatmul.mubr.msk.f32.gmra.mxu0 %vm7535_vm7, %v18181_v61 }
 0x745   : > { %14243 = vmatmul.mubr.msk.f32.gmra.mxu1 %vm7535_vm7, %v18183_v21  ;;  %14326 = vmatprep.mubr.msk.f32.mxu0 %vm7535_vm7, %v18183_v21 }
 0x747   : > { %v18194_v39 = vld [vmem:[#allocation2 + $0x138] sm:$0xff]  ;;  %v18196_v14 = vld [vmem:[#allocation2 + $0x140] sm:$0xff]  ;;  %v18206_v53 = vld [vmem:[#allocation2 + $0x148] sm:$0xff] }
 0x748   : > { %14245 = vmatprep.mubr.msk.f32.mxu1 %vm7535_vm7, %v18194_v39  ;;  %14327 = vmatmul.mubr.msk.f32.gmra.mxu0 %vm7535_vm7, %v18194_v39 }
 0x749   : > { %14246 = vmatmul.mubr.msk.f32.gmra.mxu1 %vm7535_vm7, %v18196_v14  ;;  %14329 = vmatprep.mubr.msk.f32.mxu0 %vm7535_vm7, %v18196_v14 }
 0x74a   : > { %14248 = vmatprep.mubr.msk.f32.mxu1 %vm7535_vm7, %v18206_v53 }
 0x74b   : > { %v7358_v42 = vpop.permute.xlu1 %7357  ;;  %v18210_v55 = vld [vmem:[#allocation2 + $0x150] sm:$0xff] }
 0x74c   : > { %7427 = vst.msk [vmem:[#allocation2 + $0x159] sm:$0xff] %vm7399_vm12, %v7358_v42  ;;  %14330 = vmatmul.mubr.msk.f32.gmra.mxu0 %vm7535_vm7, %v18206_v53 }
 0x74d   : > { %14249 = vmatmul.mubr.msk.f32.gmra.mxu1 %vm7535_vm7, %v18210_v55  ;;  %14332 = vmatprep.mubr.msk.f32.mxu0 %vm7535_vm7, %v18210_v55 }
 0x74f   : > { %v7360_v16 = vpop.permute.xlu0 %7359 }
 0x750   : > { %7428 = vst.msk [vmem:[#allocation2 + $0x169] sm:$0xff] %vm7399_vm12, %v7360_v16 }
 0x753   : > { %v18220_v19 = vld [vmem:[#allocation2 + $0x158] sm:$0xff]  ;;  %v18222_v4 = vld [vmem:[#allocation2 + $0x160] sm:$0xff] }
 0x754   : > { %14251 = vmatprep.mubr.msk.f32.mxu1 %vm7535_vm7, %v18220_v19  ;;  %14333 = vmatmul.mubr.msk.f32.gmra.mxu0 %vm7535_vm7, %v18220_v19 }
 0x755   : > { %14252 = vmatmul.mubr.msk.f32.gmra.mxu1 %vm7535_vm7, %v18222_v4  ;;  %14335 = vmatprep.mubr.msk.f32.mxu0 %vm7535_vm7, %v18222_v4 }
 0x757   : > { %v18232_v13 = vld [vmem:[#allocation2 + $0x168] sm:$0xff] }
 0x758   : > { %14254 = vmatprep.mubr.msk.f32.mxu1 %vm7535_vm7, %v18232_v13  ;;  %14336 = vmatmul.mubr.msk.f32.gmra.mxu0 %vm7535_vm7, %v18232_v13 }
 0x75d   : > { %v7362_v1 = vpop.permute.xlu1 %7361 }
 0x75e   : > { %7429 = vst.msk [vmem:[#allocation2 + $0x171] sm:$0xff] %vm7399_vm12, %v7362_v1 }
 0x765   : > { %v18239_v37 = vld [vmem:[#allocation2 + $0x170] sm:$0xff]  ;;  %v18241_v54 = vld [vmem:[#allocation2 + $0x178] sm:$0xff] }
 0x766   : > { %14255 = vmatmul.mubr.msk.f32.gmra.mxu1 %vm7535_vm7, %v18239_v37  ;;  %14338 = vmatprep.mubr.msk.f32.mxu0 %vm7535_vm7, %v18239_v37 }
 0x767   : > { %14257 = vmatprep.mubr.msk.f32.mxu1 %vm7535_vm7, %v18241_v54  ;;  %14339 = vmatmul.mubr.msk.f32.gmra.mxu0 %vm7535_vm7, %v18241_v54 }
 0x76f   : > { %v7364_v6 = vpop.permute.xlu0 %7363 }
 0x770   : > { %7430 = vst.msk [vmem:[#allocation2 + $0x181] sm:$0xff] %vm7399_vm12, %v7364_v6 }
 0x777   : > { %v18252_v26 = vld [vmem:[#allocation2 + $0x180] sm:$0xff] }
 0x778   : > { %14258 = vmatmul.mubr.msk.f32.gmra.mxu1 %vm7535_vm7, %v18252_v26 }
 0x779   : > { %v7366_v44 = vpop.permute.xlu1 %7365 }
 0x77a   : > { %7431 = vst.msk [vmem:[#allocation2 + $0x189] sm:$0xff] %vm7399_vm12, %v7366_v44 }
 0x781   : > { %v18257_v15 = vld [vmem:[#allocation2 + $0x188] sm:$0xff]  ;;  %v18259_v60 = vld [vmem:[#allocation2 + $0x190] sm:$0xff] }
 0x782   : > { %14260 = vmatprep.mubr.msk.f32.mxu1 %vm7535_vm7, %v18257_v15 }
 0x783   : > { %14261 = vmatmul.mubr.msk.f32.gmra.mxu1 %vm7535_vm7, %v18259_v60 }
 0x784   : > { %14347 = vmatprep.mubr.msk.f32.mxu1 %vm7535_vm7, %v17964_v57 }
 0x787   : > { %14348 = vmatmul.mubr.msk.f32.vlgmr.msra.gmra.mxu1 %vm7535_vm7, %v17974_v48 }
 0x788   : > { %14350 = vmatprep.mubr.msk.f32.mxu1 %vm7535_vm7, %v17976_v20 }
 0x78b   : > { %14351 = vmatmul.mubr.msk.f32.gmra.mxu1 %vm7535_vm7, %v17987_v47 }
 0x78c   : > { %14353 = vmatprep.mubr.msk.f32.mxu1 %vm7535_vm7, %v17995_v38 }
 0x78f   : > { %14354 = vmatmul.mubr.msk.f32.gmra.mxu1 %vm7535_vm7, %v17997_v56 }
 0x790   : > { %14356 = vmatprep.mubr.msk.f32.mxu1 %vm7535_vm7, %v18009_v8 }
 0x793   : > { %14357 = vmatmul.mubr.msk.f32.gmra.mxu1 %vm7535_vm7, %v18018_v43 }
 0x794   : > { %14359 = vmatprep.mubr.msk.f32.mxu1 %vm7535_vm7, %v18020_v32 }
 0x797   : > { %14360 = vmatmul.mubr.msk.f32.gmra.mxu1 %vm7535_vm7, %v18032_v10 }
 0x798   : > { %14362 = vmatprep.mubr.msk.f32.mxu1 %vm7535_vm7, %v18040_v17 }
 0x79b   : > { %14363 = vmatmul.mubr.msk.f32.gmra.mxu1 %vm7535_vm7, %v18042_v41 }
 0x79c   : > { %14365 = vmatprep.mubr.msk.f32.mxu1 %vm7535_vm7, %v18053_v30 }
 0x79f   : > { %14366 = vmatmul.mubr.msk.f32.gmra.mxu1 %vm7535_vm7, %v18060_v2 }
 0x7a0   : > { %14368 = vmatprep.mubr.msk.f32.mxu1 %vm7535_vm7, %v18062_v3 }
 0x7a3   : > { %14369 = vmatmul.mubr.msk.f32.gmra.mxu1 %vm7535_vm7, %v18073_v5  ;;  %v8485_v5 = vld [vmem:[#allocation2 + $0x198] sm:$0xff] }
 0x7a4   : > { %14371 = vmatprep.mubr.msk.f32.mxu1 %vm7535_vm7, %v18080_v22 }
 0x7a7   : > { %14372 = vmatmul.mubr.msk.f32.gmra.mxu1 %vm7535_vm7, %v18082_v9  ;;  %v8487_v9 = vld [vmem:[#allocation2 + $0x1a8] sm:$0xff] }
 0x7a8   : > { %v18301_v57 = vpop.f32.mrf.mxu1  ;;  %14374 = vmatprep.mubr.msk.f32.mxu1 %vm7535_vm7, %v18093_v51 }
 0x7aa   : > { %v18305_v48 = vpop.f32.mrf.mxu1 }
 0x7ab   : > { %14375 = vmatmul.mubr.msk.f32.gmra.mxu1 %vm7535_vm7, %v18100_v12 }
 0x7ac   : > { %v18309_v20 = vpop.f32.mrf.mxu1  ;;  %14377 = vmatprep.mubr.msk.f32.mxu1 %vm7535_vm7, %v18102_v18 }
 0x7ae   : > { %v18313_v47 = vpop.f32.mrf.mxu1 }
 0x7af   : > { %14378 = vmatmul.mubr.msk.f32.gmra.mxu1 %vm7535_vm7, %v18113_v35 }
 0x7b0   : > { %14380 = vmatprep.mubr.msk.f32.mxu1 %vm7535_vm7, %v18120_v0 }
 0x7b1   : > { %v18319_v38 = vpop.f32.mrf.mxu1 }
 0x7b3   : > { %14381 = vmatmul.mubr.msk.f32.gmra.mxu1 %vm7535_vm7, %v18122_v34  ;;  %v18325_v56 = vpop.f32.mrf.mxu1 }
 0x7b4   : > { %14383 = vmatprep.mubr.msk.f32.mxu1 %vm7535_vm7, %v18133_v11 }
 0x7b7   : > { %14384 = vmatmul.mubr.msk.f32.gmra.mxu1 %vm7535_vm7, %v18140_v52 }
 0x7b8   : > { %v18329_v8 = vpop.f32.mrf.mxu1  ;;  %14386 = vmatprep.mubr.msk.f32.mxu1 %vm7535_vm7, %v18142_v40  ;;  %v8201_v40 = vpop.f32.mrf.mxu0 }
 0x7ba   : > { %v18333_v43 = vpop.f32.mrf.mxu1 }
 0x7bb   : > { %14387 = vmatmul.mubr.msk.f32.gmra.mxu1 %vm7535_vm7, %v18153_v27  ;;  %v14274_v27 = vpop.f32.mrf.mxu0 }
 0x7bc   : > { %14389 = vmatprep.mubr.msk.f32.mxu1 %vm7535_vm7, %v18160_v50  ;;  %v18339_v32 = vpop.f32.mrf.mxu1 }
 0x7be   : > { %v18345_v10 = vpop.f32.mrf.mxu1 }
 0x7bf   : > { %14390 = vmatmul.mubr.msk.f32.gmra.mxu1 %vm7535_vm7, %v18162_v23  ;;  %v8211_v23 = vpop.f32.mrf.mxu0 }
 0x7c0   : > { %14392 = vmatprep.mubr.msk.f32.mxu1 %vm7535_vm7, %v18172_v7 }
 0x7c1   : > { %v18351_v17 = vpop.f32.mrf.mxu1  ;;  %v14277_v45 = vpop.f32.mrf.mxu0 }
 0x7c3   : > { %14393 = vmatmul.mubr.msk.f32.gmra.mxu1 %vm7535_vm7, %v18181_v61  ;;  %v18357_v41 = vpop.f32.mrf.mxu1  ;;  %v8221_v62 = vpop.f32.mrf.mxu0 }
 0x7c4   : > { %14395 = vmatprep.mubr.msk.f32.mxu1 %vm7535_vm7, %v18183_v21 }
 0x7c5   : > { %v14280_v61 = vpop.f32.mrf.mxu0 }
 0x7c7   : > { %14396 = vmatmul.mubr.msk.f32.gmra.mxu1 %vm7535_vm7, %v18194_v39  ;;  %v8231_v39 = vpop.f32.mrf.mxu0 }
 0x7c8   : > { %14398 = vmatprep.mubr.msk.f32.mxu1 %vm7535_vm7, %v18196_v14  ;;  %v18359_v30 = vpop.f32.mrf.mxu1 }
 0x7ca   : > { %v18365_v49 = vpop.f32.mrf.mxu1 }
 0x7cb   : > { %14399 = vmatmul.mubr.msk.f32.gmra.mxu1 %vm7535_vm7, %v18206_v53  ;;  %v18434_v53 = vpop.f32.mrf.mxu0 }
 0x7cc   : > { %14401 = vmatprep.mubr.msk.f32.mxu1 %vm7535_vm7, %v18210_v55  ;;  %v18371_v2 = vpop.f32.mrf.mxu1 }
 0x7cd   : > { %v18438_v55 = vpop.f32.mrf.mxu0 }
 0x7ce   : > { %v18377_v3 = vpop.f32.mrf.mxu1 }
 0x7cf   : > { %14402 = vmatmul.mubr.msk.f32.gmra.mxu1 %vm7535_vm7, %v18220_v19 }
 0x7d0   : > { %14404 = vmatprep.mubr.msk.f32.mxu1 %vm7535_vm7, %v18222_v4  ;;  %v18444_v4 = vpop.f32.mrf.mxu0 }
 0x7d1   : > { %v18383_v29 = vpop.f32.mrf.mxu1 }
 0x7d2   : > { %v18448_v1 = vpop.f32.mrf.mxu0 }
 0x7d3   : > { %14405 = vmatmul.mubr.msk.f32.gmra.mxu1 %vm7535_vm7, %v18232_v13  ;;  %v18389_v22 = vpop.f32.mrf.mxu1 }
 0x7d4   : > { %14407 = vmatprep.mubr.msk.f32.mxu1 %vm7535_vm7, %v18239_v37 }
 0x7d7   : > { %14408 = vmatmul.mubr.msk.f32.gmra.mxu1 %vm7535_vm7, %v18241_v54  ;;  %v18452_v54 = vpop.f32.mrf.mxu0 }
 0x7d8   : > { %14410 = vmatprep.mubr.msk.f32.mxu1 %vm7535_vm7, %v18252_v26  ;;  %v18393_v28 = vpop.f32.mrf.mxu1 }
 0x7d9   : > { %v18456_v26 = vpop.f32.mrf.mxu0 }
 0x7da   : > { %v18396_v51 = vpop.f32.mrf.mxu1 }
 0x7db   : > { %14411 = vmatmul.mubr.msk.f32.gmra.mxu1 %vm7535_vm7, %v18257_v15  ;;  %v18460_v15 = vpop.f32.mrf.mxu0 }
 0x7dc   : > { %14413 = vmatprep.mubr.msk.f32.mxu1 %vm7535_vm7, %v18259_v60  ;;  %v18398_v33 = vpop.f32.mrf.mxu1 }
 0x7de   : > { %v18400_v12 = vpop.f32.mrf.mxu1 }
 0x7df   : > { %14414 = vmatmul.mubr.msk.f32.gmra.mxu1 %vm7535_vm7, %v8485_v5 }
 0x7e0   : > { %14416 = vmatprep.mubr.msk.f32.mxu1 %vm7535_vm7, %v8486_v46  ;;  %v18466_v46 = vpop.f32.mrf.mxu0 }
 0x7e1   : > { %v18402_v18 = vpop.f32.mrf.mxu1 }
 0x7e3   : > { %14417 = vmatmul.mubr.msk.f32.gmra.mxu1 %vm7535_vm7, %v8487_v9  ;;  %v18404_v58 = vpop.f32.mrf.mxu1 }
 0x7e8   : > { %v18406_v35 = vpop.f32.mrf.mxu1 }
 0x7ea   : > { %v18408_v31 = vpop.f32.mrf.mxu1 }
 0x7ec   : > { %v18410_v0 = vpop.f32.mrf.mxu1 }
 0x7ee   : > { %v18412_v34 = vpop.f32.mrf.mxu1 }
 0x7f1   : > { %v18414_v24 = vpop.f32.mrf.mxu1 }
 0x7f3   : > { %v18416_v11 = vpop.f32.mrf.mxu1 }
 0x7f8   : > { %v18418_v52 = vpop.f32.mrf.mxu1 }
 0x7fa   : > { %v18420_v59 = vpop.f32.mrf.mxu1 }
 0x7fc   : > { %v18422_v50 = vpop.f32.mrf.mxu1 }
 0x7fd   : > { %20173 = vst [vmem:[#allocation3_spill] sm:$0xff] %v18422_v50  ;;  %v8227_v50 = vadd.f32 %v14277_v45, %v18319_v38 }
 0x7fe   : > { %v18424_v63 = vpop.f32.mrf.mxu1 }
 0x805   : > { %v18426_v7 = vpop.f32.mrf.mxu1 }
 0x806   : > { %20174 = vst [vmem:[#allocation6_spill] sm:$0xff] %v18426_v7 }
 0x807   : > { %v18428_v25 = vpop.f32.mrf.mxu1 }
 0x809   : > { %v18430_v21 = vpop.f32.mrf.mxu1 }
 0x80a   : > { %20175 = vst [vmem:[#allocation7_spill] sm:$0xff] %v18430_v21 }
 0x80b   : > { %v18432_v14 = vpop.f32.mrf.mxu1 }
 0x80c   : > { %20176 = vst [vmem:[#allocation4_spill] sm:$0xff] %v18432_v14 }
 0x80d   : > { %v18436_v42 = vpop.f32.mrf.mxu1 }
 0x80e   : > { %20177 = vst [vmem:[#allocation5_spill] sm:$0xff] %v18436_v42  ;;  %v8202_v42 = vadd.f32 %v8201_v40, %v18305_v48 }
 0x80f   : > { %v18440_v16 = vpop.f32.mrf.mxu1 }
 0x810   : > { %20178 = vst [vmem:[#allocation10_spill] sm:$0xff] %v18440_v16 }
 0x815   : > { %v18442_v19 = vpop.f32.mrf.mxu1 }
 0x816   : > { %20179 = vst [vmem:[#allocation9_spill] sm:$0xff] %v18442_v19  ;;  %v8207_v19 = vadd.f32 %v14271_v36, %v18301_v57  ;;  %v8217_v36 = vadd.f32 %v14274_v27, %v18309_v20 }
 0x817   : > { %v18446_v13 = vpop.f32.mrf.mxu1 }
 0x818   : > { %20180 = vst [vmem:[#allocation8_spill] sm:$0xff] %v18446_v13  ;;  %v18474_v13 = vpop.f32.mrf.mxu0 }
 0x826   : > { %v18450_v37 = vpop.f32.mrf.mxu1 }
 0x827   : > { %20181 = vst [vmem:[#allocation13_spill] sm:$0xff] %v18450_v37 }
 0x828   : > { %v18454_v6 = vpop.f32.mrf.mxu1 }
 0x829   : > { %20182 = vst [vmem:[#allocation15_spill] sm:$0xff] %v18454_v6 }
 0x838   : > { %v18458_v44 = vpop.f32.mrf.mxu1 }
 0x839   : > { %20183 = vst [vmem:[#allocation11_spill] sm:$0xff] %v18458_v44 }
 0x83a   : > { %v18462_v60 = vpop.f32.mrf.mxu1 }
 0x83b   : > { %20184 = vst [vmem:[#allocation17_spill] sm:$0xff] %v18462_v60  ;;  %v8212_v60 = vadd.f32 %v8211_v23, %v18313_v47  ;;  %v8222_v47 = vadd.f32 %v8221_v62, %v18325_v56  ;;  %v8232_v62 = vadd.f32 %v8231_v39, %v18333_v43 }
 0x843   : > { %v18464_v5 = vpop.f32.mrf.mxu1 }
 0x844   : > { %20185 = vst [vmem:[#allocation14_spill] sm:$0xff] %v18464_v5 }
 0x845   : > { %v18468_v9 = vpop.f32.mrf.mxu1 }
 0x846   : > { %20186 = vst [vmem:[#allocation16_spill] sm:$0xff] %v18468_v9  ;;  %v18481_v9 = vpop.f32.mrf.mxu0 }
 0x847   : > { %v14349_v37 = vpop.f32.mrf.mxu1 }
 0x848   : > { %v18472_v6 = vadd.f32 %v14349_v37, %v8207_v19  ;;  %v18486_v37 = vpop.f32.mrf.mxu0 }
 0x849   : > { %v8705_v44 = vpop.f32.mrf.mxu1 }
 0x84a   : > { %v18476_v7 = vadd.f32 %v8705_v44, %v8202_v42  ;;  %v9041_v5 = vrot.slane %v18472_v6, 1  ;;  %v9249_v23 = vrot.slane %v18472_v6, 2 }
 0x84b   : > { %v14352_v16 = vpop.f32.mrf.mxu1 }
 0x84c   : > { %20187 = vst [vmem:[#allocation12_spill] sm:$0xff] %v18476_v7  ;;  %v9040_v21 = vrot.slane %v18476_v7, 1  ;;  %v9248_v48 = vrot.slane %v18476_v7, 2  ;;  %v18491_v44 = vadd.f32 %v14352_v16, %v8217_v36  ;;  %v8237_v36 = vadd.f32 %v14280_v61, %v18329_v8 }
 0x84d   : > { %v8715_v57 = vpop.f32.mrf.mxu1 }
 0x84e   : > { %v8946_v40 = vadd.f32 %v8715_v57, %v8212_v60  ;;  %v9042_v19 = vsel %vm2092_vm5, %v9040_v21, %v9041_v5  ;;  %v9250_v21 = vsel %vm2301_vm4, %v9248_v48, %v9249_v23  ;;  %v18498_v57 = vpop.f32.mrf.mxu0  ;;  %v9045_v16 = vrot.slane %v18491_v44, 1 }
 0x84f   : > { %9120 = vrot.lane.b32.xlu0 %v9042_v19, %s14681_s12  ;;  %v14355_v42 = vpop.f32.mrf.mxu1  ;;  %v9253_v8 = vrot.slane %v18491_v44, 2 }
 0x850   : > { %v9043_v14 = vrot.slane %v8946_v40, 1  ;;  %v9251_v27 = vrot.slane %v8946_v40, 2  ;;  %v8949_v38 = vadd.f32 %v14355_v42, %v8227_v50  ;;  %v8242_v50 = vadd.f32 %v18438_v55, %v18345_v10 }
 0x851   : > { %v8725_v20 = vpop.f32.mrf.mxu1  ;;  %v8252_v55 = vadd.f32 %v18448_v1, %v18357_v41 }
 0x852   : > { %v18494_v7 = vadd.f32 %v8725_v20, %v8222_v47  ;;  %v9044_v60 = vsel %vm2092_vm5, %v9041_v5, %v9043_v14  ;;  %v9252_v5 = vsel %vm2301_vm4, %v9249_v23, %v9251_v27  ;;  %v18511_v47 = vpop.f32.mrf.mxu0  ;;  %v9048_v61 = vrot.slane %v8949_v38, 1 }
 0x853   : > { %9328 = vrot.lane.b32.xlu0 %v9250_v21, %s14680_s30  ;;  %9122 = vrot.lane.b32.xlu1 %v9044_v60, %s14681_s12  ;;  %v14358_v56 = vpop.f32.mrf.mxu1 }
 0x854   : > { %v9046_v45 = vrot.slane %v18494_v7, 1  ;;  %v9254_v48 = vrot.slane %v18494_v7, 2  ;;  %v18518_v39 = vadd.f32 %v14358_v56, %v8237_v36  ;;  %v18523_v60 = vpop.f32.mrf.mxu0 }
 0x855   : > { %v8735_v40 = vpop.f32.mrf.mxu1 }
 0x856   : > { %v18507_v14 = vadd.f32 %v8735_v40, %v8232_v62  ;;  %v9047_v19 = vsel %vm2092_vm5, %v9045_v16, %v9046_v45  ;;  %v9255_v27 = vsel %vm2301_vm4, %v9253_v8, %v9254_v48  ;;  %v9049_v21 = vsel %vm2092_vm5, %v9046_v45, %v9048_v61 }
 0x857   : > { %9330 = vrot.lane.b32.xlu1 %v9252_v5, %s14680_s30  ;;  %9124 = vrot.lane.b32.xlu0 %v9047_v19, %s14681_s12  ;;  %v14361_v43 = vpop.f32.mrf.mxu1  ;;  %v9256_v62 = vrot.slane %v8949_v38, 2  ;;  %v9051_v56 = vrot.slane %v18518_v39, 1  ;;  %v8247_v16 = vadd.f32 %v18434_v53, %v18339_v32  ;;  %v9259_v1 = vrot.slane %v18518_v39, 2 }
 0x858   : > { %v9050_v23 = vrot.slane %v18507_v14, 1  ;;  %v9258_v45 = vrot.slane %v18507_v14, 2  ;;  %v8257_v53 = vadd.f32 %v18444_v4, %v18351_v17 }
 0x859   : > { %v8745_v42 = vpop.f32.mrf.mxu1  ;;  %v9257_v40 = vsel %vm2301_vm4, %v9254_v48, %v9256_v62  ;;  %v18542_v32 = vadd.f32 %v14361_v43, %v8247_v16  ;;  %v8262_v43 = vadd.f32 %v18456_v26, %v18365_v49  ;;  %v8272_v26 = vadd.f32 %v18466_v46, %v18377_v3 }
 0x85a   : > { %v8952_v20 = vadd.f32 %v8745_v42, %v8242_v50  ;;  %v9052_v19 = vsel %vm2092_vm5, %v9050_v23, %v9051_v56  ;;  %v18537_v50 = vpop.f32.mrf.mxu0  ;;  %v9260_v42 = vsel %vm2301_vm4, %v9258_v45, %v9259_v1  ;;  %v8282_v46 = vadd.f32 %v18481_v9, %v18389_v22 }
 0x85b   : > { %9332 = vrot.lane.b32.xlu1 %v9255_v27, %s14680_s30  ;;  %9126 = vrot.lane.b32.xlu0 %v9049_v21, %s14681_s12  ;;  %v14364_v10 = vpop.f32.mrf.mxu1  ;;  %v9055_v17 = vrot.slane %v18542_v32, 1 }
 0x85c   : > { %v9053_v5 = vrot.slane %v8952_v20, 1  ;;  %v9261_v8 = vrot.slane %v8952_v20, 2  ;;  %v18549_v27 = vpop.f32.mrf.mxu0  ;;  %v8955_v4 = vadd.f32 %v14364_v10, %v8257_v53  ;;  %v8267_v20 = vadd.f32 %v18452_v54, %v18359_v30 }
 0x85d   : > { %v8755_v36 = vpop.f32.mrf.mxu1  ;;  %v9263_v30 = vrot.slane %v18542_v32, 2 }
 0x85e   : > { %v18534_v38 = vadd.f32 %v8755_v36, %v8252_v55  ;;  %v9054_v23 = vsel %vm2092_vm5, %v9051_v56, %v9053_v5  ;;  %v18558_v62 = vpop.f32.mrf.mxu0  ;;  %v9262_v36 = vsel %vm2301_vm4, %v9259_v1, %v9261_v8  ;;  %v9058_v54 = vrot.slane %v8955_v4, 1 }
 0x85f   : > { %9334 = vrot.lane.b32.xlu1 %v9257_v40, %s14680_s30  ;;  %9128 = vrot.lane.b32.xlu0 %v9052_v19, %s14681_s12  ;;  %v14367_v41 = vpop.f32.mrf.mxu1  ;;  %v9266_v8 = vrot.slane %v8955_v4, 2 }
 0x860   : > { %v9056_v61 = vrot.slane %v18534_v38, 1  ;;  %v9264_v56 = vrot.slane %v18534_v38, 2  ;;  %v18570_v10 = vadd.f32 %v14367_v41, %v8267_v20  ;;  %v18572_v45 = vpop.f32.mrf.mxu0 }
 0x861   : > { %v8765_v48 = vpop.f32.mrf.mxu1 }
 0x862   : > { %v18561_v16 = vadd.f32 %v8765_v48, %v8262_v43  ;;  %v9057_v40 = vsel %vm2092_vm5, %v9055_v17, %v9056_v61  ;;  %v9265_v53 = vsel %vm2301_vm4, %v9263_v30, %v9264_v56  ;;  %v9059_v48 = vsel %vm2092_vm5, %v9056_v61, %v9058_v54 }
 0x863   : > { %9336 = vrot.lane.b32.xlu0 %v9260_v42, %s14680_s30  ;;  %9130 = vrot.lane.b32.xlu1 %v9054_v23, %s14681_s12  ;;  %v14370_v21 = vpop.f32.mrf.mxu1  ;;  %v9061_v41 = vrot.slane %v18570_v10, 1  ;;  %v8277_v42 = vadd.f32 %v18460_v15, %v18371_v2  ;;  %v18584_v23 = vpop.f32.mrf.mxu0  ;;  %v9267_v17 = vsel %vm2301_vm4, %v9264_v56, %v9266_v8  ;;  %v9269_v9 = vrot.slane %v18570_v10, 2 }
 0x864   : > { %v9060_v19 = vrot.slane %v18561_v16, 1  ;;  %v9268_v61 = vrot.slane %v18561_v16, 2  ;;  %v8287_v15 = vadd.f32 %v18474_v13, %v18383_v29 }
 0x865   : > { %v8775_v55 = vpop.f32.mrf.mxu1  ;;  %v18594_v2 = vadd.f32 %v14370_v21, %v8277_v42  ;;  %v18598_v56 = vpop.f32.mrf.mxu0  ;;  %v8292_v21 = vadd.f32 %v18498_v57, %v18396_v51  ;;  %v8302_v57 = vadd.f32 %v18523_v60, %v18400_v12  ;;  %v8312_v60 = vadd.f32 %v18549_v27, %v18404_v58 }
 0x866   : > { %v8958_v1 = vadd.f32 %v8775_v55, %v8272_v26  ;;  %v9062_v55 = vsel %vm2092_vm5, %v9060_v19, %v9061_v41  ;;  %v9270_v30 = vsel %vm2301_vm4, %v9268_v61, %v9269_v9  ;;  %v8297_v19 = vadd.f32 %v18486_v37, %v18393_v28 }
 0x867   : > { %9338 = vrot.lane.b32.xlu1 %v9262_v36, %s14680_s30  ;;  %9132 = vrot.lane.b32.xlu0 %v9057_v40, %s14681_s12  ;;  %v14373_v49 = vpop.f32.mrf.mxu1  ;;  %v9065_v29 = vrot.slane %v18594_v2, 1  ;;  %v9273_v28 = vrot.slane %v18594_v2, 2  ;;  %v8317_v27 = vadd.f32 %v18537_v50, %v18402_v18 }
 0x868   : > { %v9063_v4 = vrot.slane %v8958_v1, 1  ;;  %v9271_v40 = vrot.slane %v8958_v1, 2  ;;  %v8961_v13 = vadd.f32 %v14373_v49, %v8287_v15  ;;  %v18610_v1 = vpop.f32.mrf.mxu0 }
 0x869   : > { %v8785_v5 = vpop.f32.mrf.mxu1 }
 0x86a   : > { %v18588_v20 = vadd.f32 %v8785_v5, %v8282_v46  ;;  %v9064_v54 = vsel %vm2092_vm5, %v9061_v41, %v9063_v4  ;;  %v9272_v46 = vsel %vm2301_vm4, %v9269_v9, %v9271_v40  ;;  %v9068_v37 = vrot.slane %v8961_v13, 1  ;;  %v18624_v42 = vpop.f32.mrf.mxu0 }
 0x86b   : > { %9340 = vrot.lane.b32.xlu1 %v9265_v53, %s14680_s30  ;;  %9134 = vrot.lane.b32.xlu0 %v9059_v48, %s14681_s12  ;;  %v14376_v3 = vpop.f32.mrf.mxu1  ;;  %v9276_v15 = vrot.slane %v8961_v13, 2 }
 0x86c   : > { %v9066_v26 = vrot.slane %v18588_v20, 1  ;;  %v9274_v48 = vrot.slane %v18588_v20, 2  ;;  %v18622_v49 = vadd.f32 %v14376_v3, %v8297_v19  ;;  %v18629_v9 = vpop.f32.mrf.mxu0 }
 0x86d   : > { %v8795_v43 = vpop.f32.mrf.mxu1 }
 0x86e   : > { %v18613_v8 = vadd.f32 %v8795_v43, %v8292_v21  ;;  %v9067_v41 = vsel %vm2092_vm5, %v9065_v29, %v9066_v26  ;;  %v9275_v4 = vsel %vm2301_vm4, %v9273_v28, %v9274_v48  ;;  %v9071_v3 = vrot.slane %v18622_v49, 1  ;;  %v18645_v13 = vpop.f32.mrf.mxu0 }
 0x86f   : > { %9342 = vrot.lane.b32.xlu1 %v9267_v17, %s14680_s30  ;;  %9136 = vrot.lane.b32.xlu0 %v9062_v55, %s14681_s12  ;;  %v14379_v22 = vpop.f32.mrf.mxu1  ;;  %v9069_v55 = vsel %vm2092_vm5, %v9066_v26, %v9068_v37  ;;  %v9277_v26 = vsel %vm2301_vm4, %v9274_v48, %v9276_v15  ;;  %v8327_v37 = vadd.f32 %v18558_v62, %v18406_v35 }
 0x870   : > { %v9070_v17 = vrot.slane %v18613_v8, 1 }
 0x871   : > { %v8805_v36 = vpop.f32.mrf.mxu1 }
 0x872   : > { %v8964_v61 = vadd.f32 %v8805_v36, %v8302_v57  ;;  %v8307_v36 = vadd.f32 %v18511_v47, %v18398_v33  ;;  %v9072_v29 = vsel %vm2092_vm5, %v9070_v17, %v9071_v3  ;;  %v9279_v33 = vrot.slane %v18622_v49, 2  ;;  %v18659_v57 = vpop.f32.mrf.mxu0 }
 0x873   : > { %9344 = vrot.lane.b32.xlu0 %v9270_v30, %s14680_s30  ;;  %9138 = vrot.lane.b32.xlu1 %v9064_v54, %s14681_s12  ;;  %v14382_v5 = vpop.f32.mrf.mxu1  ;;  %v9278_v30 = vrot.slane %v18613_v8, 2 }
 0x874   : > { %v9073_v54 = vrot.slane %v8964_v61, 1  ;;  %v18652_v47 = vadd.f32 %v14379_v22, %v8307_v36  ;;  %v8322_v22 = vadd.f32 %v18572_v45, %v18408_v31  ;;  %v8967_v50 = vadd.f32 %v14382_v5, %v8317_v27 }
 0x875   : > { %v8815_v53 = vpop.f32.mrf.mxu1  ;;  %v8332_v45 = vadd.f32 %v18598_v56, %v18412_v34  ;;  %v8342_v56 = vadd.f32 %v18624_v42, %v18416_v11 }
 0x876   : > { %v18642_v21 = vadd.f32 %v8815_v53, %v8312_v60  ;;  %v9281_v53 = vrot.slane %v8964_v61, 2  ;;  %v9075_v18 = vrot.slane %v18652_v47, 1  ;;  %v8361_v60 = vpop.f32.mrf.mxu0  ;;  %v9283_v35 = vrot.slane %v18652_v47, 2 }
 0x877   : > { %9346 = vrot.lane.b32.xlu1 %v9272_v46, %s14680_s30  ;;  %9140 = vrot.lane.b32.xlu0 %v9067_v41, %s14681_s12  ;;  %v14385_v51 = vpop.f32.mrf.mxu1  ;;  %v9280_v46 = vsel %vm2301_vm4, %v9278_v30, %v9279_v33  ;;  %v9074_v41 = vsel %vm2092_vm5, %v9071_v3, %v9073_v54  ;;  %v9078_v62 = vrot.slane %v8967_v50, 1 }
 0x878   : > { %v9076_v48 = vrot.slane %v18642_v21, 1  ;;  %v9284_v61 = vrot.slane %v18642_v21, 2  ;;  %v18682_v5 = vadd.f32 %v14385_v51, %v8327_v37  ;;  %v18687_v54 = vpop.f32.mrf.mxu0 }
 0x879   : > { %v8825_v43 = vpop.f32.mrf.mxu1 }
 0x87a   : > { %v9077_v15 = vsel %vm2092_vm5, %v9075_v18, %v9076_v48  ;;  %v9079_v30 = vsel %vm2092_vm5, %v9076_v48, %v9078_v62  ;;  %v9081_v51 = vrot.slane %v18682_v5, 1  ;;  %v9289_v42 = vrot.slane %v18682_v5, 2 }
 0x87b   : > { %9348 = vrot.lane.b32.xlu1 %v9275_v4, %s14680_s30  ;;  %9142 = vrot.lane.b32.xlu0 %v9069_v55, %s14681_s12  ;;  %v18633_v12 = vpop.f32.mrf.mxu1  ;;  %v18671_v4 = vadd.f32 %v8825_v43, %v8322_v22  ;;  %v9282_v55 = vsel %vm2301_vm4, %v9279_v33, %v9281_v53  ;;  %v8371_v22 = vpop.f32.mrf.mxu0 }
 0x87d   : > { %v8835_v40 = vpop.f32.mrf.mxu1  ;;  %v9080_v3 = vrot.slane %v18671_v4, 1  ;;  %v9288_v53 = vrot.slane %v18671_v4, 2  ;;  %v14325_v18 = vpop.f32.mrf.mxu0 }
 0x87e   : > { %v8970_v36 = vadd.f32 %v8835_v40, %v8332_v45  ;;  %v8337_v40 = vadd.f32 %v18584_v23, %v18410_v0  ;;  %v8347_v23 = vadd.f32 %v18610_v1, %v18414_v24  ;;  %v8357_v1 = vadd.f32 %v18629_v9, %v18418_v52 }
 0x87f   : > { %9350 = vrot.lane.b32.xlu1 %v9277_v26, %s14680_s30  ;;  %9144 = vrot.lane.b32.xlu0 %v9072_v29, %s14681_s12  ;;  %v18649_v58 = vpop.f32.mrf.mxu1  ;;  %v9285_v26 = vsel %vm2301_vm4, %v9283_v35, %v9284_v61  ;;  %v9286_v29 = vrot.slane %v8967_v50, 2  ;;  %v9290_v37 = vsel %vm2301_vm4, %v9288_v53, %v9289_v42  ;;  %v8381_v45 = vpop.f32.mrf.mxu0 }
 0x880   : > { %v9083_v48 = vrot.slane %v8970_v36, 1  ;;  %v18709_v0 = vadd.f32 %v18633_v12, %v8337_v40  ;;  %v8352_v12 = vadd.f32 %v18645_v13, %v18420_v59  ;;  %v8973_v24 = vadd.f32 %v18649_v58, %v8347_v23 }
 0x881   : > { %v8845_v19 = vpop.f32.mrf.mxu1  ;;  %v9287_v27 = vsel %vm2301_vm4, %v9284_v61, %v9286_v29  ;;  %v8362_v59 = vadd.f32 %v8361_v60, %v18424_v63  ;;  %v14328_v58 = vpop.f32.mrf.mxu0  ;;  %v8372_v63 = vadd.f32 %v8371_v22, %v18428_v25  ;;  %v20189_v25 = vld [vmem:[#allocation4_spill] sm:$0xff] }
 0x882   : > { %v9084_v61 = vsel %vm2092_vm5, %v9081_v51, %v9083_v48  ;;  %v9293_v13 = vrot.slane %v18709_v0, 2  ;;  %v9088_v52 = vrot.slane %v8973_v24, 1  ;;  %v8382_v22 = vadd.f32 %v8381_v45, %v20189_v25  ;;  %v20194_v25 = vld [vmem:[#allocation5_spill] sm:$0xff] }
 0x883   : > { %9352 = vrot.lane.b32.xlu0 %v9280_v46, %s14680_s30  ;;  %9146 = vrot.lane.b32.xlu1 %v9074_v41, %s14681_s12  ;;  %v18663_v28 = vpop.f32.mrf.mxu1  ;;  %v18700_v46 = vadd.f32 %v8845_v19, %v8342_v56  ;;  %v9082_v41 = vsel %vm2092_vm5, %v9080_v3, %v9081_v51  ;;  %v9291_v19 = vrot.slane %v8970_v36, 2  ;;  %v9296_v51 = vrot.slane %v8973_v24, 2  ;;  %v8391_v53 = vpop.f32.mrf.mxu0 }
 0x884   : > { %v18736_v9 = vadd.f32 %v18663_v28, %v8357_v1  ;;  %v20188_v28 = vld [vmem:[#allocation3_spill] sm:$0xff] }
 0x885   : > { %v8855_v17 = vpop.f32.mrf.mxu1  ;;  %v9086_v50 = vrot.slane %v18700_v46, 1  ;;  %v9294_v35 = vrot.slane %v18700_v46, 2  ;;  %v9292_v3 = vsel %vm2301_vm4, %v9289_v42, %v9291_v19 }
 0x886   : > { %v18725_v62 = vadd.f32 %v8855_v17, %v8352_v12  ;;  %v9091_v60 = vrot.slane %v18736_v9, 1  ;;  %v18762_v12 = vpop.f32.mrf.mxu0 }
 0x887   : > { %9354 = vrot.lane.b32.xlu1 %v9282_v55, %s14680_s30  ;;  %9148 = vrot.lane.b32.xlu0 %v9077_v15, %s14681_s12  ;;  %v18677_v31 = vpop.f32.mrf.mxu1  ;;  %v9085_v15 = vrot.slane %v18709_v0, 1  ;;  %v9295_v29 = vsel %vm2301_vm4, %v9293_v13, %v9294_v35  ;;  %v9089_v56 = vsel %vm2092_vm5, %v9086_v50, %v9088_v52 }
 0x888   : > { %v9090_v17 = vrot.slane %v18725_v62, 1  ;;  %v9298_v48 = vrot.slane %v18725_v62, 2  ;;  %v8401_v13 = vpop.f32.mrf.mxu0 }
 0x889   : > { %v8865_v43 = vpop.f32.mrf.mxu1  ;;  %v9087_v36 = vsel %vm2092_vm5, %v9085_v15, %v9086_v50 }
 0x88a   : > { %v9092_v23 = vsel %vm2092_vm5, %v9090_v17, %v9091_v60 }
 0x88b   : > { %9356 = vrot.lane.b32.xlu1 %v9285_v26, %s14680_s30  ;;  %9150 = vrot.lane.b32.xlu0 %v9079_v30, %s14681_s12  ;;  %v18691_v34 = vpop.f32.mrf.mxu1  ;;  %v8976_v30 = vadd.f32 %v8865_v43, %v8362_v59  ;;  %v9297_v43 = vsel %vm2301_vm4, %v9294_v35, %v9296_v51  ;;  %v20192_v59 = vld [vmem:[#allocation6_spill] sm:$0xff]  ;;  %v14334_v51 = vpop.f32.mrf.mxu0 }
 0x88d   : > { %v8875_v33 = vpop.f32.mrf.mxu1 }
 0x88e   : > { %v18749_v42 = vadd.f32 %v8875_v33, %v8372_v63  ;;  %v9301_v33 = vrot.slane %v8976_v30, 2 }
 0x88f   : > { %9358 = vrot.lane.b32.xlu1 %v9287_v27, %s14680_s30  ;;  %9152 = vrot.lane.b32.xlu0 %v9082_v41, %s14681_s12  ;;  %v18705_v11 = vpop.f32.mrf.mxu1  ;;  %v8367_v27 = vadd.f32 %v18659_v57, %v20188_v28  ;;  %v9093_v41 = vrot.slane %v8976_v30, 1  ;;  %v9299_v57 = vrot.slane %v18736_v9, 2 }
 0x890   : > { %v9096_v15 = vrot.slane %v18749_v42, 1  ;;  %v9304_v17 = vrot.slane %v18749_v42, 2 }
 0x891   : > { %v8885_v55 = vpop.f32.mrf.mxu1  ;;  %v18759_v50 = vadd.f32 %v18677_v31, %v8367_v27  ;;  %v9300_v1 = vsel %vm2301_vm4, %v9298_v48, %v9299_v57  ;;  %v9094_v35 = vsel %vm2092_vm5, %v9091_v60, %v9093_v41  ;;  %v20191_v31 = vld [vmem:[#allocation10_spill] sm:$0xff]  ;;  %v9302_v52 = vsel %vm2301_vm4, %v9299_v57, %v9301_v33  ;;  %v20193_v48 = vld [vmem:[#allocation8_spill] sm:$0xff] }
 0x892   : > { %v18765_v24 = vadd.f32 %v8885_v55, %v8382_v22  ;;  %v8392_v45 = vadd.f32 %v8391_v53, %v20191_v31  ;;  %v8377_v55 = vadd.f32 %v18687_v54, %v20192_v59  ;;  %v8402_v41 = vadd.f32 %v8401_v13, %v20193_v48  ;;  %v20195_v31 = vld [vmem:[#allocation15_spill] sm:$0xff] }
 0x893   : > { %9360 = vrot.lane.b32.xlu0 %v9290_v37, %s14680_s30  ;;  %9154 = vrot.lane.b32.xlu1 %v9084_v61, %s14681_s12  ;;  %v18729_v26 = vpop.f32.mrf.mxu1  ;;  %v20190_v37 = vld [vmem:[#allocation7_spill] sm:$0xff]  ;;  %v8397_v22 = vadd.f32 %v14328_v58, %v20194_v25 }
 0x894   : > { %v8387_v61 = vadd.f32 %v14325_v18, %v20190_v37  ;;  %v9095_v18 = vrot.slane %v18759_v50, 1  ;;  %v9100_v30 = vrot.slane %v18765_v24, 1  ;;  %v8979_v54 = vadd.f32 %v18691_v34, %v8377_v55  ;;  %v12601_v34 = vld [vmem:[%s20090_s9 + $0x28] sm:$0xff] }
 0x895   : > { %v8895_v40 = vpop.f32.mrf.mxu1  ;;  %14419 = vmatprep.subr.mxu0 %v12601_v34  ;;  %v9308_v55 = vrot.slane %v18765_v24, 2 }
 0x896   : > { %14420 = vmatpush3.msra.mxu0 %v12601_v34  ;;  %v9306_v58 = vrot.slane %v8979_v54, 2 }
 0x897   : > { %9362 = vrot.lane.b32.xlu1 %v9292_v3, %s14680_s30  ;;  %9156 = vrot.lane.b32.xlu0 %v9087_v36, %s14681_s12  ;;  %v18752_v19 = vpop.f32.mrf.mxu1  ;;  %v18774_v36 = vadd.f32 %v18705_v11, %v8387_v61  ;;  %v9303_v11 = vrot.slane %v18759_v50, 2 }
 0x899   : > { %v8905_v3 = vpop.f32.mrf.mxu1  ;;  %v9101_v60 = vrot.slane %v18774_v36, 1  ;;  %v9305_v27 = vsel %vm2301_vm4, %v9303_v11, %v9304_v17 }
 0x89a   : > { %v18796_v37 = vadd.f32 %v8905_v3, %v8402_v41  ;;  %v18809_v3 = vadd.f32 %v18729_v26, %v8397_v22  ;;  %v20197_v26 = vld [vmem:[#allocation17_spill] sm:$0xff] }
 0x89b   : > { %9364 = vrot.lane.b32.xlu1 %v9295_v29, %s14680_s30  ;;  %9158 = vrot.lane.b32.xlu0 %v9089_v56, %s14681_s12  ;;  %v8982_v29 = vadd.f32 %v8895_v40, %v8392_v45  ;;  %v9097_v56 = vsel %vm2092_vm5, %v9095_v18, %v9096_v15  ;;  %v14412_v63 = vpop.f32.mrf.mxu1  ;;  %v9102_v53 = vsel %vm2092_vm5, %v9100_v30, %v9101_v60  ;;  %v8411_v40 = vpop.f32.mrf.mxu0  ;;  %v9309_v18 = vrot.slane %v18774_v36, 2 }
 0x89c   : > { %v8412_v45 = vadd.f32 %v8411_v40, %v20195_v31  ;;  %v9106_v13 = vrot.slane %v18796_v37, 1  ;;  %v9307_v30 = vsel %vm2301_vm4, %v9304_v17, %v9306_v58  ;;  %v9314_v17 = vrot.slane %v18796_v37, 2  ;;  %v9800_v58 = vld [vmem:[%s20090_s9] sm:$0xff] }
 0x89d   : > { %v9103_v28 = vrot.slane %v8982_v29, 1  ;;  %v9311_v57 = vrot.slane %v8982_v29, 2 }
 0x89f   : > { %9366 = vrot.lane.b32.xlu1 %v9297_v43, %s14680_s30  ;;  %9160 = vrot.lane.b32.xlu0 %v9092_v23, %s14681_s12  ;;  %v8915_v43 = vpop.f32.mrf.mxu1  ;;  %v9098_v23 = vrot.slane %v8979_v54, 1  ;;  %v9104_v33 = vsel %vm2092_vm5, %v9101_v60, %v9103_v28  ;;  %v9312_v29 = vsel %vm2301_vm4, %v9309_v18, %v9311_v57  ;;  %v20198_v28 = vld [vmem:[#allocation9_spill] sm:$0xff]  ;;  %v9802_v57 = vld [vmem:[%s20090_s9 + $0x10] sm:$0xff] }
 0x8a0   : > { %14497 = vmatprep.subr.mxu1 %v9802_v57 }
 0x8a1   : > { %v9099_v61 = vsel %vm2092_vm5, %v9096_v15, %v9098_v23  ;;  %v20196_v15 = vld [vmem:[#allocation13_spill] sm:$0xff]  ;;  %14498 = vmatpush3.msra.mxu1 %v9802_v57 }
 0x8a2   : > { %v8417_v59 = vadd.f32 %v14334_v51, %v20196_v15  ;;  %v9105_v51 = vrot.slane %v18809_v3, 1 }
 0x8a3   : > { %9368 = vrot.lane.b32.xlu0 %v9300_v1, %s14680_s30  ;;  %9162 = vrot.lane.b32.xlu1 %v9094_v35, %s14681_s12  ;;  %v18800_v1 = vpop.f32.mrf.mxu0  ;;  %v18802_v35 = vpop.f32.mrf.mxu1 }
 0x8a4   : > { %v18822_v60 = vadd.f32 %v14412_v63, %v8417_v59  ;;  %v9107_v48 = vsel %vm2092_vm5, %v9105_v51, %v9106_v13  ;;  %v9313_v63 = vrot.slane %v18809_v3, 2 }
 0x8a5   : > { %v8925_v11 = vpop.f32.mrf.mxu1 }
 0x8a6   : > { %v9315_v34 = vsel %vm2301_vm4, %v9313_v63, %v9314_v17 }
 0x8a7   : > { %9370 = vrot.lane.b32.xlu1 %v9302_v52, %s14680_s30  ;;  %9164 = vrot.lane.b32.xlu0 %v9097_v56, %s14681_s12  ;;  %v18814_v52 = vadd.f32 %v8915_v43, %v8412_v45  ;;  %v8421_v56 = vpop.f32.mrf.mxu0 }
 0x8a8   : > { %v8422_v54 = vadd.f32 %v8421_v56, %v20197_v26 }
 0x8a9   : > { %v9110_v40 = vrot.slane %v18814_v52, 1  ;;  %v9318_v15 = vrot.slane %v18814_v52, 2 }
 0x8aa   : > { %v18829_v43 = vadd.f32 %v8925_v11, %v8422_v54  ;;  %v18864_v11 = vld [vmem:[%s20089_s8] ss:$0 sm:$0xff] }
 0x8ab   : > { %9372 = vrot.lane.b32.xlu1 %v9305_v27, %s14680_s30  ;;  %9168 = vrot.lane.b32.xlu0 %v9102_v53, %s14681_s12  ;;  %v8407_v27 = vadd.f32 %v18762_v12, %v20198_v28  ;;  %v9310_v53 = vsel %vm2301_vm4, %v9308_v55, %v9309_v18  ;;  %v9111_v12 = vrot.slane %v18822_v60, 1  ;;  %v9752_v18 = vld [vmem:[#allocation2] sm:$0xff]  ;;  %v9753_v55 = vld [vmem:[#allocation2 + $0x8] sm:$0xff] }
 0x8ac   : > { %v9113_v23 = vrot.slane %v18829_v43, 1  ;;  %14503 = vmatprep.mubr.msk.f32.mxu1 %vm387_vm2, %v9752_v18 }
 0x8ad   : > { %v8985_v41 = vadd.f32 %v18752_v19, %v8407_v27  ;;  %v9112_v25 = vsel %vm2092_vm5, %v9110_v40, %v9111_v12 }
 0x8ae   : > { %v9114_v19 = vsel %vm2092_vm5, %v9111_v12, %v9113_v23  ;;  %v12599_v12 = vld [vmem:[%s20090_s9 + $0x18] sm:$0xff]  ;;  %v18878_v23 = vpop.f32.mrf.mxu0 }
 0x8af   : > { %9166 = vrot.lane.b32.xlu1 %v9099_v61, %s14681_s12  ;;  %9170 = vrot.lane.b32.xlu0 %v9104_v33, %s14681_s12  ;;  %v9108_v22 = vrot.slane %v8985_v41, 1  ;;  %v9801_v33 = vld [vmem:[%s20090_s9 + $0x8] sm:$0xff]  ;;  %v9316_v31 = vrot.slane %v8985_v41, 2 }
 0x8b0   : > { %14499 = vmatprep.subr.mxu1 %v9801_v33 }
 0x8b1   : > { %v9109_v61 = vsel %vm2092_vm5, %v9106_v13, %v9108_v22  ;;  %v9317_v59 = vsel %vm2301_vm4, %v9314_v17, %v9316_v31  ;;  %14500 = vmatpush3.msra.mxu1 %v9801_v33  ;;  %v9754_v13 = vld [vmem:[#allocation2 + $0x10] sm:$0xff]  ;;  %v12600_v17 = vld [vmem:[%s20090_s9 + $0x20] sm:$0xff]  ;;  %v8431_v31 = vpop.f32.mrf.mxu0 }
 0x8b2   : > { %14501 = vmatprep.subr.mxu1 %v9800_v58  ;;  %14421 = vmatprep.subr.mxu0 %v12600_v17 }
 0x8b3   : > { %9374 = vrot.lane.b32.xlu1 %v9307_v30, %s14680_s30  ;;  %9378 = vrot.lane.b32.xlu0 %v9312_v29, %s14680_s30  ;;  %v9319_v30 = vrot.slane %v18822_v60, 2  ;;  %v20199_v29 = vld [vmem:[#allocation12_spill] sm:$0xff] }
 0x8b4   : > { %14502 = vmatpush3.msra.mxu1 %v9800_v58  ;;  %14422 = vmatpush3.msra.mxu0 %v12600_v17 }
 0x8b5   : > { %14504 = vmatmul.mubr.msk.f32.vlgmr.msra.gmra.mxu1 %vm387_vm2, %v9753_v55  ;;  %v9320_v28 = vsel %vm2301_vm4, %v9318_v15, %v9319_v30  ;;  %14423 = vmatprep.subr.mxu0 %v12599_v12 }
 0x8b6   : > { %14506 = vmatprep.mubr.msk.f32.mxu1 %vm387_vm2, %v9754_v13  ;;  %14424 = vmatpush3.msra.mxu0 %v12599_v12 }
 0x8b7   : > { %9376 = vrot.lane.b32.xlu1 %v9310_v53, %s14680_s30  ;;  %9172 = vrot.lane.b32.xlu0 %v9107_v48, %s14681_s12 }
 0x8bb   : > { %9380 = vrot.lane.b32.xlu1 %v9315_v34, %s14680_s30  ;;  %9176 = vrot.lane.b32.xlu0 %v9112_v25, %s14681_s12  ;;  %v18880_v34 = vpop.f32.mrf.mxu1 }
 0x8bd   : > { %v8935_v58 = vpop.f32.mrf.mxu1 }
 0x8bf   : > { %9174 = vrot.lane.b32.xlu1 %v9109_v61, %s14681_s12  ;;  %9178 = vrot.lane.b32.xlu0 %v9114_v19, %s14681_s12 }
 0x8c1   : > { %v9121_v45 = vpop.permute.xlu0 %9120 }
 0x8c2   : > { %v9216_v56 = vadd.f32 %v9121_v45, %v20199_v29  ;;  %v9321_v45 = vrot.slane %v18829_v43, 2 }
 0x8c3   : > { %9382 = vrot.lane.b32.xlu1 %v9317_v59, %s14680_s30 }
 0x8c5   : > { %v9329_v26 = vpop.permute.xlu0 %9328  ;;  %v9123_v54 = vpop.permute.xlu1 %9122 }
 0x8c6   : > { %v9424_v51 = vadd.f32 %v9329_v26, %v9216_v56  ;;  %v9217_v53 = vadd.f32 %v9123_v54, %v18472_v6  ;;  %v20201_v54 = vld [vmem:[#allocation11_spill] sm:$0xff] }
 0x8c7   : > { %9384 = vrot.lane.b32.xlu1 %v9320_v28, %s14680_s30 }
 0x8c8   : > { %v9463_v27 = vadd.f32 %v18864_v11, %v9424_v51  ;;  %v8427_v51 = vadd.f32 %v18800_v1, %v20201_v54  ;;  %v20202_v54 = vld [vmem:[#allocation14_spill] sm:$0xff] }
 0x8c9   : > { %v9331_v40 = vpop.permute.xlu1 %9330  ;;  %v9125_v48 = vpop.permute.xlu0 %9124 }
 0x8ca   : > { %v9425_v63 = vadd.f32 %v9331_v40, %v9217_v53  ;;  %vm9495_vm7 = vcmp.ge.f32.partialorder %v9463_v27, 0.0  ;;  %v9527_v41 = vmul.f32 0.2, %v9463_v27  ;;  %v9218_v25 = vadd.f32 %v9125_v48, %v18491_v44  ;;  %v20200_v44 = vld [vmem:[#allocation16_spill] sm:$0xff] }
 0x8cb   : > { %v8432_v55 = vadd.f32 %v8431_v31, %v20200_v44  ;;  %v9322_v53 = vsel %vm2301_vm4, %v9319_v30, %v9321_v45  ;;  %v18900_v48 = vadd.f32 %v18802_v35, %v8427_v51  ;;  %v8437_v51 = vadd.f32 %v18878_v23, %v20202_v54 }
 0x8cc   : > { %v9464_v6 = vadd.f32 %v18864_v11, %v9425_v63  ;;  %v9559_v22 = vsel %vm9495_vm7, %v9463_v27, %v9527_v41 }
 0x8cd   : > { %v9333_v57 = vpop.permute.xlu1 %9332  ;;  %v9127_v61 = vpop.permute.xlu0 %9126  ;;  %9623 = vrot.lane.b32.xlu0 %v9559_v22, %s14685_s13  ;;  %v18892_v28 = vadd.f32 %v8935_v58, %v8432_v55  ;;  %v9323_v22 = vrot.slane %v18900_v48, 2 }
 0x8ce   : > { %v9426_v19 = vadd.f32 %v9333_v57, %v9218_v25  ;;  %vm9496_vm0 = vcmp.ge.f32.partialorder %v9464_v6, 0.0  ;;  %v9528_v33 = vmul.f32 0.2, %v9464_v6  ;;  %v9219_v15 = vadd.f32 %v9127_v61, %v18494_v7 }
 0x8cf   : > { %v9324_v41 = vrot.slane %v18892_v28, 2 }
 0x8d0   : > { %v9465_v18 = vadd.f32 %v18864_v11, %v9426_v19  ;;  %v9560_v59 = vsel %vm9496_vm0, %v9464_v6, %v9528_v33 }
 0x8d1   : > { %v9335_v13 = vpop.permute.xlu1 %9334  ;;  %v9129_v29 = vpop.permute.xlu0 %9128  ;;  %9625 = vrot.lane.b32.xlu0 %v9560_v59, %s14685_s13  ;;  %v9325_v31 = vsel %vm2301_vm4, %v9323_v22, %v9324_v41 }
 0x8d2   : > { %v9427_v56 = vadd.f32 %v9335_v13, %v9219_v15  ;;  %vm9497_vm1 = vcmp.ge.f32.partialorder %v9465_v18, 0.0  ;;  %v9529_v26 = vmul.f32 0.2, %v9465_v18  ;;  %v9220_v27 = vadd.f32 %v9129_v29, %v18507_v14 }
 0x8d3   : > { %v9116_v15 = vrot.slane %v18892_v28, 1  ;;  %v9115_v29 = vrot.slane %v18900_v48, 1 }
 0x8d4   : > { %v9466_v43 = vadd.f32 %v18864_v11, %v9427_v56  ;;  %v9561_v7 = vsel %vm9497_vm1, %v9465_v18, %v9529_v26 }
 0x8d5   : > { %v9337_v17 = vpop.permute.xlu0 %9336  ;;  %v9131_v40 = vpop.permute.xlu1 %9130  ;;  %9627 = vrot.lane.b32.xlu1 %v9561_v7, %s14685_s13  ;;  %9386 = vrot.lane.b32.xlu0 %v9322_v53, %s14680_s30 }
 0x8d6   : > { %v9428_v63 = vadd.f32 %v9337_v17, %v9220_v27  ;;  %vm9498_vm8 = vcmp.ge.f32.partialorder %v9466_v43, 0.0  ;;  %v9530_v1 = vmul.f32 0.2, %v9466_v43  ;;  %v9221_v14 = vadd.f32 %v9131_v40, %v18518_v39 }
 0x8d7   : > { %v8991_v40 = vadd.f32 %v18880_v34, %v8437_v51 }
 0x8d8   : > { %v9467_v12 = vadd.f32 %v18864_v11, %v9428_v63  ;;  %v9562_v6 = vsel %vm9498_vm8, %v9466_v43, %v9530_v1 }
 0x8d9   : > { %v9339_v30 = vpop.permute.xlu1 %9338  ;;  %v9133_v25 = vpop.permute.xlu0 %9132  ;;  %9629 = vrot.lane.b32.xlu1 %v9562_v6, %s14685_s13 }
 0x8da   : > { %v9429_v57 = vadd.f32 %v9339_v30, %v9221_v14  ;;  %vm9499_vm9 = vcmp.ge.f32.partialorder %v9467_v12, 0.0  ;;  %v9531_v35 = vmul.f32 0.2, %v9467_v12  ;;  %v9222_v19 = vadd.f32 %v9133_v25, %v18542_v32 }
 0x8db   : > { %v9118_v30 = vrot.slane %v8991_v40, 1 }
 0x8dc   : > { %v9468_v61 = vadd.f32 %v18864_v11, %v9429_v57  ;;  %v9563_v33 = vsel %vm9499_vm9, %v9467_v12, %v9531_v35 }
 0x8dd   : > { %v9341_v39 = vpop.permute.xlu1 %9340  ;;  %v9135_v45 = vpop.permute.xlu0 %9134  ;;  %9631 = vrot.lane.b32.xlu0 %v9563_v33, %s14685_s13  ;;  %9388 = vrot.lane.b32.xlu1 %v9325_v31, %s14680_s30  ;;  %v9119_v35 = vsel %vm2092_vm5, %v9116_v15, %v9118_v30 }
 0x8de   : > { %v9430_v58 = vadd.f32 %v9341_v39, %v9222_v19  ;;  %vm9500_vm10 = vcmp.ge.f32.partialorder %v9468_v61, 0.0  ;;  %v9532_v18 = vmul.f32 0.2, %v9468_v61  ;;  %v9223_v32 = vadd.f32 %v9135_v45, %v18534_v38 }
 0x8df   : > { %v9117_v38 = vsel %vm2092_vm5, %v9115_v29, %v9116_v15 }
 0x8e0   : > { %v9469_v59 = vadd.f32 %v18864_v11, %v9430_v58  ;;  %v9564_v44 = vsel %vm9500_vm10, %v9468_v61, %v9532_v18 }
 0x8e1   : > { %v9343_v55 = vpop.permute.xlu1 %9342  ;;  %v9137_v13 = vpop.permute.xlu0 %9136  ;;  %9633 = vrot.lane.b32.xlu0 %v9564_v44, %s14685_s13 }
 0x8e2   : > { %v9431_v56 = vadd.f32 %v9343_v55, %v9223_v32  ;;  %vm9501_vm11 = vcmp.ge.f32.partialorder %v9469_v59, 0.0  ;;  %v9533_v26 = vmul.f32 0.2, %v9469_v59  ;;  %v9224_v27 = vadd.f32 %v9137_v13, %v18561_v16 }
 0x8e4   : > { %v9470_v43 = vadd.f32 %v18864_v11, %v9431_v56  ;;  %v9565_v7 = vsel %vm9501_vm11, %v9469_v59, %v9533_v26 }
 0x8e5   : > { %v9345_v53 = vpop.permute.xlu0 %9344  ;;  %v9139_v17 = vpop.permute.xlu1 %9138  ;;  %9635 = vrot.lane.b32.xlu1 %v9565_v7, %s14685_s13  ;;  %9180 = vrot.lane.b32.xlu0 %v9117_v38, %s14681_s12 }
 0x8e6   : > { %v9432_v63 = vadd.f32 %v9345_v53, %v9224_v27  ;;  %vm9502_vm12 = vcmp.ge.f32.partialorder %v9470_v43, 0.0  ;;  %v9534_v1 = vmul.f32 0.2, %v9470_v43  ;;  %v9225_v12 = vadd.f32 %v9139_v17, %v18570_v10 }
 0x8e7   : > { %v9326_v10 = vrot.slane %v8991_v40, 2 }
 0x8e8   : > { %v9471_v23 = vadd.f32 %v18864_v11, %v9432_v63  ;;  %v9566_v14 = vsel %vm9502_vm12, %v9470_v43, %v9534_v1 }
 0x8e9   : > { %v9347_v16 = vpop.permute.xlu1 %9346  ;;  %v9141_v6 = vpop.permute.xlu0 %9140  ;;  %9637 = vrot.lane.b32.xlu1 %v9566_v14, %s14685_s13 }
 0x8ea   : > { %v9433_v25 = vadd.f32 %v9347_v16, %v9225_v12  ;;  %vm9503_vm13 = vcmp.ge.f32.partialorder %v9471_v23, 0.0  ;;  %v9535_v22 = vmul.f32 0.2, %v9471_v23  ;;  %v9226_v34 = vadd.f32 %v9141_v6, %v18594_v2 }
 0x8eb   : > { %v9327_v2 = vsel %vm2301_vm4, %v9324_v41, %v9326_v10 }
 0x8ec   : > { %v9472_v57 = vadd.f32 %v18864_v11, %v9433_v25  ;;  %v9567_v61 = vsel %vm9503_vm13, %v9471_v23, %v9535_v22 }
 0x8ed   : > { %v9349_v19 = vpop.permute.xlu1 %9348  ;;  %v9143_v33 = vpop.permute.xlu0 %9142  ;;  %9182 = vrot.lane.b32.xlu1 %v9119_v35, %s14681_s12  ;;  %9639 = vrot.lane.b32.xlu0 %v9567_v61, %s14685_s13 }
 0x8ee   : > { %v9434_v31 = vadd.f32 %v9349_v19, %v9226_v34  ;;  %vm9504_vm14 = vcmp.ge.f32.partialorder %v9472_v57, 0.0  ;;  %v9536_v39 = vmul.f32 0.2, %v9472_v57  ;;  %v9227_v58 = vadd.f32 %v9143_v33, %v18588_v20 }
 0x8f0   : > { %v9473_v45 = vadd.f32 %v18864_v11, %v9434_v31  ;;  %v9568_v18 = vsel %vm9504_vm14, %v9472_v57, %v9536_v39  ;;  %v18962_v39 = vld [vmem:[%s20090_s9 + $0x40] sm:$0xff] }
 0x8f1   : > { %v9351_v15 = vpop.permute.xlu1 %9350  ;;  %v9145_v59 = vpop.permute.xlu0 %9144  ;;  %9390 = vrot.lane.b32.xlu1 %v9327_v2, %s14680_s30  ;;  %9641 = vrot.lane.b32.xlu0 %v9568_v18, %s14685_s13 }
 0x8f2   : > { %v9435_v32 = vadd.f32 %v9351_v15, %v9227_v58  ;;  %vm9505_vm6 = vcmp.ge.f32.partialorder %v9473_v45, 0.0  ;;  %v9537_v44 = vmul.f32 0.2, %v9473_v45  ;;  %v9228_v13 = vadd.f32 %v9145_v59, %v18613_v8  ;;  %14575 = vmatprep.subr.mxu0 %v18962_v39 }
 0x8f4   : > { %v9474_v55 = vadd.f32 %v18864_v11, %v9435_v32  ;;  %v9569_v29 = vsel %vm9505_vm6, %v9473_v45, %v9537_v44 }
 0x8f5   : > { %v9353_v20 = vpop.permute.xlu0 %9352  ;;  %v9147_v56 = vpop.permute.xlu1 %9146  ;;  %9643 = vrot.lane.b32.xlu0 %v9569_v29, %s14685_s13 }
 0x8f6   : > { %v9436_v41 = vadd.f32 %v9353_v20, %v9228_v13  ;;  %vm9506_vm15 = vcmp.ge.f32.partialorder %v9474_v55, 0.0  ;;  %v9538_v26 = vmul.f32 0.2, %v9474_v55  ;;  %v9229_v51 = vadd.f32 %v9147_v56, %v18622_v49 }
 0x8f8   : > { %v9475_v54 = vadd.f32 %v18864_v11, %v9436_v41  ;;  %v9570_v43 = vsel %vm9506_vm15, %v9474_v55, %v9538_v26 }
 0x8f9   : > { %v9355_v27 = vpop.permute.xlu1 %9354  ;;  %v9149_v7 = vpop.permute.xlu0 %9148  ;;  %9645 = vrot.lane.b32.xlu1 %v9570_v43, %s14685_s13 }
 0x8fa   : > { %v9437_v38 = vadd.f32 %v9355_v27, %v9229_v51  ;;  %vm9507_vm7 = vcmp.ge.f32.partialorder %v9475_v54, 0.0  ;;  %v9539_v8 = vmul.f32 0.2, %v9475_v54  ;;  %v9230_v17 = vadd.f32 %v9149_v7, %v18652_v47 }
 0x8fc   : > { %v9476_v53 = vadd.f32 %v18864_v11, %v9437_v38  ;;  %v9571_v40 = vsel %vm9507_vm7, %v9475_v54, %v9539_v8 }
 0x8fd   : > { %v9357_v63 = vpop.permute.xlu1 %9356  ;;  %v9151_v1 = vpop.permute.xlu0 %9150  ;;  %9647 = vrot.lane.b32.xlu0 %v9571_v40, %s14685_s13 }
 0x8fe   : > { %v9438_v23 = vadd.f32 %v9357_v63, %v9230_v17  ;;  %vm9508_vm0 = vcmp.ge.f32.partialorder %v9476_v53, 0.0  ;;  %v9540_v49 = vmul.f32 0.2, %v9476_v53  ;;  %v9231_v14 = vadd.f32 %v9151_v1, %v18642_v21 }
 0x900   : > { %v9477_v12 = vadd.f32 %v18864_v11, %v9438_v23  ;;  %v9572_v16 = vsel %vm9508_vm0, %v9476_v53, %v9540_v49 }
 0x901   : > { %v9359_v6 = vpop.permute.xlu1 %9358  ;;  %v9153_v30 = vpop.permute.xlu0 %9152  ;;  %9649 = vrot.lane.b32.xlu1 %v9572_v16, %s14685_s13 }
 0x902   : > { %v9439_v25 = vadd.f32 %v9359_v6, %v9231_v14  ;;  %vm9509_vm1 = vcmp.ge.f32.partialorder %v9477_v12, 0.0  ;;  %v9541_v47 = vmul.f32 0.2, %v9477_v12  ;;  %v9232_v57 = vadd.f32 %v9153_v30, %v18671_v4 }
 0x904   : > { %v9478_v22 = vadd.f32 %v18864_v11, %v9439_v25  ;;  %v9573_v34 = vsel %vm9509_vm1, %v9477_v12, %v9541_v47 }
 0x905   : > { %v9361_v35 = vpop.permute.xlu0 %9360  ;;  %v9155_v61 = vpop.permute.xlu1 %9154  ;;  %9651 = vrot.lane.b32.xlu0 %v9573_v34, %s14685_s13 }
 0x906   : > { %v9440_v19 = vadd.f32 %v9361_v35, %v9232_v57  ;;  %vm9510_vm8 = vcmp.ge.f32.partialorder %v9478_v22, 0.0  ;;  %v9542_v21 = vmul.f32 0.2, %v9478_v22  ;;  %v9233_v10 = vadd.f32 %v9155_v61, %v18682_v5 }
 0x908   : > { %v9479_v33 = vadd.f32 %v18864_v11, %v9440_v19  ;;  %v9574_v31 = vsel %vm9510_vm8, %v9478_v22, %v9542_v21 }
 0x909   : > { %v9363_v45 = vpop.permute.xlu1 %9362  ;;  %v9157_v4 = vpop.permute.xlu0 %9156  ;;  %9653 = vrot.lane.b32.xlu1 %v9574_v31, %s14685_s13 }
 0x90a   : > { %v9441_v58 = vadd.f32 %v9363_v45, %v9233_v10  ;;  %vm9511_vm9 = vcmp.ge.f32.partialorder %v9479_v33, 0.0  ;;  %v9543_v2 = vmul.f32 0.2, %v9479_v33  ;;  %v9234_v15 = vadd.f32 %v9157_v4, %v18709_v0 }
 0x90c   : > { %v9480_v18 = vadd.f32 %v18864_v11, %v9441_v58  ;;  %v9575_v5 = vsel %vm9511_vm9, %v9479_v33, %v9543_v2  ;;  %vm9719_vm9 = vcmask 195744  }
 0x90d   : > { %v9365_v59 = vpop.permute.xlu1 %9364  ;;  %v9159_v32 = vpop.permute.xlu0 %9158  ;;  %9655 = vrot.lane.b32.xlu0 %v9575_v5, %s14685_s13 }
 0x90e   : > { %v9442_v44 = vadd.f32 %v9365_v59, %v9234_v15  ;;  %vm9512_vm10 = vcmp.ge.f32.partialorder %v9480_v18, 0.0  ;;  %v9544_v55 = vmul.f32 0.2, %v9480_v18  ;;  %v9235_v29 = vadd.f32 %v9159_v32, %v18700_v46 }
 0x910   : > { %v9481_v13 = vadd.f32 %v18864_v11, %v9442_v44  ;;  %v9576_v20 = vsel %vm9512_vm10, %v9480_v18, %v9544_v55 }
 0x911   : > { %v9367_v56 = vpop.permute.xlu1 %9366  ;;  %v9161_v41 = vpop.permute.xlu0 %9160  ;;  %9657 = vrot.lane.b32.xlu1 %v9576_v20, %s14685_s13 }
 0x912   : > { %v9443_v26 = vadd.f32 %v9367_v56, %v9235_v29  ;;  %vm9513_vm11 = vcmp.ge.f32.partialorder %v9481_v13, 0.0  ;;  %v9545_v0 = vmul.f32 0.2, %v9481_v13  ;;  %v9236_v51 = vadd.f32 %v9161_v41, %v18725_v62 }
 0x914   : > { %v9482_v54 = vadd.f32 %v18864_v11, %v9443_v26  ;;  %v9577_v43 = vsel %vm9513_vm11, %v9481_v13, %v9545_v0 }
 0x915   : > { %v9369_v27 = vpop.permute.xlu0 %9368  ;;  %v9163_v7 = vpop.permute.xlu1 %9162  ;;  %9659 = vrot.lane.b32.xlu0 %v9577_v43, %s14685_s13 }
 0x916   : > { %v9444_v38 = vadd.f32 %v9369_v27, %v9236_v51  ;;  %vm9514_vm12 = vcmp.ge.f32.partialorder %v9482_v54, 0.0  ;;  %v9546_v46 = vmul.f32 0.2, %v9482_v54  ;;  %v9237_v53 = vadd.f32 %v9163_v7, %v18736_v9 }
 0x918   : > { %v9483_v8 = vadd.f32 %v18864_v11, %v9444_v38  ;;  %v9578_v17 = vsel %vm9514_vm12, %v9482_v54, %v9546_v46 }
 0x919   : > { %v9371_v40 = vpop.permute.xlu1 %9370  ;;  %v9165_v63 = vpop.permute.xlu0 %9164  ;;  %9661 = vrot.lane.b32.xlu1 %v9578_v17, %s14685_s13 }
 0x91a   : > { %v9445_v1 = vadd.f32 %v9371_v40, %v9237_v53  ;;  %vm9515_vm13 = vcmp.ge.f32.partialorder %v9483_v8, 0.0  ;;  %v9547_v62 = vmul.f32 0.2, %v9483_v8  ;;  %v9238_v49 = vadd.f32 %v9165_v63, %v18759_v50 }
 0x91c   : > { %v9484_v23 = vadd.f32 %v18864_v11, %v9445_v1  ;;  %v9579_v12 = vsel %vm9515_vm13, %v9483_v8, %v9547_v62 }
 0x91d   : > { %v9373_v14 = vpop.permute.xlu1 %9372  ;;  %v9169_v16 = vpop.permute.xlu0 %9168  ;;  %9663 = vrot.lane.b32.xlu0 %v9579_v12, %s14685_s13 }
 0x91e   : > { %v9446_v6 = vadd.f32 %v9373_v14, %v9238_v49  ;;  %vm9516_vm14 = vcmp.ge.f32.partialorder %v9484_v23, 0.0  ;;  %v9548_v9 = vmul.f32 0.2, %v9484_v23  ;;  %v9240_v10 = vadd.f32 %v9169_v16, %v18765_v24 }
 0x920   : > { %v9485_v30 = vadd.f32 %v18864_v11, %v9446_v6  ;;  %v9580_v25 = vsel %vm9516_vm14, %v9484_v23, %v9548_v9 }
 0x921   : > { %v9167_v47 = vpop.permute.xlu1 %9166  ;;  %v9171_v22 = vpop.permute.xlu0 %9170  ;;  %9665 = vrot.lane.b32.xlu1 %v9580_v25, %s14685_s13 }
 0x922   : > { %vm9517_vm6 = vcmp.ge.f32.partialorder %v9485_v30, 0.0  ;;  %v9549_v57 = vmul.f32 0.2, %v9485_v30  ;;  %v9239_v34 = vadd.f32 %v9167_v47, %v18749_v42  ;;  %v9241_v50 = vadd.f32 %v9171_v22, %v18774_v36  ;;  %v12698_v47 = vld [vmem:[%s20090_s9 + $0x30] sm:$0xff] }
 0x924   : > { %v9581_v35 = vsel %vm9517_vm6, %v9485_v30, %v9549_v57 }
 0x925   : > { %v9375_v61 = vpop.permute.xlu1 %9374  ;;  %v9379_v19 = vpop.permute.xlu0 %9378  ;;  %9667 = vrot.lane.b32.xlu0 %v9581_v35, %s14685_s13 }
 0x926   : > { %v9447_v21 = vadd.f32 %v9375_v61, %v9239_v34  ;;  %v9449_v33 = vadd.f32 %v9379_v19, %v9241_v50 }
 0x928   : > { %v9486_v31 = vadd.f32 %v18864_v11, %v9447_v21  ;;  %v9488_v45 = vadd.f32 %v18864_v11, %v9449_v33 }
 0x929   : > { %v9377_v4 = vpop.permute.xlu1 %9376  ;;  %v9173_v58 = vpop.permute.xlu0 %9172 }
 0x92a   : > { %v9448_v2 = vadd.f32 %v9377_v4, %v9240_v10  ;;  %vm9518_vm15 = vcmp.ge.f32.partialorder %v9486_v31, 0.0  ;;  %v9550_v42 = vmul.f32 0.2, %v9486_v31  ;;  %v9242_v18 = vadd.f32 %v9173_v58, %v18809_v3 }
 0x92b   : > { %v9552_v5 = vmul.f32 0.2, %v9488_v45  ;;  %vm9520_vm7 = vcmp.ge.f32.partialorder %v9488_v45, 0.0 }
 0x92c   : > { %v9487_v36 = vadd.f32 %v18864_v11, %v9448_v2  ;;  %v9582_v15 = vsel %vm9518_vm15, %v9486_v31, %v9550_v42 }
 0x92d   : > { %v9381_v59 = vpop.permute.xlu1 %9380  ;;  %9669 = vrot.lane.b32.xlu1 %v9582_v15, %s14685_s13  ;;  %v9584_v55 = vsel %vm9520_vm7, %v9488_v45, %v9552_v5  ;;  %v9177_v41 = vpop.permute.xlu0 %9176 }
 0x92e   : > { %v9450_v24 = vadd.f32 %v9381_v59, %v9242_v18  ;;  %vm9519_vm0 = vcmp.ge.f32.partialorder %v9487_v36, 0.0  ;;  %v9551_v32 = vmul.f32 0.2, %v9487_v36  ;;  %v9244_v54 = vadd.f32 %v9177_v41, %v18814_v52 }
 0x930   : > { %v9489_v44 = vadd.f32 %v18864_v11, %v9450_v24  ;;  %v9583_v13 = vsel %vm9519_vm0, %v9487_v36, %v9551_v32 }
 0x931   : > { %v9175_v29 = vpop.permute.xlu1 %9174  ;;  %9673 = vrot.lane.b32.xlu1 %v9584_v55, %s14685_s13  ;;  %9671 = vrot.lane.b32.xlu0 %v9583_v13, %s14685_s13  ;;  %v9179_v38 = vpop.permute.xlu0 %9178 }
 0x932   : > { %vm9521_vm1 = vcmp.ge.f32.partialorder %v9489_v44, 0.0  ;;  %v9553_v3 = vmul.f32 0.2, %v9489_v44  ;;  %v9243_v20 = vadd.f32 %v9175_v29, %v18796_v37  ;;  %v9245_v40 = vadd.f32 %v9179_v38, %v18822_v60  ;;  %v12699_v60 = vld [vmem:[%s20090_s9 + $0x38] sm:$0xff] }
 0x934   : > { %v9585_v56 = vsel %vm9521_vm1, %v9489_v44, %v9553_v3 }
 0x935   : > { %v9383_v26 = vpop.permute.xlu1 %9382  ;;  %9675 = vrot.lane.b32.xlu0 %v9585_v56, %s14685_s13 }
 0x936   : > { %v9451_v0 = vadd.f32 %v9383_v26, %v9243_v20 }
 0x938   : > { %v9490_v51 = vadd.f32 %v18864_v11, %v9451_v0 }
 0x939   : > { %v9385_v43 = vpop.permute.xlu1 %9384 }
 0x93a   : > { %v9452_v27 = vadd.f32 %v9385_v43, %v9244_v54  ;;  %vm9522_vm8 = vcmp.ge.f32.partialorder %v9490_v51, 0.0  ;;  %v9554_v7 = vmul.f32 0.2, %v9490_v51 }
 0x93c   : > { %v9491_v46 = vadd.f32 %v18864_v11, %v9452_v27  ;;  %v9586_v8 = vsel %vm9522_vm8, %v9490_v51, %v9554_v7 }
 0x93d   : > { %9677 = vrot.lane.b32.xlu1 %v9586_v8, %s14685_s13 }
 0x93e   : > { %vm9523_vm10 = vcmp.ge.f32.partialorder %v9491_v46, 0.0  ;;  %v9555_v37 = vmul.f32 0.2, %v9491_v46 }
 0x93f   : > { %v9624_v53 = vpop.permute.xlu0 %9623 }
 0x940   : > { %v9587_v17 = vsel %vm9523_vm10, %v9491_v46, %v9555_v37  ;;  %9720 = vst.msk [vmem:[#allocation2 + $0x19] sm:$0xff] %vm9719_vm9, %v9624_v53 }
 0x941   : > { %9679 = vrot.lane.b32.xlu0 %v9587_v17, %s14685_s13 }
 0x943   : > { %v9626_v52 = vpop.permute.xlu0 %9625 }
 0x944   : > { %9721 = vst.msk [vmem:[#allocation2 + $0x21] sm:$0xff] %vm9719_vm9, %v9626_v52 }
 0x947   : > { %v9628_v63 = vpop.permute.xlu1 %9627  ;;  %v9387_v1 = vpop.permute.xlu0 %9386  ;;  %v9803_v62 = vld [vmem:[#allocation2 + $0x18] sm:$0xff] }
 0x948   : > { %v9453_v23 = vadd.f32 %v9387_v1, %v9245_v40  ;;  %14425 = vmatprep.mubr.msk.f32.mxu0 %vm387_vm2, %v9803_v62  ;;  %9722 = vst.msk [vmem:[#allocation2 + $0x31] sm:$0xff] %vm9719_vm9, %v9628_v63  ;;  %14507 = vmatmul.mubr.msk.f32.gmra.mxu1 %vm387_vm2, %v9803_v62 }
 0x94a   : > { %v9492_v49 = vadd.f32 %v18864_v11, %v9453_v23 }
 0x94b   : > { %v9630_v12 = vpop.permute.xlu1 %9629  ;;  %v9804_v14 = vld [vmem:[#allocation2 + $0x20] sm:$0xff]  ;;  %v9805_v16 = vld [vmem:[#allocation2 + $0x28] sm:$0xff] }
 0x94c   : > { %v9556_v6 = vmul.f32 0.2, %v9492_v49  ;;  %9723 = vst.msk [vmem:[#allocation2 + $0x39] sm:$0xff] %vm9719_vm9, %v9630_v12  ;;  %14426 = vmatmul.mubr.msk.f32.vlgmr.msra.gmra.mxu0 %vm387_vm2, %v9804_v14  ;;  %14509 = vmatprep.mubr.msk.f32.mxu1 %vm387_vm2, %v9804_v14  ;;  %vm9524_vm11 = vcmp.ge.f32.partialorder %v9492_v49, 0.0 }
 0x94d   : > { %14428 = vmatprep.mubr.msk.f32.mxu0 %vm387_vm2, %v9805_v16  ;;  %14510 = vmatmul.mubr.msk.f32.gmra.mxu1 %vm387_vm2, %v9805_v16 }
 0x94e   : > { %v9588_v9 = vsel %vm9524_vm11, %v9492_v49, %v9556_v6  ;;  %14576 = vmatpush3.msra.mxu0 %v18962_v39 }
 0x94f   : > { %v9632_v30 = vpop.permute.xlu0 %9631  ;;  %9681 = vrot.lane.b32.xlu1 %v9588_v9, %s14685_s13  ;;  %v19019_v25 = vld [vmem:[#allocation2 + $0x30] sm:$0xff]  ;;  %14577 = vmatprep.subr.mxu0 %v12699_v60  ;;  %v9389_v39 = vpop.permute.xlu1 %9388 }
 0x950   : > { %9724 = vst.msk [vmem:[#allocation2 + $0x49] sm:$0xff] %vm9719_vm9, %v9632_v30  ;;  %14429 = vmatmul.mubr.msk.f32.gmra.mxu0 %vm387_vm2, %v19019_v25  ;;  %14512 = vmatprep.mubr.msk.f32.mxu1 %vm387_vm2, %v19019_v25 }
 0x951   : > { %14578 = vmatpush3.msra.mxu0 %v12699_v60 }
 0x952   : > { %14579 = vmatprep.subr.mxu0 %v12698_v47 }
 0x953   : > { %v9634_v22 = vpop.permute.xlu0 %9633  ;;  %v19029_v57 = vld [vmem:[#allocation2 + $0x38] sm:$0xff]  ;;  %v19031_v34 = vld [vmem:[#allocation2 + $0x40] sm:$0xff]  ;;  %14580 = vmatpush3.msra.mxu0 %v12698_v47 }
 0x954   : > { %9725 = vst.msk [vmem:[#allocation2 + $0x51] sm:$0xff] %vm9719_vm9, %v9634_v22  ;;  %14431 = vmatprep.mubr.msk.f32.mxu0 %vm387_vm2, %v19029_v57  ;;  %14513 = vmatmul.mubr.msk.f32.gmra.mxu1 %vm387_vm2, %v19029_v57 }
 0x955   : > { %14432 = vmatmul.mubr.msk.f32.gmra.mxu0 %vm387_vm2, %v19031_v34  ;;  %14515 = vmatprep.mubr.msk.f32.mxu1 %vm387_vm2, %v19031_v34 }
 0x957   : > { %v9636_v50 = vpop.permute.xlu1 %9635  ;;  %v9181_v35 = vpop.permute.xlu0 %9180  ;;  %v19042_v61 = vld [vmem:[#allocation2 + $0x48] sm:$0xff] }
 0x958   : > { %9726 = vst.msk [vmem:[#allocation2 + $0x61] sm:$0xff] %vm9719_vm9, %v9636_v50  ;;  %v9246_v19 = vadd.f32 %v9181_v35, %v18900_v48  ;;  %14434 = vmatprep.mubr.msk.f32.mxu0 %vm387_vm2, %v19042_v61  ;;  %14516 = vmatmul.mubr.msk.f32.gmra.mxu1 %vm387_vm2, %v19042_v61 }
 0x95a   : > { %v9454_v21 = vadd.f32 %v9389_v39, %v9246_v19 }
 0x95b   : > { %v9638_v33 = vpop.permute.xlu1 %9637  ;;  %v19050_v10 = vld [vmem:[#allocation2 + $0x50] sm:$0xff]  ;;  %v19052_v31 = vld [vmem:[#allocation2 + $0x58] sm:$0xff] }
 0x95c   : > { %v9493_v45 = vadd.f32 %v18864_v11, %v9454_v21  ;;  %9727 = vst.msk [vmem:[#allocation2 + $0x69] sm:$0xff] %vm9719_vm9, %v9638_v33  ;;  %14435 = vmatmul.mubr.msk.f32.gmra.mxu0 %vm387_vm2, %v19050_v10  ;;  %14518 = vmatprep.mubr.msk.f32.mxu1 %vm387_vm2, %v19050_v10 }
 0x95d   : > { %14437 = vmatprep.mubr.msk.f32.mxu0 %vm387_vm2, %v19052_v31  ;;  %14519 = vmatmul.mubr.msk.f32.gmra.mxu1 %vm387_vm2, %v19052_v31 }
 0x95e   : > { %vm9525_vm12 = vcmp.ge.f32.partialorder %v9493_v45, 0.0  ;;  %v9557_v48 = vmul.f32 0.2, %v9493_v45 }
 0x95f   : > { %v9183_v4 = vpop.permute.xlu1 %9182  ;;  %v9640_v58 = vpop.permute.xlu0 %9639  ;;  %v19064_v2 = vld [vmem:[#allocation2 + $0x60] sm:$0xff] }
 0x960   : > { %9728 = vst.msk [vmem:[#allocation2 + $0x79] sm:$0xff] %vm9719_vm9, %v9640_v58  ;;  %14438 = vmatmul.mubr.msk.f32.gmra.mxu0 %vm387_vm2, %v19064_v2  ;;  %14521 = vmatprep.mubr.msk.f32.mxu1 %vm387_vm2, %v19064_v2  ;;  %v9589_v42 = vsel %vm9525_vm12, %v9493_v45, %v9557_v48  ;;  %v9247_v36 = vadd.f32 %v9183_v4, %v18892_v28 }
 0x961   : > { %9683 = vrot.lane.b32.xlu0 %v9589_v42, %s14685_s13 }
 0x963   : > { %v9391_v18 = vpop.permute.xlu1 %9390  ;;  %v9642_v15 = vpop.permute.xlu0 %9641  ;;  %v19073_v5 = vld [vmem:[#allocation2 + $0x68] sm:$0xff]  ;;  %v19075_v59 = vld [vmem:[#allocation2 + $0x70] sm:$0xff] }
 0x964   : > { %v9455_v24 = vadd.f32 %v9391_v18, %v9247_v36  ;;  %9729 = vst.msk [vmem:[#allocation2 + $0x81] sm:$0xff] %vm9719_vm9, %v9642_v15  ;;  %14440 = vmatprep.mubr.msk.f32.mxu0 %vm387_vm2, %v19073_v5  ;;  %14522 = vmatmul.mubr.msk.f32.gmra.mxu1 %vm387_vm2, %v19073_v5 }
 0x965   : > { %14441 = vmatmul.mubr.msk.f32.gmra.mxu0 %vm387_vm2, %v19075_v59  ;;  %14524 = vmatprep.mubr.msk.f32.mxu1 %vm387_vm2, %v19075_v59 }
 0x966   : > { %v9494_v28 = vadd.f32 %v18864_v11, %v9455_v24 }
 0x967   : > { %v9644_v32 = vpop.permute.xlu0 %9643  ;;  %v19087_v44 = vld [vmem:[#allocation2 + $0x78] sm:$0xff] }
 0x968   : > { %v9558_v55 = vmul.f32 0.2, %v9494_v28  ;;  %9730 = vst.msk [vmem:[#allocation2 + $0x91] sm:$0xff] %vm9719_vm9, %v9644_v32  ;;  %14443 = vmatprep.mubr.msk.f32.mxu0 %vm387_vm2, %v19087_v44  ;;  %14525 = vmatmul.mubr.msk.f32.gmra.mxu1 %vm387_vm2, %v19087_v44  ;;  %vm9526_vm13 = vcmp.ge.f32.partialorder %v9494_v28, 0.0 }
 0x96a   : > { %v9590_v13 = vsel %vm9526_vm13, %v9494_v28, %v9558_v55 }
 0x96b   : > { %9685 = vrot.lane.b32.xlu1 %v9590_v13, %s14685_s13  ;;  %v9646_v29 = vpop.permute.xlu1 %9645  ;;  %v19095_v3 = vld [vmem:[#allocation2 + $0x80] sm:$0xff]  ;;  %v19097_v11 = vld [vmem:[#allocation2 + $0x88] sm:$0xff] }
 0x96c   : > { %9731 = vst.msk [vmem:[#allocation2 + $0x99] sm:$0xff] %vm9719_vm9, %v9646_v29  ;;  %14444 = vmatmul.mubr.msk.f32.gmra.mxu0 %vm387_vm2, %v19095_v3  ;;  %14527 = vmatprep.mubr.msk.f32.mxu1 %vm387_vm2, %v19095_v3 }
 0x96d   : > { %14446 = vmatprep.mubr.msk.f32.mxu0 %vm387_vm2, %v19097_v11  ;;  %14528 = vmatmul.mubr.msk.f32.gmra.mxu1 %vm387_vm2, %v19097_v11 }
 0x96f   : > { %v9648_v20 = vpop.permute.xlu0 %9647  ;;  %v19108_v56 = vld [vmem:[#allocation2 + $0x90] sm:$0xff] }
 0x970   : > { %9732 = vst.msk [vmem:[#allocation2 + $0xa9] sm:$0xff] %vm9719_vm9, %v9648_v20  ;;  %14447 = vmatmul.mubr.msk.f32.gmra.mxu0 %vm387_vm2, %v19108_v56  ;;  %14530 = vmatprep.mubr.msk.f32.mxu1 %vm387_vm2, %v19108_v56 }
 0x973   : > { %v9650_v41 = vpop.permute.xlu1 %9649  ;;  %v19115_v26 = vld [vmem:[#allocation2 + $0x98] sm:$0xff]  ;;  %v19117_v0 = vld [vmem:[#allocation2 + $0xa0] sm:$0xff] }
 0x974   : > { %9733 = vst.msk [vmem:[#allocation2 + $0xb1] sm:$0xff] %vm9719_vm9, %v9650_v41  ;;  %14449 = vmatprep.mubr.msk.f32.mxu0 %vm387_vm2, %v19115_v26  ;;  %14531 = vmatmul.mubr.msk.f32.gmra.mxu1 %vm387_vm2, %v19115_v26 }
 0x975   : > { %14450 = vmatmul.mubr.msk.f32.gmra.mxu0 %vm387_vm2, %v19117_v0  ;;  %14533 = vmatprep.mubr.msk.f32.mxu1 %vm387_vm2, %v19117_v0 }
 0x977   : > { %v9652_v54 = vpop.permute.xlu0 %9651  ;;  %v19128_v51 = vld [vmem:[#allocation2 + $0xa8] sm:$0xff] }
 0x978   : > { %9734 = vst.msk [vmem:[#allocation2 + $0xc1] sm:$0xff] %vm9719_vm9, %v9652_v54  ;;  %14452 = vmatprep.mubr.msk.f32.mxu0 %vm387_vm2, %v19128_v51  ;;  %14534 = vmatmul.mubr.msk.f32.gmra.mxu1 %vm387_vm2, %v19128_v51 }
 0x97b   : > { %v9654_v43 = vpop.permute.xlu1 %9653  ;;  %v19135_v27 = vld [vmem:[#allocation2 + $0xb0] sm:$0xff]  ;;  %v19137_v7 = vld [vmem:[#allocation2 + $0xb8] sm:$0xff] }
 0x97c   : > { %9735 = vst.msk [vmem:[#allocation2 + $0xc9] sm:$0xff] %vm9719_vm9, %v9654_v43  ;;  %14453 = vmatmul.mubr.msk.f32.gmra.mxu0 %vm387_vm2, %v19135_v27  ;;  %14536 = vmatprep.mubr.msk.f32.mxu1 %vm387_vm2, %v19135_v27  ;;  %v10799_v43 = vld [vmem:[#allocation2 + $0x1a0] sm:$0xff] }
 0x97d   : > { %14455 = vmatprep.mubr.msk.f32.mxu0 %vm387_vm2, %v19137_v7  ;;  %14537 = vmatmul.mubr.msk.f32.gmra.mxu1 %vm387_vm2, %v19137_v7 }
 0x97f   : > { %v9656_v38 = vpop.permute.xlu0 %9655  ;;  %v19148_v46 = vld [vmem:[#allocation2 + $0xc0] sm:$0xff] }
 0x980   : > { %9736 = vst.msk [vmem:[#allocation2 + $0xd9] sm:$0xff] %vm9719_vm9, %v9656_v38  ;;  %14456 = vmatmul.mubr.msk.f32.gmra.mxu0 %vm387_vm2, %v19148_v46  ;;  %14539 = vmatprep.mubr.msk.f32.mxu1 %vm387_vm2, %v19148_v46 }
 0x983   : > { %v9658_v8 = vpop.permute.xlu1 %9657  ;;  %v19155_v37 = vld [vmem:[#allocation2 + $0xc8] sm:$0xff]  ;;  %v19157_v53 = vld [vmem:[#allocation2 + $0xd0] sm:$0xff] }
 0x984   : > { %9737 = vst.msk [vmem:[#allocation2 + $0xe1] sm:$0xff] %vm9719_vm9, %v9658_v8  ;;  %14458 = vmatprep.mubr.msk.f32.mxu0 %vm387_vm2, %v19155_v37  ;;  %14540 = vmatmul.mubr.msk.f32.gmra.mxu1 %vm387_vm2, %v19155_v37 }
 0x985   : > { %14459 = vmatmul.mubr.msk.f32.gmra.mxu0 %vm387_vm2, %v19157_v53  ;;  %14542 = vmatprep.mubr.msk.f32.mxu1 %vm387_vm2, %v19157_v53 }
 0x987   : > { %v9660_v17 = vpop.permute.xlu0 %9659  ;;  %v19168_v52 = vld [vmem:[#allocation2 + $0xd8] sm:$0xff] }
 0x988   : > { %9738 = vst.msk [vmem:[#allocation2 + $0xf1] sm:$0xff] %vm9719_vm9, %v9660_v17  ;;  %14461 = vmatprep.mubr.msk.f32.mxu0 %vm387_vm2, %v19168_v52  ;;  %14543 = vmatmul.mubr.msk.f32.gmra.mxu1 %vm387_vm2, %v19168_v52 }
 0x98b   : > { %v9662_v40 = vpop.permute.xlu1 %9661  ;;  %v19175_v63 = vld [vmem:[#allocation2 + $0xe0] sm:$0xff]  ;;  %v19177_v1 = vld [vmem:[#allocation2 + $0xe8] sm:$0xff] }
 0x98c   : > { %9739 = vst.msk [vmem:[#allocation2 + $0xf9] sm:$0xff] %vm9719_vm9, %v9662_v40  ;;  %14462 = vmatmul.mubr.msk.f32.gmra.mxu0 %vm387_vm2, %v19175_v63  ;;  %14545 = vmatprep.mubr.msk.f32.mxu1 %vm387_vm2, %v19175_v63 }
 0x98d   : > { %14464 = vmatprep.mubr.msk.f32.mxu0 %vm387_vm2, %v19177_v1  ;;  %14546 = vmatmul.mubr.msk.f32.gmra.mxu1 %vm387_vm2, %v19177_v1 }
 0x98f   : > { %v9664_v62 = vpop.permute.xlu0 %9663  ;;  %v19188_v23 = vld [vmem:[#allocation2 + $0xf0] sm:$0xff] }
 0x990   : > { %9740 = vst.msk [vmem:[#allocation2 + $0x109] sm:$0xff] %vm9719_vm9, %v9664_v62  ;;  %14465 = vmatmul.mubr.msk.f32.gmra.mxu0 %vm387_vm2, %v19188_v23  ;;  %14548 = vmatprep.mubr.msk.f32.mxu1 %vm387_vm2, %v19188_v23 }
 0x993   : > { %v9666_v49 = vpop.permute.xlu1 %9665  ;;  %v19195_v12 = vld [vmem:[#allocation2 + $0xf8] sm:$0xff]  ;;  %v19197_v14 = vld [vmem:[#allocation2 + $0x100] sm:$0xff] }
 0x994   : > { %9741 = vst.msk [vmem:[#allocation2 + $0x111] sm:$0xff] %vm9719_vm9, %v9666_v49  ;;  %14467 = vmatprep.mubr.msk.f32.mxu0 %vm387_vm2, %v19195_v12  ;;  %14549 = vmatmul.mubr.msk.f32.gmra.mxu1 %vm387_vm2, %v19195_v12 }
 0x995   : > { %14468 = vmatmul.mubr.msk.f32.gmra.mxu0 %vm387_vm2, %v19197_v14  ;;  %14551 = vmatprep.mubr.msk.f32.mxu1 %vm387_vm2, %v19197_v14 }
 0x997   : > { %v9668_v16 = vpop.permute.xlu0 %9667  ;;  %v19208_v6 = vld [vmem:[#allocation2 + $0x108] sm:$0xff] }
 0x998   : > { %9742 = vst.msk [vmem:[#allocation2 + $0x121] sm:$0xff] %vm9719_vm9, %v9668_v16  ;;  %14470 = vmatprep.mubr.msk.f32.mxu0 %vm387_vm2, %v19208_v6  ;;  %14552 = vmatmul.mubr.msk.f32.gmra.mxu1 %vm387_vm2, %v19208_v6 }
 0x99b   : > { %v19215_v60 = vld [vmem:[#allocation2 + $0x110] sm:$0xff]  ;;  %v19217_v9 = vld [vmem:[#allocation2 + $0x118] sm:$0xff] }
 0x99c   : > { %14471 = vmatmul.mubr.msk.f32.gmra.mxu0 %vm387_vm2, %v19215_v60  ;;  %14554 = vmatprep.mubr.msk.f32.mxu1 %vm387_vm2, %v19215_v60 }
 0x99d   : > { %14473 = vmatprep.mubr.msk.f32.mxu0 %vm387_vm2, %v19217_v9  ;;  %14555 = vmatmul.mubr.msk.f32.gmra.mxu1 %vm387_vm2, %v19217_v9 }
 0x99f   : > { %v9670_v30 = vpop.permute.xlu1 %9669  ;;  %v19227_v47 = vld [vmem:[#allocation2 + $0x120] sm:$0xff] }
 0x9a0   : > { %9743 = vst.msk [vmem:[#allocation2 + $0x129] sm:$0xff] %vm9719_vm9, %v9670_v30  ;;  %14474 = vmatmul.mubr.msk.f32.gmra.mxu0 %vm387_vm2, %v19227_v47  ;;  %14557 = vmatprep.mubr.msk.f32.mxu1 %vm387_vm2, %v19227_v47 }
 0x9a3   : > { %v9674_v39 = vpop.permute.xlu1 %9673  ;;  %v9672_v22 = vpop.permute.xlu0 %9671 }
 0x9a4   : > { %9745 = vst.msk [vmem:[#allocation2 + $0x141] sm:$0xff] %vm9719_vm9, %v9674_v39  ;;  %9744 = vst.msk [vmem:[#allocation2 + $0x139] sm:$0xff] %vm9719_vm9, %v9672_v22 }
 0x9a7   : > { %v9676_v50 = vpop.permute.xlu0 %9675  ;;  %v19236_v35 = vld [vmem:[#allocation2 + $0x128] sm:$0xff]  ;;  %v19238_v19 = vld [vmem:[#allocation2 + $0x130] sm:$0xff] }
 0x9a8   : > { %9746 = vst.msk [vmem:[#allocation2 + $0x151] sm:$0xff] %vm9719_vm9, %v9676_v50  ;;  %14476 = vmatprep.mubr.msk.f32.mxu0 %vm387_vm2, %v19236_v35  ;;  %14558 = vmatmul.mubr.msk.f32.gmra.mxu1 %vm387_vm2, %v19236_v35 }
 0x9a9   : > { %14477 = vmatmul.mubr.msk.f32.gmra.mxu0 %vm387_vm2, %v19238_v19  ;;  %14560 = vmatprep.mubr.msk.f32.mxu1 %vm387_vm2, %v19238_v19 }
 0x9ab   : > { %v19249_v21 = vld [vmem:[#allocation2 + $0x138] sm:$0xff]  ;;  %v19251_v33 = vld [vmem:[#allocation2 + $0x140] sm:$0xff]  ;;  %v19261_v45 = vld [vmem:[#allocation2 + $0x148] sm:$0xff] }
 0x9ac   : > { %14479 = vmatprep.mubr.msk.f32.mxu0 %vm387_vm2, %v19249_v21  ;;  %14561 = vmatmul.mubr.msk.f32.gmra.mxu1 %vm387_vm2, %v19249_v21 }
 0x9ad   : > { %14480 = vmatmul.mubr.msk.f32.gmra.mxu0 %vm387_vm2, %v19251_v33  ;;  %14563 = vmatprep.mubr.msk.f32.mxu1 %vm387_vm2, %v19251_v33 }
 0x9ae   : > { %14482 = vmatprep.mubr.msk.f32.mxu0 %vm387_vm2, %v19261_v45 }
 0x9af   : > { %v9678_v48 = vpop.permute.xlu1 %9677  ;;  %v19265_v4 = vld [vmem:[#allocation2 + $0x150] sm:$0xff] }
 0x9b0   : > { %9747 = vst.msk [vmem:[#allocation2 + $0x159] sm:$0xff] %vm9719_vm9, %v9678_v48  ;;  %14564 = vmatmul.mubr.msk.f32.gmra.mxu1 %vm387_vm2, %v19261_v45 }
 0x9b1   : > { %14483 = vmatmul.mubr.msk.f32.gmra.mxu0 %vm387_vm2, %v19265_v4  ;;  %14566 = vmatprep.mubr.msk.f32.mxu1 %vm387_vm2, %v19265_v4 }
 0x9b3   : > { %v9680_v58 = vpop.permute.xlu0 %9679 }
 0x9b4   : > { %9748 = vst.msk [vmem:[#allocation2 + $0x169] sm:$0xff] %vm9719_vm9, %v9680_v58 }
 0x9b7   : > { %v19275_v42 = vld [vmem:[#allocation2 + $0x158] sm:$0xff]  ;;  %v19277_v36 = vld [vmem:[#allocation2 + $0x160] sm:$0xff] }
 0x9b8   : > { %14485 = vmatprep.mubr.msk.f32.mxu0 %vm387_vm2, %v19275_v42  ;;  %14567 = vmatmul.mubr.msk.f32.gmra.mxu1 %vm387_vm2, %v19275_v42 }
 0x9b9   : > { %14486 = vmatmul.mubr.msk.f32.gmra.mxu0 %vm387_vm2, %v19277_v36  ;;  %14569 = vmatprep.mubr.msk.f32.mxu1 %vm387_vm2, %v19277_v36 }
 0x9bb   : > { %v19287_v18 = vld [vmem:[#allocation2 + $0x168] sm:$0xff] }
 0x9bc   : > { %14488 = vmatprep.mubr.msk.f32.mxu0 %vm387_vm2, %v19287_v18  ;;  %14570 = vmatmul.mubr.msk.f32.gmra.mxu1 %vm387_vm2, %v19287_v18 }
 0x9c1   : > { %v9682_v15 = vpop.permute.xlu1 %9681 }
 0x9c2   : > { %9749 = vst.msk [vmem:[#allocation2 + $0x171] sm:$0xff] %vm9719_vm9, %v9682_v15 }
 0x9c9   : > { %v19294_v24 = vld [vmem:[#allocation2 + $0x170] sm:$0xff]  ;;  %v19296_v28 = vld [vmem:[#allocation2 + $0x178] sm:$0xff] }
 0x9ca   : > { %14489 = vmatmul.mubr.msk.f32.gmra.mxu0 %vm387_vm2, %v19294_v24  ;;  %14572 = vmatprep.mubr.msk.f32.mxu1 %vm387_vm2, %v19294_v24 }
 0x9cb   : > { %14491 = vmatprep.mubr.msk.f32.mxu0 %vm387_vm2, %v19296_v28  ;;  %14573 = vmatmul.mubr.msk.f32.gmra.mxu1 %vm387_vm2, %v19296_v28 }
 0x9d3   : > { %v9684_v32 = vpop.permute.xlu0 %9683 }
 0x9d4   : > { %9750 = vst.msk [vmem:[#allocation2 + $0x181] sm:$0xff] %vm9719_vm9, %v9684_v32 }
 0x9db   : > { %v19307_v55 = vld [vmem:[#allocation2 + $0x180] sm:$0xff] }
 0x9dc   : > { %14492 = vmatmul.mubr.msk.f32.gmra.mxu0 %vm387_vm2, %v19307_v55 }
 0x9dd   : > { %v9686_v13 = vpop.permute.xlu1 %9685 }
 0x9de   : > { %9751 = vst.msk [vmem:[#allocation2 + $0x189] sm:$0xff] %vm9719_vm9, %v9686_v13 }
 0x9e5   : > { %v19312_v29 = vld [vmem:[#allocation2 + $0x188] sm:$0xff]  ;;  %v19314_v20 = vld [vmem:[#allocation2 + $0x190] sm:$0xff] }
 0x9e6   : > { %14494 = vmatprep.mubr.msk.f32.mxu0 %vm387_vm2, %v19312_v29 }
 0x9e7   : > { %14495 = vmatmul.mubr.msk.f32.gmra.mxu0 %vm387_vm2, %v19314_v20 }
 0x9e8   : > { %14581 = vmatprep.mubr.msk.f32.mxu0 %vm387_vm2, %v19019_v25 }
 0x9eb   : > { %14582 = vmatmul.mubr.msk.f32.vlgmr.msra.gmra.mxu0 %vm387_vm2, %v19029_v57 }
 0x9ec   : > { %14584 = vmatprep.mubr.msk.f32.mxu0 %vm387_vm2, %v19031_v34 }
 0x9ef   : > { %14585 = vmatmul.mubr.msk.f32.gmra.mxu0 %vm387_vm2, %v19042_v61 }
 0x9f0   : > { %14587 = vmatprep.mubr.msk.f32.mxu0 %vm387_vm2, %v19050_v10 }
 0x9f3   : > { %14588 = vmatmul.mubr.msk.f32.gmra.mxu0 %vm387_vm2, %v19052_v31 }
 0x9f4   : > { %14590 = vmatprep.mubr.msk.f32.mxu0 %vm387_vm2, %v19064_v2 }
 0x9f7   : > { %14591 = vmatmul.mubr.msk.f32.gmra.mxu0 %vm387_vm2, %v19073_v5 }
 0x9f8   : > { %14593 = vmatprep.mubr.msk.f32.mxu0 %vm387_vm2, %v19075_v59 }
 0x9fb   : > { %14594 = vmatmul.mubr.msk.f32.gmra.mxu0 %vm387_vm2, %v19087_v44 }
 0x9fc   : > { %14596 = vmatprep.mubr.msk.f32.mxu0 %vm387_vm2, %v19095_v3 }
 0x9ff   : > { %14597 = vmatmul.mubr.msk.f32.gmra.mxu0 %vm387_vm2, %v19097_v11 }
 0xa00   : > { %14599 = vmatprep.mubr.msk.f32.mxu0 %vm387_vm2, %v19108_v56 }
 0xa03   : > { %14600 = vmatmul.mubr.msk.f32.gmra.mxu0 %vm387_vm2, %v19115_v26 }
 0xa04   : > { %14602 = vmatprep.mubr.msk.f32.mxu0 %vm387_vm2, %v19117_v0 }
 0xa07   : > { %14603 = vmatmul.mubr.msk.f32.gmra.mxu0 %vm387_vm2, %v19128_v51  ;;  %v10798_v51 = vld [vmem:[#allocation2 + $0x198] sm:$0xff] }
 0xa08   : > { %14605 = vmatprep.mubr.msk.f32.mxu0 %vm387_vm2, %v19135_v27 }
 0xa0b   : > { %14606 = vmatmul.mubr.msk.f32.gmra.mxu0 %vm387_vm2, %v19137_v7  ;;  %v10800_v7 = vld [vmem:[#allocation2 + $0x1a8] sm:$0xff] }
 0xa0c   : > { %v19356_v25 = vpop.f32.mrf.mxu0  ;;  %14608 = vmatprep.mubr.msk.f32.mxu0 %vm387_vm2, %v19148_v46 }
 0xa0e   : > { %v19360_v57 = vpop.f32.mrf.mxu0 }
 0xa0f   : > { %14609 = vmatmul.mubr.msk.f32.gmra.mxu0 %vm387_vm2, %v19155_v37 }
 0xa10   : > { %v19364_v34 = vpop.f32.mrf.mxu0  ;;  %14611 = vmatprep.mubr.msk.f32.mxu0 %vm387_vm2, %v19157_v53 }
 0xa12   : > { %v19368_v61 = vpop.f32.mrf.mxu0 }
 0xa13   : > { %14612 = vmatmul.mubr.msk.f32.gmra.mxu0 %vm387_vm2, %v19168_v52 }
 0xa14   : > { %14614 = vmatprep.mubr.msk.f32.mxu0 %vm387_vm2, %v19175_v63 }
 0xa15   : > { %v19374_v10 = vpop.f32.mrf.mxu0 }
 0xa17   : > { %14615 = vmatmul.mubr.msk.f32.gmra.mxu0 %vm387_vm2, %v19177_v1  ;;  %v19380_v31 = vpop.f32.mrf.mxu0 }
 0xa18   : > { %14617 = vmatprep.mubr.msk.f32.mxu0 %vm387_vm2, %v19188_v23 }
 0xa1b   : > { %14618 = vmatmul.mubr.msk.f32.gmra.mxu0 %vm387_vm2, %v19195_v12  ;;  %v14505_v12 = vpop.f32.mrf.mxu1 }
 0xa1c   : > { %v19384_v2 = vpop.f32.mrf.mxu0  ;;  %14620 = vmatprep.mubr.msk.f32.mxu0 %vm387_vm2, %v19197_v14 }
 0xa1d   : > { %v10514_v16 = vpop.f32.mrf.mxu1 }
 0xa1e   : > { %v19388_v5 = vpop.f32.mrf.mxu0 }
 0xa1f   : > { %14621 = vmatmul.mubr.msk.f32.gmra.mxu0 %vm387_vm2, %v19208_v6 }
 0xa20   : > { %14623 = vmatprep.mubr.msk.f32.mxu0 %vm387_vm2, %v19215_v60  ;;  %v19394_v59 = vpop.f32.mrf.mxu0  ;;  %v14508_v60 = vpop.f32.mrf.mxu1 }
 0xa22   : > { %v19400_v44 = vpop.f32.mrf.mxu0  ;;  %v10524_v30 = vpop.f32.mrf.mxu1 }
 0xa23   : > { %14624 = vmatmul.mubr.msk.f32.gmra.mxu0 %vm387_vm2, %v19217_v9 }
 0xa24   : > { %14626 = vmatprep.mubr.msk.f32.mxu0 %vm387_vm2, %v19227_v47  ;;  %v14511_v39 = vpop.f32.mrf.mxu1 }
 0xa25   : > { %v19406_v3 = vpop.f32.mrf.mxu0 }
 0xa26   : > { %v10534_v50 = vpop.f32.mrf.mxu1 }
 0xa27   : > { %14627 = vmatmul.mubr.msk.f32.gmra.mxu0 %vm387_vm2, %v19236_v35  ;;  %v19412_v11 = vpop.f32.mrf.mxu0 }
 0xa28   : > { %14629 = vmatprep.mubr.msk.f32.mxu0 %vm387_vm2, %v19238_v19  ;;  %v14514_v19 = vpop.f32.mrf.mxu1 }
 0xa2b   : > { %14630 = vmatmul.mubr.msk.f32.gmra.mxu0 %vm387_vm2, %v19249_v21 }
 0xa2c   : > { %14632 = vmatprep.mubr.msk.f32.mxu0 %vm387_vm2, %v19251_v33  ;;  %v19414_v56 = vpop.f32.mrf.mxu0  ;;  %v10544_v33 = vpop.f32.mrf.mxu1 }
 0xa2e   : > { %v19420_v41 = vpop.f32.mrf.mxu0  ;;  %v19491_v48 = vpop.f32.mrf.mxu1 }
 0xa2f   : > { %14633 = vmatmul.mubr.msk.f32.gmra.mxu0 %vm387_vm2, %v19261_v45 }
 0xa30   : > { %14635 = vmatprep.mubr.msk.f32.mxu0 %vm387_vm2, %v19265_v4  ;;  %v19426_v26 = vpop.f32.mrf.mxu0  ;;  %v19495_v58 = vpop.f32.mrf.mxu1 }
 0xa32   : > { %v19432_v0 = vpop.f32.mrf.mxu0 }
 0xa33   : > { %14636 = vmatmul.mubr.msk.f32.gmra.mxu0 %vm387_vm2, %v19275_v42 }
 0xa34   : > { %14638 = vmatprep.mubr.msk.f32.mxu0 %vm387_vm2, %v19277_v36  ;;  %v19499_v36 = vpop.f32.mrf.mxu1 }
 0xa35   : > { %v19438_v54 = vpop.f32.mrf.mxu0 }
 0xa37   : > { %14639 = vmatmul.mubr.msk.f32.gmra.mxu0 %vm387_vm2, %v19287_v18  ;;  %v19444_v27 = vpop.f32.mrf.mxu0 }
 0xa38   : > { %14641 = vmatprep.mubr.msk.f32.mxu0 %vm387_vm2, %v19294_v24  ;;  %v19505_v24 = vpop.f32.mrf.mxu1 }
 0xa3b   : > { %14642 = vmatmul.mubr.msk.f32.gmra.mxu0 %vm387_vm2, %v19296_v28  ;;  %v19507_v28 = vpop.f32.mrf.mxu1 }
 0xa3c   : > { %14644 = vmatprep.mubr.msk.f32.mxu0 %vm387_vm2, %v19307_v55  ;;  %v19448_v38 = vpop.f32.mrf.mxu0 }
 0xa3d   : > { %v19513_v13 = vpop.f32.mrf.mxu1 }
 0xa3e   : > { %v19451_v46 = vpop.f32.mrf.mxu0 }
 0xa3f   : > { %14645 = vmatmul.mubr.msk.f32.gmra.mxu0 %vm387_vm2, %v19312_v29 }
 0xa40   : > { %14647 = vmatprep.mubr.msk.f32.mxu0 %vm387_vm2, %v19314_v20  ;;  %v19453_v8 = vpop.f32.mrf.mxu0  ;;  %v19517_v20 = vpop.f32.mrf.mxu1 }
 0xa42   : > { %v19455_v37 = vpop.f32.mrf.mxu0 }
 0xa43   : > { %14648 = vmatmul.mubr.msk.f32.gmra.mxu0 %vm387_vm2, %v10798_v51 }
 0xa44   : > { %14650 = vmatprep.mubr.msk.f32.mxu0 %vm387_vm2, %v10799_v43 }
 0xa45   : > { %v19457_v53 = vpop.f32.mrf.mxu0 }
 0xa47   : > { %14651 = vmatmul.mubr.msk.f32.gmra.mxu0 %vm387_vm2, %v10800_v7  ;;  %v19459_v17 = vpop.f32.mrf.mxu0  ;;  %v10520_v7 = vadd.f32 %v14505_v12, %v19356_v25  ;;  %v10530_v12 = vadd.f32 %v14508_v60, %v19364_v34 }
 0xa4c   : > { %v19461_v52 = vpop.f32.mrf.mxu0 }
 0xa4e   : > { %v19463_v40 = vpop.f32.mrf.mxu0 }
 0xa50   : > { %v19465_v63 = vpop.f32.mrf.mxu0 }
 0xa52   : > { %v19467_v1 = vpop.f32.mrf.mxu0 }
 0xa55   : > { %v19469_v62 = vpop.f32.mrf.mxu0 }
 0xa57   : > { %v19471_v23 = vpop.f32.mrf.mxu0 }
 0xa5c   : > { %v19473_v49 = vpop.f32.mrf.mxu0 }
 0xa5e   : > { %v19475_v14 = vpop.f32.mrf.mxu0 }
 0xa60   : > { %v19477_v6 = vpop.f32.mrf.mxu0 }
 0xa62   : > { %v19479_v9 = vpop.f32.mrf.mxu0 }
 0xa69   : > { %v19481_v47 = vpop.f32.mrf.mxu0 }
 0xa6a   : > { %20203 = vst [vmem:[#allocation3_spill] sm:$0xff] %v19481_v47  ;;  %v10540_v47 = vadd.f32 %v14511_v39, %v19374_v10 }
 0xa6b   : > { %v19483_v22 = vpop.f32.mrf.mxu0 }
 0xa6d   : > { %v19485_v35 = vpop.f32.mrf.mxu0 }
 0xa6e   : > { %20204 = vst [vmem:[#allocation4_spill] sm:$0xff] %v19485_v35  ;;  %v10525_v35 = vadd.f32 %v10524_v30, %v19368_v61 }
 0xa6f   : > { %v19487_v21 = vpop.f32.mrf.mxu0 }
 0xa70   : > { %20205 = vst [vmem:[#allocation7_spill] sm:$0xff] %v19487_v21 }
 0xa71   : > { %v19489_v45 = vpop.f32.mrf.mxu0 }
 0xa72   : > { %20206 = vst [vmem:[#allocation10_spill] sm:$0xff] %v19489_v45  ;;  %v10515_v45 = vadd.f32 %v10514_v16, %v19360_v57 }
 0xa73   : > { %v19493_v4 = vpop.f32.mrf.mxu0 }
 0xa74   : > { %20207 = vst [vmem:[#allocation6_spill] sm:$0xff] %v19493_v4 }
 0xa79   : > { %v19497_v42 = vpop.f32.mrf.mxu0 }
 0xa7a   : > { %20208 = vst [vmem:[#allocation8_spill] sm:$0xff] %v19497_v42 }
 0xa7b   : > { %v19501_v18 = vpop.f32.mrf.mxu0 }
 0xa7c   : > { %20209 = vst [vmem:[#allocation5_spill] sm:$0xff] %v19501_v18 }
 0xa8a   : > { %v19503_v15 = vpop.f32.mrf.mxu0 }
 0xa8b   : > { %20210 = vst [vmem:[#allocation15_spill] sm:$0xff] %v19503_v15  ;;  %v19524_v15 = vpop.f32.mrf.mxu1 }
 0xa8c   : > { %v19509_v32 = vpop.f32.mrf.mxu0 }
 0xa8d   : > { %20211 = vst [vmem:[#allocation13_spill] sm:$0xff] %v19509_v32  ;;  %v19531_v4 = vpop.f32.mrf.mxu1 }
 0xa9c   : > { %v19511_v55 = vpop.f32.mrf.mxu0 }
 0xa9d   : > { %20212 = vst [vmem:[#allocation17_spill] sm:$0xff] %v19511_v55 }
 0xa9e   : > { %v19515_v29 = vpop.f32.mrf.mxu0 }
 0xa9f   : > { %20213 = vst [vmem:[#allocation9_spill] sm:$0xff] %v19515_v29 }
 0xaa7   : > { %v19519_v51 = vpop.f32.mrf.mxu0 }
 0xaa8   : > { %20214 = vst [vmem:[#allocation12_spill] sm:$0xff] %v19519_v51 }
 0xaa9   : > { %v19521_v43 = vpop.f32.mrf.mxu0 }
 0xaaa   : > { %20215 = vst [vmem:[#allocation16_spill] sm:$0xff] %v19521_v43 }
 0xaab   : > { %v14583_v42 = vpop.f32.mrf.mxu0 }
 0xaac   : > { %v19527_v32 = vadd.f32 %v14583_v42, %v10520_v7  ;;  %v19539_v42 = vpop.f32.mrf.mxu1 }
 0xaad   : > { %v11015_v55 = vpop.f32.mrf.mxu0 }
 0xaae   : > { %v19529_v18 = vadd.f32 %v11015_v55, %v10515_v45  ;;  %v11351_v51 = vrot.slane %v19527_v32, 1  ;;  %v10535_v55 = vadd.f32 %v10534_v50, %v19380_v31  ;;  %v11559_v61 = vrot.slane %v19527_v32, 2  ;;  %v19547_v34 = vpop.f32.mrf.mxu1 }
 0xaaf   : > { %v14586_v29 = vpop.f32.mrf.mxu0  ;;  %v10545_v50 = vadd.f32 %v10544_v33, %v19388_v5 }
 0xab0   : > { %v11350_v43 = vrot.slane %v19529_v18, 1  ;;  %v11558_v21 = vrot.slane %v19529_v18, 2  ;;  %v19544_v30 = vadd.f32 %v14586_v29, %v10530_v12  ;;  %v10550_v12 = vadd.f32 %v14514_v19, %v19384_v2 }
 0xab1   : > { %v11025_v25 = vpop.f32.mrf.mxu0 }
 0xab2   : > { %v11256_v57 = vadd.f32 %v11025_v25, %v10525_v35  ;;  %v11352_v16 = vsel %vm2092_vm5, %v11350_v43, %v11351_v51  ;;  %v11560_v43 = vsel %vm2301_vm4, %v11558_v21, %v11559_v61  ;;  %v11355_v10 = vrot.slane %v19544_v30, 1 }
 0xab3   : > { %11430 = vrot.lane.b32.xlu0 %v11352_v16, %s14680_s30  ;;  %v14589_v45 = vpop.f32.mrf.mxu0  ;;  %v11563_v2 = vrot.slane %v19544_v30, 2 }
 0xab4   : > { %v11353_v7 = vrot.slane %v11256_v57, 1  ;;  %v11561_v35 = vrot.slane %v11256_v57, 2  ;;  %v11259_v39 = vadd.f32 %v14589_v45, %v10540_v47  ;;  %v19559_v57 = vpop.f32.mrf.mxu1  ;;  %v10555_v47 = vadd.f32 %v19495_v58, %v19400_v44 }
 0xab5   : > { %v11035_v60 = vpop.f32.mrf.mxu0  ;;  %v10565_v58 = vadd.f32 %v19505_v24, %v19412_v11 }
 0xab6   : > { %v19549_v25 = vadd.f32 %v11035_v60, %v10535_v55  ;;  %v11354_v16 = vsel %vm2092_vm5, %v11351_v51, %v11353_v7  ;;  %v11562_v7 = vsel %vm2301_vm4, %v11559_v61, %v11561_v35  ;;  %v11358_v19 = vrot.slane %v11259_v39, 1  ;;  %v19573_v45 = vpop.f32.mrf.mxu1 }
 0xab7   : > { %11638 = vrot.lane.b32.xlu0 %v11560_v43, %s14686_s21  ;;  %11432 = vrot.lane.b32.xlu1 %v11354_v16, %s14680_s30  ;;  %v14592_v31 = vpop.f32.mrf.mxu0 }
 0xab8   : > { %v11356_v29 = vrot.slane %v19549_v25, 1  ;;  %v11564_v51 = vrot.slane %v19549_v25, 2  ;;  %v19571_v33 = vadd.f32 %v14592_v31, %v10550_v12  ;;  %v10560_v12 = vadd.f32 %v19491_v48, %v19394_v59 }
 0xab9   : > { %v11045_v21 = vpop.f32.mrf.mxu0  ;;  %v10570_v48 = vadd.f32 %v19499_v36, %v19406_v3 }
 0xaba   : > { %v19562_v55 = vadd.f32 %v11045_v21, %v10545_v50  ;;  %v11357_v60 = vsel %vm2092_vm5, %v11355_v10, %v11356_v29  ;;  %v11359_v16 = vsel %vm2092_vm5, %v11356_v29, %v11358_v19  ;;  %v11565_v50 = vsel %vm2301_vm4, %v11563_v2, %v11564_v51  ;;  %v19585_v21 = vpop.f32.mrf.mxu1 }
 0xabb   : > { %11640 = vrot.lane.b32.xlu1 %v11562_v7, %s14686_s21  ;;  %11434 = vrot.lane.b32.xlu0 %v11357_v60, %s14680_s30  ;;  %v14595_v5 = vpop.f32.mrf.mxu0  ;;  %v11566_v10 = vrot.slane %v11259_v39, 2  ;;  %v11361_v31 = vrot.slane %v19571_v33, 1  ;;  %v11569_v24 = vrot.slane %v19571_v33, 2 }
 0xabc   : > { %v11360_v61 = vrot.slane %v19562_v55, 1  ;;  %v11568_v39 = vrot.slane %v19562_v55, 2  ;;  %v19595_v59 = vadd.f32 %v14595_v5, %v10560_v12  ;;  %v10575_v5 = vadd.f32 %v19513_v13, %v19420_v41 }
 0xabd   : > { %v11055_v43 = vpop.f32.mrf.mxu0  ;;  %v11567_v29 = vsel %vm2301_vm4, %v11564_v51, %v11566_v10  ;;  %v19599_v51 = vpop.f32.mrf.mxu1 }
 0xabe   : > { %v11262_v35 = vadd.f32 %v11055_v43, %v10555_v47  ;;  %v11362_v2 = vsel %vm2092_vm5, %v11360_v61, %v11361_v31  ;;  %v11570_v61 = vsel %vm2301_vm4, %v11568_v39, %v11569_v24  ;;  %v11365_v3 = vrot.slane %v19595_v59, 1 }
 0xabf   : > { %11436 = vrot.lane.b32.xlu1 %v11359_v16, %s14680_s30  ;;  %11642 = vrot.lane.b32.xlu0 %v11565_v50, %s14686_s21  ;;  %v14598_v44 = vpop.f32.mrf.mxu0 }
 0xac0   : > { %v11363_v60 = vrot.slane %v11262_v35, 1  ;;  %v11571_v43 = vrot.slane %v11262_v35, 2  ;;  %v11265_v36 = vadd.f32 %v14598_v44, %v10570_v48  ;;  %v10580_v35 = vadd.f32 %v19507_v28, %v19414_v56 }
 0xac1   : > { %v11065_v7 = vpop.f32.mrf.mxu0  ;;  %v10585_v56 = vadd.f32 %v19524_v15, %v19432_v0  ;;  %v11573_v28 = vrot.slane %v19595_v59, 2  ;;  %v10595_v15 = vadd.f32 %v19539_v42, %v19444_v27 }
 0xac2   : > { %v19589_v47 = vadd.f32 %v11065_v7, %v10565_v58  ;;  %v11364_v50 = vsel %vm2092_vm5, %v11361_v31, %v11363_v60  ;;  %v19611_v58 = vpop.f32.mrf.mxu1  ;;  %v11368_v13 = vrot.slane %v11265_v36, 1 }
 0xac3   : > { %11644 = vrot.lane.b32.xlu1 %v11567_v29, %s14686_s21  ;;  %11438 = vrot.lane.b32.xlu0 %v11362_v2, %s14680_s30  ;;  %v14601_v11 = vpop.f32.mrf.mxu0  ;;  %v11572_v29 = vsel %vm2301_vm4, %v11569_v24, %v11571_v43 }
 0xac4   : > { %v11366_v16 = vrot.slane %v19589_v47, 1  ;;  %v11574_v7 = vrot.slane %v19589_v47, 2  ;;  %v19618_v60 = vpop.f32.mrf.mxu1  ;;  %v19625_v44 = vadd.f32 %v14601_v11, %v10580_v35 }
 0xac5   : > { %v11075_v19 = vpop.f32.mrf.mxu0 }
 0xac6   : > { %v19614_v31 = vadd.f32 %v11075_v19, %v10575_v5  ;;  %v11367_v39 = vsel %vm2092_vm5, %v11365_v3, %v11366_v16  ;;  %v11369_v19 = vsel %vm2092_vm5, %v11366_v16, %v11368_v13  ;;  %v11575_v43 = vsel %vm2301_vm4, %v11573_v28, %v11574_v7 }
 0xac7   : > { %11646 = vrot.lane.b32.xlu0 %v11570_v61, %s14686_s21  ;;  %11440 = vrot.lane.b32.xlu1 %v11364_v50, %s14680_s30  ;;  %v14604_v10 = vpop.f32.mrf.mxu0  ;;  %v19630_v61 = vpop.f32.mrf.mxu1  ;;  %v11576_v50 = vrot.slane %v11265_v36, 2  ;;  %v11371_v11 = vrot.slane %v19625_v44, 1  ;;  %v10590_v5 = vadd.f32 %v19517_v20, %v19426_v26  ;;  %v11579_v42 = vrot.slane %v19625_v44, 2 }
 0xac8   : > { %v11370_v24 = vrot.slane %v19614_v31, 1  ;;  %v11578_v35 = vrot.slane %v19614_v31, 2  ;;  %v10600_v20 = vadd.f32 %v19531_v4, %v19438_v54 }
 0xac9   : > { %v11085_v12 = vpop.f32.mrf.mxu0  ;;  %v11577_v16 = vsel %vm2301_vm4, %v11574_v7, %v11576_v50  ;;  %v19649_v26 = vadd.f32 %v14604_v10, %v10590_v5  ;;  %v10605_v10 = vadd.f32 %v19559_v57, %v19451_v46  ;;  %v10615_v57 = vadd.f32 %v19585_v21, %v19455_v37 }
 0xaca   : > { %v11268_v48 = vadd.f32 %v11085_v12, %v10585_v56  ;;  %v11580_v13 = vsel %vm2301_vm4, %v11578_v35, %v11579_v42  ;;  %v10625_v21 = vadd.f32 %v19611_v58, %v19459_v17  ;;  %v10630_v58 = vadd.f32 %v19599_v51, %v19457_v53 }
 0xacb   : > { %11648 = vrot.lane.b32.xlu1 %v11572_v29, %s14686_s21  ;;  %11442 = vrot.lane.b32.xlu0 %v11367_v39, %s14680_s30  ;;  %v14607_v41 = vpop.f32.mrf.mxu0  ;;  %v11372_v29 = vsel %vm2092_vm5, %v11370_v24, %v11371_v11  ;;  %v19644_v39 = vpop.f32.mrf.mxu1  ;;  %v11375_v54 = vrot.slane %v19649_v26, 1 }
 0xacc   : > { %v11373_v12 = vrot.slane %v11268_v48, 1  ;;  %v11581_v56 = vrot.slane %v11268_v48, 2  ;;  %v11271_v4 = vadd.f32 %v14607_v41, %v10600_v20  ;;  %v10610_v48 = vadd.f32 %v19547_v34, %v19448_v38 }
 0xacd   : > { %v11095_v2 = vpop.f32.mrf.mxu0  ;;  %v19656_v24 = vpop.f32.mrf.mxu1  ;;  %v11583_v38 = vrot.slane %v19649_v26, 2 }
 0xace   : > { %v19641_v36 = vadd.f32 %v11095_v2, %v10595_v15  ;;  %v11374_v2 = vsel %vm2092_vm5, %v11371_v11, %v11373_v12  ;;  %v11582_v11 = vsel %vm2301_vm4, %v11579_v42, %v11581_v56  ;;  %v11378_v34 = vrot.slane %v11271_v4, 1 }
 0xacf   : > { %11444 = vrot.lane.b32.xlu1 %v11369_v19, %s14680_s30  ;;  %11650 = vrot.lane.b32.xlu0 %v11575_v43, %s14686_s21  ;;  %v14610_v0 = vpop.f32.mrf.mxu0  ;;  %v11586_v56 = vrot.slane %v11271_v4, 2 }
 0xad0   : > { %v11376_v28 = vrot.slane %v19641_v36, 1  ;;  %v11584_v50 = vrot.slane %v19641_v36, 2  ;;  %v19677_v41 = vadd.f32 %v14610_v0, %v10610_v48 }
 0xad1   : > { %v11105_v3 = vpop.f32.mrf.mxu0 }
 0xad2   : > { %v19666_v15 = vadd.f32 %v11105_v3, %v10605_v10  ;;  %v11377_v5 = vsel %vm2092_vm5, %v11375_v54, %v11376_v28  ;;  %v11585_v42 = vsel %vm2301_vm4, %v11583_v38, %v11584_v50  ;;  %v11381_v0 = vrot.slane %v19677_v41, 1 }
 0xad3   : > { %11652 = vrot.lane.b32.xlu1 %v11577_v16, %s14686_s21  ;;  %11446 = vrot.lane.b32.xlu0 %v11372_v29, %s14680_s30  ;;  %v14613_v27 = vpop.f32.mrf.mxu0  ;;  %v19670_v16 = vpop.f32.mrf.mxu1  ;;  %v11379_v29 = vsel %vm2092_vm5, %v11376_v28, %v11378_v34 }
 0xad4   : > { %v11380_v35 = vrot.slane %v19666_v15, 1  ;;  %v11588_v10 = vrot.slane %v19666_v15, 2 }
 0xad5   : > { %v11115_v7 = vpop.f32.mrf.mxu0  ;;  %v10654_v20 = vpop.f32.mrf.mxu1 }
 0xad6   : > { %v11274_v12 = vadd.f32 %v11115_v7, %v10615_v57  ;;  %v10620_v7 = vadd.f32 %v19573_v45, %v19453_v8  ;;  %v11382_v48 = vsel %vm2092_vm5, %v11380_v35, %v11381_v0  ;;  %v11589_v8 = vrot.slane %v19677_v41, 2 }
 0xad7   : > { %11654 = vrot.lane.b32.xlu0 %v11580_v13, %s14686_s21  ;;  %11448 = vrot.lane.b32.xlu1 %v11374_v2, %s14680_s30  ;;  %v14616_v19 = vpop.f32.mrf.mxu0  ;;  %v19691_v13 = vpop.f32.mrf.mxu1  ;;  %v11587_v2 = vsel %vm2301_vm4, %v11584_v50, %v11586_v56  ;;  %v10640_v35 = vadd.f32 %v19618_v60, %v19461_v52  ;;  %v10645_v52 = vadd.f32 %v19656_v24, %v19467_v1 }
 0xad8   : > { %v11383_v54 = vrot.slane %v11274_v12, 1  ;;  %v19703_v45 = vadd.f32 %v14613_v27, %v10620_v7  ;;  %v11590_v57 = vsel %vm2301_vm4, %v11588_v10, %v11589_v8  ;;  %v10635_v27 = vadd.f32 %v19630_v61, %v19463_v40 }
 0xad9   : > { %v11125_v43 = vpop.f32.mrf.mxu0  ;;  %v10664_v50 = vpop.f32.mrf.mxu1  ;;  %v11277_v51 = vadd.f32 %v14616_v19, %v10630_v58  ;;  %v10655_v24 = vadd.f32 %v10654_v20, %v19471_v23  ;;  %v10650_v58 = vadd.f32 %v19644_v39, %v19465_v63  ;;  %v10660_v39 = vadd.f32 %v19670_v16, %v19469_v62 }
 0xada   : > { %v19695_v4 = vadd.f32 %v11125_v43, %v10625_v21  ;;  %v11384_v38 = vsel %vm2092_vm5, %v11381_v0, %v11383_v54  ;;  %v11385_v53 = vrot.slane %v19703_v45, 1  ;;  %v11593_v60 = vrot.slane %v19703_v45, 2 }
 0xadb   : > { %11656 = vrot.lane.b32.xlu1 %v11582_v11, %s14686_s21  ;;  %11450 = vrot.lane.b32.xlu0 %v11377_v5, %s14680_s30  ;;  %v14619_v46 = vpop.f32.mrf.mxu0  ;;  %v11591_v5 = vrot.slane %v11274_v12, 2  ;;  %v19719_v12 = vpop.f32.mrf.mxu1  ;;  %v11388_v61 = vrot.slane %v11277_v51, 1  ;;  %v10670_v16 = vadd.f32 %v19691_v13, %v19473_v49 }
 0xadc   : > { %v11386_v43 = vrot.slane %v19695_v4, 1  ;;  %v19733_v19 = vadd.f32 %v14619_v46, %v10640_v35 }
 0xadd   : > { %v11135_v3 = vpop.f32.mrf.mxu0  ;;  %v11592_v21 = vsel %vm2301_vm4, %v11589_v8, %v11591_v5  ;;  %v11596_v8 = vrot.slane %v11277_v51, 2 }
 0xade   : > { %v19722_v56 = vadd.f32 %v11135_v3, %v10635_v27  ;;  %v11387_v0 = vsel %vm2092_vm5, %v11385_v53, %v11386_v43  ;;  %v10674_v3 = vpop.f32.mrf.mxu1  ;;  %v11389_v54 = vsel %vm2092_vm5, %v11386_v43, %v11388_v61  ;;  %v11391_v46 = vrot.slane %v19733_v19, 1 }
 0xadf   : > { %11452 = vrot.lane.b32.xlu1 %v11379_v29, %s14680_s30  ;;  %11658 = vrot.lane.b32.xlu0 %v11585_v42, %s14686_s21  ;;  %v19684_v37 = vpop.f32.mrf.mxu0  ;;  %v11594_v42 = vrot.slane %v19695_v4, 2  ;;  %v11599_v20 = vrot.slane %v19733_v19, 2 }
 0xae0   : > { %v14556_v5 = vpop.f32.mrf.mxu1  ;;  %v19757_v63 = vadd.f32 %v19684_v37, %v10650_v58  ;;  %v10665_v37 = vadd.f32 %v10664_v50, %v19475_v14  ;;  %v10675_v14 = vadd.f32 %v10674_v3, %v19479_v9 }
 0xae1   : > { %v11145_v28 = vpop.f32.mrf.mxu0  ;;  %v11597_v43 = vsel %vm2301_vm4, %v11594_v42, %v11596_v8 }
 0xae2   : > { %v11280_v10 = vadd.f32 %v11145_v28, %v10645_v52  ;;  %v10684_v51 = vpop.f32.mrf.mxu1 }
 0xae3   : > { %11660 = vrot.lane.b32.xlu1 %v11587_v2, %s14686_s21  ;;  %11454 = vrot.lane.b32.xlu0 %v11382_v48, %s14680_s30  ;;  %v19700_v17 = vpop.f32.mrf.mxu0  ;;  %v11390_v2 = vrot.slane %v19722_v56, 1  ;;  %v11595_v48 = vsel %vm2301_vm4, %v11593_v60, %v11594_v42  ;;  %v11395_v60 = vrot.slane %v19757_v63, 1  ;;  %v10685_v9 = vadd.f32 %v10684_v51, %v19483_v22 }
 0xae4   : > { %v11601_v35 = vrot.slane %v11280_v10, 2  ;;  %v11283_v62 = vadd.f32 %v19700_v17, %v10660_v39  ;;  %v11603_v17 = vrot.slane %v19757_v63, 2 }
 0xae5   : > { %v11155_v11 = vpop.f32.mrf.mxu0  ;;  %v11392_v53 = vsel %vm2092_vm5, %v11390_v2, %v11391_v46 }
 0xae6   : > { %v19748_v27 = vadd.f32 %v11155_v11, %v10655_v24  ;;  %v11398_v49 = vrot.slane %v11283_v62, 1 }
 0xae7   : > { %11662 = vrot.lane.b32.xlu0 %v11590_v57, %s14686_s21  ;;  %11456 = vrot.lane.b32.xlu1 %v11384_v38, %s14680_s30  ;;  %v19712_v34 = vpop.f32.mrf.mxu0  ;;  %v11598_v57 = vrot.slane %v19722_v56, 2  ;;  %v11393_v38 = vrot.slane %v11280_v10, 1  ;;  %v11602_v10 = vsel %vm2301_vm4, %v11599_v20, %v11601_v35 }
 0xae8   : > { %v11396_v11 = vrot.slane %v19748_v27, 1  ;;  %v11604_v61 = vrot.slane %v19748_v27, 2  ;;  %v19783_v13 = vadd.f32 %v19712_v34, %v10670_v16  ;;  %v10680_v34 = vadd.f32 %v19719_v12, %v19477_v6  ;;  %v20216_v12 = vld [vmem:[#allocation3_spill] sm:$0xff] }
 0xae9   : > { %v11165_v29 = vpop.f32.mrf.mxu0  ;;  %v11600_v42 = vsel %vm2301_vm4, %v11598_v57, %v11599_v20  ;;  %v10690_v51 = vadd.f32 %v14556_v5, %v20216_v12  ;;  %v20217_v16 = vld [vmem:[#allocation7_spill] sm:$0xff]  ;;  %v20218_v5 = vld [vmem:[#allocation4_spill] sm:$0xff] }
 0xaea   : > { %v19772_v2 = vadd.f32 %v11165_v29, %v10665_v37  ;;  %v11399_v24 = vsel %vm2092_vm5, %v11396_v11, %v11398_v49  ;;  %v11401_v3 = vrot.slane %v19783_v13, 1  ;;  %v11609_v22 = vrot.slane %v19783_v13, 2 }
 0xaeb   : > { %11664 = vrot.lane.b32.xlu1 %v11592_v21, %s14686_s21  ;;  %11458 = vrot.lane.b32.xlu0 %v11387_v0, %s14680_s30  ;;  %v19728_v40 = vpop.f32.mrf.mxu0  ;;  %v11394_v21 = vsel %vm2092_vm5, %v11391_v46, %v11393_v38  ;;  %v14559_v0 = vpop.f32.mrf.mxu1  ;;  %v11605_v46 = vsel %vm2301_vm4, %v11603_v17, %v11604_v61 }
 0xaec   : > { %v11400_v50 = vrot.slane %v19772_v2, 1  ;;  %v11608_v38 = vrot.slane %v19772_v2, 2  ;;  %v19805_v6 = vadd.f32 %v19728_v40, %v10680_v34 }
 0xaed   : > { %v11175_v7 = vpop.f32.mrf.mxu0 }
 0xaee   : > { %v11286_v29 = vadd.f32 %v11175_v7, %v10675_v14  ;;  %v11402_v39 = vsel %vm2092_vm5, %v11400_v50, %v11401_v3  ;;  %v11405_v40 = vrot.slane %v19805_v6, 1 }
 0xaef   : > { %11460 = vrot.lane.b32.xlu1 %v11389_v54, %s14680_s30  ;;  %11666 = vrot.lane.b32.xlu0 %v11595_v48, %s14686_s21  ;;  %v19740_v1 = vpop.f32.mrf.mxu0  ;;  %v11397_v54 = vsel %vm2092_vm5, %v11395_v60, %v11396_v11  ;;  %v10694_v48 = vpop.f32.mrf.mxu1 }
 0xaf1   : > { %v11185_v28 = vpop.f32.mrf.mxu0  ;;  %v14562_v58 = vpop.f32.mrf.mxu1 }
 0xaf2   : > { %v19796_v20 = vadd.f32 %v11185_v28, %v10685_v9 }
 0xaf3   : > { %11668 = vrot.lane.b32.xlu1 %v11597_v43, %s14686_s21  ;;  %11462 = vrot.lane.b32.xlu0 %v11392_v53, %s14680_s30  ;;  %v19753_v23 = vpop.f32.mrf.mxu0  ;;  %v11606_v43 = vrot.slane %v11283_v62, 2  ;;  %v11403_v53 = vrot.slane %v11286_v29, 1  ;;  %v10704_v35 = vpop.f32.mrf.mxu1 }
 0xaf4   : > { %v11406_v28 = vrot.slane %v19796_v20, 1  ;;  %v11614_v14 = vrot.slane %v19796_v20, 2 }
 0xaf5   : > { %v11195_v52 = vpop.f32.mrf.mxu0  ;;  %v11607_v7 = vsel %vm2301_vm4, %v11604_v61, %v11606_v43  ;;  %v11404_v37 = vsel %vm2092_vm5, %v11401_v3, %v11403_v53  ;;  %v14565_v60 = vpop.f32.mrf.mxu1  ;;  %v10695_v61 = vadd.f32 %v10694_v48, %v20217_v16  ;;  %v20219_v48 = vld [vmem:[#allocation6_spill] sm:$0xff] }
 0xaf6   : > { %v11407_v50 = vsel %vm2092_vm5, %v11405_v40, %v11406_v28 }
 0xaf7   : > { %11670 = vrot.lane.b32.xlu0 %v11600_v42, %s14686_s21  ;;  %11464 = vrot.lane.b32.xlu1 %v11394_v21, %s14680_s30  ;;  %v19776_v8 = vpop.f32.mrf.mxu0  ;;  %v11611_v42 = vrot.slane %v11286_v29, 2  ;;  %v11610_v21 = vsel %vm2301_vm4, %v11608_v38, %v11609_v22  ;;  %v19818_v17 = vadd.f32 %v11195_v52, %v10695_v61  ;;  %v10714_v29 = vpop.f32.mrf.mxu1 }
 0xaf9   : > { %v11205_v57 = vpop.f32.mrf.mxu0  ;;  %v11612_v49 = vsel %vm2301_vm4, %v11609_v22, %v11611_v42  ;;  %v14568_v52 = vpop.f32.mrf.mxu1  ;;  %v11410_v9 = vrot.slane %v19818_v17, 1 }
 0xafb   : > { %11672 = vrot.lane.b32.xlu1 %v11602_v10, %s14686_s21  ;;  %11466 = vrot.lane.b32.xlu0 %v11397_v54, %s14680_s30  ;;  %v19799_v11 = vpop.f32.mrf.mxu0  ;;  %v11289_v10 = vadd.f32 %v19740_v1, %v10690_v51  ;;  %v10700_v54 = vadd.f32 %v14559_v0, %v20218_v5  ;;  %v11613_v1 = vrot.slane %v19805_v6, 2  ;;  %v10724_v51 = vpop.f32.mrf.mxu1 }
 0xafd   : > { %v11215_v62 = vpop.f32.mrf.mxu0  ;;  %v11408_v43 = vrot.slane %v11289_v10, 1  ;;  %v19827_v0 = vadd.f32 %v19753_v23, %v10700_v54  ;;  %v11616_v38 = vrot.slane %v11289_v10, 2  ;;  %v20221_v23 = vld [vmem:[#allocation10_spill] sm:$0xff]  ;;  %v14571_v5 = vpop.f32.mrf.mxu1 }
 0xafe   : > { %v10710_v12 = vadd.f32 %v14562_v58, %v20221_v23  ;;  %v20222_v58 = vld [vmem:[#allocation8_spill] sm:$0xff] }
 0xaff   : > { %11468 = vrot.lane.b32.xlu1 %v11399_v24, %s14680_s30  ;;  %11674 = vrot.lane.b32.xlu0 %v11605_v46, %s14686_s21  ;;  %v14646_v24 = vpop.f32.mrf.mxu0  ;;  %v10705_v46 = vadd.f32 %v10704_v35, %v20219_v48  ;;  %v11409_v34 = vsel %vm2092_vm5, %v11406_v28, %v11408_v43  ;;  %v11411_v22 = vrot.slane %v19827_v0, 1  ;;  %v11617_v42 = vsel %vm2301_vm4, %v11614_v14, %v11616_v38 }
 0xb00   : > { %v11619_v61 = vrot.slane %v19827_v0, 2  ;;  %v19846_v40 = vadd.f32 %v19776_v8, %v10710_v12  ;;  %v10720_v10 = vadd.f32 %v14565_v60, %v20222_v58  ;;  %v10734_v60 = vpop.f32.mrf.mxu1 }
 0xb01   : > { %v11292_v3 = vadd.f32 %v11205_v57, %v10705_v46  ;;  %v11225_v53 = vpop.f32.mrf.mxu0  ;;  %v11618_v57 = vrot.slane %v19818_v17, 2 }
 0xb02   : > { %v11415_v8 = vrot.slane %v19846_v40, 1  ;;  %v11295_v46 = vadd.f32 %v19799_v11, %v10720_v10  ;;  %v14574_v38 = vpop.f32.mrf.mxu1  ;;  %v11623_v11 = vrot.slane %v19846_v40, 2 }
 0xb03   : > { %11676 = vrot.lane.b32.xlu1 %v11607_v7, %s14686_s21  ;;  %11470 = vrot.lane.b32.xlu0 %v11402_v39, %s14680_s30  ;;  %v11615_v7 = vsel %vm2301_vm4, %v11613_v1, %v11614_v14  ;;  %v20220_v39 = vld [vmem:[#allocation5_spill] sm:$0xff]  ;;  %v11413_v28 = vrot.slane %v11292_v3, 1  ;;  %v14649_v16 = vpop.f32.mrf.mxu0  ;;  %v11621_v54 = vrot.slane %v11292_v3, 2  ;;  %v20224_v1 = vld [vmem:[#allocation15_spill] sm:$0xff] }
 0xb04   : > { %v10715_v35 = vadd.f32 %v10714_v29, %v20220_v39  ;;  %v20223_v29 = vld [vmem:[#allocation13_spill] sm:$0xff]  ;;  %v10730_v43 = vadd.f32 %v14568_v52, %v20224_v1  ;;  %v11418_v23 = vrot.slane %v11295_v46, 1 }
 0xb05   : > { %v10725_v48 = vadd.f32 %v10724_v51, %v20223_v29 }
 0xb06   : > { %v19867_v52 = vadd.f32 %v14646_v24, %v10730_v43  ;;  %v20227_v24 = vld [vmem:[#allocation17_spill] sm:$0xff] }
 0xb07   : > { %11678 = vrot.lane.b32.xlu0 %v11610_v21, %s14686_s21  ;;  %11472 = vrot.lane.b32.xlu1 %v11404_v37, %s14680_s30  ;;  %v19839_v21 = vadd.f32 %v11215_v62, %v10715_v35  ;;  %v11412_v37 = vsel %vm2092_vm5, %v11410_v9, %v11411_v22  ;;  %v11620_v62 = vsel %vm2301_vm4, %v11618_v57, %v11619_v61  ;;  %v20225_v35 = vld [vmem:[#allocation9_spill] sm:$0xff]  ;;  %v10744_v57 = vpop.f32.mrf.mxu1 }
 0xb08   : > { %v19859_v3 = vadd.f32 %v11225_v53, %v10725_v48  ;;  %v11421_v10 = vrot.slane %v19867_v52, 1  ;;  %v11629_v48 = vrot.slane %v19867_v52, 2 }
 0xb09   : > { %v11416_v14 = vrot.slane %v19839_v21, 1  ;;  %v11624_v9 = vrot.slane %v19839_v21, 2 }
 0xb0a   : > { %v11420_v53 = vrot.slane %v19859_v3, 1 }
 0xb0b   : > { %11680 = vrot.lane.b32.xlu1 %v11612_v49, %s14686_s21  ;;  %11474 = vrot.lane.b32.xlu0 %v11407_v50, %s14680_s30  ;;  %v11414_v49 = vsel %vm2092_vm5, %v11411_v22, %v11413_v28  ;;  %v11235_v50 = vpop.f32.mrf.mxu0  ;;  %v10735_v22 = vadd.f32 %v10734_v60, %v20225_v35  ;;  %v11419_v51 = vsel %vm2092_vm5, %v11416_v14, %v11418_v23  ;;  %v11626_v28 = vrot.slane %v11295_v46, 2  ;;  %v20228_v46 = vld [vmem:[#allocation12_spill] sm:$0xff] }
 0xb0c   : > { %v11422_v29 = vsel %vm2092_vm5, %v11420_v53, %v11421_v10  ;;  %v10750_v60 = vadd.f32 %v14574_v38, %v20228_v46  ;;  %v19898_v38 = vld [vmem:[%s20091_s10] ss:$0 sm:$0xff] }
 0xb0d   : > { %v14652_v39 = vpop.f32.mrf.mxu0  ;;  %v11298_v12 = vadd.f32 %v11235_v50, %v10735_v22 }
 0xb0e   : > { %v11301_v35 = vadd.f32 %v14652_v39, %v10750_v60 }
 0xb0f   : > { %11476 = vrot.lane.b32.xlu1 %v11409_v34, %s14680_s30  ;;  %11682 = vrot.lane.b32.xlu0 %v11615_v7, %s14686_s21  ;;  %v11622_v34 = vsel %vm2301_vm4, %v11619_v61, %v11621_v54  ;;  %v11417_v7 = vsel %vm2092_vm5, %v11415_v8, %v11416_v14  ;;  %v20226_v61 = vld [vmem:[#allocation16_spill] sm:$0xff]  ;;  %v10740_v54 = vadd.f32 %v14571_v5, %v20227_v24  ;;  %v11423_v14 = vrot.slane %v11298_v12, 1 }
 0xb10   : > { %v10745_v58 = vadd.f32 %v10744_v57, %v20226_v61  ;;  %v11631_v1 = vrot.slane %v11298_v12, 2  ;;  %v11428_v39 = vrot.slane %v11301_v35, 1 }
 0xb11   : > { %v19885_v8 = vadd.f32 %v14649_v16, %v10740_v54 }
 0xb12   : > { %v11632_v12 = vsel %vm2301_vm4, %v11629_v48, %v11631_v1 }
 0xb13   : > { %11684 = vrot.lane.b32.xlu1 %v11617_v42, %s14686_s21  ;;  %11478 = vrot.lane.b32.xlu0 %v11412_v37, %s14680_s30  ;;  %v11625_v42 = vsel %vm2301_vm4, %v11623_v11, %v11624_v9  ;;  %v11245_v37 = vpop.f32.mrf.mxu0 }
 0xb14   : > { %v19879_v50 = vadd.f32 %v11245_v37, %v10745_v58 }
 0xb16   : > { %v11426_v43 = vrot.slane %v19879_v50, 1  ;;  %v11634_v23 = vrot.slane %v19879_v50, 2 }
 0xb17   : > { %11686 = vrot.lane.b32.xlu0 %v11620_v62, %s14686_s21  ;;  %11480 = vrot.lane.b32.xlu1 %v11414_v49, %s14680_s30  ;;  %v11627_v62 = vsel %vm2301_vm4, %v11624_v9, %v11626_v28  ;;  %v11628_v49 = vrot.slane %v19859_v3, 2  ;;  %v11805_v28 = vld [vmem:[%s14830_s29] sm:$0xff] }
 0xb18   : > { %v11429_v24 = vsel %vm2092_vm5, %v11426_v43, %v11428_v39 }
 0xb19   : > { %v11630_v9 = vsel %vm2301_vm4, %v11628_v49, %v11629_v48 }
 0xb1b   : > { %11688 = vrot.lane.b32.xlu1 %v11622_v34, %s14686_s21  ;;  %11482 = vrot.lane.b32.xlu0 %v11417_v7, %s14680_s30  ;;  %v11424_v34 = vsel %vm2092_vm5, %v11421_v10, %v11423_v14  ;;  %v11425_v7 = vrot.slane %v19885_v8, 1 }
 0xb1f   : > { %11484 = vrot.lane.b32.xlu1 %v11419_v51, %s14680_s30  ;;  %11690 = vrot.lane.b32.xlu0 %v11625_v42, %s14686_s21  ;;  %v11427_v51 = vsel %vm2092_vm5, %v11425_v7, %v11426_v43  ;;  %v11807_v7 = vld [vmem:[%s14830_s29 + $0x10] sm:$0xff] }
 0xb23   : > { %11692 = vrot.lane.b32.xlu1 %v11627_v62, %s14686_s21  ;;  %11486 = vrot.lane.b32.xlu0 %v11422_v29, %s14680_s30  ;;  %v11806_v29 = vld [vmem:[%s14830_s29 + $0x8] sm:$0xff] }
 0xb25   : > { %v11431_v5 = vpop.permute.xlu0 %11430 }
 0xb26   : > { %v11526_v16 = vadd.f32 %v11431_v5, %v19529_v18  ;;  %v11633_v18 = vrot.slane %v19885_v8, 2 }
 0xb27   : > { %11694 = vrot.lane.b32.xlu0 %v11630_v9, %s14686_s21  ;;  %11488 = vrot.lane.b32.xlu1 %v11424_v34, %s14680_s30 }
 0xb28   : > { %v11635_v54 = vsel %vm2301_vm4, %v11633_v18, %v11634_v23 }
 0xb29   : > { %v11639_v22 = vpop.permute.xlu0 %11638  ;;  %v11433_v11 = vpop.permute.xlu1 %11432 }
 0xb2a   : > { %v11734_v53 = vadd.f32 %v11639_v22, %v11526_v16  ;;  %v11527_v57 = vadd.f32 %v11433_v11, %v19527_v32  ;;  %v11636_v32 = vrot.slane %v11301_v35, 2 }
 0xb2b   : > { %11696 = vrot.lane.b32.xlu1 %v11632_v12, %s14686_s21  ;;  %11490 = vrot.lane.b32.xlu0 %v11427_v51, %s14680_s30  ;;  %v11808_v12 = vld [vmem:[%s14830_s29 + $0x18] sm:$0xff] }
 0xb2c   : > { %v11773_v42 = vadd.f32 %v19898_v38, %v11734_v53  ;;  %v11637_v1 = vsel %vm2301_vm4, %v11634_v23, %v11636_v32 }
 0xb2d   : > { %v11641_v37 = vpop.permute.xlu1 %11640  ;;  %v11435_v61 = vpop.permute.xlu0 %11434 }
 0xb2e   : > { %v11837_v58 = vmul.f32 0.2, %v11773_v42  ;;  %v11735_v10 = vadd.f32 %v11641_v37, %v11527_v57  ;;  %v11528_v14 = vadd.f32 %v11435_v61, %v19544_v30  ;;  %v11809_v37 = vld [vmem:[%s14830_s29 + $0x20] sm:$0xff] }
 0xb2f   : > { %11492 = vrot.lane.b32.xlu1 %v11429_v24, %s14680_s30  ;;  %11698 = vrot.lane.b32.xlu0 %v11635_v54, %s14686_s21 }
 0xb30   : > { %v11869_v62 = vadd.f32 %v11837_v58, %v11805_v28  ;;  %v11774_v49 = vadd.f32 %v19898_v38, %v11735_v10 }
 0xb31   : > { %v11437_v48 = vpop.permute.xlu1 %11436  ;;  %v11643_v46 = vpop.permute.xlu0 %11642 }
 0xb32   : > { %11901 = vst.msk [vmem:[%s19916_s27] sm:$0xff] %vm466_vm3, %v11869_v62  ;;  %v11838_v60 = vmul.f32 0.2, %v11774_v49  ;;  %v11736_v5 = vadd.f32 %v11643_v46, %v11528_v14  ;;  %v11529_v9 = vadd.f32 %v11437_v48, %v19549_v25  ;;  %v11810_v62 = vld [vmem:[%s14830_s29 + $0x28] sm:$0xff] }
 0xb33   : > { %11700 = vrot.lane.b32.xlu1 %v11637_v1, %s14686_s21 }
 0xb34   : > { %v11870_v43 = vadd.f32 %v11838_v60, %v11806_v29  ;;  %v11775_v34 = vadd.f32 %v19898_v38, %v11736_v5  ;;  %v11811_v5 = vld [vmem:[%s14830_s29 + $0x30] sm:$0xff] }
 0xb35   : > { %v11645_v30 = vpop.permute.xlu1 %11644  ;;  %v11439_v35 = vpop.permute.xlu0 %11438 }
 0xb36   : > { %11902 = vst.msk [vmem:[%s19916_s27 + $0x8] sm:$0xff] %vm466_vm3, %v11870_v43  ;;  %v11839_v16 = vmul.f32 0.2, %v11775_v34  ;;  %v11737_v22 = vadd.f32 %v11645_v30, %v11529_v9  ;;  %v11530_v53 = vadd.f32 %v11439_v35, %v19562_v55  ;;  %v11812_v35 = vld [vmem:[%s14830_s29 + $0x38] sm:$0xff] }
 0xb38   : > { %v11871_v11 = vadd.f32 %v11839_v16, %v11807_v7  ;;  %v11776_v23 = vadd.f32 %v19898_v38, %v11737_v22 }
 0xb39   : > { %v11647_v51 = vpop.permute.xlu0 %11646  ;;  %v11441_v18 = vpop.permute.xlu1 %11440 }
 0xb3a   : > { %11903 = vst.msk [vmem:[%s19916_s27 + $0x10] sm:$0xff] %vm466_vm3, %v11871_v11  ;;  %v11840_v25 = vmul.f32 0.2, %v11776_v23  ;;  %v11738_v39 = vadd.f32 %v11647_v51, %v11530_v53  ;;  %v11531_v28 = vadd.f32 %v11441_v18, %v19571_v33  ;;  %v11813_v51 = vld [vmem:[%s14830_s29 + $0x40] sm:$0xff] }
 0xb3c   : > { %v11872_v42 = vadd.f32 %v11840_v25, %v11808_v12  ;;  %v11777_v57 = vadd.f32 %v19898_v38, %v11738_v39 }
 0xb3d   : > { %v11649_v61 = vpop.permute.xlu1 %11648  ;;  %v11443_v58 = vpop.permute.xlu0 %11442 }
 0xb3e   : > { %11904 = vst.msk [vmem:[%s19916_s27 + $0x18] sm:$0xff] %vm466_vm3, %v11872_v42  ;;  %v11841_v55 = vmul.f32 0.2, %v11777_v57  ;;  %v11739_v10 = vadd.f32 %v11649_v61, %v11531_v28  ;;  %v11532_v32 = vadd.f32 %v11443_v58, %v19595_v59 }
 0xb40   : > { %v11873_v24 = vadd.f32 %v11841_v55, %v11809_v37  ;;  %v11778_v54 = vadd.f32 %v19898_v38, %v11739_v10  ;;  %v11814_v37 = vld [vmem:[%s14830_s29 + $0x48] sm:$0xff] }
 0xb41   : > { %v11445_v49 = vpop.permute.xlu1 %11444  ;;  %v11651_v14 = vpop.permute.xlu0 %11650 }
 0xb42   : > { %11905 = vst.msk [vmem:[%s19916_s27 + $0x20] sm:$0xff] %vm466_vm3, %v11873_v24  ;;  %v11842_v33 = vmul.f32 0.2, %v11778_v54  ;;  %v11740_v29 = vadd.f32 %v11651_v14, %v11532_v32  ;;  %v11533_v46 = vadd.f32 %v11445_v49, %v19589_v47  ;;  %v11815_v32 = vld [vmem:[%s14830_s29 + $0x50] sm:$0xff] }
 0xb44   : > { %v11874_v48 = vadd.f32 %v11842_v33, %v11810_v62  ;;  %v11779_v60 = vadd.f32 %v19898_v38, %v11740_v29 }
 0xb45   : > { %v11653_v1 = vpop.permute.xlu1 %11652  ;;  %v11447_v43 = vpop.permute.xlu0 %11446 }
 0xb46   : > { %11906 = vst.msk [vmem:[%s19916_s27 + $0x28] sm:$0xff] %vm466_vm3, %v11874_v48  ;;  %v11843_v59 = vmul.f32 0.2, %v11779_v60  ;;  %v11741_v9 = vadd.f32 %v11653_v1, %v11533_v46  ;;  %v11534_v30 = vadd.f32 %v11447_v43, %v19614_v31  ;;  %v11816_v46 = vld [vmem:[%s14830_s29 + $0x58] sm:$0xff] }
 0xb48   : > { %v11875_v34 = vadd.f32 %v11843_v59, %v11811_v5  ;;  %v11780_v7 = vadd.f32 %v19898_v38, %v11741_v9 }
 0xb49   : > { %v11655_v16 = vpop.permute.xlu0 %11654  ;;  %v11449_v22 = vpop.permute.xlu1 %11448 }
 0xb4a   : > { %11907 = vst.msk [vmem:[%s19916_s27 + $0x30] sm:$0xff] %vm466_vm3, %v11875_v34  ;;  %v11844_v47 = vmul.f32 0.2, %v11780_v7  ;;  %v11742_v11 = vadd.f32 %v11655_v16, %v11534_v30  ;;  %v11535_v12 = vadd.f32 %v11449_v22, %v19625_v44  ;;  %v11817_v34 = vld [vmem:[%s14830_s29 + $0x60] sm:$0xff] }
 0xb4c   : > { %v11876_v23 = vadd.f32 %v11844_v47, %v11812_v35  ;;  %v11781_v53 = vadd.f32 %v19898_v38, %v11742_v11  ;;  %v11818_v11 = vld [vmem:[%s14830_s29 + $0x68] sm:$0xff] }
 0xb4d   : > { %v11657_v18 = vpop.permute.xlu1 %11656  ;;  %v11451_v25 = vpop.permute.xlu0 %11450 }
 0xb4e   : > { %11908 = vst.msk [vmem:[%s19916_s27 + $0x38] sm:$0xff] %vm466_vm3, %v11876_v23  ;;  %v11845_v31 = vmul.f32 0.2, %v11781_v53  ;;  %v11743_v39 = vadd.f32 %v11657_v18, %v11535_v12  ;;  %v11536_v28 = vadd.f32 %v11451_v25, %v19649_v26 }
 0xb50   : > { %v11877_v42 = vadd.f32 %v11845_v31, %v11813_v51  ;;  %v11782_v57 = vadd.f32 %v19898_v38, %v11743_v39  ;;  %v11819_v31 = vld [vmem:[%s14830_s29 + $0x70] sm:$0xff] }
 0xb51   : > { %v11453_v61 = vpop.permute.xlu1 %11452  ;;  %v11659_v58 = vpop.permute.xlu0 %11658 }
 0xb52   : > { %11909 = vst.msk [vmem:[%s19916_s27 + $0x40] sm:$0xff] %vm466_vm3, %v11877_v42  ;;  %v11846_v44 = vmul.f32 0.2, %v11782_v57  ;;  %v11744_v55 = vadd.f32 %v11659_v58, %v11536_v28  ;;  %v11537_v24 = vadd.f32 %v11453_v61, %v19641_v36  ;;  %v11820_v58 = vld [vmem:[%s14830_s29 + $0x78] sm:$0xff] }
 0xb54   : > { %v11878_v10 = vadd.f32 %v11846_v44, %v11814_v37  ;;  %v11783_v54 = vadd.f32 %v19898_v38, %v11744_v55 }
 0xb55   : > { %v11661_v62 = vpop.permute.xlu1 %11660  ;;  %v11455_v49 = vpop.permute.xlu0 %11454 }
 0xb56   : > { %11910 = vst.msk [vmem:[%s19916_s27 + $0x48] sm:$0xff] %vm466_vm3, %v11878_v10  ;;  %v11847_v26 = vmul.f32 0.2, %v11783_v54  ;;  %v11745_v14 = vadd.f32 %v11661_v62, %v11537_v24  ;;  %v11538_v48 = vadd.f32 %v11455_v49, %v19666_v15  ;;  %v11821_v62 = vld [vmem:[%s14830_s29 + $0x80] sm:$0xff] }
 0xb58   : > { %v11879_v33 = vadd.f32 %v11847_v26, %v11815_v32  ;;  %v11784_v29 = vadd.f32 %v19898_v38, %v11745_v14 }
 0xb59   : > { %v11663_v60 = vpop.permute.xlu0 %11662  ;;  %v11457_v5 = vpop.permute.xlu1 %11456 }
 0xb5a   : > { %11911 = vst.msk [vmem:[%s19916_s27 + $0x50] sm:$0xff] %vm466_vm3, %v11879_v33  ;;  %v11848_v36 = vmul.f32 0.2, %v11784_v29  ;;  %v11746_v1 = vadd.f32 %v11663_v60, %v11538_v48  ;;  %v11539_v9 = vadd.f32 %v11457_v5, %v19677_v41 }
 0xb5c   : > { %v11880_v43 = vadd.f32 %v11848_v36, %v11816_v46  ;;  %v11785_v59 = vadd.f32 %v19898_v38, %v11746_v1  ;;  %v11822_v46 = vld [vmem:[%s14830_s29 + $0x88] sm:$0xff] }
 0xb5d   : > { %v11665_v7 = vpop.permute.xlu1 %11664  ;;  %v11459_v30 = vpop.permute.xlu0 %11458 }
 0xb5e   : > { %11912 = vst.msk [vmem:[%s19916_s27 + $0x58] sm:$0xff] %vm466_vm3, %v11880_v43  ;;  %v11849_v15 = vmul.f32 0.2, %v11785_v59  ;;  %v11747_v35 = vadd.f32 %v11665_v7, %v11539_v9  ;;  %v11540_v47 = vadd.f32 %v11459_v30, %v19703_v45  ;;  %v11823_v9 = vld [vmem:[%s14830_s29 + $0x90] sm:$0xff] }
 0xb60   : > { %v11881_v16 = vadd.f32 %v11849_v15, %v11817_v34  ;;  %v11786_v22 = vadd.f32 %v19898_v38, %v11747_v35 }
 0xb61   : > { %v11461_v23 = vpop.permute.xlu1 %11460  ;;  %v11667_v53 = vpop.permute.xlu0 %11666 }
 0xb62   : > { %11913 = vst.msk [vmem:[%s19916_s27 + $0x60] sm:$0xff] %vm466_vm3, %v11881_v16  ;;  %v11850_v41 = vmul.f32 0.2, %v11786_v22  ;;  %v11748_v12 = vadd.f32 %v11667_v53, %v11540_v47  ;;  %v11541_v18 = vadd.f32 %v11461_v23, %v19695_v4  ;;  %v11824_v22 = vld [vmem:[%s14830_s29 + $0x98] sm:$0xff] }
 0xb64   : > { %v11882_v51 = vadd.f32 %v11850_v41, %v11818_v11  ;;  %v11787_v25 = vadd.f32 %v19898_v38, %v11748_v12 }
 0xb65   : > { %v11669_v39 = vpop.permute.xlu1 %11668  ;;  %v11463_v42 = vpop.permute.xlu0 %11462 }
 0xb66   : > { %11914 = vst.msk [vmem:[%s19916_s27 + $0x68] sm:$0xff] %vm466_vm3, %v11882_v51  ;;  %v11851_v45 = vmul.f32 0.2, %v11787_v25  ;;  %v11749_v57 = vadd.f32 %v11669_v39, %v11541_v18  ;;  %v11542_v61 = vadd.f32 %v11463_v42, %v19722_v56  ;;  %v11825_v51 = vld [vmem:[%s14830_s29 + $0xa0] sm:$0xff] }
 0xb68   : > { %v11883_v28 = vadd.f32 %v11851_v45, %v11819_v31  ;;  %v11788_v37 = vadd.f32 %v19898_v38, %v11749_v57  ;;  %v11826_v57 = vld [vmem:[%s14830_s29 + $0xa8] sm:$0xff] }
 0xb69   : > { %v11671_v44 = vpop.permute.xlu0 %11670  ;;  %v11465_v55 = vpop.permute.xlu1 %11464 }
 0xb6a   : > { %11915 = vst.msk [vmem:[%s19916_s27 + $0x70] sm:$0xff] %vm466_vm3, %v11883_v28  ;;  %v11852_v4 = vmul.f32 0.2, %v11788_v37  ;;  %v11750_v10 = vadd.f32 %v11671_v44, %v11542_v61  ;;  %v11543_v32 = vadd.f32 %v11465_v55, %v19733_v19 }
 0xb6c   : > { %v11884_v24 = vadd.f32 %v11852_v4, %v11820_v58  ;;  %v11789_v54 = vadd.f32 %v19898_v38, %v11750_v10  ;;  %v11827_v4 = vld [vmem:[%s14830_s29 + $0xb0] sm:$0xff] }
 0xb6d   : > { %v11673_v49 = vpop.permute.xlu1 %11672  ;;  %v11467_v26 = vpop.permute.xlu0 %11466 }
 0xb6e   : > { %11916 = vst.msk [vmem:[%s19916_s27 + $0x78] sm:$0xff] %vm466_vm3, %v11884_v24  ;;  %v11853_v56 = vmul.f32 0.2, %v11789_v54  ;;  %v11751_v14 = vadd.f32 %v11673_v49, %v11543_v32  ;;  %v11544_v48 = vadd.f32 %v11467_v26, %v19757_v63  ;;  %v11828_v26 = vld [vmem:[%s14830_s29 + $0xb8] sm:$0xff] }
 0xb70   : > { %v11885_v33 = vadd.f32 %v11853_v56, %v11821_v62  ;;  %v11790_v29 = vadd.f32 %v19898_v38, %v11751_v14 }
 0xb71   : > { %v11469_v60 = vpop.permute.xlu1 %11468  ;;  %v11675_v5 = vpop.permute.xlu0 %11674 }
 0xb72   : > { %11917 = vst.msk [vmem:[%s19916_s27 + $0x80] sm:$0xff] %vm466_vm3, %v11885_v33  ;;  %v11854_v19 = vmul.f32 0.2, %v11790_v29  ;;  %v11752_v36 = vadd.f32 %v11675_v5, %v11544_v48  ;;  %v11545_v43 = vadd.f32 %v11469_v60, %v19748_v27  ;;  %v11829_v60 = vld [vmem:[%s14830_s29 + $0xc0] sm:$0xff] }
 0xb74   : > { %v11886_v1 = vadd.f32 %v11854_v19, %v11822_v46  ;;  %v11791_v59 = vadd.f32 %v19898_v38, %v11752_v36 }
 0xb75   : > { %v11677_v34 = vpop.permute.xlu1 %11676  ;;  %v11471_v7 = vpop.permute.xlu0 %11470 }
 0xb76   : > { %11918 = vst.msk [vmem:[%s19916_s27 + $0x88] sm:$0xff] %vm466_vm3, %v11886_v1  ;;  %v11855_v63 = vmul.f32 0.2, %v11791_v59  ;;  %v11753_v30 = vadd.f32 %v11677_v34, %v11545_v43  ;;  %v11546_v16 = vadd.f32 %v11471_v7, %v19772_v2 }
 0xb78   : > { %v11887_v15 = vadd.f32 %v11855_v63, %v11823_v9  ;;  %v11792_v35 = vadd.f32 %v19898_v38, %v11753_v30  ;;  %v11830_v9 = vld [vmem:[%s14830_s29 + $0xc8] sm:$0xff] }
 0xb79   : > { %v11679_v47 = vpop.permute.xlu0 %11678  ;;  %v11473_v11 = vpop.permute.xlu1 %11472 }
 0xb7a   : > { %11919 = vst.msk [vmem:[%s19916_s27 + $0x90] sm:$0xff] %vm466_vm3, %v11887_v15  ;;  %v11856_v27 = vmul.f32 0.2, %v11792_v35  ;;  %v11754_v23 = vadd.f32 %v11679_v47, %v11546_v16  ;;  %v11547_v12 = vadd.f32 %v11473_v11, %v19783_v13  ;;  %v11831_v16 = vld [vmem:[%s14830_s29 + $0xd0] sm:$0xff] }
 0xb7c   : > { %v11888_v53 = vadd.f32 %v11856_v27, %v11824_v22  ;;  %v11793_v41 = vadd.f32 %v19898_v38, %v11754_v23 }
 0xb7d   : > { %v11681_v18 = vpop.permute.xlu1 %11680  ;;  %v11475_v25 = vpop.permute.xlu0 %11474 }
 0xb7e   : > { %11920 = vst.msk [vmem:[%s19916_s27 + $0x98] sm:$0xff] %vm466_vm3, %v11888_v53  ;;  %v11857_v2 = vmul.f32 0.2, %v11793_v41  ;;  %v11755_v31 = vadd.f32 %v11681_v18, %v11547_v12  ;;  %v11548_v45 = vadd.f32 %v11475_v25, %v19805_v6  ;;  %v11832_v41 = vld [vmem:[%s14830_s29 + $0xd8] sm:$0xff] }
 0xb80   : > { %v11889_v39 = vadd.f32 %v11857_v2, %v11825_v51  ;;  %v11794_v42 = vadd.f32 %v19898_v38, %v11755_v31 }
 0xb81   : > { %v11477_v28 = vpop.permute.xlu1 %11476  ;;  %v11683_v37 = vpop.permute.xlu0 %11682 }
 0xb82   : > { %11921 = vst.msk [vmem:[%s19916_s27 + $0xa0] sm:$0xff] %vm466_vm3, %v11889_v39  ;;  %v11858_v13 = vmul.f32 0.2, %v11794_v42  ;;  %v11756_v61 = vadd.f32 %v11683_v37, %v11548_v45  ;;  %v11549_v44 = vadd.f32 %v11477_v28, %v19796_v20  ;;  %v11833_v39 = vld [vmem:[%s14830_s29 + $0xe0] sm:$0xff] }
 0xb84   : > { %v11890_v58 = vadd.f32 %v11858_v13, %v11826_v57  ;;  %v11795_v55 = vadd.f32 %v19898_v38, %v11756_v61  ;;  %v11834_v61 = vld [vmem:[%s14830_s29 + $0xe8] sm:$0xff] }
 0xb85   : > { %v11685_v10 = vpop.permute.xlu1 %11684  ;;  %v11479_v24 = vpop.permute.xlu0 %11478 }
 0xb86   : > { %11922 = vst.msk [vmem:[%s19916_s27 + $0xa8] sm:$0xff] %vm466_vm3, %v11890_v58  ;;  %v11859_v6 = vmul.f32 0.2, %v11795_v55  ;;  %v11757_v54 = vadd.f32 %v11685_v10, %v11549_v44  ;;  %v11550_v49 = vadd.f32 %v11479_v24, %v19818_v17 }
 0xb88   : > { %v11891_v32 = vadd.f32 %v11859_v6, %v11827_v4  ;;  %v11796_v62 = vadd.f32 %v19898_v38, %v11757_v54  ;;  %v11835_v6 = vld [vmem:[%s14830_s29 + $0xf0] sm:$0xff] }
 0xb89   : > { %v11687_v56 = vpop.permute.xlu0 %11686  ;;  %v11481_v14 = vpop.permute.xlu1 %11480 }
 0xb8a   : > { %11923 = vst.msk [vmem:[%s19916_s27 + $0xb0] sm:$0xff] %vm466_vm3, %v11891_v32  ;;  %v11860_v20 = vmul.f32 0.2, %v11796_v62  ;;  %v11758_v33 = vadd.f32 %v11687_v56, %v11550_v49  ;;  %v11551_v46 = vadd.f32 %v11481_v14, %v19827_v0 }
 0xb8c   : > { %v11892_v29 = vadd.f32 %v11860_v20, %v11828_v26  ;;  %v11797_v48 = vadd.f32 %v19898_v38, %v11758_v33  ;;  %v11836_v26 = vld [vmem:[%s14830_s29 + $0xf8] sm:$0xff] }
 0xb8d   : > { %v11689_v5 = vpop.permute.xlu1 %11688  ;;  %v11483_v19 = vpop.permute.xlu0 %11482 }
 0xb8e   : > { %11924 = vst.msk [vmem:[%s19916_s27 + $0xb8] sm:$0xff] %vm466_vm3, %v11892_v29  ;;  %v11861_v17 = vmul.f32 0.2, %v11797_v48  ;;  %v11759_v36 = vadd.f32 %v11689_v5, %v11551_v46  ;;  %v11552_v59 = vadd.f32 %v11483_v19, %v19846_v40 }
 0xb90   : > { %v11893_v1 = vadd.f32 %v11861_v17, %v11829_v60  ;;  %v11798_v43 = vadd.f32 %v19898_v38, %v11759_v36 }
 0xb91   : > { %v11485_v34 = vpop.permute.xlu1 %11484  ;;  %v11691_v7 = vpop.permute.xlu0 %11690 }
 0xb92   : > { %11925 = vst.msk [vmem:[%s19916_s27 + $0xc0] sm:$0xff] %vm466_vm3, %v11893_v1  ;;  %v11862_v0 = vmul.f32 0.2, %v11798_v43  ;;  %v11760_v63 = vadd.f32 %v11691_v7, %v11552_v59  ;;  %v11553_v15 = vadd.f32 %v11485_v34, %v19839_v21 }
 0xb94   : > { %v11894_v30 = vadd.f32 %v11862_v0, %v11830_v9  ;;  %v11799_v35 = vadd.f32 %v19898_v38, %v11760_v63 }
 0xb95   : > { %v11693_v22 = vpop.permute.xlu1 %11692  ;;  %v11487_v47 = vpop.permute.xlu0 %11486 }
 0xb96   : > { %11926 = vst.msk [vmem:[%s19916_s27 + $0xc8] sm:$0xff] %vm466_vm3, %v11894_v30  ;;  %v11863_v40 = vmul.f32 0.2, %v11799_v35  ;;  %v11761_v11 = vadd.f32 %v11693_v22, %v11553_v15  ;;  %v11554_v53 = vadd.f32 %v11487_v47, %v19859_v3 }
 0xb98   : > { %v11895_v27 = vadd.f32 %v11863_v40, %v11831_v16  ;;  %v11800_v23 = vadd.f32 %v19898_v38, %v11761_v11 }
 0xb99   : > { %v11695_v12 = vpop.permute.xlu0 %11694  ;;  %v11489_v51 = vpop.permute.xlu1 %11488 }
 0xb9a   : > { %11927 = vst.msk [vmem:[%s19916_s27 + $0xd0] sm:$0xff] %vm466_vm3, %v11895_v27  ;;  %v11864_v21 = vmul.f32 0.2, %v11800_v23  ;;  %v11762_v18 = vadd.f32 %v11695_v12, %v11554_v53  ;;  %v11555_v31 = vadd.f32 %v11489_v51, %v19867_v52 }
 0xb9c   : > { %v11896_v25 = vadd.f32 %v11864_v21, %v11832_v41  ;;  %v11801_v2 = vadd.f32 %v19898_v38, %v11762_v18 }
 0xb9d   : > { %v11697_v42 = vpop.permute.xlu1 %11696  ;;  %v11491_v45 = vpop.permute.xlu0 %11490 }
 0xb9e   : > { %11928 = vst.msk [vmem:[%s19916_s27 + $0xd8] sm:$0xff] %vm466_vm3, %v11896_v25  ;;  %v11865_v3 = vmul.f32 0.2, %v11801_v2  ;;  %v11763_v57 = vadd.f32 %v11697_v42, %v11555_v31  ;;  %v11556_v13 = vadd.f32 %v11491_v45, %v19885_v8 }
 0xba0   : > { %v11897_v28 = vadd.f32 %v11865_v3, %v11833_v39  ;;  %v11802_v37 = vadd.f32 %v19898_v38, %v11763_v57 }
 0xba1   : > { %v11493_v58 = vpop.permute.xlu1 %11492  ;;  %v11699_v44 = vpop.permute.xlu0 %11698 }
 0xba2   : > { %11929 = vst.msk [vmem:[%s19916_s27 + $0xe0] sm:$0xff] %vm466_vm3, %v11897_v28  ;;  %v11866_v52 = vmul.f32 0.2, %v11802_v37  ;;  %v11764_v55 = vadd.f32 %v11699_v44, %v11556_v13  ;;  %v11557_v10 = vadd.f32 %v11493_v58, %v19879_v50 }
 0xba4   : > { %v11898_v4 = vadd.f32 %v11866_v52, %v11834_v61  ;;  %v11803_v24 = vadd.f32 %v19898_v38, %v11764_v55 }
 0xba5   : > { %v11701_v54 = vpop.permute.xlu1 %11700 }
 0xba6   : > { %11930 = vst.msk [vmem:[%s19916_s27 + $0xe8] sm:$0xff] %vm466_vm3, %v11898_v4  ;;  %v11867_v8 = vmul.f32 0.2, %v11803_v24  ;;  %v11765_v32 = vadd.f32 %v11701_v54, %v11557_v10 }
 0xba8   : > { %v11899_v62 = vadd.f32 %v11867_v8, %v11835_v6  ;;  %v11804_v49 = vadd.f32 %v19898_v38, %v11765_v32 }
 0xbaa   : > { %11931 = vst.msk [vmem:[%s19916_s27 + $0xf0] sm:$0xff] %vm466_vm3, %v11899_v62  ;;  %v11868_v56 = vmul.f32 0.2, %v11804_v49 }
 0xbac   : > { %v11900_v14 = vadd.f32 %v11868_v56, %v11836_v26 }
 0xbae   : > { %11932 = vst.msk [vmem:[%s19916_s27 + $0xf8] sm:$0xff] %vm466_vm3, %v11900_v14 }
 0xbaf PF: > { %s21_s17 = sadd.s32 1, %s14677_s17  }
 0xbb0   : > { %p18_p4 = scmp.ge.s32.totalorder %s21_s17, 4  }
 0xbb2   :  { %20 = sbr.rel (!%p18_p4) target bundleno = 1 (0x1), region = 107 }

</bundles_post_ra>
